<compile_context>
chip_gen: v7x
topology: tpu7x:2x2x1
jax: 0.10.0
libtpu: 0.0.40
codegen_flags: <defaults>
</compile_context>

<pallas_src>
import functools
import math

import numpy as np
import jax
import jax.numpy as jnp
from jax import lax
from jax.experimental import pallas as pl
from jax.experimental.pallas import tpu as pltpu

# ---------------- config (small but consistent with the module) ----------------
DIM = 32
NUM_HEADS = 4
WINDOW_SIZE = 4
MLP_RATIO = 4.0
SHIFT_SIZE = WINDOW_SIZE // 2          # partition_type == 'SWIN'
LN_EPS = 1e-5
HEAD_DIM = DIM // NUM_HEADS
N_TOK = WINDOW_SIZE * WINDOW_SIZE
HIDDEN = int(DIM * MLP_RATIO)

WIN_BLOCK = 8                          # windows per 128-row slab -> (WIN_BLOCK*N_TOK, C) = (128, 32)
WBN = WIN_BLOCK * N_TOK                # 128 token rows per slab


# ---------------- glue helpers ----------------
def window_partition(x, ws):
    B, H, W, C = x.shape
    x = x.reshape(B, H // ws, ws, W // ws, ws, C)
    return x.transpose(0, 1, 3, 2, 4, 5).reshape(-1, ws, ws, C)


def window_reverse(windows, ws, H, W):
    B = windows.shape[0] // ((H // ws) * (W // ws))
    x = windows.reshape(B, H // ws, W // ws, ws, ws, -1)
    return x.transpose(0, 1, 3, 2, 4, 5).reshape(B, H, W, -1)


def build_attn_mask(Hp, Wp, ws, shift):
    h_idx = np.arange(Hp)
    w_idx = np.arange(Wp)
    hid = (h_idx >= Hp - ws).astype(np.float32) + (h_idx >= Hp - shift).astype(np.float32)
    wid = (w_idx >= Wp - ws).astype(np.float32) + (w_idx >= Wp - shift).astype(np.float32)
    img_mask = (hid[:, None] * 3.0 + wid[None, :])[None, :, :, None]      # (1, Hp, Wp, 1)
    mw = window_partition(jnp.asarray(img_mask, jnp.float32), ws).reshape(-1, ws * ws)
    am = mw[:, None, :] - mw[:, :, None]                                  # (nW, N, N)
    return jnp.where(am != 0, -100.0, 0.0).astype(jnp.float32)


def compute_relative_position_bias(params, ws, num_heads):
    # parameter-only precompute (cpb_mlp); plain JAX glue, not on the activation hot path
    rc = np.arange(-(ws - 1), ws, dtype=np.float32)
    gh, gw = np.meshgrid(rc, rc, indexing="ij")
    table = np.stack([gh, gw], axis=-1)[None]                             # (1, 2ws-1, 2ws-1, 2)
    table[..., 0] /= (ws - 1)
    table[..., 1] /= (ws - 1)
    table *= 8.0
    table = np.sign(table) * np.log2(np.abs(table) + 1.0) / np.log2(8.0)
    table = jnp.asarray(table, jnp.float32)
    h = jnp.maximum(table @ params["cpb_w1"].T + params["cpb_b1"], 0.0)
    bias_table = (h @ params["cpb_w2"].T).reshape(-1, num_heads)          # ((2ws-1)^2, nH)

    coords_h, coords_w = np.meshgrid(np.arange(ws), np.arange(ws), indexing="ij")
    coords = np.stack([coords_h, coords_w]).reshape(2, -1)                # (2, N)
    rel = coords[:, :, None] - coords[:, None, :]                         # (2, N, N)
    rel = rel.transpose(1, 2, 0).astype(np.int64)
    rel[:, :, 0] += ws - 1
    rel[:, :, 1] += ws - 1
    rel[:, :, 0] *= 2 * ws - 1
    rpi = rel.sum(-1)                                                     # (N, N)

    bias = bias_table[rpi.reshape(-1)].reshape(N_TOK, N_TOK, num_heads)
    bias = jnp.transpose(bias, (2, 0, 1))                                 # (nH, N, N)
    return 16.0 * jax.nn.sigmoid(bias)


def build_periodic_dense_bias(relbias, attn_mask, nW, period):
    """Fused rel-pos bias + shift mask + block-diagonal -1e9 mask.

    Returns (period*NUM_HEADS, WBN, WBN); one entry per (window-block-within-period, head),
    already expanded to the dense 128x128 logit layout the kernel uses, so the per-step work is
    a single add.  Independent of batch size B.
    """
    combined = relbias[None] + attn_mask[:, None]                          # (nW, nH, N, N)
    win_ids = np.arange(period * WIN_BLOCK) % nW
    pw = combined[win_ids]                                                 # (period*8, nH, N, N)
    pw = pw.reshape(period, WIN_BLOCK, NUM_HEADS, N_TOK, N_TOK).transpose(0, 2, 1, 3, 4)
    pw = pw.reshape(period, NUM_HEADS, WBN, N_TOK)                         # per-row, window-local cols
    col_pos = np.arange(WBN) % N_TOK
    dense = pw[:, :, :, col_pos]                                           # (period, nH, WBN, WBN)
    r = np.arange(WBN)
    same = (r[:, None] // N_TOK) == (r[None, :] // N_TOK)                  # block-diagonal mask
    dense = jnp.where(jnp.asarray(same)[None, None], dense, -1e9)
    return dense.reshape(period * NUM_HEADS, WBN, WBN).astype(jnp.float32)


# ---------------- kernel 1: slab-batched window attention ----------------
def window_attention_kernel(x_ref, wq_ref, wk_ref, wv_ref, bq_ref, bv_ref,
                            gmat_ref, qscale_ref, hmask_ref, bias_ref,
                            wproj_ref, bproj_ref, o_ref, *, slabs, period):
    x = x_ref[...]                                                        # (slabs*WBN, C)

    # q/k/v as three separate (M,32)@(32,32) matmuls -> no 96-lane result slicing
    q = jnp.dot(x, wq_ref[...], preferred_element_type=jnp.float32) + bq_ref[...]
    k = jnp.dot(x, wk_ref[...], preferred_element_type=jnp.float32)
    v = jnp.dot(x, wv_ref[...], preferred_element_type=jnp.float32) + bv_ref[...]

    # per-head L2 normalization via a same-head (C,C) 0/1 matmul (no lane reshapes)
    g = gmat_ref[...]
    qn = q * lax.rsqrt(jnp.maximum(jnp.dot(q * q, g, preferred_element_type=jnp.float32), 1e-24))
    kn = k * lax.rsqrt(jnp.maximum(jnp.dot(k * k, g, preferred_element_type=jnp.float32), 1e-24))

    ones_mat = jnp.ones((WBN, DIM), jnp.float32)     # MXU row-sum helper (all columns identical)
    step = pl.program_id(0)

    parts = []
    for j in range(slabs):                           # unrolled sub-slabs of 128 token rows
        r0 = j * WBN
        qn_j = qn[r0:r0 + WBN, :]
        kn_j = kn[r0:r0 + WBN, :]
        v_j = v[r0:r0 + WBN, :]
        bias_base = ((step * slabs + j) % period) * NUM_HEADS     # scalar index into resident bias

        acc = jnp.zeros((WBN, DIM), jnp.float32)
        for h in range(NUM_HEADS):                   # 4 dense MXU passes, unrolled
            qh = qn_j * qscale_ref[h:h + 1]          # head channel mask + logit scale folded in
            s = lax.dot_general(qh, kn_j, (((1,), (1,)), ((), ())),
                                preferred_element_type=jnp.float32)        # (WBN, WBN)
            s = s + bias_ref[bias_base + h]          # rel-bias + shift mask + block-diag -1e9
            s = s - jnp.max(s, axis=-1, keepdims=True)   # required: scale<=100 + bias 16 + mask
            p = jnp.exp(s)                           # unnormalized probabilities
            # row-sum on the MXU (idle) instead of the XLU; normalize AFTER attn@v at (128,32)
            denom = jnp.dot(p, ones_mat, preferred_element_type=jnp.float32)
            pv = jnp.dot(p, v_j * hmask_ref[h:h + 1], preferred_element_type=jnp.float32)
            acc = acc + pv * pl.reciprocal(denom, approx=True)
        parts.append(acc)

    full = parts[0] if slabs == 1 else jnp.concatenate(parts, axis=0)
    # output projection once over the full 256-512 row slab (feeds the 256-wide MXU)
    o_ref[...] = jnp.dot(full, wproj_ref[...], preferred_element_type=jnp.float32) + bproj_ref[...]


def run_window_attention(x_flat, wq_t, wk_t, wv_t, bq, bv, gmat, qscale, hmask,
                         bias_dense, wproj_t, bproj, nblk, slabs, period):
    C = DIM
    rows = slabs * WBN
    kernel = functools.partial(window_attention_kernel, slabs=slabs, period=period)
    return pl.pallas_call(
        kernel,
        out_shape=jax.ShapeDtypeStruct((nblk * rows, C), jnp.float32),
        grid=(nblk,),
        in_specs=[
            pl.BlockSpec((rows, C), lambda i: (i, 0)),                      # token slab
            pl.BlockSpec((C, C), lambda i: (0, 0)),                         # wq (resident)
            pl.BlockSpec((C, C), lambda i: (0, 0)),                         # wk
            pl.BlockSpec((C, C), lambda i: (0, 0)),                         # wv
            pl.BlockSpec((1, C), lambda i: (0, 0)),                         # q bias
            pl.BlockSpec((1, C), lambda i: (0, 0)),                         # v bias
            pl.BlockSpec((C, C), lambda i: (0, 0)),                         # same-head matrix
            pl.BlockSpec((NUM_HEADS, C), lambda i: (0, 0)),                 # per-head scale*mask
            pl.BlockSpec((NUM_HEADS, C), lambda i: (0, 0)),                 # per-head channel mask
            pl.BlockSpec((period * NUM_HEADS, WBN, WBN), lambda i: (0, 0, 0)),  # resident fused bias
            pl.BlockSpec((C, C), lambda i: (0, 0)),                         # proj weight
            pl.BlockSpec((1, C), lambda i: (0, 0)),                         # proj bias
        ],
        out_specs=pl.BlockSpec((rows, C), lambda i: (i, 0)),
        compiler_params=pltpu.CompilerParams(dimension_semantics=("parallel",)),
    )(x_flat, wq_t, wk_t, wv_t, bq, bv, gmat, qscale, hmask, bias_dense, wproj_t, bproj)


# ---------------- kernel 2: residual + LN1, MLP, LN2 + residual (token-tiled) ----------------
def ln_mlp_kernel(xa_ref, sc_ref, g1_ref, b1_ref, g2_ref, b2_ref,
                  w1_ref, bb1_ref, w2_ref, bb2_ref, o_ref):
    xa = xa_ref[...]
    mu = jnp.mean(xa, -1, keepdims=True)
    var = jnp.mean((xa - mu) ** 2, -1, keepdims=True)
    y = sc_ref[...] + ((xa - mu) * lax.rsqrt(var + LN_EPS) * g1_ref[...] + b1_ref[...])

    h = jnp.dot(y, w1_ref[...], preferred_element_type=jnp.float32) + bb1_ref[...]
    h = jax.nn.gelu(h, approximate=True)             # tanh GELU -> EUP slot (validated vs erf ref)
    m = jnp.dot(h, w2_ref[...], preferred_element_type=jnp.float32) + bb2_ref[...]

    mu2 = jnp.mean(m, -1, keepdims=True)
    var2 = jnp.mean((m - mu2) ** 2, -1, keepdims=True)
    o_ref[...] = y + ((m - mu2) * lax.rsqrt(var2 + LN_EPS) * g2_ref[...] + b2_ref[...])


def run_ln_mlp(xa, sc, params, tile_t):
    T_pad, C = xa.shape
    H = HIDDEN
    nblk = T_pad // tile_t
    return pl.pallas_call(
        ln_mlp_kernel,
        out_shape=jax.ShapeDtypeStruct((T_pad, C), jnp.float32),
        grid=(nblk,),
        in_specs=[
            pl.BlockSpec((tile_t, C), lambda i: (i, 0)),
            pl.BlockSpec((tile_t, C), lambda i: (i, 0)),
            pl.BlockSpec((1, C), lambda i: (0, 0)),
            pl.BlockSpec((1, C), lambda i: (0, 0)),
            pl.BlockSpec((1, C), lambda i: (0, 0)),
            pl.BlockSpec((1, C), lambda i: (0, 0)),
            pl.BlockSpec((C, H), lambda i: (0, 0)),
            pl.BlockSpec((1, H), lambda i: (0, 0)),
            pl.BlockSpec((H, C), lambda i: (0, 0)),
            pl.BlockSpec((1, C), lambda i: (0, 0)),
        ],
        out_specs=pl.BlockSpec((tile_t, C), lambda i: (i, 0)),
        compiler_params=pltpu.CompilerParams(dimension_semantics=("parallel",)),
    )(xa, sc,
      params["norm1_g"][None, :], params["norm1_b"][None, :],
      params["norm2_g"][None, :], params["norm2_b"][None, :],
      params["fc1_w"].T, params["fc1_b"][None, :],
      params["fc2_w"].T, params["fc2_b"][None, :])


# ---------------- full forward (Attn_.forward) ----------------
def attn_block_forward(x, params):
    B, H, W, C = x.shape
    shortcut = x
    ws = WINDOW_SIZE
    pad_r = (ws - W % ws) % ws
    pad_b = (ws - H % ws) % ws
    xp = jnp.pad(x, ((0, 0), (0, pad_b), (0, pad_r), (0, 0)))
    Hp, Wp = H + pad_b, W + pad_r
    nW = (Hp // ws) * (Wp // ws)

    if SHIFT_SIZE > 0:
        attn_mask = build_attn_mask(Hp, Wp, ws, SHIFT_SIZE)                # (nW, N, N)
        shifted_x = jnp.roll(xp, (-SHIFT_SIZE, -SHIFT_SIZE), axis=(1, 2))
    else:
        attn_mask = jnp.zeros((nW, N_TOK, N_TOK), jnp.float32)
        shifted_x = xp

    # TODO(synk): fold window_partition/window_reverse into the kernel index_maps so only the
    # cyclic roll remains as a full-tensor HBM relayout.
    x_windows = window_partition(shifted_x, ws).reshape(-1, N_TOK, C)      # (B_, N, C)
    B_ = x_windows.shape[0]

    # slabs of 8 windows (128 rows); batch 1/2/4 slabs per grid step (grid stays >= 2 and even
    # for the test case -> both v7x TensorCores fed).
    nslab = -(-B_ // WIN_BLOCK)
    slabs = 4 if nslab >= 8 else (2 if nslab >= 3 else 1)
    nblk = -(-nslab // slabs)
    B_pad = nblk * slabs * WIN_BLOCK
    if B_pad != B_:
        x_windows = jnp.pad(x_windows, ((0, B_pad - B_), (0, 0), (0, 0)))

    # parameter/mask-only precomputes (outside the hot kernels); bias is periodic, not B-replicated
    period = math.lcm(nW, WIN_BLOCK) // WIN_BLOCK
    relbias = compute_relative_position_bias(params, ws, NUM_HEADS)        # (nH, N, N)
    bias_dense = build_periodic_dense_bias(relbias, attn_mask, nW, period)

    scale = jnp.exp(jnp.minimum(params["logit_scale"].reshape(NUM_HEADS),
                                jnp.log(jnp.asarray(100.0))))              # clamp then exp
    head_of = jnp.arange(C) // HEAD_DIM
    hmask = (jnp.arange(NUM_HEADS)[:, None] == head_of[None, :]).astype(jnp.float32)   # (nH, C)
    qscale = hmask * scale[:, None]                                        # scale folded per head
    gmat = (head_of[:, None] == head_of[None, :]).astype(jnp.float32)      # (C, C) same-head

    wq_t = params["qkv_w"][0 * DIM:1 * DIM].T
    wk_t = params["qkv_w"][1 * DIM:2 * DIM].T
    wv_t = params["qkv_w"][2 * DIM:3 * DIM].T

    out_flat = run_window_attention(
        x_windows.reshape(B_pad * N_TOK, C),
        wq_t, wk_t, wv_t,
        params["q_bias"][None, :], params["v_bias"][None, :],
        gmat, qscale, hmask, bias_dense,
        params["proj_w"].T, params["proj_b"][None, :],
        nblk, slabs, period)

    attn_windows = out_flat.reshape(B_pad, N_TOK, C)[:B_].reshape(-1, ws, ws, C)
    shifted_out = window_reverse(attn_windows, ws, Hp, Wp)
    if SHIFT_SIZE > 0:
        xo = jnp.roll(shifted_out, (SHIFT_SIZE, SHIFT_SIZE), axis=(1, 2))
    else:
        xo = shifted_out
    xo = xo[:, :H, :W, :]

    # LN/MLP tiled over tokens; tiles up to 2048 rows, grid kept >= 2 steps
    T = B * H * W
    tile_t = 128
    for cand in (256, 512, 1024, 2048):
        if T >= 2 * cand:
            tile_t = cand
    nblk2 = -(-T // tile_t)
    T_pad = nblk2 * tile_t
    xa = xo.reshape(T, C)
    sc = shortcut.reshape(T, C)
    if T_pad != T:
        xa = jnp.pad(xa, ((0, T_pad - T), (0, 0)))
        sc = jnp.pad(sc, ((0, T_pad - T), (0, 0)))
    out = run_ln_mlp(xa, sc, params, tile_t)[:T]
    return out.reshape(B, H, W, C)


# ---------------- pure-JAX reference (for a silent sanity check) ----------------
def ref_forward(x, params):
    HP = lax.Precision.HIGHEST
    B, H, W, C = x.shape
    shortcut = x
    ws = WINDOW_SIZE
    pad_r = (ws - W % ws) % ws
    pad_b = (ws - H % ws) % ws
    xp = jnp.pad(x, ((0, 0), (0, pad_b), (0, pad_r), (0, 0)))
    Hp, Wp = xp.shape[1], xp.shape[2]
    mask = build_attn_mask(Hp, Wp, ws, SHIFT_SIZE)
    sx = jnp.roll(xp, (-SHIFT_SIZE, -SHIFT_SIZE), axis=(1, 2))
    xw = window_partition(sx, ws).reshape(-1, N_TOK, C)
    B_, N, _ = xw.shape

    qkv_bias = jnp.concatenate(
        [params["q_bias"], jnp.zeros_like(params["v_bias"]), params["v_bias"]])
    scale = jnp.exp(jnp.minimum(params["logit_scale"],
                                jnp.log(jnp.asarray(100.0)))).reshape(NUM_HEADS)
    relbias = compute_relative_position_bias(params, ws, NUM_HEADS)

    qkv = jnp.einsum("bnc,dc->bnd", xw, params["qkv_w"], precision=HP) + qkv_bias
    qkv = qkv.reshape(B_, N, 3, NUM_HEADS, HEAD_DIM).transpose(2, 0, 3, 1, 4)
    q, k, v = qkv[0], qkv[1], qkv[2]
    qn = q / jnp.maximum(jnp.sqrt(jnp.sum(q * q, -1, keepdims=True)), 1e-12)
    kn = k / jnp.maximum(jnp.sqrt(jnp.sum(k * k, -1, keepdims=True)), 1e-12)
    attn = jnp.einsum("bhnd,bhmd->bhnm", qn, kn, precision=HP)
    attn = attn * scale[None, :, None, None] + relbias[None]
    nW = mask.shape[0]
    attn = attn.reshape(B_ // nW, nW, NUM_HEADS, N, N) + mask[None, :, None]
    attn = jax.nn.softmax(attn.reshape(B_, NUM_HEADS, N, N), -1)
    o = jnp.einsum("bhnm,bhmd->bhnd", attn, v, precision=HP)
    o = o.transpose(0, 2, 1, 3).reshape(B_, N, C)
    o = jnp.einsum("bnc,dc->bnd", o, params["proj_w"], precision=HP) + params["proj_b"]

    sxo = window_reverse(o.reshape(-1, ws, ws, C), ws, Hp, Wp)
    xo = jnp.roll(sxo, (SHIFT_SIZE, SHIFT_SIZE), axis=(1, 2))[:, :H, :W, :]

    def ln(z, g, b):
        mu = jnp.mean(z, -1, keepdims=True)
        var = jnp.mean((z - mu) ** 2, -1, keepdims=True)
        return (z - mu) * lax.rsqrt(var + LN_EPS) * g + b

    y = shortcut + ln(xo, params["norm1_g"], params["norm1_b"])
    h1 = jax.nn.gelu(jnp.einsum("bhwc,dc->bhwd", y, params["fc1_w"], precision=HP)
                     + params["fc1_b"], approximate=False)
    m = jnp.einsum("bhwd,cd->bhwc", h1, params["fc2_w"], precision=HP) + params["fc2_b"]
    return y + ln(m, params["norm2_g"], params["norm2_b"])


# ---------------- deterministic parameter init ----------------
def init_params(key):
    keys = jax.random.split(key, 12)

    def w(k, shape, s=0.02):
        return jax.random.normal(k, shape, jnp.float32) * s

    return dict(
        qkv_w=w(keys[0], (3 * DIM, DIM)),
        q_bias=w(keys[1], (DIM,)),
        v_bias=w(keys[2], (DIM,)),
        logit_scale=jnp.log(10.0 * jnp.ones((NUM_HEADS, 1, 1), jnp.float32)),
        cpb_w1=w(keys[3], (512, 2)),
        cpb_b1=w(keys[4], (512,)),
        cpb_w2=w(keys[5], (NUM_HEADS, 512)),
        proj_w=w(keys[6], (DIM, DIM)),
        proj_b=w(keys[7], (DIM,)),
        norm1_g=jnp.ones((DIM,), jnp.float32),
        norm1_b=jnp.zeros((DIM,), jnp.float32),
        norm2_g=jnp.ones((DIM,), jnp.float32),
        norm2_b=jnp.zeros((DIM,), jnp.float32),
        fc1_w=w(keys[8], (HIDDEN, DIM)),
        fc1_b=w(keys[9], (HIDDEN,)),
        fc2_w=w(keys[10], (DIM, HIDDEN)),
        fc2_b=w(keys[11], (DIM,)),
    )


if __name__ == "__main__":
    key = jax.random.PRNGKey(0)
    pkey, xkey = jax.random.split(key)
    params = init_params(pkey)

    B, H, W = 2, 10, 10          # H,W not multiples of window_size -> exercises the pad/crop path
    x = jax.random.normal(xkey, (B, H, W, DIM), jnp.float32)

    out = jax.block_until_ready(jax.jit(attn_block_forward)(x, params))
    ref = jax.block_until_ready(ref_forward(x, params))

    assert out.shape == (B, H, W, DIM)
    np.testing.assert_allclose(np.asarray(out), np.asarray(ref), rtol=5e-2, atol=5e-2)
    print("KERNEL_OK")
</pallas_src>

<mosaic_0001>
module attributes {stable_mosaic.version = 11 : i64} {
  func.func @window_attention_kernel(%arg0: i32, %arg1: memref<256x32xf32, #tpu.memory_space<vmem>>, %arg2: memref<32x32xf32, #tpu.memory_space<vmem>>, %arg3: memref<32x32xf32, #tpu.memory_space<vmem>>, %arg4: memref<32x32xf32, #tpu.memory_space<vmem>>, %arg5: memref<1x32xf32, #tpu.memory_space<vmem>>, %arg6: memref<1x32xf32, #tpu.memory_space<vmem>>, %arg7: memref<32x32xf32, #tpu.memory_space<vmem>>, %arg8: memref<4x32xf32, #tpu.memory_space<vmem>>, %arg9: memref<4x32xf32, #tpu.memory_space<vmem>>, %arg10: memref<36x128x128xf32, #tpu.memory_space<vmem>>, %arg11: memref<32x32xf32, #tpu.memory_space<vmem>>, %arg12: memref<1x32xf32, #tpu.memory_space<vmem>>, %arg13: memref<256x32xf32, #tpu.memory_space<vmem>>) attributes {dimension_semantics = [#tpu.dimension_semantics<parallel>], iteration_bounds = array<i64: 2>, scalar_prefetch = 0 : i64, scratch_operands = 0 : i64, tpu.core_type = #tpu.core_type<tc>, window_params = [{transform_indices = @transform_0, window_bounds = array<i64: 256, 32>}, {pipeline_mode = #tpu.pipeline_mode<synchronous>, transform_indices = @transform_1, window_bounds = array<i64: 32, 32>}, {pipeline_mode = #tpu.pipeline_mode<synchronous>, transform_indices = @transform_2, window_bounds = array<i64: 32, 32>}, {pipeline_mode = #tpu.pipeline_mode<synchronous>, transform_indices = @transform_3, window_bounds = array<i64: 32, 32>}, {pipeline_mode = #tpu.pipeline_mode<synchronous>, transform_indices = @transform_4, window_bounds = array<i64: 1, 32>}, {pipeline_mode = #tpu.pipeline_mode<synchronous>, transform_indices = @transform_5, window_bounds = array<i64: 1, 32>}, {pipeline_mode = #tpu.pipeline_mode<synchronous>, transform_indices = @transform_6, window_bounds = array<i64: 32, 32>}, {pipeline_mode = #tpu.pipeline_mode<synchronous>, transform_indices = @transform_7, window_bounds = array<i64: 4, 32>}, {pipeline_mode = #tpu.pipeline_mode<synchronous>, transform_indices = @transform_8, window_bounds = array<i64: 4, 32>}, {pipeline_mode = #tpu.pipeline_mode<synchronous>, transform_indices = @transform_9, window_bounds = array<i64: 36, 128, 128>}, {pipeline_mode = #tpu.pipeline_mode<synchronous>, transform_indices = @transform_10, window_bounds = array<i64: 32, 32>}, {pipeline_mode = #tpu.pipeline_mode<synchronous>, transform_indices = @transform_11, window_bounds = array<i64: 1, 32>}, {transform_indices = @transform_12, window_bounds = array<i64: 256, 32>}]} {
    %c0 = arith.constant 0 : index
    %c0_0 = arith.constant 0 : index
    %0 = vector.load %arg1[%c0, %c0_0] : memref<256x32xf32, #tpu.memory_space<vmem>>, vector<256x32xf32>
    %c0_1 = arith.constant 0 : index
    %c0_2 = arith.constant 0 : index
    %1 = vector.load %arg2[%c0_1, %c0_2] : memref<32x32xf32, #tpu.memory_space<vmem>>, vector<32x32xf32>
    %cst = arith.constant dense<0.000000e+00> : vector<256x32xf32>
    %2 = tpu.matmul %0, %1, %cst {dimension_numbers = #tpu.dot_dimension_numbers<[1], [0], [0], [1], [0, 0, 1, 1], [], []>} : vector<256x32xf32>, vector<32x32xf32>, vector<256x32xf32> -> vector<256x32xf32>
    %c0_3 = arith.constant 0 : index
    %c0_4 = arith.constant 0 : index
    %3 = vector.load %arg5[%c0_3, %c0_4] : memref<1x32xf32, #tpu.memory_space<vmem>>, vector<1x32xf32>
    %4 = vector.broadcast %3 : vector<1x32xf32> to vector<256x32xf32>
    %5 = arith.addf %2, %4 : vector<256x32xf32>
    %c0_5 = arith.constant 0 : index
    %c0_6 = arith.constant 0 : index
    %6 = vector.load %arg3[%c0_5, %c0_6] : memref<32x32xf32, #tpu.memory_space<vmem>>, vector<32x32xf32>
    %cst_7 = arith.constant dense<0.000000e+00> : vector<256x32xf32>
    %7 = tpu.matmul %0, %6, %cst_7 {dimension_numbers = #tpu.dot_dimension_numbers<[1], [0], [0], [1], [0, 0, 1, 1], [], []>} : vector<256x32xf32>, vector<32x32xf32>, vector<256x32xf32> -> vector<256x32xf32>
    %c0_8 = arith.constant 0 : index
    %c0_9 = arith.constant 0 : index
    %8 = vector.load %arg4[%c0_8, %c0_9] : memref<32x32xf32, #tpu.memory_space<vmem>>, vector<32x32xf32>
    %cst_10 = arith.constant dense<0.000000e+00> : vector<256x32xf32>
    %9 = tpu.matmul %0, %8, %cst_10 {dimension_numbers = #tpu.dot_dimension_numbers<[1], [0], [0], [1], [0, 0, 1, 1], [], []>} : vector<256x32xf32>, vector<32x32xf32>, vector<256x32xf32> -> vector<256x32xf32>
    %c0_11 = arith.constant 0 : index
    %c0_12 = arith.constant 0 : index
    %10 = vector.load %arg6[%c0_11, %c0_12] : memref<1x32xf32, #tpu.memory_space<vmem>>, vector<1x32xf32>
    %11 = vector.broadcast %10 : vector<1x32xf32> to vector<256x32xf32>
    %12 = arith.addf %9, %11 : vector<256x32xf32>
    %c0_13 = arith.constant 0 : index
    %c0_14 = arith.constant 0 : index
    %13 = vector.load %arg7[%c0_13, %c0_14] : memref<32x32xf32, #tpu.memory_space<vmem>>, vector<32x32xf32>
    %14 = arith.mulf %5, %5 : vector<256x32xf32>
    %cst_15 = arith.constant dense<0.000000e+00> : vector<256x32xf32>
    %15 = tpu.matmul %14, %13, %cst_15 {dimension_numbers = #tpu.dot_dimension_numbers<[1], [0], [0], [1], [0, 0, 1, 1], [], []>} : vector<256x32xf32>, vector<32x32xf32>, vector<256x32xf32> -> vector<256x32xf32>
    %cst_16 = arith.constant 1.000000e-24 : f32
    %16 = vector.broadcast %cst_16 : f32 to vector<256x32xf32>
    %17 = arith.maximumf %15, %16 : vector<256x32xf32>
    %18 = math.rsqrt %17 : vector<256x32xf32>
    %19 = arith.mulf %5, %18 : vector<256x32xf32>
    %20 = arith.mulf %7, %7 : vector<256x32xf32>
    %cst_17 = arith.constant dense<0.000000e+00> : vector<256x32xf32>
    %21 = tpu.matmul %20, %13, %cst_17 {dimension_numbers = #tpu.dot_dimension_numbers<[1], [0], [0], [1], [0, 0, 1, 1], [], []>} : vector<256x32xf32>, vector<32x32xf32>, vector<256x32xf32> -> vector<256x32xf32>
    %cst_18 = arith.constant 1.000000e-24 : f32
    %22 = vector.broadcast %cst_18 : f32 to vector<256x32xf32>
    %23 = arith.maximumf %21, %22 : vector<256x32xf32>
    %24 = math.rsqrt %23 : vector<256x32xf32>
    %25 = arith.mulf %7, %24 : vector<256x32xf32>
    %cst_19 = arith.constant 1.000000e+00 : f32
    %26 = vector.broadcast %cst_19 : f32 to vector<128x32xf32>
    %27 = vector.extract_strided_slice %19 {offsets = [0, 0], sizes = [128, 32], strides = [1, 1]} : vector<256x32xf32> to vector<128x32xf32>
    %28 = vector.extract_strided_slice %25 {offsets = [0, 0], sizes = [128, 32], strides = [1, 1]} : vector<256x32xf32> to vector<128x32xf32>
    %29 = vector.extract_strided_slice %12 {offsets = [0, 0], sizes = [128, 32], strides = [1, 1]} : vector<256x32xf32> to vector<128x32xf32>
    %c2_i32 = arith.constant 2 : i32
    %30 = arith.muli %arg0, %c2_i32 : i32
    %c0_i32 = arith.constant 0 : i32
    %31 = arith.addi %30, %c0_i32 : i32
    %c9_i32 = arith.constant 9 : i32
    %c0_i32_20 = arith.constant 0 : i32
    %32 = arith.cmpi eq, %c9_i32, %c0_i32_20 : i32
    %c1_i32 = arith.constant 1 : i32
    %33 = arith.select %32, %c1_i32, %c9_i32 : i32
    %34 = arith.remsi %31, %33 : i32
    %c0_i32_21 = arith.constant 0 : i32
    %35 = arith.cmpi ne, %34, %c0_i32_21 : i32
    %c0_i32_22 = arith.constant 0 : i32
    %36 = arith.cmpi slt, %34, %c0_i32_22 : i32
    %c0_i32_23 = arith.constant 0 : i32
    %37 = arith.cmpi slt, %33, %c0_i32_23 : i32
    %38 = arith.xori %36, %37 : i1
    %39 = arith.andi %38, %35 : i1
    %40 = arith.addi %34, %33 : i32
    %41 = arith.select %39, %40, %34 : i32
    %c4_i32 = arith.constant 4 : i32
    %42 = arith.muli %41, %c4_i32 : i32
    %cst_24 = arith.constant 0.000000e+00 : f32
    %43 = vector.broadcast %cst_24 : f32 to vector<128x32xf32>
    %c0_25 = arith.constant 0 : index
    %c0_26 = arith.constant 0 : index
    %44 = vector.load %arg8[%c0_25, %c0_26] : memref<4x32xf32, #tpu.memory_space<vmem>>, vector<1x32xf32>
    %45 = vector.broadcast %44 : vector<1x32xf32> to vector<128x32xf32>
    %46 = arith.mulf %27, %45 : vector<128x32xf32>
    %cst_27 = arith.constant dense<0.000000e+00> : vector<128x128xf32>
    %47 = tpu.matmul %46, %28, %cst_27 {dimension_numbers = #tpu.dot_dimension_numbers<[1], [1], [0], [0], [0, 0, 1, 0], [], []>} : vector<128x32xf32>, vector<128x32xf32>, vector<128x128xf32> -> vector<128x128xf32>
    %c0_i32_28 = arith.constant 0 : i32
    %48 = arith.addi %42, %c0_i32_28 : i32
    %49 = arith.index_cast %48 : i32 to index
    %c0_29 = arith.constant 0 : index
    %c0_30 = arith.constant 0 : index
    %50 = vector.load %arg10[%49, %c0_29, %c0_30] : memref<36x128x128xf32, #tpu.memory_space<vmem>>, vector<1x128x128xf32>
    %51 = vector.shape_cast %50 : vector<1x128x128xf32> to vector<128x128xf32>
    %52 = arith.addf %47, %51 : vector<128x128xf32>
    %cst_31 = arith.constant dense<0xFF800000> : vector<128xf32>
    %53 = vector.multi_reduction <maximumf>, %52, %cst_31 [1] : vector<128x128xf32> to vector<128xf32>
    %54 = vector.shape_cast %53 : vector<128xf32> to vector<128x1xf32>
    %55 = vector.broadcast %54 : vector<128x1xf32> to vector<128x128xf32>
    %56 = arith.subf %52, %55 : vector<128x128xf32>
    %57 = math.exp %56 : vector<128x128xf32>
    %cst_32 = arith.constant dense<0.000000e+00> : vector<128x32xf32>
    %58 = tpu.matmul %57, %26, %cst_32 {dimension_numbers = #tpu.dot_dimension_numbers<[1], [0], [0], [1], [0, 0, 1, 1], [], []>} : vector<128x128xf32>, vector<128x32xf32>, vector<128x32xf32> -> vector<128x32xf32>
    %c0_33 = arith.constant 0 : index
    %c0_34 = arith.constant 0 : index
    %59 = vector.load %arg9[%c0_33, %c0_34] : memref<4x32xf32, #tpu.memory_space<vmem>>, vector<1x32xf32>
    %60 = vector.broadcast %59 : vector<1x32xf32> to vector<128x32xf32>
    %61 = arith.mulf %29, %60 : vector<128x32xf32>
    %cst_35 = arith.constant dense<0.000000e+00> : vector<128x32xf32>
    %62 = tpu.matmul %57, %61, %cst_35 {dimension_numbers = #tpu.dot_dimension_numbers<[1], [0], [0], [1], [0, 0, 1, 1], [], []>} : vector<128x128xf32>, vector<128x32xf32>, vector<128x32xf32> -> vector<128x32xf32>
    %63 = tpu.reciprocal %58 {approx = true} : vector<128x32xf32> -> vector<128x32xf32>
    %64 = arith.mulf %62, %63 : vector<128x32xf32>
    %65 = arith.addf %43, %64 : vector<128x32xf32>
    %c1 = arith.constant 1 : index
    %c0_36 = arith.constant 0 : index
    %66 = vector.load %arg8[%c1, %c0_36] : memref<4x32xf32, #tpu.memory_space<vmem>>, vector<1x32xf32>
    %67 = vector.broadcast %66 : vector<1x32xf32> to vector<128x32xf32>
    %68 = arith.mulf %27, %67 : vector<128x32xf32>
    %cst_37 = arith.constant dense<0.000000e+00> : vector<128x128xf32>
    %69 = tpu.matmul %68, %28, %cst_37 {dimension_numbers = #tpu.dot_dimension_numbers<[1], [1], [0], [0], [0, 0, 1, 0], [], []>} : vector<128x32xf32>, vector<128x32xf32>, vector<128x128xf32> -> vector<128x128xf32>
    %c1_i32_38 = arith.constant 1 : i32
    %70 = arith.addi %42, %c1_i32_38 : i32
    %71 = arith.index_cast %70 : i32 to index
    %c0_39 = arith.constant 0 : index
    %c0_40 = arith.constant 0 : index
    %72 = vector.load %arg10[%71, %c0_39, %c0_40] : memref<36x128x128xf32, #tpu.memory_space<vmem>>, vector<1x128x128xf32>
    %73 = vector.shape_cast %72 : vector<1x128x128xf32> to vector<128x128xf32>
    %74 = arith.addf %69, %73 : vector<128x128xf32>
    %cst_41 = arith.constant dense<0xFF800000> : vector<128xf32>
    %75 = vector.multi_reduction <maximumf>, %74, %cst_41 [1] : vector<128x128xf32> to vector<128xf32>
    %76 = vector.shape_cast %75 : vector<128xf32> to vector<128x1xf32>
    %77 = vector.broadcast %76 : vector<128x1xf32> to vector<128x128xf32>
    %78 = arith.subf %74, %77 : vector<128x128xf32>
    %79 = math.exp %78 : vector<128x128xf32>
    %cst_42 = arith.constant dense<0.000000e+00> : vector<128x32xf32>
    %80 = tpu.matmul %79, %26, %cst_42 {dimension_numbers = #tpu.dot_dimension_numbers<[1], [0], [0], [1], [0, 0, 1, 1], [], []>} : vector<128x128xf32>, vector<128x32xf32>, vector<128x32xf32> -> vector<128x32xf32>
    %c1_43 = arith.constant 1 : index
    %c0_44 = arith.constant 0 : index
    %81 = vector.load %arg9[%c1_43, %c0_44] : memref<4x32xf32, #tpu.memory_space<vmem>>, vector<1x32xf32>
    %82 = vector.broadcast %81 : vector<1x32xf32> to vector<128x32xf32>
    %83 = arith.mulf %29, %82 : vector<128x32xf32>
    %cst_45 = arith.constant dense<0.000000e+00> : vector<128x32xf32>
    %84 = tpu.matmul %79, %83, %cst_45 {dimension_numbers = #tpu.dot_dimension_numbers<[1], [0], [0], [1], [0, 0, 1, 1], [], []>} : vector<128x128xf32>, vector<128x32xf32>, vector<128x32xf32> -> vector<128x32xf32>
    %85 = tpu.reciprocal %80 {approx = true} : vector<128x32xf32> -> vector<128x32xf32>
    %86 = arith.mulf %84, %85 : vector<128x32xf32>
    %87 = arith.addf %65, %86 : vector<128x32xf32>
    %c2 = arith.constant 2 : index
    %c0_46 = arith.constant 0 : index
    %88 = vector.load %arg8[%c2, %c0_46] : memref<4x32xf32, #tpu.memory_space<vmem>>, vector<1x32xf32>
    %89 = vector.broadcast %88 : vector<1x32xf32> to vector<128x32xf32>
    %90 = arith.mulf %27, %89 : vector<128x32xf32>
    %cst_47 = arith.constant dense<0.000000e+00> : vector<128x128xf32>
    %91 = tpu.matmul %90, %28, %cst_47 {dimension_numbers = #tpu.dot_dimension_numbers<[1], [1], [0], [0], [0, 0, 1, 0], [], []>} : vector<128x32xf32>, vector<128x32xf32>, vector<128x128xf32> -> vector<128x128xf32>
    %c2_i32_48 = arith.constant 2 : i32
    %92 = arith.addi %42, %c2_i32_48 : i32
    %93 = arith.index_cast %92 : i32 to index
    %c0_49 = arith.constant 0 : index
    %c0_50 = arith.constant 0 : index
    %94 = vector.load %arg10[%93, %c0_49, %c0_50] : memref<36x128x128xf32, #tpu.memory_space<vmem>>, vector<1x128x128xf32>
    %95 = vector.shape_cast %94 : vector<1x128x128xf32> to vector<128x128xf32>
    %96 = arith.addf %91, %95 : vector<128x128xf32>
    %cst_51 = arith.constant dense<0xFF800000> : vector<128xf32>
    %97 = vector.multi_reduction <maximumf>, %96, %cst_51 [1] : vector<128x128xf32> to vector<128xf32>
    %98 = vector.shape_cast %97 : vector<128xf32> to vector<128x1xf32>
    %99 = vector.broadcast %98 : vector<128x1xf32> to vector<128x128xf32>
    %100 = arith.subf %96, %99 : vector<128x128xf32>
    %101 = math.exp %100 : vector<128x128xf32>
    %cst_52 = arith.constant dense<0.000000e+00> : vector<128x32xf32>
    %102 = tpu.matmul %101, %26, %cst_52 {dimension_numbers = #tpu.dot_dimension_numbers<[1], [0], [0], [1], [0, 0, 1, 1], [], []>} : vector<128x128xf32>, vector<128x32xf32>, vector<128x32xf32> -> vector<128x32xf32>
    %c2_53 = arith.constant 2 : index
    %c0_54 = arith.constant 0 : index
    %103 = vector.load %arg9[%c2_53, %c0_54] : memref<4x32xf32, #tpu.memory_space<vmem>>, vector<1x32xf32>
    %104 = vector.broadcast %103 : vector<1x32xf32> to vector<128x32xf32>
    %105 = arith.mulf %29, %104 : vector<128x32xf32>
    %cst_55 = arith.constant dense<0.000000e+00> : vector<128x32xf32>
    %106 = tpu.matmul %101, %105, %cst_55 {dimension_numbers = #tpu.dot_dimension_numbers<[1], [0], [0], [1], [0, 0, 1, 1], [], []>} : vector<128x128xf32>, vector<128x32xf32>, vector<128x32xf32> -> vector<128x32xf32>
    %107 = tpu.reciprocal %102 {approx = true} : vector<128x32xf32> -> vector<128x32xf32>
    %108 = arith.mulf %106, %107 : vector<128x32xf32>
    %109 = arith.addf %87, %108 : vector<128x32xf32>
    %c3 = arith.constant 3 : index
    %c0_56 = arith.constant 0 : index
    %110 = vector.load %arg8[%c3, %c0_56] : memref<4x32xf32, #tpu.memory_space<vmem>>, vector<1x32xf32>
    %111 = vector.broadcast %110 : vector<1x32xf32> to vector<128x32xf32>
    %112 = arith.mulf %27, %111 : vector<128x32xf32>
    %cst_57 = arith.constant dense<0.000000e+00> : vector<128x128xf32>
    %113 = tpu.matmul %112, %28, %cst_57 {dimension_numbers = #tpu.dot_dimension_numbers<[1], [1], [0], [0], [0, 0, 1, 0], [], []>} : vector<128x32xf32>, vector<128x32xf32>, vector<128x128xf32> -> vector<128x128xf32>
    %c3_i32 = arith.constant 3 : i32
    %114 = arith.addi %42, %c3_i32 : i32
    %115 = arith.index_cast %114 : i32 to index
    %c0_58 = arith.constant 0 : index
    %c0_59 = arith.constant 0 : index
    %116 = vector.load %arg10[%115, %c0_58, %c0_59] : memref<36x128x128xf32, #tpu.memory_space<vmem>>, vector<1x128x128xf32>
    %117 = vector.shape_cast %116 : vector<1x128x128xf32> to vector<128x128xf32>
    %118 = arith.addf %113, %117 : vector<128x128xf32>
    %cst_60 = arith.constant dense<0xFF800000> : vector<128xf32>
    %119 = vector.multi_reduction <maximumf>, %118, %cst_60 [1] : vector<128x128xf32> to vector<128xf32>
    %120 = vector.shape_cast %119 : vector<128xf32> to vector<128x1xf32>
    %121 = vector.broadcast %120 : vector<128x1xf32> to vector<128x128xf32>
    %122 = arith.subf %118, %121 : vector<128x128xf32>
    %123 = math.exp %122 : vector<128x128xf32>
    %cst_61 = arith.constant dense<0.000000e+00> : vector<128x32xf32>
    %124 = tpu.matmul %123, %26, %cst_61 {dimension_numbers = #tpu.dot_dimension_numbers<[1], [0], [0], [1], [0, 0, 1, 1], [], []>} : vector<128x128xf32>, vector<128x32xf32>, vector<128x32xf32> -> vector<128x32xf32>
    %c3_62 = arith.constant 3 : index
    %c0_63 = arith.constant 0 : index
    %125 = vector.load %arg9[%c3_62, %c0_63] : memref<4x32xf32, #tpu.memory_space<vmem>>, vector<1x32xf32>
    %126 = vector.broadcast %125 : vector<1x32xf32> to vector<128x32xf32>
    %127 = arith.mulf %29, %126 : vector<128x32xf32>
    %cst_64 = arith.constant dense<0.000000e+00> : vector<128x32xf32>
    %128 = tpu.matmul %123, %127, %cst_64 {dimension_numbers = #tpu.dot_dimension_numbers<[1], [0], [0], [1], [0, 0, 1, 1], [], []>} : vector<128x128xf32>, vector<128x32xf32>, vector<128x32xf32> -> vector<128x32xf32>
    %129 = tpu.reciprocal %124 {approx = true} : vector<128x32xf32> -> vector<128x32xf32>
    %130 = arith.mulf %128, %129 : vector<128x32xf32>
    %131 = arith.addf %109, %130 : vector<128x32xf32>
    %132 = vector.extract_strided_slice %19 {offsets = [128, 0], sizes = [128, 32], strides = [1, 1]} : vector<256x32xf32> to vector<128x32xf32>
    %133 = vector.extract_strided_slice %25 {offsets = [128, 0], sizes = [128, 32], strides = [1, 1]} : vector<256x32xf32> to vector<128x32xf32>
    %134 = vector.extract_strided_slice %12 {offsets = [128, 0], sizes = [128, 32], strides = [1, 1]} : vector<256x32xf32> to vector<128x32xf32>
    %c2_i32_65 = arith.constant 2 : i32
    %135 = arith.muli %arg0, %c2_i32_65 : i32
    %c1_i32_66 = arith.constant 1 : i32
    %136 = arith.addi %135, %c1_i32_66 : i32
    %c9_i32_67 = arith.constant 9 : i32
    %c0_i32_68 = arith.constant 0 : i32
    %137 = arith.cmpi eq, %c9_i32_67, %c0_i32_68 : i32
    %c1_i32_69 = arith.constant 1 : i32
    %138 = arith.select %137, %c1_i32_69, %c9_i32_67 : i32
    %139 = arith.remsi %136, %138 : i32
    %c0_i32_70 = arith.constant 0 : i32
    %140 = arith.cmpi ne, %139, %c0_i32_70 : i32
    %c0_i32_71 = arith.constant 0 : i32
    %141 = arith.cmpi slt, %139, %c0_i32_71 : i32
    %c0_i32_72 = arith.constant 0 : i32
    %142 = arith.cmpi slt, %138, %c0_i32_72 : i32
    %143 = arith.xori %141, %142 : i1
    %144 = arith.andi %143, %140 : i1
    %145 = arith.addi %139, %138 : i32
    %146 = arith.select %144, %145, %139 : i32
    %c4_i32_73 = arith.constant 4 : i32
    %147 = arith.muli %146, %c4_i32_73 : i32
    %cst_74 = arith.constant 0.000000e+00 : f32
    %148 = vector.broadcast %cst_74 : f32 to vector<128x32xf32>
    %c0_75 = arith.constant 0 : index
    %c0_76 = arith.constant 0 : index
    %149 = vector.load %arg8[%c0_75, %c0_76] : memref<4x32xf32, #tpu.memory_space<vmem>>, vector<1x32xf32>
    %150 = vector.broadcast %149 : vector<1x32xf32> to vector<128x32xf32>
    %151 = arith.mulf %132, %150 : vector<128x32xf32>
    %cst_77 = arith.constant dense<0.000000e+00> : vector<128x128xf32>
    %152 = tpu.matmul %151, %133, %cst_77 {dimension_numbers = #tpu.dot_dimension_numbers<[1], [1], [0], [0], [0, 0, 1, 0], [], []>} : vector<128x32xf32>, vector<128x32xf32>, vector<128x128xf32> -> vector<128x128xf32>
    %c0_i32_78 = arith.constant 0 : i32
    %153 = arith.addi %147, %c0_i32_78 : i32
    %154 = arith.index_cast %153 : i32 to index
    %c0_79 = arith.constant 0 : index
    %c0_80 = arith.constant 0 : index
    %155 = vector.load %arg10[%154, %c0_79, %c0_80] : memref<36x128x128xf32, #tpu.memory_space<vmem>>, vector<1x128x128xf32>
    %156 = vector.shape_cast %155 : vector<1x128x128xf32> to vector<128x128xf32>
    %157 = arith.addf %152, %156 : vector<128x128xf32>
    %cst_81 = arith.constant dense<0xFF800000> : vector<128xf32>
    %158 = vector.multi_reduction <maximumf>, %157, %cst_81 [1] : vector<128x128xf32> to vector<128xf32>
    %159 = vector.shape_cast %158 : vector<128xf32> to vector<128x1xf32>
    %160 = vector.broadcast %159 : vector<128x1xf32> to vector<128x128xf32>
    %161 = arith.subf %157, %160 : vector<128x128xf32>
    %162 = math.exp %161 : vector<128x128xf32>
    %cst_82 = arith.constant dense<0.000000e+00> : vector<128x32xf32>
    %163 = tpu.matmul %162, %26, %cst_82 {dimension_numbers = #tpu.dot_dimension_numbers<[1], [0], [0], [1], [0, 0, 1, 1], [], []>} : vector<128x128xf32>, vector<128x32xf32>, vector<128x32xf32> -> vector<128x32xf32>
    %c0_83 = arith.constant 0 : index
    %c0_84 = arith.constant 0 : index
    %164 = vector.load %arg9[%c0_83, %c0_84] : memref<4x32xf32, #tpu.memory_space<vmem>>, vector<1x32xf32>
    %165 = vector.broadcast %164 : vector<1x32xf32> to vector<128x32xf32>
    %166 = arith.mulf %134, %165 : vector<128x32xf32>
    %cst_85 = arith.constant dense<0.000000e+00> : vector<128x32xf32>
    %167 = tpu.matmul %162, %166, %cst_85 {dimension_numbers = #tpu.dot_dimension_numbers<[1], [0], [0], [1], [0, 0, 1, 1], [], []>} : vector<128x128xf32>, vector<128x32xf32>, vector<128x32xf32> -> vector<128x32xf32>
    %168 = tpu.reciprocal %163 {approx = true} : vector<128x32xf32> -> vector<128x32xf32>
    %169 = arith.mulf %167, %168 : vector<128x32xf32>
    %170 = arith.addf %148, %169 : vector<128x32xf32>
    %c1_86 = arith.constant 1 : index
    %c0_87 = arith.constant 0 : index
    %171 = vector.load %arg8[%c1_86, %c0_87] : memref<4x32xf32, #tpu.memory_space<vmem>>, vector<1x32xf32>
    %172 = vector.broadcast %171 : vector<1x32xf32> to vector<128x32xf32>
    %173 = arith.mulf %132, %172 : vector<128x32xf32>
    %cst_88 = arith.constant dense<0.000000e+00> : vector<128x128xf32>
    %174 = tpu.matmul %173, %133, %cst_88 {dimension_numbers = #tpu.dot_dimension_numbers<[1], [1], [0], [0], [0, 0, 1, 0], [], []>} : vector<128x32xf32>, vector<128x32xf32>, vector<128x128xf32> -> vector<128x128xf32>
    %c1_i32_89 = arith.constant 1 : i32
    %175 = arith.addi %147, %c1_i32_89 : i32
    %176 = arith.index_cast %175 : i32 to index
    %c0_90 = arith.constant 0 : index
    %c0_91 = arith.constant 0 : index
    %177 = vector.load %arg10[%176, %c0_90, %c0_91] : memref<36x128x128xf32, #tpu.memory_space<vmem>>, vector<1x128x128xf32>
    %178 = vector.shape_cast %177 : vector<1x128x128xf32> to vector<128x128xf32>
    %179 = arith.addf %174, %178 : vector<128x128xf32>
    %cst_92 = arith.constant dense<0xFF800000> : vector<128xf32>
    %180 = vector.multi_reduction <maximumf>, %179, %cst_92 [1] : vector<128x128xf32> to vector<128xf32>
    %181 = vector.shape_cast %180 : vector<128xf32> to vector<128x1xf32>
    %182 = vector.broadcast %181 : vector<128x1xf32> to vector<128x128xf32>
    %183 = arith.subf %179, %182 : vector<128x128xf32>
    %184 = math.exp %183 : vector<128x128xf32>
    %cst_93 = arith.constant dense<0.000000e+00> : vector<128x32xf32>
    %185 = tpu.matmul %184, %26, %cst_93 {dimension_numbers = #tpu.dot_dimension_numbers<[1], [0], [0], [1], [0, 0, 1, 1], [], []>} : vector<128x128xf32>, vector<128x32xf32>, vector<128x32xf32> -> vector<128x32xf32>
    %c1_94 = arith.constant 1 : index
    %c0_95 = arith.constant 0 : index
    %186 = vector.load %arg9[%c1_94, %c0_95] : memref<4x32xf32, #tpu.memory_space<vmem>>, vector<1x32xf32>
    %187 = vector.broadcast %186 : vector<1x32xf32> to vector<128x32xf32>
    %188 = arith.mulf %134, %187 : vector<128x32xf32>
    %cst_96 = arith.constant dense<0.000000e+00> : vector<128x32xf32>
    %189 = tpu.matmul %184, %188, %cst_96 {dimension_numbers = #tpu.dot_dimension_numbers<[1], [0], [0], [1], [0, 0, 1, 1], [], []>} : vector<128x128xf32>, vector<128x32xf32>, vector<128x32xf32> -> vector<128x32xf32>
    %190 = tpu.reciprocal %185 {approx = true} : vector<128x32xf32> -> vector<128x32xf32>
    %191 = arith.mulf %189, %190 : vector<128x32xf32>
    %192 = arith.addf %170, %191 : vector<128x32xf32>
    %c2_97 = arith.constant 2 : index
    %c0_98 = arith.constant 0 : index
    %193 = vector.load %arg8[%c2_97, %c0_98] : memref<4x32xf32, #tpu.memory_space<vmem>>, vector<1x32xf32>
    %194 = vector.broadcast %193 : vector<1x32xf32> to vector<128x32xf32>
    %195 = arith.mulf %132, %194 : vector<128x32xf32>
    %cst_99 = arith.constant dense<0.000000e+00> : vector<128x128xf32>
    %196 = tpu.matmul %195, %133, %cst_99 {dimension_numbers = #tpu.dot_dimension_numbers<[1], [1], [0], [0], [0, 0, 1, 0], [], []>} : vector<128x32xf32>, vector<128x32xf32>, vector<128x128xf32> -> vector<128x128xf32>
    %c2_i32_100 = arith.constant 2 : i32
    %197 = arith.addi %147, %c2_i32_100 : i32
    %198 = arith.index_cast %197 : i32 to index
    %c0_101 = arith.constant 0 : index
    %c0_102 = arith.constant 0 : index
    %199 = vector.load %arg10[%198, %c0_101, %c0_102] : memref<36x128x128xf32, #tpu.memory_space<vmem>>, vector<1x128x128xf32>
    %200 = vector.shape_cast %199 : vector<1x128x128xf32> to vector<128x128xf32>
    %201 = arith.addf %196, %200 : vector<128x128xf32>
    %cst_103 = arith.constant dense<0xFF800000> : vector<128xf32>
    %202 = vector.multi_reduction <maximumf>, %201, %cst_103 [1] : vector<128x128xf32> to vector<128xf32>
    %203 = vector.shape_cast %202 : vector<128xf32> to vector<128x1xf32>
    %204 = vector.broadcast %203 : vector<128x1xf32> to vector<128x128xf32>
    %205 = arith.subf %201, %204 : vector<128x128xf32>
    %206 = math.exp %205 : vector<128x128xf32>
    %cst_104 = arith.constant dense<0.000000e+00> : vector<128x32xf32>
    %207 = tpu.matmul %206, %26, %cst_104 {dimension_numbers = #tpu.dot_dimension_numbers<[1], [0], [0], [1], [0, 0, 1, 1], [], []>} : vector<128x128xf32>, vector<128x32xf32>, vector<128x32xf32> -> vector<128x32xf32>
    %c2_105 = arith.constant 2 : index
    %c0_106 = arith.constant 0 : index
    %208 = vector.load %arg9[%c2_105, %c0_106] : memref<4x32xf32, #tpu.memory_space<vmem>>, vector<1x32xf32>
    %209 = vector.broadcast %208 : vector<1x32xf32> to vector<128x32xf32>
    %210 = arith.mulf %134, %209 : vector<128x32xf32>
    %cst_107 = arith.constant dense<0.000000e+00> : vector<128x32xf32>
    %211 = tpu.matmul %206, %210, %cst_107 {dimension_numbers = #tpu.dot_dimension_numbers<[1], [0], [0], [1], [0, 0, 1, 1], [], []>} : vector<128x128xf32>, vector<128x32xf32>, vector<128x32xf32> -> vector<128x32xf32>
    %212 = tpu.reciprocal %207 {approx = true} : vector<128x32xf32> -> vector<128x32xf32>
    %213 = arith.mulf %211, %212 : vector<128x32xf32>
    %214 = arith.addf %192, %213 : vector<128x32xf32>
    %c3_108 = arith.constant 3 : index
    %c0_109 = arith.constant 0 : index
    %215 = vector.load %arg8[%c3_108, %c0_109] : memref<4x32xf32, #tpu.memory_space<vmem>>, vector<1x32xf32>
    %216 = vector.broadcast %215 : vector<1x32xf32> to vector<128x32xf32>
    %217 = arith.mulf %132, %216 : vector<128x32xf32>
    %cst_110 = arith.constant dense<0.000000e+00> : vector<128x128xf32>
    %218 = tpu.matmul %217, %133, %cst_110 {dimension_numbers = #tpu.dot_dimension_numbers<[1], [1], [0], [0], [0, 0, 1, 0], [], []>} : vector<128x32xf32>, vector<128x32xf32>, vector<128x128xf32> -> vector<128x128xf32>
    %c3_i32_111 = arith.constant 3 : i32
    %219 = arith.addi %147, %c3_i32_111 : i32
    %220 = arith.index_cast %219 : i32 to index
    %c0_112 = arith.constant 0 : index
    %c0_113 = arith.constant 0 : index
    %221 = vector.load %arg10[%220, %c0_112, %c0_113] : memref<36x128x128xf32, #tpu.memory_space<vmem>>, vector<1x128x128xf32>
    %222 = vector.shape_cast %221 : vector<1x128x128xf32> to vector<128x128xf32>
    %223 = arith.addf %218, %222 : vector<128x128xf32>
    %cst_114 = arith.constant dense<0xFF800000> : vector<128xf32>
    %224 = vector.multi_reduction <maximumf>, %223, %cst_114 [1] : vector<128x128xf32> to vector<128xf32>
    %225 = vector.shape_cast %224 : vector<128xf32> to vector<128x1xf32>
    %226 = vector.broadcast %225 : vector<128x1xf32> to vector<128x128xf32>
    %227 = arith.subf %223, %226 : vector<128x128xf32>
    %228 = math.exp %227 : vector<128x128xf32>
    %cst_115 = arith.constant dense<0.000000e+00> : vector<128x32xf32>
    %229 = tpu.matmul %228, %26, %cst_115 {dimension_numbers = #tpu.dot_dimension_numbers<[1], [0], [0], [1], [0, 0, 1, 1], [], []>} : vector<128x128xf32>, vector<128x32xf32>, vector<128x32xf32> -> vector<128x32xf32>
    %c3_116 = arith.constant 3 : index
    %c0_117 = arith.constant 0 : index
    %230 = vector.load %arg9[%c3_116, %c0_117] : memref<4x32xf32, #tpu.memory_space<vmem>>, vector<1x32xf32>
    %231 = vector.broadcast %230 : vector<1x32xf32> to vector<128x32xf32>
    %232 = arith.mulf %134, %231 : vector<128x32xf32>
    %cst_118 = arith.constant dense<0.000000e+00> : vector<128x32xf32>
    %233 = tpu.matmul %228, %232, %cst_118 {dimension_numbers = #tpu.dot_dimension_numbers<[1], [0], [0], [1], [0, 0, 1, 1], [], []>} : vector<128x128xf32>, vector<128x32xf32>, vector<128x32xf32> -> vector<128x32xf32>
    %234 = tpu.reciprocal %229 {approx = true} : vector<128x32xf32> -> vector<128x32xf32>
    %235 = arith.mulf %233, %234 : vector<128x32xf32>
    %236 = arith.addf %214, %235 : vector<128x32xf32>
    %237 = tpu.concatenate %131, %236 in 0 : vector<128x32xf32>, vector<128x32xf32> -> vector<256x32xf32>
    %c0_119 = arith.constant 0 : index
    %c0_120 = arith.constant 0 : index
    %238 = vector.load %arg11[%c0_119, %c0_120] : memref<32x32xf32, #tpu.memory_space<vmem>>, vector<32x32xf32>
    %cst_121 = arith.constant dense<0.000000e+00> : vector<256x32xf32>
    %239 = tpu.matmul %237, %238, %cst_121 {dimension_numbers = #tpu.dot_dimension_numbers<[1], [0], [0], [1], [0, 0, 1, 1], [], []>} : vector<256x32xf32>, vector<32x32xf32>, vector<256x32xf32> -> vector<256x32xf32>
    %c0_122 = arith.constant 0 : index
    %c0_123 = arith.constant 0 : index
    %240 = vector.load %arg12[%c0_122, %c0_123] : memref<1x32xf32, #tpu.memory_space<vmem>>, vector<1x32xf32>
    %241 = vector.broadcast %240 : vector<1x32xf32> to vector<256x32xf32>
    %242 = arith.addf %239, %241 : vector<256x32xf32>
    %c0_124 = arith.constant 0 : index
    %c0_125 = arith.constant 0 : index
    %243 = vector.load %arg13[%c0_124, %c0_125] : memref<256x32xf32, #tpu.memory_space<vmem>>, vector<256x32xf32>
    tpu.vector_store %arg13[%c0_124, %c0_125], %242 {strides = array<i32>} : memref<256x32xf32, #tpu.memory_space<vmem>>, vector<256x32xf32>,
    return
  }
  func.func @transform_0(%arg0: i32) -> (i32, i32) {
    %c0_i32 = arith.constant 0 : i32
    %c0_i32_0 = arith.constant 0 : i32
    return %arg0, %c0_i32 : i32, i32
  }
  func.func @transform_1(%arg0: i32) -> (i32, i32) {
    %c0_i32 = arith.constant 0 : i32
    %c0_i32_0 = arith.constant 0 : i32
    %c0_i32_1 = arith.constant 0 : i32
    return %c0_i32, %c0_i32_0 : i32, i32
  }
  func.func @transform_2(%arg0: i32) -> (i32, i32) {
    %c0_i32 = arith.constant 0 : i32
    %c0_i32_0 = arith.constant 0 : i32
    %c0_i32_1 = arith.constant 0 : i32
    return %c0_i32, %c0_i32_0 : i32, i32
  }
  func.func @transform_3(%arg0: i32) -> (i32, i32) {
    %c0_i32 = arith.constant 0 : i32
    %c0_i32_0 = arith.constant 0 : i32
    %c0_i32_1 = arith.constant 0 : i32
    return %c0_i32, %c0_i32_0 : i32, i32
  }
  func.func @transform_4(%arg0: i32) -> (i32, i32) {
    %c0_i32 = arith.constant 0 : i32
    %c0_i32_0 = arith.constant 0 : i32
    %c0_i32_1 = arith.constant 0 : i32
    return %c0_i32, %c0_i32_0 : i32, i32
  }
  func.func @transform_5(%arg0: i32) -> (i32, i32) {
    %c0_i32 = arith.constant 0 : i32
    %c0_i32_0 = arith.constant 0 : i32
    %c0_i32_1 = arith.constant 0 : i32
    return %c0_i32, %c0_i32_0 : i32, i32
  }
  func.func @transform_6(%arg0: i32) -> (i32, i32) {
    %c0_i32 = arith.constant 0 : i32
    %c0_i32_0 = arith.constant 0 : i32
    %c0_i32_1 = arith.constant 0 : i32
    return %c0_i32, %c0_i32_0 : i32, i32
  }
  func.func @transform_7(%arg0: i32) -> (i32, i32) {
    %c0_i32 = arith.constant 0 : i32
    %c0_i32_0 = arith.constant 0 : i32
    %c0_i32_1 = arith.constant 0 : i32
    return %c0_i32, %c0_i32_0 : i32, i32
  }
  func.func @transform_8(%arg0: i32) -> (i32, i32) {
    %c0_i32 = arith.constant 0 : i32
    %c0_i32_0 = arith.constant 0 : i32
    %c0_i32_1 = arith.constant 0 : i32
    return %c0_i32, %c0_i32_0 : i32, i32
  }
  func.func @transform_9(%arg0: i32) -> (i32, i32, i32) {
    %c0_i32 = arith.constant 0 : i32
    %c0_i32_0 = arith.constant 0 : i32
    %c0_i32_1 = arith.constant 0 : i32
    %c0_i32_2 = arith.constant 0 : i32
    return %c0_i32, %c0_i32_0, %c0_i32_1 : i32, i32, i32
  }
  func.func @transform_10(%arg0: i32) -> (i32, i32) {
    %c0_i32 = arith.constant 0 : i32
    %c0_i32_0 = arith.constant 0 : i32
    %c0_i32_1 = arith.constant 0 : i32
    return %c0_i32, %c0_i32_0 : i32, i32
  }
  func.func @transform_11(%arg0: i32) -> (i32, i32) {
    %c0_i32 = arith.constant 0 : i32
    %c0_i32_0 = arith.constant 0 : i32
    %c0_i32_1 = arith.constant 0 : i32
    return %c0_i32, %c0_i32_0 : i32, i32
  }
  func.func @transform_12(%arg0: i32) -> (i32, i32) {
    %c0_i32 = arith.constant 0 : i32
    %c0_i32_0 = arith.constant 0 : i32
    return %arg0, %c0_i32 : i32, i32
  }
}

module attributes {stable_mosaic.version = 11 : i64} {
  func.func @ln_mlp_kernel(%arg0: i32, %arg1: memref<128x32xf32, #tpu.memory_space<vmem>>, %arg2: memref<128x32xf32, #tpu.memory_space<vmem>>, %arg3: memref<1x32xf32, #tpu.memory_space<vmem>>, %arg4: memref<1x32xf32, #tpu.memory_space<vmem>>, %arg5: memref<1x32xf32, #tpu.memory_space<vmem>>, %arg6: memref<1x32xf32, #tpu.memory_space<vmem>>, %arg7: memref<32x128xf32, #tpu.memory_space<vmem>>, %arg8: memref<1x128xf32, #tpu.memory_space<vmem>>, %arg9: memref<128x32xf32, #tpu.memory_space<vmem>>, %arg10: memref<1x32xf32, #tpu.memory_space<vmem>>, %arg11: memref<128x32xf32, #tpu.memory_space<vmem>>) attributes {dimension_semantics = [#tpu.dimension_semantics<parallel>], iteration_bounds = array<i64: 2>, scalar_prefetch = 0 : i64, scratch_operands = 0 : i64, tpu.core_type = #tpu.core_type<tc>, window_params = [{transform_indices = @transform_0, window_bounds = array<i64: 128, 32>}, {transform_indices = @transform_1, window_bounds = array<i64: 128, 32>}, {pipeline_mode = #tpu.pipeline_mode<synchronous>, transform_indices = @transform_2, window_bounds = array<i64: 1, 32>}, {pipeline_mode = #tpu.pipeline_mode<synchronous>, transform_indices = @transform_3, window_bounds = array<i64: 1, 32>}, {pipeline_mode = #tpu.pipeline_mode<synchronous>, transform_indices = @transform_4, window_bounds = array<i64: 1, 32>}, {pipeline_mode = #tpu.pipeline_mode<synchronous>, transform_indices = @transform_5, window_bounds = array<i64: 1, 32>}, {pipeline_mode = #tpu.pipeline_mode<synchronous>, transform_indices = @transform_6, window_bounds = array<i64: 32, 128>}, {pipeline_mode = #tpu.pipeline_mode<synchronous>, transform_indices = @transform_7, window_bounds = array<i64: 1, 128>}, {pipeline_mode = #tpu.pipeline_mode<synchronous>, transform_indices = @transform_8, window_bounds = array<i64: 128, 32>}, {pipeline_mode = #tpu.pipeline_mode<synchronous>, transform_indices = @transform_9, window_bounds = array<i64: 1, 32>}, {transform_indices = @transform_10, window_bounds = array<i64: 128, 32>}]} {
    %c0 = arith.constant 0 : index
    %c0_0 = arith.constant 0 : index
    %0 = vector.load %arg1[%c0, %c0_0] : memref<128x32xf32, #tpu.memory_space<vmem>>, vector<128x32xf32>
    %cst = arith.constant dense<0.000000e+00> : vector<128xf32>
    %1 = vector.multi_reduction <add>, %0, %cst [1] : vector<128x32xf32> to vector<128xf32>
    %2 = vector.shape_cast %1 : vector<128xf32> to vector<128x1xf32>
    %cst_1 = arith.constant 3.200000e+01 : f32
    %3 = vector.broadcast %cst_1 : f32 to vector<128x1xf32>
    %4 = arith.divf %2, %3 : vector<128x1xf32>
    %5 = vector.broadcast %4 : vector<128x1xf32> to vector<128x32xf32>
    %6 = arith.subf %0, %5 : vector<128x32xf32>
    %7 = arith.mulf %6, %6 : vector<128x32xf32>
    %cst_2 = arith.constant dense<0.000000e+00> : vector<128xf32>
    %8 = vector.multi_reduction <add>, %7, %cst_2 [1] : vector<128x32xf32> to vector<128xf32>
    %9 = vector.shape_cast %8 : vector<128xf32> to vector<128x1xf32>
    %cst_3 = arith.constant 3.200000e+01 : f32
    %10 = vector.broadcast %cst_3 : f32 to vector<128x1xf32>
    %11 = arith.divf %9, %10 : vector<128x1xf32>
    %c0_4 = arith.constant 0 : index
    %c0_5 = arith.constant 0 : index
    %12 = vector.load %arg2[%c0_4, %c0_5] : memref<128x32xf32, #tpu.memory_space<vmem>>, vector<128x32xf32>
    %13 = vector.broadcast %4 : vector<128x1xf32> to vector<128x32xf32>
    %14 = arith.subf %0, %13 : vector<128x32xf32>
    %cst_6 = arith.constant 9.99999974E-6 : f32
    %15 = vector.broadcast %cst_6 : f32 to vector<128x1xf32>
    %16 = arith.addf %11, %15 : vector<128x1xf32>
    %17 = math.rsqrt %16 : vector<128x1xf32>
    %18 = vector.broadcast %17 : vector<128x1xf32> to vector<128x32xf32>
    %19 = arith.mulf %14, %18 : vector<128x32xf32>
    %c0_7 = arith.constant 0 : index
    %c0_8 = arith.constant 0 : index
    %20 = vector.load %arg3[%c0_7, %c0_8] : memref<1x32xf32, #tpu.memory_space<vmem>>, vector<1x32xf32>
    %21 = vector.broadcast %20 : vector<1x32xf32> to vector<128x32xf32>
    %22 = arith.mulf %19, %21 : vector<128x32xf32>
    %c0_9 = arith.constant 0 : index
    %c0_10 = arith.constant 0 : index
    %23 = vector.load %arg4[%c0_9, %c0_10] : memref<1x32xf32, #tpu.memory_space<vmem>>, vector<1x32xf32>
    %24 = vector.broadcast %23 : vector<1x32xf32> to vector<128x32xf32>
    %25 = arith.addf %22, %24 : vector<128x32xf32>
    %26 = arith.addf %12, %25 : vector<128x32xf32>
    %c0_11 = arith.constant 0 : index
    %c0_12 = arith.constant 0 : index
    %27 = vector.load %arg7[%c0_11, %c0_12] : memref<32x128xf32, #tpu.memory_space<vmem>>, vector<32x128xf32>
    %cst_13 = arith.constant dense<0.000000e+00> : vector<128x128xf32>
    %28 = tpu.matmul %26, %27, %cst_13 {dimension_numbers = #tpu.dot_dimension_numbers<[1], [0], [0], [1], [0, 0, 1, 1], [], []>} : vector<128x32xf32>, vector<32x128xf32>, vector<128x128xf32> -> vector<128x128xf32>
    %c0_14 = arith.constant 0 : index
    %c0_15 = arith.constant 0 : index
    %29 = vector.load %arg8[%c0_14, %c0_15] : memref<1x128xf32, #tpu.memory_space<vmem>>, vector<1x128xf32>
    %30 = vector.broadcast %29 : vector<1x128xf32> to vector<128x128xf32>
    %31 = arith.addf %28, %30 : vector<128x128xf32>
    %32 = arith.mulf %31, %31 : vector<128x128xf32>
    %33 = arith.mulf %31, %32 : vector<128x128xf32>
    %cst_16 = arith.constant 4.471500e-02 : f32
    %34 = vector.broadcast %cst_16 : f32 to vector<128x128xf32>
    %35 = arith.mulf %34, %33 : vector<128x128xf32>
    %36 = arith.addf %31, %35 : vector<128x128xf32>
    %cst_17 = arith.constant 0.797884583 : f32
    %37 = vector.broadcast %cst_17 : f32 to vector<128x128xf32>
    %38 = arith.mulf %37, %36 : vector<128x128xf32>
    %39 = math.tanh %38 : vector<128x128xf32>
    %cst_18 = arith.constant 1.000000e+00 : f32
    %40 = vector.broadcast %cst_18 : f32 to vector<128x128xf32>
    %41 = arith.addf %40, %39 : vector<128x128xf32>
    %cst_19 = arith.constant 5.000000e-01 : f32
    %42 = vector.broadcast %cst_19 : f32 to vector<128x128xf32>
    %43 = arith.mulf %42, %41 : vector<128x128xf32>
    %44 = arith.mulf %31, %43 : vector<128x128xf32>
    %c0_20 = arith.constant 0 : index
    %c0_21 = arith.constant 0 : index
    %45 = vector.load %arg9[%c0_20, %c0_21] : memref<128x32xf32, #tpu.memory_space<vmem>>, vector<128x32xf32>
    %cst_22 = arith.constant dense<0.000000e+00> : vector<128x32xf32>
    %46 = tpu.matmul %44, %45, %cst_22 {dimension_numbers = #tpu.dot_dimension_numbers<[1], [0], [0], [1], [0, 0, 1, 1], [], []>} : vector<128x128xf32>, vector<128x32xf32>, vector<128x32xf32> -> vector<128x32xf32>
    %c0_23 = arith.constant 0 : index
    %c0_24 = arith.constant 0 : index
    %47 = vector.load %arg10[%c0_23, %c0_24] : memref<1x32xf32, #tpu.memory_space<vmem>>, vector<1x32xf32>
    %48 = vector.broadcast %47 : vector<1x32xf32> to vector<128x32xf32>
    %49 = arith.addf %46, %48 : vector<128x32xf32>
    %cst_25 = arith.constant dense<0.000000e+00> : vector<128xf32>
    %50 = vector.multi_reduction <add>, %49, %cst_25 [1] : vector<128x32xf32> to vector<128xf32>
    %51 = vector.shape_cast %50 : vector<128xf32> to vector<128x1xf32>
    %cst_26 = arith.constant 3.200000e+01 : f32
    %52 = vector.broadcast %cst_26 : f32 to vector<128x1xf32>
    %53 = arith.divf %51, %52 : vector<128x1xf32>
    %54 = vector.broadcast %53 : vector<128x1xf32> to vector<128x32xf32>
    %55 = arith.subf %49, %54 : vector<128x32xf32>
    %56 = arith.mulf %55, %55 : vector<128x32xf32>
    %cst_27 = arith.constant dense<0.000000e+00> : vector<128xf32>
    %57 = vector.multi_reduction <add>, %56, %cst_27 [1] : vector<128x32xf32> to vector<128xf32>
    %58 = vector.shape_cast %57 : vector<128xf32> to vector<128x1xf32>
    %cst_28 = arith.constant 3.200000e+01 : f32
    %59 = vector.broadcast %cst_28 : f32 to vector<128x1xf32>
    %60 = arith.divf %58, %59 : vector<128x1xf32>
    %61 = vector.broadcast %53 : vector<128x1xf32> to vector<128x32xf32>
    %62 = arith.subf %49, %61 : vector<128x32xf32>
    %cst_29 = arith.constant 9.99999974E-6 : f32
    %63 = vector.broadcast %cst_29 : f32 to vector<128x1xf32>
    %64 = arith.addf %60, %63 : vector<128x1xf32>
    %65 = math.rsqrt %64 : vector<128x1xf32>
    %66 = vector.broadcast %65 : vector<128x1xf32> to vector<128x32xf32>
    %67 = arith.mulf %62, %66 : vector<128x32xf32>
    %c0_30 = arith.constant 0 : index
    %c0_31 = arith.constant 0 : index
    %68 = vector.load %arg5[%c0_30, %c0_31] : memref<1x32xf32, #tpu.memory_space<vmem>>, vector<1x32xf32>
    %69 = vector.broadcast %68 : vector<1x32xf32> to vector<128x32xf32>
    %70 = arith.mulf %67, %69 : vector<128x32xf32>
    %c0_32 = arith.constant 0 : index
    %c0_33 = arith.constant 0 : index
    %71 = vector.load %arg6[%c0_32, %c0_33] : memref<1x32xf32, #tpu.memory_space<vmem>>, vector<1x32xf32>
    %72 = vector.broadcast %71 : vector<1x32xf32> to vector<128x32xf32>
    %73 = arith.addf %70, %72 : vector<128x32xf32>
    %74 = arith.addf %26, %73 : vector<128x32xf32>
    %c0_34 = arith.constant 0 : index
    %c0_35 = arith.constant 0 : index
    %75 = vector.load %arg11[%c0_34, %c0_35] : memref<128x32xf32, #tpu.memory_space<vmem>>, vector<128x32xf32>
    tpu.vector_store %arg11[%c0_34, %c0_35], %74 {strides = array<i32>} : memref<128x32xf32, #tpu.memory_space<vmem>>, vector<128x32xf32>,
    return
  }
  func.func @transform_0(%arg0: i32) -> (i32, i32) {
    %c0_i32 = arith.constant 0 : i32
    %c0_i32_0 = arith.constant 0 : i32
    return %arg0, %c0_i32 : i32, i32
  }
  func.func @transform_1(%arg0: i32) -> (i32, i32) {
    %c0_i32 = arith.constant 0 : i32
    %c0_i32_0 = arith.constant 0 : i32
    return %arg0, %c0_i32 : i32, i32
  }
  func.func @transform_2(%arg0: i32) -> (i32, i32) {
    %c0_i32 = arith.constant 0 : i32
    %c0_i32_0 = arith.constant 0 : i32
    %c0_i32_1 = arith.constant 0 : i32
    return %c0_i32, %c0_i32_0 : i32, i32
  }
  func.func @transform_3(%arg0: i32) -> (i32, i32) {
    %c0_i32 = arith.constant 0 : i32
    %c0_i32_0 = arith.constant 0 : i32
    %c0_i32_1 = arith.constant 0 : i32
    return %c0_i32, %c0_i32_0 : i32, i32
  }
  func.func @transform_4(%arg0: i32) -> (i32, i32) {
    %c0_i32 = arith.constant 0 : i32
    %c0_i32_0 = arith.constant 0 : i32
    %c0_i32_1 = arith.constant 0 : i32
    return %c0_i32, %c0_i32_0 : i32, i32
  }
  func.func @transform_5(%arg0: i32) -> (i32, i32) {
    %c0_i32 = arith.constant 0 : i32
    %c0_i32_0 = arith.constant 0 : i32
    %c0_i32_1 = arith.constant 0 : i32
    return %c0_i32, %c0_i32_0 : i32, i32
  }
  func.func @transform_6(%arg0: i32) -> (i32, i32) {
    %c0_i32 = arith.constant 0 : i32
    %c0_i32_0 = arith.constant 0 : i32
    %c0_i32_1 = arith.constant 0 : i32
    return %c0_i32, %c0_i32_0 : i32, i32
  }
  func.func @transform_7(%arg0: i32) -> (i32, i32) {
    %c0_i32 = arith.constant 0 : i32
    %c0_i32_0 = arith.constant 0 : i32
    %c0_i32_1 = arith.constant 0 : i32
    return %c0_i32, %c0_i32_0 : i32, i32
  }
  func.func @transform_8(%arg0: i32) -> (i32, i32) {
    %c0_i32 = arith.constant 0 : i32
    %c0_i32_0 = arith.constant 0 : i32
    %c0_i32_1 = arith.constant 0 : i32
    return %c0_i32, %c0_i32_0 : i32, i32
  }
  func.func @transform_9(%arg0: i32) -> (i32, i32) {
    %c0_i32 = arith.constant 0 : i32
    %c0_i32_0 = arith.constant 0 : i32
    %c0_i32_1 = arith.constant 0 : i32
    return %c0_i32, %c0_i32_0 : i32, i32
  }
  func.func @transform_10(%arg0: i32) -> (i32, i32) {
    %c0_i32 = arith.constant 0 : i32
    %c0_i32_0 = arith.constant 0 : i32
    return %arg0, %c0_i32 : i32, i32
  }
}

</mosaic_0001>

<bundles_post_ra>
// kernel: attn_block_forward.3
= control target key start
LH: loop header
LB: loop body
LE: loop exit
PB: predicated region body
PF: predicated region fallthrough
CT: control target
= control target key end

     0   :  { %s1957_s13 = smov 0   ;;  %s2746_s0 = inlined_call_operand.vmem [shape: f32[256,32], index: 0, kind: input, shape index: {}]   ;;  %s2747_s1 = inlined_call_operand.vmem [shape: f32[256,32], index: 1, kind: input, shape index: {}]   ;;  %s2748_s2 = inlined_call_operand.vmem [shape: f32[1,32], index: 2, kind: input, shape index: {}]   ;;  %s2749_s3 = inlined_call_operand.vmem [shape: f32[1,32], index: 3, kind: input, shape index: {}]   ;;  %s2750_s4 = inlined_call_operand.vmem [shape: f32[1,32], index: 4, kind: input, shape index: {}]   ;;  %s2751_s5 = inlined_call_operand.vmem [shape: f32[1,32], index: 5, kind: input, shape index: {}]   ;;  %s2752_s6 = inlined_call_operand.vmem [shape: f32[32,128], index: 6, kind: input, shape index: {}]   ;;  %s2753_s7 = inlined_call_operand.vmem [shape: f32[1,128], index: 7, kind: input, shape index: {}]   ;;  %s2754_s8 = inlined_call_operand.vmem [shape: f32[128,32], index: 8, kind: input, shape index: {}]   ;;  %s2755_s9 = inlined_call_operand.vmem [shape: f32[1,32], index: 9, kind: input, shape index: {}]   ;;  %s2756_s10 = inlined_call_operand.vmem [shape: f32[256,32], index: 10, kind: output, shape index: {}]  }
   0x1 LB: > { %s1559_s14 = sadd.s32 4294967295, %s1900_s13   ;;  %p1563_p0 = scmp.ge.s32.totalorder %s1900_s13, 1  ;;  %s1900_s13 = sphi %s1957_s13, %s20_s13  }
   0x2   : > { %p324_p1 = scmp.lt.s32.totalorder %s1900_s13, 3 }
   0x4   : > { %p325_p2 = pnand %p1563_p0, %p324_p1 }
   0x5   : > { %s1564_s15 = sshll.u32 (!%p325_p2), %s1559_s14, 4  ;;  %vm401_vm0 = vcmask (!%p325_p2), 261120  }
   0x6   : > { %328 = sbr.rel (%p325_p2) target bundleno = 1147 (0x47b), region = 60  ;;  %p368_p3 = scmp.lt.s32.totalorder (!%p325_p2), %s1564_s15, 31 }
   0xd   : > { %s2758_s15 = smov (!%p368_p3, %s1564_s15), 31 }
   0xe   : > { %s1965_s16 = sshll.u32 %s2758_s15, 3 }
   0xf   : > { %s1971_s19 = scalar_lea.vmem %s2746_s0, %s1965_s16  ;;  %s2157_s18 = scalar_lea.vmem %s2747_s1, %s1965_s16 }
  0x10   : > { %v385_v0 = vld [vmem:[%s1971_s19] sm:$0xff]  ;;  %v387_v1 = vld [vmem:[%s1971_s19 + $0x10] sm:$0xff]  ;;  %v386_v2 = vld [vmem:[%s1971_s19 + $0x8] sm:$0xff]  ;;  %s2650_s23 = scalar_lea.vmem %s2756_s10, %s1965_s16 }
  0x11   : > { %v402_v3 = vsel %vm401_vm0, %v385_v0, 0.0  ;;  %v408_v4 = vsel %vm401_vm0, %v387_v1, 0.0  ;;  %v388_v5 = vld [vmem:[%s1971_s19 + $0x18] sm:$0xff]  ;;  %v405_v6 = vsel %vm401_vm0, %v386_v2, 0.0  ;;  %v389_v8 = vld [vmem:[%s1971_s19 + $0x20] sm:$0xff]  ;;  %v390_v9 = vld [vmem:[%s1971_s19 + $0x28] sm:$0xff] }
  0x12   : > { %403 = vadd.xlane.f32.xlu0 %v402_v3  ;;  %409 = vadd.xlane.f32.xlu1 %v408_v4  ;;  %v411_v7 = vsel %vm401_vm0, %v388_v5, 0.0  ;;  %v414_v10 = vsel %vm401_vm0, %v389_v8, 0.0  ;;  %v417_v11 = vsel %vm401_vm0, %v390_v9, 0.0  ;;  %v1986_v12 = vld [vmem:[%s1971_s19 + $0x30] sm:$0xff]  ;;  %v1989_v13 = vld [vmem:[%s1971_s19 + $0x38] sm:$0xff]  ;;  %v1996_v16 = vld [vmem:[%s1971_s19 + $0x40] sm:$0xff] }
  0x13   : > { %v420_v14 = vsel %vm401_vm0, %v1986_v12, 0.0  ;;  %v423_v15 = vsel %vm401_vm0, %v1989_v13, 0.0  ;;  %v1999_v17 = vld [vmem:[%s1971_s19 + $0x48] sm:$0xff]  ;;  %v426_v18 = vsel %vm401_vm0, %v1996_v16, 0.0  ;;  %v2006_v20 = vld [vmem:[%s1971_s19 + $0x50] sm:$0xff]  ;;  %v2009_v21 = vld [vmem:[%s1971_s19 + $0x58] sm:$0xff] }
  0x14   : > { %v429_v19 = vsel %vm401_vm0, %v1999_v17, 0.0  ;;  %v432_v22 = vsel %vm401_vm0, %v2006_v20, 0.0  ;;  %v435_v23 = vsel %vm401_vm0, %v2009_v21, 0.0  ;;  %v2016_v24 = vld [vmem:[%s1971_s19 + $0x60] sm:$0xff]  ;;  %v2019_v25 = vld [vmem:[%s1971_s19 + $0x68] sm:$0xff]  ;;  %v2026_v28 = vld [vmem:[%s1971_s19 + $0x70] sm:$0xff] }
  0x15   : > { %v438_v26 = vsel %vm401_vm0, %v2016_v24, 0.0  ;;  %v441_v27 = vsel %vm401_vm0, %v2019_v25, 0.0  ;;  %v2029_v29 = vld [vmem:[%s1971_s19 + $0x78] sm:$0xff]  ;;  %v444_v30 = vsel %vm401_vm0, %v2026_v28, 0.0 }
  0x16   : > { %406 = vadd.xlane.f32.xlu0 %v405_v6  ;;  %412 = vadd.xlane.f32.xlu1 %v411_v7  ;;  %v447_v31 = vsel %vm401_vm0, %v2029_v29, 0.0 }
  0x1a   : > { %415 = vadd.xlane.f32.xlu0 %v414_v10  ;;  %418 = vadd.xlane.f32.xlu1 %v417_v11 }
  0x1e   : > { %421 = vadd.xlane.f32.xlu0 %v420_v14  ;;  %424 = vadd.xlane.f32.xlu1 %v423_v15 }
  0x22   : > { %427 = vadd.xlane.f32.xlu0 %v426_v18  ;;  %430 = vadd.xlane.f32.xlu1 %v429_v19 }
  0x26   : > { %433 = vadd.xlane.f32.xlu0 %v432_v22  ;;  %436 = vadd.xlane.f32.xlu1 %v435_v23 }
  0x2a   : > { %439 = vadd.xlane.f32.xlu0 %v438_v26  ;;  %442 = vadd.xlane.f32.xlu1 %v441_v27 }
  0x2e   : > { %445 = vadd.xlane.f32.xlu0 %v444_v30  ;;  %448 = vadd.xlane.f32.xlu1 %v447_v31 }
  0x9f   : > { %v404_v32 = vpop.xlane.xlu0 %403  ;;  %v410_v33 = vpop.xlane.xlu1 %409 }
  0xa0   : > { %v451_v34 = vmul.f32 0.03125, %v404_v32  ;;  %v453_v35 = vmul.f32 0.03125, %v410_v33 }
  0xa2   : > { %v2035_v36 = vsub.f32 %v385_v0, %v451_v34  ;;  %v2037_v37 = vsub.f32 %v387_v1, %v453_v35 }
  0xa3   : > { %v407_v38 = vpop.xlane.xlu0 %406  ;;  %v413_v39 = vpop.xlane.xlu1 %412 }
  0xa4   : > { %v452_v40 = vmul.f32 0.03125, %v407_v38  ;;  %v454_v41 = vmul.f32 0.03125, %v413_v39  ;;  %v483_v42 = vmul.f32 %v2035_v36, %v2035_v36  ;;  %v485_v43 = vmul.f32 %v2037_v37, %v2037_v37 }
  0xa6   : > { %v2043_v44 = vsub.f32 %v386_v2, %v452_v40  ;;  %v2045_v45 = vsub.f32 %v388_v5, %v454_v41  ;;  %v499_v46 = vsel %vm401_vm0, %v483_v42, 0.0  ;;  %v505_v49 = vsel %vm401_vm0, %v485_v43, 0.0 }
  0xa7   : > { %500 = vadd.xlane.f32.xlu0 %v499_v46  ;;  %v416_v47 = vpop.xlane.xlu0 %415  ;;  %v419_v48 = vpop.xlane.xlu1 %418 }
  0xa8   : > { %v455_v50 = vmul.f32 0.03125, %v416_v47  ;;  %v456_v51 = vmul.f32 0.03125, %v419_v48  ;;  %v484_v52 = vmul.f32 %v2043_v44, %v2043_v44  ;;  %v486_v53 = vmul.f32 %v2045_v45, %v2045_v45 }
  0xaa   : > { %v2053_v54 = vsub.f32 %v389_v8, %v455_v50  ;;  %v2055_v55 = vsub.f32 %v390_v9, %v456_v51  ;;  %v502_v56 = vsel %vm401_vm0, %v484_v52, 0.0  ;;  %v508_v59 = vsel %vm401_vm0, %v486_v53, 0.0  ;;  %v690_v53 = vld [vmem:[%s2752_s6 + $0x8] sm:$0xff] }
  0xab   : > { %506 = vadd.xlane.f32.xlu0 %v505_v49  ;;  %503 = vadd.xlane.f32.xlu1 %v502_v56  ;;  %v422_v57 = vpop.xlane.xlu0 %421  ;;  %v425_v58 = vpop.xlane.xlu1 %424 }
  0xac   : > { %v457_v60 = vmul.f32 0.03125, %v422_v57  ;;  %v458_v61 = vmul.f32 0.03125, %v425_v58  ;;  %v487_v62 = vmul.f32 %v2053_v54, %v2053_v54  ;;  %v488_v63 = vmul.f32 %v2055_v55, %v2055_v55  ;;  %v691_v57 = vld [vmem:[%s2752_s6 + $0x10] sm:$0xff]  ;;  %v692_v58 = vld [vmem:[%s2752_s6 + $0x18] sm:$0xff] }
  0xae   : > { %v2064_v0 = vsub.f32 %v1986_v12, %v457_v60  ;;  %v2067_v1 = vsub.f32 %v1989_v13, %v458_v61  ;;  %v511_v2 = vsel %vm401_vm0, %v487_v62, 0.0  ;;  %v514_v5 = vsel %vm401_vm0, %v488_v63, 0.0  ;;  %v1037_v60 = vld [vmem:[%s2754_s8] sm:$0xff]  ;;  %v1038_v61 = vld [vmem:[%s2754_s8 + $0x8] sm:$0xff] }
  0xaf   : > { %509 = vadd.xlane.f32.xlu1 %v508_v59  ;;  %512 = vadd.xlane.f32.xlu0 %v511_v2  ;;  %v428_v3 = vpop.xlane.xlu0 %427  ;;  %v431_v4 = vpop.xlane.xlu1 %430  ;;  %v1738_v59 = vpack.c.bf16 %v692_v58, %v691_v57  ;;  %v2143_v62 = vpack.c.bf16 %v1038_v61, %v1037_v60  ;;  %v564_v61 = vld [vmem:[%s2157_s18 + $0x8] sm:$0xff] }
  0xb0   : > { %v459_v6 = vmul.f32 0.03125, %v428_v3  ;;  %v460_v7 = vmul.f32 0.03125, %v431_v4  ;;  %v489_v8 = vmul.f32 %v2064_v0, %v2064_v0  ;;  %v490_v9 = vmul.f32 %v2067_v1, %v2067_v1 }
  0xb1   : > { %1774 = vmatprep.subr.bf16.mxu1 %v2143_v62 }
  0xb2   : > { %v2076_v10 = vsub.f32 %v1996_v16, %v459_v6  ;;  %v2079_v11 = vsub.f32 %v1999_v17, %v460_v7  ;;  %v517_v12 = vsel %vm401_vm0, %v489_v8, 0.0  ;;  %v520_v15 = vsel %vm401_vm0, %v490_v9, 0.0  ;;  %1782 = vmatpush3.bf16.msra.mxu1 %v2143_v62 }
  0xb3   : > { %515 = vadd.xlane.f32.xlu1 %v514_v5  ;;  %518 = vadd.xlane.f32.xlu0 %v517_v12  ;;  %v434_v13 = vpop.xlane.xlu0 %433  ;;  %v437_v14 = vpop.xlane.xlu1 %436 }
  0xb4   : > { %v461_v18 = vmul.f32 0.03125, %v434_v13  ;;  %v462_v19 = vmul.f32 0.03125, %v437_v14  ;;  %v491_v22 = vmul.f32 %v2076_v10, %v2076_v10  ;;  %v492_v16 = vmul.f32 %v2079_v11, %v2079_v11 }
  0xb6   : > { %v2088_v23 = vsub.f32 %v2006_v20, %v461_v18  ;;  %v2091_v17 = vsub.f32 %v2009_v21, %v462_v19  ;;  %v523_v26 = vsel %vm401_vm0, %v491_v22, 0.0  ;;  %v526_v31 = vsel %vm401_vm0, %v492_v16, 0.0 }
  0xb7   : > { %521 = vadd.xlane.f32.xlu1 %v520_v15  ;;  %524 = vadd.xlane.f32.xlu0 %v523_v26  ;;  %v440_v27 = vpop.xlane.xlu0 %439  ;;  %v443_v30 = vpop.xlane.xlu1 %442 }
  0xb8   : > { %v463_v32 = vmul.f32 0.03125, %v440_v27  ;;  %v464_v33 = vmul.f32 0.03125, %v443_v30  ;;  %v493_v34 = vmul.f32 %v2088_v23, %v2088_v23  ;;  %v494_v20 = vmul.f32 %v2091_v17, %v2091_v17 }
  0xba   : > { %v2100_v35 = vsub.f32 %v2016_v24, %v463_v32  ;;  %v2103_v21 = vsub.f32 %v2019_v25, %v464_v33  ;;  %v529_v38 = vsel %vm401_vm0, %v493_v34, 0.0  ;;  %v532_v41 = vsel %vm401_vm0, %v494_v20, 0.0  ;;  %v2151_v33 = vld [vmem:[%s2748_s2] ss:$0 sm:$0xff] }
  0xbb   : > { %527 = vadd.xlane.f32.xlu1 %v526_v31  ;;  %530 = vadd.xlane.f32.xlu0 %v529_v38  ;;  %v446_v39 = vpop.xlane.xlu0 %445  ;;  %v449_v40 = vpop.xlane.xlu1 %448 }
  0xbc   : > { %v465_v42 = vmul.f32 0.03125, %v446_v39  ;;  %v466_v43 = vmul.f32 0.03125, %v449_v40  ;;  %v495_v46 = vmul.f32 %v2100_v35, %v2100_v35  ;;  %v496_v24 = vmul.f32 %v2103_v21, %v2103_v21 }
  0xbe   : > { %v2112_v47 = vsub.f32 %v2026_v28, %v465_v42  ;;  %v2115_v25 = vsub.f32 %v2029_v29, %v466_v43  ;;  %v535_v48 = vsel %vm401_vm0, %v495_v46, 0.0  ;;  %v538_v49 = vsel %vm401_vm0, %v496_v24, 0.0  ;;  %v689_v29 = vld [vmem:[%s2752_s6] sm:$0xff] }
  0xbf   : > { %533 = vadd.xlane.f32.xlu1 %v532_v41  ;;  %536 = vadd.xlane.f32.xlu0 %v535_v48  ;;  %v1734_v56 = vpack.c.bf16 %v690_v53, %v689_v29  ;;  %v2163_v41 = vld [vmem:[%s2749_s3] ss:$0 sm:$0xff] }
  0xc0   : > { %v497_v50 = vmul.f32 %v2112_v47, %v2112_v47  ;;  %v498_v51 = vmul.f32 %v2115_v25, %v2115_v25  ;;  %v563_v48 = vld [vmem:[%s2157_s18] sm:$0xff] }
  0xc1   : > { %1735 = vmatprep.subr.bf16.mxu0 %v1734_v56 }
  0xc2   : > { %v541_v52 = vsel %vm401_vm0, %v497_v50, 0.0  ;;  %v544_v28 = vsel %vm401_vm0, %v498_v51, 0.0  ;;  %1737 = vmatpush3.bf16.msra.mxu0 %v1734_v56 }
  0xc3   : > { %539 = vadd.xlane.f32.xlu1 %v538_v49  ;;  %542 = vadd.xlane.f32.xlu0 %v541_v52 }
  0xc4   : > { %1739 = vmatprep.subr.bf16.mxu0 %v1738_v59 }
  0xc6   : > { %1741 = vmatpush3.bf16.msra.mxu0 %v1738_v59 }
  0xc7   : > { %545 = vadd.xlane.f32.xlu1 %v544_v28  ;;  %1743 = vmatprep.subr.bf16.mxu0 %v2143_v62 }
 0x134   : > { %v501_v63 = vpop.xlane.xlu0 %500 }
 0x135   : > { %v547_v2 = vmul.f32 0.03125, %v501_v63 }
 0x137   : > { %v579_v3 = vadd.f32 1e-05, %v547_v2 }
 0x138   : > { %v504_v4 = vpop.xlane.xlu1 %503  ;;  %v507_v5 = vpop.xlane.xlu0 %506 }
 0x139   : > { %1798 = vrsqrt.f32 %v579_v3  ;;  %v548_v6 = vmul.f32 0.03125, %v504_v4  ;;  %v549_v7 = vmul.f32 0.03125, %v507_v5 }
 0x13b   : > { %v580_v8 = vadd.f32 1e-05, %v548_v6  ;;  %v581_v9 = vadd.f32 1e-05, %v549_v7 }
 0x13c   : > { %v510_v12 = vpop.xlane.xlu1 %509  ;;  %v513_v13 = vpop.xlane.xlu0 %512 }
 0x13d   : > { %1800 = vrsqrt.f32 %v580_v8  ;;  %v550_v14 = vmul.f32 0.03125, %v510_v12  ;;  %v551_v15 = vmul.f32 0.03125, %v513_v13  ;;  %v565_v8 = vld [vmem:[%s2157_s18 + $0x10] sm:$0xff] }
 0x13e   : > { %1802 = vrsqrt.f32 %v581_v9 }
 0x13f   : > { %v582_v18 = vadd.f32 1e-05, %v550_v14  ;;  %v583_v19 = vadd.f32 1e-05, %v551_v15 }
 0x140   : > { %v516_v22 = vpop.xlane.xlu1 %515  ;;  %v519_v16 = vpop.xlane.xlu0 %518 }
 0x141   : > { %1804 = vrsqrt.f32 %v582_v18  ;;  %v552_v26 = vmul.f32 0.03125, %v516_v22  ;;  %v553_v27 = vmul.f32 0.03125, %v519_v16  ;;  %v566_v18 = vld [vmem:[%s2157_s18 + $0x18] sm:$0xff] }
 0x142   : > { %1806 = vrsqrt.f32 %v583_v19 }
 0x143   : > { %v1799_v30 = vpop.eup %1798  ;;  %v584_v31 = vadd.f32 1e-05, %v552_v26  ;;  %v585_v32 = vadd.f32 1e-05, %v553_v27 }
 0x144   : > { %v522_v34 = vpop.xlane.xlu1 %521  ;;  %v525_v20 = vpop.xlane.xlu0 %524  ;;  %v611_v38 = vmul.f32 %v1799_v30, %v2035_v36 }
 0x145   : > { %1808 = vrsqrt.f32 %v584_v31  ;;  %v554_v39 = vmul.f32 0.03125, %v522_v34  ;;  %v555_v40 = vmul.f32 0.03125, %v525_v20  ;;  %v567_v20 = vld [vmem:[%s2157_s18 + $0x20] sm:$0xff] }
 0x146   : > { %1810 = vrsqrt.f32 %v585_v32  ;;  %v634_v42 = vmul.f32 %v2151_v33, %v611_v38 }
 0x147   : > { %v1801_v43 = vpop.eup %1800  ;;  %v586_v46 = vadd.f32 1e-05, %v554_v39  ;;  %v587_v24 = vadd.f32 1e-05, %v555_v40 }
 0x148   : > { %v1803_v49 = vpop.eup %1802  ;;  %v612_v50 = vmul.f32 %v1801_v43, %v2043_v44  ;;  %v528_v36 = vpop.xlane.xlu1 %527  ;;  %v657_v52 = vadd.f32 %v2163_v41, %v634_v42  ;;  %v568_v43 = vld [vmem:[%s2157_s18 + $0x28] sm:$0xff] }
 0x149   : > { %v531_v51 = vpop.xlane.xlu0 %530  ;;  %v613_v28 = vmul.f32 %v1803_v49, %v2037_v37  ;;  %1812 = vrsqrt.f32 %v586_v46  ;;  %v556_v29 = vmul.f32 0.03125, %v528_v36  ;;  %v569_v36 = vld [vmem:[%s2157_s18 + $0x30] sm:$0xff] }
 0x14a   : > { %v557_v53 = vmul.f32 0.03125, %v531_v51  ;;  %1814 = vrsqrt.f32 %v587_v24  ;;  %v2170_v56 = vadd.f32 %v657_v52, %v563_v48  ;;  %v635_v57 = vmul.f32 %v2151_v33, %v612_v50 }
 0x14b   : > { %v1805_v58 = vpop.eup %1804  ;;  %v588_v59 = vadd.f32 1e-05, %v556_v29  ;;  %v636_v44 = vmul.f32 %v2151_v33, %v613_v28 }
 0x14c   : > { %v589_v60 = vadd.f32 1e-05, %v557_v53  ;;  %v1807_v63 = vpop.eup %1806  ;;  %v614_v2 = vmul.f32 %v1805_v58, %v2045_v45  ;;  %v534_v3 = vpop.xlane.xlu1 %533  ;;  %1654 = vmatprep.mubr.msk.f32.mxu0 %vm401_vm0, %v2170_v56  ;;  %v658_v4 = vadd.f32 %v2163_v41, %v635_v57 }
 0x14d   : > { %v537_v37 = vpop.xlane.xlu0 %536  ;;  %v615_v5 = vmul.f32 %v1807_v63, %v2053_v54  ;;  %1816 = vrsqrt.f32 %v588_v59  ;;  %v558_v6 = vmul.f32 0.03125, %v534_v3  ;;  %v659_v12 = vadd.f32 %v2163_v41, %v636_v44  ;;  %v570_v59 = vld [vmem:[%s2157_s18 + $0x38] sm:$0xff]  ;;  %v571_v63 = vld [vmem:[%s2157_s18 + $0x40] sm:$0xff] }
 0x14e   : > { %v559_v7 = vmul.f32 0.03125, %v537_v37  ;;  %1818 = vrsqrt.f32 %v589_v60  ;;  %v2181_v9 = vadd.f32 %v658_v4, %v564_v61  ;;  %v637_v45 = vmul.f32 %v2151_v33, %v614_v2 }
 0x14f   : > { %v1809_v13 = vpop.eup %1808  ;;  %v590_v14 = vadd.f32 1e-05, %v558_v6  ;;  %v638_v19 = vmul.f32 %v2151_v33, %v615_v5  ;;  %v2190_v27 = vadd.f32 %v659_v12, %v565_v8  ;;  %v572_v6 = vld [vmem:[%s2157_s18 + $0x48] sm:$0xff] }
 0x150   : > { %v591_v15 = vadd.f32 1e-05, %v559_v7  ;;  %v1811_v22 = vpop.eup %1810  ;;  %v616_v54 = vmul.f32 %v1809_v13, %v2055_v55  ;;  %v540_v16 = vpop.xlane.xlu1 %539  ;;  %1655 = vmatmul.mubr.msk.f32.vlgmr.msra.gmra.mrb[0].mxu0 %vm401_vm0, %v2181_v9  ;;  %v660_v30 = vadd.f32 %v2163_v41, %v637_v45  ;;  %v573_v45 = vld [vmem:[%s2157_s18 + $0x50] sm:$0xff] }
 0x151   : > { %v543_v26 = vpop.xlane.xlu0 %542  ;;  %v617_v31 = vmul.f32 %v1811_v22, %v2064_v0  ;;  %1820 = vrsqrt.f32 %v590_v14  ;;  %v560_v32 = vmul.f32 0.03125, %v540_v16  ;;  %1745 = vmatpush3.bf16.msra.mxu0 %v2143_v62  ;;  %1657 = vmatprep.mubr.msk.f32.mxu0 %vm401_vm0, %v2190_v27  ;;  %v661_v38 = vadd.f32 %v2163_v41, %v638_v19  ;;  %v574_v22 = vld [vmem:[%s2157_s18 + $0x58] sm:$0xff] }
 0x152   : > { %v561_v34 = vmul.f32 0.03125, %v543_v26  ;;  %1822 = vrsqrt.f32 %v591_v15  ;;  %v2198_v55 = vadd.f32 %v660_v30, %v566_v18  ;;  %v639_v39 = vmul.f32 %v2151_v33, %v616_v54  ;;  %v575_v30 = vld [vmem:[%s2157_s18 + $0x60] sm:$0xff] }
 0x153   : > { %v1813_v40 = vpop.eup %1812  ;;  %v592_v42 = vadd.f32 1e-05, %v560_v32  ;;  %v640_v46 = vmul.f32 %v2151_v33, %v617_v31  ;;  %v2207_v49 = vadd.f32 %v661_v38, %v567_v20 }
 0x154   : > { %v593_v0 = vadd.f32 1e-05, %v561_v34  ;;  %v1815_v24 = vpop.eup %1814  ;;  %v618_v62 = vmul.f32 %v1813_v40, %v2067_v1  ;;  %v546_v48 = vpop.xlane.xlu1 %545  ;;  %1658 = vmatmul.mubr.msk.f32.gmra.mrb[2].mxu0 %vm401_vm0, %v2198_v55  ;;  %v662_v50 = vadd.f32 %v2163_v41, %v639_v39  ;;  %v576_v39 = vld [vmem:[%s2157_s18 + $0x68] sm:$0xff] }
 0x155   : > { %v619_v51 = vmul.f32 %v1815_v24, %v2076_v10  ;;  %1824 = vrsqrt.f32 %v592_v42  ;;  %v562_v52 = vmul.f32 0.03125, %v546_v48  ;;  %v663_v28 = vadd.f32 %v2163_v41, %v640_v46  ;;  %1660 = vmatprep.mubr.msk.f32.mxu0 %vm401_vm0, %v2207_v49  ;;  %v578_v48 = vld [vmem:[%s2157_s18 + $0x78] sm:$0xff] }
 0x156   : > { %1826 = vrsqrt.f32 %v593_v0  ;;  %v2215_v1 = vadd.f32 %v662_v50, %v568_v43  ;;  %v641_v29 = vmul.f32 %v2151_v33, %v618_v62  ;;  %v577_v0 = vld [vmem:[%s2157_s18 + $0x70] sm:$0xff] }
 0x157   : > { %v1817_v53 = vpop.eup %1816  ;;  %v594_v57 = vadd.f32 1e-05, %v562_v52  ;;  %v2218_v58 = vadd.f32 %v663_v28, %v569_v36  ;;  %v642_v10 = vmul.f32 %v2151_v33, %v619_v51  ;;  %v1040_v36 = vld [vmem:[%s2754_s8 + $0x18] sm:$0xff]  ;;  %v1042_v52 = vld [vmem:[%s2754_s8 + $0x28] sm:$0xff] }
 0x158   : > { %v1819_v60 = vpop.eup %1818  ;;  %v620_v61 = vmul.f32 %v1817_v53, %v2079_v11  ;;  %1661 = vmatmul.mubr.msk.f32.gmra.mrb[4].mxu0 %vm401_vm0, %v2215_v1  ;;  %v664_v44 = vadd.f32 %v2163_v41, %v641_v29  ;;  %v1043_v29 = vld [vmem:[%s2754_s8 + $0x30] sm:$0xff]  ;;  %v1044_v53 = vld [vmem:[%s2754_s8 + $0x38] sm:$0xff] }
 0x159   : > { %v621_v2 = vmul.f32 %v1819_v60, %v2088_v23  ;;  %1828 = vrsqrt.f32 %v594_v57  ;;  %1663 = vmatprep.mubr.msk.f32.mxu0 %vm401_vm0, %v2218_v58  ;;  %v665_v3 = vadd.f32 %v2163_v41, %v642_v10  ;;  %v1754_v57 = vpack.c.bf16 %v1044_v53, %v1043_v29  ;;  %v1046_v10 = vld [vmem:[%s2754_s8 + $0x48] sm:$0xff] }
 0x15a   : > { %v2231_v37 = vadd.f32 %v664_v44, %v570_v59  ;;  %v643_v4 = vmul.f32 %v2151_v33, %v620_v61  ;;  %v1045_v59 = vld [vmem:[%s2754_s8 + $0x40] sm:$0xff]  ;;  %v1047_v61 = vld [vmem:[%s2754_s8 + $0x50] sm:$0xff]  ;;  %v1048_v44 = vld [vmem:[%s2754_s8 + $0x58] sm:$0xff] }
 0x15b   : > { %v1821_v11 = vpop.eup %1820  ;;  %v2234_v5 = vadd.f32 %v665_v3, %v571_v63  ;;  %v644_v7 = vmul.f32 %v2151_v33, %v621_v2  ;;  %v1758_v60 = vpack.c.bf16 %v1046_v10, %v1045_v59  ;;  %v1762_v63 = vpack.c.bf16 %v1048_v44, %v1047_v61  ;;  %v1049_v2 = vld [vmem:[%s2754_s8 + $0x60] sm:$0xff]  ;;  %v1050_v3 = vld [vmem:[%s2754_s8 + $0x68] sm:$0xff] }
 0x15c   : > { %v1823_v8 = vpop.eup %1822  ;;  %v622_v23 = vmul.f32 %v1821_v11, %v2091_v17  ;;  %1664 = vmatmul.mubr.msk.f32.gmra.mrb[6].mxu0 %vm401_vm0, %v2231_v37  ;;  %v666_v12 = vadd.f32 %v2163_v41, %v643_v4  ;;  %v1766_v4 = vpack.c.bf16 %v1050_v3, %v1049_v2  ;;  %v1051_v11 = vld [vmem:[%s2754_s8 + $0x70] sm:$0xff] }
 0x15d   : > { %v623_v13 = vmul.f32 %v1823_v8, %v2100_v35  ;;  %1666 = vmatprep.mubr.msk.f32.mxu0 %vm401_vm0, %v2234_v5  ;;  %v667_v14 = vadd.f32 %v2163_v41, %v644_v7  ;;  %v2338_v8 = vld [vmem:[%s2753_s7] ss:$0 sm:$0xff] }
 0x15e   : > { %v2247_v15 = vadd.f32 %v666_v12, %v572_v6  ;;  %v645_v18 = vmul.f32 %v2151_v33, %v622_v23  ;;  %v1052_v6 = vld [vmem:[%s2754_s8 + $0x78] sm:$0xff] }
 0x15f   : > { %v1825_v19 = vpop.eup %1824  ;;  %v2250_v17 = vadd.f32 %v667_v14, %v573_v45  ;;  %v646_v54 = vmul.f32 %v2151_v33, %v623_v13  ;;  %v1770_v7 = vpack.c.bf16 %v1052_v6, %v1051_v11 }
 0x160   : > { %v1827_v16 = vpop.eup %1826  ;;  %v624_v26 = vmul.f32 %v1825_v19, %v2103_v21  ;;  %1667 = vmatmul.mubr.msk.f32.gmra.mrb[8].mxu0 %vm401_vm0, %v2247_v15  ;;  %v668_v35 = vadd.f32 %v2163_v41, %v645_v18 }
 0x161   : > { %v625_v31 = vmul.f32 %v1827_v16, %v2112_v47  ;;  %1669 = vmatprep.mubr.msk.f32.mxu0 %vm401_vm0, %v2250_v17  ;;  %v669_v32 = vadd.f32 %v2163_v41, %v646_v54 }
 0x162   : > { %v2263_v34 = vadd.f32 %v668_v35, %v574_v22  ;;  %v647_v20 = vmul.f32 %v2151_v33, %v624_v26 }
 0x163   : > { %v1829_v21 = vpop.eup %1828  ;;  %v2266_v38 = vadd.f32 %v669_v32, %v575_v30  ;;  %v648_v40 = vmul.f32 %v2151_v33, %v625_v31 }
 0x164   : > { %v626_v42 = vmul.f32 %v1829_v21, %v2115_v25  ;;  %1670 = vmatmul.mubr.msk.f32.gmra.mrb[10].mxu0 %vm401_vm0, %v2263_v34  ;;  %v670_v47 = vadd.f32 %v2163_v41, %v647_v20 }
 0x165   : > { %1672 = vmatprep.mubr.msk.f32.mxu0 %vm401_vm0, %v2266_v38  ;;  %v671_v43 = vadd.f32 %v2163_v41, %v648_v40 }
 0x166   : > { %v2278_v46 = vadd.f32 %v670_v47, %v576_v39  ;;  %v649_v24 = vmul.f32 %v2151_v33, %v626_v42  ;;  %v1039_v33 = vld [vmem:[%s2754_s8 + $0x10] sm:$0xff] }
 0x167   : > { %v2281_v62 = vadd.f32 %v671_v43, %v577_v0  ;;  %v1746_v51 = vpack.c.bf16 %v1040_v36, %v1039_v33 }
 0x168   : > { %1673 = vmatmul.mubr.msk.f32.gmra.mrb[12].mxu0 %vm401_vm0, %v2278_v46  ;;  %v672_v25 = vadd.f32 %v2163_v41, %v649_v24  ;;  %v1041_v41 = vld [vmem:[%s2754_s8 + $0x20] sm:$0xff] }
 0x169   : > { %1675 = vmatprep.mubr.msk.f32.mxu0 %vm401_vm0, %v2281_v62  ;;  %1747 = vmatprep.subr.bf16.mxu0 %v1746_v51  ;;  %v1750_v28 = vpack.c.bf16 %v1042_v52, %v1041_v41 }
 0x16a   : > { %v2289_v50 = vadd.f32 %v672_v25, %v578_v48  ;;  %1775 = vmatprep.subr.bf16.mxu1 %v1746_v51  ;;  %1749 = vmatpush3.bf16.msra.mxu0 %v1746_v51 }
 0x16b   : > { %1783 = vmatpush3.bf16.msra.mxu1 %v1746_v51  ;;  %1751 = vmatprep.subr.bf16.mxu0 %v1750_v28 }
 0x16c   : > { %1676 = vmatmul.mubr.msk.f32.gmra.mrb[14].mxu0 %vm401_vm0, %v2289_v50  ;;  %1776 = vmatprep.subr.bf16.mxu1 %v1750_v28 }
 0x16e   : > { %1753 = vmatpush3.bf16.msra.mxu0 %v1750_v28 }
 0x16f   : > { %1784 = vmatpush3.bf16.msra.mxu1 %v1750_v28  ;;  %1755 = vmatprep.subr.bf16.mxu0 %v1754_v57 }
 0x170   : > { %1777 = vmatprep.subr.bf16.mxu1 %v1754_v57 }
 0x172   : > { %1757 = vmatpush3.bf16.msra.mxu0 %v1754_v57 }
 0x173   : > { %1785 = vmatpush3.bf16.msra.mxu1 %v1754_v57  ;;  %1759 = vmatprep.subr.bf16.mxu0 %v1758_v60 }
 0x174   : > { %1778 = vmatprep.subr.bf16.mxu1 %v1758_v60 }
 0x176   : > { %1761 = vmatpush3.bf16.msra.mxu0 %v1758_v60 }
 0x177   : > { %1786 = vmatpush3.bf16.msra.mxu1 %v1758_v60  ;;  %1763 = vmatprep.subr.bf16.mxu0 %v1762_v63 }
 0x178   : > { %1779 = vmatprep.subr.bf16.mxu1 %v1762_v63 }
 0x17a   : > { %1765 = vmatpush3.bf16.msra.mxu0 %v1762_v63 }
 0x17b   : > { %1787 = vmatpush3.bf16.msra.mxu1 %v1762_v63  ;;  %1767 = vmatprep.subr.bf16.mxu0 %v1766_v4 }
 0x17c   : > { %1780 = vmatprep.subr.bf16.mxu1 %v1766_v4 }
 0x17e   : > { %1769 = vmatpush3.bf16.msra.mxu0 %v1766_v4 }
 0x17f   : > { %1788 = vmatpush3.bf16.msra.mxu1 %v1766_v4  ;;  %1771 = vmatprep.subr.bf16.mxu0 %v1770_v7 }
 0x180   : > { %1781 = vmatprep.subr.bf16.mxu1 %v1770_v7 }
 0x182   : > { %1773 = vmatpush3.bf16.msra.mxu0 %v1770_v7 }
 0x183   : > { %1789 = vmatpush3.bf16.msra.mxu1 %v1770_v7 }
 0x223   : > { %v1656_v23 = vpop.f32.mrb[0].mxu0 }
 0x224   : > { %v2341_v12 = vadd.f32 %v1656_v23, %v2338_v8  ;;  %v814_v45 = vpop.f32.mrb[1].mxu0 }
 0x225   : > { %v2344_v13 = vadd.f32 %v2338_v8, %v814_v45 }
 0x226   : > { %v894_v14 = vmul.f32 %v2341_v12, %v2341_v12 }
 0x227   : > { %v893_v18 = vmul.f32 %v2344_v13, %v2344_v13  ;;  %v1659_v19 = vpop.f32.mrb[2].mxu0 }
 0x228   : > { %v910_v22 = vmul.f32 %v894_v14, %v2341_v12  ;;  %v2352_v54 = vadd.f32 %v1659_v19, %v2338_v8  ;;  %v824_v16 = vpop.f32.mrb[3].mxu0 }
 0x229   : > { %v909_v26 = vmul.f32 %v893_v18, %v2344_v13  ;;  %v2356_v35 = vadd.f32 %v2338_v8, %v824_v16 }
 0x22a   : > { %v926_v30 = vmul.f32 0.044715, %v910_v22  ;;  %v896_v31 = vmul.f32 %v2352_v54, %v2352_v54 }
 0x22b   : > { %v925_v32 = vmul.f32 0.044715, %v909_v26  ;;  %v895_v20 = vmul.f32 %v2356_v35, %v2356_v35  ;;  %v1662_v21 = vpop.f32.mrb[4].mxu0 }
 0x22c   : > { %v942_v39 = vadd.f32 %v926_v30, %v2341_v12  ;;  %v912_v40 = vmul.f32 %v896_v31, %v2352_v54  ;;  %v2365_v42 = vadd.f32 %v1662_v21, %v2338_v8  ;;  %v834_v47 = vpop.f32.mrb[5].mxu0 }
 0x22d   : > { %v941_v0 = vadd.f32 %v925_v32, %v2344_v13  ;;  %v911_v43 = vmul.f32 %v895_v20, %v2356_v35  ;;  %v2370_v24 = vadd.f32 %v2338_v8, %v834_v47 }
 0x22e   : > { %v958_v48 = vmul.f32 0.7978846, %v942_v39  ;;  %v928_v25 = vmul.f32 0.044715, %v912_v40  ;;  %v898_v33 = vmul.f32 %v2365_v42, %v2365_v42 }
 0x22f   : > { %v957_v36 = vmul.f32 0.7978846, %v941_v0  ;;  %v927_v51 = vmul.f32 0.044715, %v911_v43  ;;  %v897_v41 = vmul.f32 %v2370_v24, %v2370_v24  ;;  %v1665_v52 = vpop.f32.mrb[6].mxu0 }
 0x230   : > { %1830 = vtanh.f32 %v958_v48  ;;  %v944_v28 = vadd.f32 %v928_v25, %v2352_v54  ;;  %v914_v29 = vmul.f32 %v898_v33, %v2365_v42  ;;  %v2379_v53 = vadd.f32 %v1665_v52, %v2338_v8  ;;  %v844_v57 = vpop.f32.mrb[7].mxu0 }
 0x231   : > { %v943_v59 = vadd.f32 %v927_v51, %v2356_v35  ;;  %v913_v10 = vmul.f32 %v897_v41, %v2370_v24  ;;  %v2384_v60 = vadd.f32 %v2338_v8, %v844_v57  ;;  %1832 = vtanh.f32 %v957_v36 }
 0x232   : > { %v960_v61 = vmul.f32 0.7978846, %v944_v28  ;;  %v930_v44 = vmul.f32 0.044715, %v914_v29  ;;  %v900_v63 = vmul.f32 %v2379_v53, %v2379_v53 }
 0x233   : > { %v959_v2 = vmul.f32 0.7978846, %v943_v59  ;;  %v929_v3 = vmul.f32 0.044715, %v913_v10  ;;  %v899_v4 = vmul.f32 %v2384_v60, %v2384_v60  ;;  %v1668_v11 = vpop.f32.mrb[8].mxu0 }
 0x234   : > { %v946_v6 = vadd.f32 %v930_v44, %v2365_v42  ;;  %v916_v7 = vmul.f32 %v900_v63, %v2379_v53  ;;  %v2393_v23 = vadd.f32 %v1668_v11, %v2338_v8  ;;  %v854_v45 = vpop.f32.mrb[9].mxu0  ;;  %1834 = vtanh.f32 %v960_v61 }
 0x235   : > { %v945_v14 = vadd.f32 %v929_v3, %v2370_v24  ;;  %v915_v18 = vmul.f32 %v899_v4, %v2384_v60  ;;  %v2398_v19 = vadd.f32 %v2338_v8, %v854_v45  ;;  %1836 = vtanh.f32 %v959_v2 }
 0x236   : > { %v962_v22 = vmul.f32 0.7978846, %v946_v6  ;;  %v932_v16 = vmul.f32 0.044715, %v916_v7  ;;  %v902_v26 = vmul.f32 %v2393_v23, %v2393_v23 }
 0x237   : > { %v961_v30 = vmul.f32 0.7978846, %v945_v14  ;;  %v901_v31 = vmul.f32 %v2398_v19, %v2398_v19  ;;  %v1671_v32 = vpop.f32.mrb[10].mxu0  ;;  %v931_v20 = vmul.f32 0.044715, %v915_v18 }
 0x238   : > { %v918_v21 = vmul.f32 %v902_v26, %v2393_v23  ;;  %v2406_v39 = vadd.f32 %v1671_v32, %v2338_v8  ;;  %v864_v40 = vpop.f32.mrb[11].mxu0  ;;  %1838 = vtanh.f32 %v962_v22  ;;  %v948_v47 = vadd.f32 %v932_v16, %v2379_v53 }
 0x239   : > { %v917_v0 = vmul.f32 %v901_v31, %v2398_v19  ;;  %v2411_v43 = vadd.f32 %v2338_v8, %v864_v40  ;;  %1840 = vtanh.f32 %v961_v30  ;;  %v947_v36 = vadd.f32 %v931_v20, %v2384_v60 }
 0x23a   : > { %v1831_v48 = vpop.eup %1830  ;;  %v934_v25 = vmul.f32 0.044715, %v918_v21  ;;  %v904_v33 = vmul.f32 %v2406_v39, %v2406_v39  ;;  %v964_v2 = vmul.f32 0.7978846, %v948_v47 }
 0x23b   : > { %v1833_v51 = vpop.eup %1832  ;;  %v990_v41 = vadd.f32 1.0, %v1831_v48  ;;  %v933_v52 = vmul.f32 0.044715, %v917_v0  ;;  %v903_v28 = vmul.f32 %v2411_v43, %v2411_v43  ;;  %v1674_v29 = vpop.f32.mrb[12].mxu0  ;;  %v963_v14 = vmul.f32 0.7978846, %v947_v36 }
 0x23c   : > { %v950_v57 = vadd.f32 %v934_v25, %v2393_v23  ;;  %v920_v59 = vmul.f32 %v904_v33, %v2406_v39  ;;  %v2421_v10 = vadd.f32 %v1674_v29, %v2338_v8  ;;  %v874_v61 = vpop.f32.mrb[13].mxu0  ;;  %v989_v44 = vadd.f32 1.0, %v1833_v51 }
 0x23d   : > { %v1006_v63 = vmul.f32 0.5, %v990_v41  ;;  %v919_v3 = vmul.f32 %v903_v28, %v2411_v43  ;;  %v2425_v4 = vadd.f32 %v2338_v8, %v874_v61  ;;  %v949_v6 = vadd.f32 %v933_v52, %v2398_v19 }
 0x23e   : > { %v1835_v11 = vpop.eup %1834  ;;  %v906_v7 = vmul.f32 %v2421_v10, %v2421_v10  ;;  %v1005_v45 = vmul.f32 0.5, %v989_v44  ;;  %v966_v22 = vmul.f32 0.7978846, %v950_v57  ;;  %v936_v31 = vmul.f32 0.044715, %v920_v59 }
 0x23f   : > { %v1837_v18 = vpop.eup %1836  ;;  %v935_v16 = vmul.f32 0.044715, %v919_v3  ;;  %v905_v26 = vmul.f32 %v2425_v4, %v2425_v4  ;;  %v1677_v30 = vpop.f32.mrb[14].mxu0  ;;  %v1022_v47 = vmul.f32 %v1006_v63, %v2341_v12  ;;  %v965_v36 = vmul.f32 0.7978846, %v949_v6 }
 0x240   : > { %v922_v32 = vmul.f32 %v906_v7, %v2421_v10  ;;  %v2434_v20 = vadd.f32 %v1677_v30, %v2338_v8  ;;  %v884_v21 = vpop.f32.mrb[15].mxu0  ;;  %v1021_v40 = vmul.f32 %v1005_v45, %v2344_v13  ;;  %v991_v25 = vadd.f32 1.0, %v1837_v18 }
 0x241   : > { %v921_v0 = vmul.f32 %v905_v26, %v2425_v4  ;;  %v2440_v48 = vadd.f32 %v2338_v8, %v884_v21  ;;  %v992_v52 = vadd.f32 1.0, %v1835_v11  ;;  %v951_v29 = vadd.f32 %v935_v16, %v2411_v43 }
 0x242   : > { %v1839_v33 = vpop.eup %1838  ;;  %v938_v51 = vmul.f32 0.044715, %v922_v32  ;;  %v908_v41 = vmul.f32 %v2434_v20, %v2434_v20  ;;  %1710 = vmatprep.mubr.f32.mxu0 %v1021_v40  ;;  %v1007_v57 = vmul.f32 0.5, %v991_v25  ;;  %v952_v8 = vadd.f32 %v936_v31, %v2406_v39 }
 0x243   : > { %v1841_v28 = vpop.eup %1840  ;;  %v937_v13 = vmul.f32 0.044715, %v921_v0  ;;  %v907_v12 = vmul.f32 %v2440_v48, %v2440_v48  ;;  %1711 = vmatmul.mubr.f32.vlgmr.msra.gmra.mrb[16].mxu0 %v1022_v47  ;;  %v1008_v61 = vmul.f32 0.5, %v992_v52  ;;  %v994_v6 = vadd.f32 1.0, %v1839_v33 }
 0x244   : > { %v924_v59 = vmul.f32 %v908_v41, %v2434_v20  ;;  %v993_v44 = vadd.f32 1.0, %v1841_v28  ;;  %v1023_v11 = vmul.f32 %v1007_v57, %v2356_v35  ;;  %v954_v7 = vadd.f32 %v938_v51, %v2421_v10 }
 0x245   : > { %v953_v63 = vadd.f32 %v937_v13, %v2425_v4  ;;  %v923_v3 = vmul.f32 %v907_v12, %v2440_v48  ;;  %v1024_v18 = vmul.f32 %v1008_v61, %v2352_v54  ;;  %v967_v26 = vmul.f32 0.7978846, %v951_v29 }
 0x246   : > { %v940_v45 = vmul.f32 0.044715, %v924_v59  ;;  %v1009_v16 = vmul.f32 0.5, %v993_v44  ;;  %1713 = vmatprep.mubr.f32.mxu0 %v1023_v11  ;;  %v1010_v31 = vmul.f32 0.5, %v994_v6  ;;  %1842 = vtanh.f32 %v963_v14 }
 0x247   : > { %v939_v30 = vmul.f32 0.044715, %v923_v3  ;;  %v968_v32 = vmul.f32 0.7978846, %v952_v8  ;;  %1714 = vmatmul.mubr.f32.gmra.mrb[18].mxu0 %v1024_v18  ;;  %1844 = vtanh.f32 %v964_v2  ;;  %v969_v40 = vmul.f32 0.7978846, %v953_v63 }
 0x248   : > { %v1025_v21 = vmul.f32 %v1009_v16, %v2370_v24  ;;  %1846 = vtanh.f32 %v965_v36  ;;  %v970_v47 = vmul.f32 0.7978846, %v954_v7  ;;  %v956_v0 = vadd.f32 %v940_v45, %v2434_v20 }
 0x249   : > { %v955_v35 = vadd.f32 %v939_v30, %v2440_v48  ;;  %v1026_v54 = vmul.f32 %v1010_v31, %v2365_v42  ;;  %1848 = vtanh.f32 %v966_v22 }
 0x24a   : > { %1716 = vmatprep.mubr.f32.mxu0 %v1025_v21  ;;  %1850 = vtanh.f32 %v967_v26  ;;  %v972_v14 = vmul.f32 0.7978846, %v956_v0 }
 0x24b   : > { %v971_v25 = vmul.f32 0.7978846, %v955_v35  ;;  %1717 = vmatmul.mubr.f32.gmra.mrb[20].mxu0 %v1026_v54  ;;  %1852 = vtanh.f32 %v968_v32 }
 0x24c   : > { %1854 = vtanh.f32 %v969_v40 }
 0x24d   : > { %1856 = vtanh.f32 %v970_v47 }
 0x24e   : > { %1858 = vtanh.f32 %v971_v25 }
 0x24f   : > { %1860 = vtanh.f32 %v972_v14 }
 0x250   : > { %v1843_v24 = vpop.eup %1842 }
 0x251   : > { %v1845_v2 = vpop.eup %1844  ;;  %v995_v33 = vadd.f32 1.0, %v1843_v24 }
 0x252   : > { %v1847_v36 = vpop.eup %1846  ;;  %v996_v51 = vadd.f32 1.0, %v1845_v2 }
 0x253   : > { %v1849_v41 = vpop.eup %1848  ;;  %v1011_v52 = vmul.f32 0.5, %v995_v33  ;;  %v997_v28 = vadd.f32 1.0, %v1847_v36 }
 0x254   : > { %v1851_v29 = vpop.eup %1850  ;;  %v1012_v42 = vmul.f32 0.5, %v996_v51  ;;  %v998_v22 = vadd.f32 1.0, %v1849_v41 }
 0x255   : > { %v1853_v13 = vpop.eup %1852  ;;  %v1027_v12 = vmul.f32 %v1011_v52, %v2384_v60  ;;  %v1013_v57 = vmul.f32 0.5, %v997_v28  ;;  %v999_v8 = vadd.f32 1.0, %v1851_v29 }
 0x256   : > { %v1855_v59 = vpop.eup %1854  ;;  %v1028_v61 = vmul.f32 %v1012_v42, %v2379_v53  ;;  %v1014_v44 = vmul.f32 0.5, %v998_v22  ;;  %v1000_v63 = vadd.f32 1.0, %v1853_v13 }
 0x257   : > { %v1857_v3 = vpop.eup %1856  ;;  %1719 = vmatprep.mubr.f32.mxu1 %v1027_v12  ;;  %v1029_v11 = vmul.f32 %v1013_v57, %v2398_v19  ;;  %v1015_v6 = vmul.f32 0.5, %v999_v8  ;;  %v1001_v7 = vadd.f32 1.0, %v1855_v59 }
 0x258   : > { %v1859_v45 = vpop.eup %1858  ;;  %1720 = vmatmul.mubr.f32.vlgmr.msra.gmra.mrb[0].mxu1 %v1028_v61  ;;  %v1030_v26 = vmul.f32 %v1014_v44, %v2393_v23  ;;  %v1016_v30 = vmul.f32 0.5, %v1000_v63  ;;  %v1002_v31 = vadd.f32 1.0, %v1857_v3 }
 0x259   : > { %1722 = vmatprep.mubr.f32.mxu1 %v1029_v11  ;;  %v1031_v18 = vmul.f32 %v1015_v6, %v2411_v43  ;;  %v1017_v16 = vmul.f32 0.5, %v1001_v7  ;;  %v1003_v60 = vadd.f32 1.0, %v1859_v45  ;;  %v1861_v53 = vpop.eup %1860 }
 0x25a   : > { %v1032_v19 = vmul.f32 %v1016_v30, %v2406_v39  ;;  %v1018_v40 = vmul.f32 0.5, %v1002_v31  ;;  %v1004_v35 = vadd.f32 1.0, %v1861_v53 }
 0x25b   : > { %v1033_v32 = vmul.f32 %v1017_v16, %v2425_v4  ;;  %v1019_v21 = vmul.f32 0.5, %v1003_v60  ;;  %v1589_v4 = vld [vmem:[%s2755_s9] ss:$0 sm:$0xff] }
 0x25c   : > { %1723 = vmatmul.mubr.f32.gmra.mrb[2].mxu1 %v1030_v26  ;;  %v1034_v47 = vmul.f32 %v1018_v40, %v2421_v10  ;;  %v1020_v0 = vmul.f32 0.5, %v1004_v35 }
 0x25d   : > { %1725 = vmatprep.mubr.f32.mxu1 %v1031_v18  ;;  %v1035_v43 = vmul.f32 %v1019_v21, %v2440_v48 }
 0x25e   : > { %v1036_v23 = vmul.f32 %v1020_v0, %v2434_v20 }
 0x260   : > { %1726 = vmatmul.mubr.f32.gmra.mrb[4].mxu1 %v1032_v19 }
 0x261   : > { %1728 = vmatprep.mubr.f32.mxu1 %v1033_v32 }
 0x264   : > { %1729 = vmatmul.mubr.f32.gmra.mrb[6].mxu1 %v1034_v47 }
 0x265   : > { %1731 = vmatprep.mubr.f32.mxu1 %v1035_v43 }
 0x268   : > { %1732 = vmatmul.mubr.f32.gmra.mrb[8].mxu1 %v1036_v23 }
 0x316   : > { %v1712_v54 = vpop.f32.mrb[16].mxu0 }
 0x317   : > { %v2471_v39 = vadd.f32 %v1712_v54, %v1589_v4  ;;  %v1126_v25 = vpop.f32.mrb[17].mxu0 }
 0x318   : > { %v2473_v14 = vadd.f32 %v1589_v4, %v1126_v25 }
 0x319   : > { %v1208_v48 = vsel %vm401_vm0, %v2471_v39, 0.0 }
 0x31a   : > { %1209 = vadd.xlane.f32.xlu1 %v1208_v48  ;;  %v1205_v10 = vsel %vm401_vm0, %v2473_v14, 0.0  ;;  %v1715_v24 = vpop.f32.mrb[18].mxu0 }
 0x31b   : > { %1206 = vadd.xlane.f32.xlu0 %v1205_v10  ;;  %v2479_v20 = vadd.f32 %v1715_v24, %v1589_v4  ;;  %v1136_v2 = vpop.f32.mrb[19].mxu0 }
 0x31c   : > { %v2481_v33 = vadd.f32 %v1589_v4, %v1136_v2 }
 0x31d   : > { %v1214_v36 = vsel %vm401_vm0, %v2479_v20, 0.0 }
 0x31e   : > { %1215 = vadd.xlane.f32.xlu1 %v1214_v36  ;;  %v1718_v51 = vpop.f32.mrb[20].mxu0  ;;  %v1211_v41 = vsel %vm401_vm0, %v2481_v33, 0.0 }
 0x31f   : > { %v2487_v52 = vadd.f32 %v1718_v51, %v1589_v4  ;;  %v1146_v28 = vpop.f32.mrb[21].mxu0  ;;  %1212 = vadd.xlane.f32.xlu0 %v1211_v41 }
 0x320   : > { %v2489_v29 = vadd.f32 %v1589_v4, %v1146_v28 }
 0x321   : > { %v1220_v42 = vsel %vm401_vm0, %v2487_v52, 0.0 }
 0x322   : > { %1221 = vadd.xlane.f32.xlu1 %v1220_v42  ;;  %v1217_v22 = vsel %vm401_vm0, %v2489_v29, 0.0 }
 0x323   : > { %1218 = vadd.xlane.f32.xlu0 %v1217_v22 }
 0x32b   : > { %v1721_v13 = vpop.f32.mrb[0].mxu1 }
 0x32c   : > { %v2495_v12 = vadd.f32 %v1721_v13, %v1589_v4  ;;  %v1156_v57 = vpop.f32.mrb[1].mxu1 }
 0x32d   : > { %v2497_v8 = vadd.f32 %v1589_v4, %v1156_v57 }
 0x32e   : > { %v1226_v59 = vsel %vm401_vm0, %v2495_v12, 0.0 }
 0x32f   : > { %v1724_v61 = vpop.f32.mrb[2].mxu1  ;;  %1227 = vadd.xlane.f32.xlu1 %v1226_v59  ;;  %v1223_v44 = vsel %vm401_vm0, %v2497_v8, 0.0 }
 0x330   : > { %v2503_v63 = vadd.f32 %v1724_v61, %v1589_v4  ;;  %v1166_v3 = vpop.f32.mrb[3].mxu1  ;;  %1224 = vadd.xlane.f32.xlu0 %v1223_v44 }
 0x331   : > { %v2505_v11 = vadd.f32 %v1589_v4, %v1166_v3 }
 0x332   : > { %v1232_v6 = vsel %vm401_vm0, %v2503_v63, 0.0 }
 0x333   : > { %v1727_v7 = vpop.f32.mrb[4].mxu1  ;;  %1233 = vadd.xlane.f32.xlu1 %v1232_v6  ;;  %v1229_v45 = vsel %vm401_vm0, %v2505_v11, 0.0 }
 0x334   : > { %v2511_v18 = vadd.f32 %v1727_v7, %v1589_v4  ;;  %v1176_v16 = vpop.f32.mrb[5].mxu1  ;;  %1230 = vadd.xlane.f32.xlu0 %v1229_v45 }
 0x335   : > { %v2513_v60 = vadd.f32 %v1589_v4, %v1176_v16 }
 0x336   : > { %v1238_v26 = vsel %vm401_vm0, %v2511_v18, 0.0 }
 0x337   : > { %v1730_v30 = vpop.f32.mrb[6].mxu1  ;;  %1239 = vadd.xlane.f32.xlu1 %v1238_v26  ;;  %v1235_v31 = vsel %vm401_vm0, %v2513_v60, 0.0 }
 0x338   : > { %v2519_v53 = vadd.f32 %v1730_v30, %v1589_v4  ;;  %v1186_v32 = vpop.f32.mrb[7].mxu1  ;;  %1236 = vadd.xlane.f32.xlu0 %v1235_v31 }
 0x339   : > { %v2521_v21 = vadd.f32 %v1589_v4, %v1186_v32 }
 0x33a   : > { %v1244_v19 = vsel %vm401_vm0, %v2519_v53, 0.0 }
 0x33b   : > { %1245 = vadd.xlane.f32.xlu1 %v1244_v19  ;;  %v1733_v40 = vpop.f32.mrb[8].mxu1  ;;  %v1241_v35 = vsel %vm401_vm0, %v2521_v21, 0.0 }
 0x33c   : > { %v2527_v43 = vadd.f32 %v1733_v40, %v1589_v4  ;;  %1242 = vadd.xlane.f32.xlu0 %v1241_v35  ;;  %v1196_v47 = vpop.f32.mrb[9].mxu1 }
 0x33d   : > { %v2529_v0 = vadd.f32 %v1589_v4, %v1196_v47 }
 0x33e   : > { %v1250_v23 = vsel %vm401_vm0, %v2527_v43, 0.0 }
 0x33f   : > { %1251 = vadd.xlane.f32.xlu1 %v1250_v23  ;;  %v1247_v54 = vsel %vm401_vm0, %v2529_v0, 0.0 }
 0x340   : > { %1248 = vadd.xlane.f32.xlu0 %v1247_v54 }
 0x3a7   : > { %v1210_v25 = vpop.xlane.xlu1 %1209 }
 0x3a8   : > { %v1254_v48 = vmul.f32 0.03125, %v1210_v25  ;;  %v1207_v10 = vpop.xlane.xlu0 %1206 }
 0x3a9   : > { %v1253_v24 = vmul.f32 0.03125, %v1207_v10 }
 0x3aa   : > { %v2536_v2 = vsub.f32 %v2471_v39, %v1254_v48 }
 0x3ab   : > { %v2539_v36 = vsub.f32 %v2473_v14, %v1253_v24  ;;  %v1216_v4 = vpop.xlane.xlu1 %1215 }
 0x3ac   : > { %v1286_v51 = vmul.f32 %v2536_v2, %v2536_v2  ;;  %v1256_v41 = vmul.f32 0.03125, %v1216_v4  ;;  %v1213_v28 = vpop.xlane.xlu0 %1212 }
 0x3ad   : > { %v1285_v42 = vmul.f32 %v2539_v36, %v2539_v36  ;;  %v1255_v22 = vmul.f32 0.03125, %v1213_v28 }
 0x3ae   : > { %v1304_v13 = vsel %vm401_vm0, %v1286_v51, 0.0  ;;  %v2547_v57 = vsub.f32 %v2479_v20, %v1256_v41 }
 0x3af   : > { %1305 = vadd.xlane.f32.xlu1 %v1304_v13  ;;  %v1301_v39 = vsel %vm401_vm0, %v1285_v42, 0.0  ;;  %v2551_v14 = vsub.f32 %v2481_v33, %v1255_v22  ;;  %v1222_v59 = vpop.xlane.xlu1 %1221 }
 0x3b0   : > { %1302 = vadd.xlane.f32.xlu0 %v1301_v39  ;;  %v1258_v61 = vmul.f32 0.03125, %v1222_v59  ;;  %v1219_v44 = vpop.xlane.xlu0 %1218  ;;  %v1288_v3 = vmul.f32 %v2547_v57, %v2547_v57 }
 0x3b1   : > { %v1257_v6 = vmul.f32 0.03125, %v1219_v44  ;;  %v1287_v7 = vmul.f32 %v2551_v14, %v2551_v14 }
 0x3b2   : > { %v2558_v20 = vsub.f32 %v2487_v52, %v1258_v61  ;;  %v1310_v45 = vsel %vm401_vm0, %v1288_v3, 0.0 }
 0x3b3   : > { %v2562_v16 = vsub.f32 %v2489_v29, %v1257_v6  ;;  %1311 = vadd.xlane.f32.xlu1 %v1310_v45  ;;  %v1307_v33 = vsel %vm401_vm0, %v1287_v7, 0.0 }
 0x3b4   : > { %1308 = vadd.xlane.f32.xlu0 %v1307_v33  ;;  %v1290_v26 = vmul.f32 %v2558_v20, %v2558_v20 }
 0x3b5   : > { %v1289_v30 = vmul.f32 %v2562_v16, %v2562_v16 }
 0x3b6   : > { %v1316_v31 = vsel %vm401_vm0, %v1290_v26, 0.0 }
 0x3b7   : > { %1317 = vadd.xlane.f32.xlu1 %v1316_v31  ;;  %v1313_v52 = vsel %vm401_vm0, %v1289_v30, 0.0 }
 0x3b8   : > { %1314 = vadd.xlane.f32.xlu0 %v1313_v52 }
 0x3bc   : > { %v1228_v32 = vpop.xlane.xlu1 %1227 }
 0x3bd   : > { %v1260_v19 = vmul.f32 0.03125, %v1228_v32  ;;  %v1225_v29 = vpop.xlane.xlu0 %1224 }
 0x3be   : > { %v1259_v40 = vmul.f32 0.03125, %v1225_v29 }
 0x3bf   : > { %v2572_v35 = vsub.f32 %v2495_v12, %v1260_v19 }
 0x3c0   : > { %v2575_v47 = vsub.f32 %v2497_v8, %v1259_v40  ;;  %v1234_v23 = vpop.xlane.xlu1 %1233 }
 0x3c1   : > { %v1262_v54 = vmul.f32 0.03125, %v1234_v23  ;;  %v1231_v25 = vpop.xlane.xlu0 %1230  ;;  %v1292_v48 = vmul.f32 %v2572_v35, %v2572_v35 }
 0x3c2   : > { %v1261_v10 = vmul.f32 0.03125, %v1231_v25  ;;  %v1291_v24 = vmul.f32 %v2575_v47, %v2575_v47 }
 0x3c3   : > { %v2582_v4 = vsub.f32 %v2503_v63, %v1262_v54  ;;  %v1322_v51 = vsel %vm401_vm0, %v1292_v48, 0.0 }
 0x3c4   : > { %v2586_v12 = vsub.f32 %v2505_v11, %v1261_v10  ;;  %v1240_v8 = vpop.xlane.xlu1 %1239  ;;  %1323 = vadd.xlane.f32.xlu1 %v1322_v51  ;;  %v1319_v41 = vsel %vm401_vm0, %v1291_v24, 0.0 }
 0x3c5   : > { %v1264_v28 = vmul.f32 0.03125, %v1240_v8  ;;  %v1237_v42 = vpop.xlane.xlu0 %1236  ;;  %1320 = vadd.xlane.f32.xlu0 %v1319_v41  ;;  %v1294_v22 = vmul.f32 %v2582_v4, %v2582_v4 }
 0x3c6   : > { %v1263_v13 = vmul.f32 0.03125, %v1237_v42  ;;  %v1293_v63 = vmul.f32 %v2586_v12, %v2586_v12 }
 0x3c7   : > { %v2594_v39 = vsub.f32 %v2511_v18, %v1264_v28  ;;  %v1328_v11 = vsel %vm401_vm0, %v1294_v22, 0.0 }
 0x3c8   : > { %v2598_v59 = vsub.f32 %v2513_v60, %v1263_v13  ;;  %v1246_v61 = vpop.xlane.xlu1 %1245  ;;  %1329 = vadd.xlane.f32.xlu1 %v1328_v11  ;;  %v1325_v44 = vsel %vm401_vm0, %v1293_v63, 0.0 }
 0x3c9   : > { %v1266_v3 = vmul.f32 0.03125, %v1246_v61  ;;  %v1243_v6 = vpop.xlane.xlu0 %1242  ;;  %1326 = vadd.xlane.f32.xlu0 %v1325_v44  ;;  %v1296_v7 = vmul.f32 %v2594_v39, %v2594_v39 }
 0x3ca   : > { %v1265_v45 = vmul.f32 0.03125, %v1243_v6  ;;  %v1295_v18 = vmul.f32 %v2598_v59, %v2598_v59 }
 0x3cb   : > { %v2606_v33 = vsub.f32 %v2519_v53, %v1266_v3  ;;  %v1334_v60 = vsel %vm401_vm0, %v1296_v7, 0.0 }
 0x3cc   : > { %v2610_v26 = vsub.f32 %v2521_v21, %v1265_v45  ;;  %1335 = vadd.xlane.f32.xlu1 %v1334_v60  ;;  %v1252_v30 = vpop.xlane.xlu1 %1251  ;;  %v1331_v31 = vsel %vm401_vm0, %v1295_v18, 0.0 }
 0x3cd   : > { %v1268_v52 = vmul.f32 0.03125, %v1252_v30  ;;  %1332 = vadd.xlane.f32.xlu0 %v1331_v31  ;;  %v1249_v32 = vpop.xlane.xlu0 %1248  ;;  %v1298_v19 = vmul.f32 %v2606_v33, %v2606_v33  ;;  %v2634_v30 = vld [vmem:[%s2750_s4] ss:$0 sm:$0xff] }
 0x3ce   : > { %v1267_v29 = vmul.f32 0.03125, %v1249_v32  ;;  %v1297_v53 = vmul.f32 %v2610_v26, %v2610_v26  ;;  %v2640_v32 = vld [vmem:[%s2751_s5] ss:$0 sm:$0xff] }
 0x3cf   : > { %v2618_v40 = vsub.f32 %v2527_v43, %v1268_v52  ;;  %v1340_v21 = vsel %vm401_vm0, %v1298_v19, 0.0 }
 0x3d0   : > { %v2622_v23 = vsub.f32 %v2529_v0, %v1267_v29  ;;  %1341 = vadd.xlane.f32.xlu1 %v1340_v21  ;;  %v1337_v54 = vsel %vm401_vm0, %v1297_v53, 0.0 }
 0x3d1   : > { %1338 = vadd.xlane.f32.xlu0 %v1337_v54  ;;  %v1300_v25 = vmul.f32 %v2618_v40, %v2618_v40 }
 0x3d2   : > { %v1299_v48 = vmul.f32 %v2622_v23, %v2622_v23 }
 0x3d3   : > { %v1346_v10 = vsel %vm401_vm0, %v1300_v25, 0.0 }
 0x3d4   : > { %1347 = vadd.xlane.f32.xlu1 %v1346_v10  ;;  %v1343_v43 = vsel %vm401_vm0, %v1299_v48, 0.0 }
 0x3d5   : > { %1344 = vadd.xlane.f32.xlu0 %v1343_v43 }
 0x43c   : > { %v1306_v24 = vpop.xlane.xlu1 %1305 }
 0x43d   : > { %v1350_v51 = vmul.f32 0.03125, %v1306_v24  ;;  %v1303_v0 = vpop.xlane.xlu0 %1302 }
 0x43e   : > { %v1349_v8 = vmul.f32 0.03125, %v1303_v0 }
 0x43f   : > { %v1366_v41 = vadd.f32 1e-05, %v1350_v51 }
 0x440   : > { %v1365_v28 = vadd.f32 1e-05, %v1349_v8  ;;  %v1312_v42 = vpop.xlane.xlu1 %1311 }
 0x441   : > { %1862 = vrsqrt.f32 %v1366_v41  ;;  %v1352_v22 = vmul.f32 0.03125, %v1312_v42  ;;  %v1309_v13 = vpop.xlane.xlu0 %1308 }
 0x442   : > { %1864 = vrsqrt.f32 %v1365_v28  ;;  %v1351_v63 = vmul.f32 0.03125, %v1309_v13 }
 0x443   : > { %v1368_v11 = vadd.f32 1e-05, %v1352_v22 }
 0x444   : > { %v1367_v61 = vadd.f32 1e-05, %v1351_v63  ;;  %v1318_v44 = vpop.xlane.xlu1 %1317 }
 0x445   : > { %1866 = vrsqrt.f32 %v1368_v11  ;;  %v1354_v3 = vmul.f32 0.03125, %v1318_v44  ;;  %v1315_v6 = vpop.xlane.xlu0 %1314 }
 0x446   : > { %1868 = vrsqrt.f32 %v1367_v61  ;;  %v1353_v7 = vmul.f32 0.03125, %v1315_v6 }
 0x447   : > { %v1370_v45 = vadd.f32 1e-05, %v1354_v3 }
 0x448   : > { %v1369_v18 = vadd.f32 1e-05, %v1353_v7 }
 0x449   : > { %1870 = vrsqrt.f32 %v1370_v45 }
 0x44a   : > { %1872 = vrsqrt.f32 %v1369_v18 }
 0x44b   : > { %v1863_v60 = vpop.eup %1862 }
 0x44c   : > { %v1865_v31 = vpop.eup %1864  ;;  %v1398_v52 = vmul.f32 %v1863_v60, %v2536_v2 }
 0x44d   : > { %v1397_v19 = vmul.f32 %v1865_v31, %v2539_v36 }
 0x44e   : > { %v1421_v29 = vmul.f32 %v2634_v30, %v1398_v52 }
 0x44f   : > { %v1420_v53 = vmul.f32 %v2634_v30, %v1397_v19  ;;  %v1867_v21 = vpop.eup %1866 }
 0x450   : > { %v1444_v54 = vadd.f32 %v2640_v32, %v1421_v29  ;;  %v1869_v25 = vpop.eup %1868  ;;  %v1400_v48 = vmul.f32 %v1867_v21, %v2547_v57 }
 0x451   : > { %v1443_v2 = vadd.f32 %v2640_v32, %v1420_v53  ;;  %v1399_v10 = vmul.f32 %v1869_v25, %v2551_v14  ;;  %v1324_v43 = vpop.xlane.xlu1 %1323 }
 0x452   : > { %v1460_v36 = vadd.f32 %v1444_v54, %v2181_v9  ;;  %v1423_v51 = vmul.f32 %v2634_v30, %v1400_v48  ;;  %v1356_v0 = vmul.f32 0.03125, %v1324_v43  ;;  %v1321_v8 = vpop.xlane.xlu0 %1320 }
 0x453   : > { %v1459_v24 = vadd.f32 %v1443_v2, %v2170_v56  ;;  %v1871_v41 = vpop.eup %1870  ;;  %v1422_v28 = vmul.f32 %v2634_v30, %v1399_v10  ;;  %v1355_v42 = vmul.f32 0.03125, %v1321_v8 }
 0x454   : > { %1476 = vst.msk [vmem:[%s2650_s23 + $0x8] sm:$0xff] %vm401_vm0, %v1460_v36  ;;  %v1873_v22 = vpop.eup %1872  ;;  %v1446_v9 = vadd.f32 %v2640_v32, %v1423_v51  ;;  %v1402_v57 = vmul.f32 %v1871_v41, %v2558_v20  ;;  %v1372_v14 = vadd.f32 1e-05, %v1356_v0 }
 0x455   : > { %1475 = vst.msk [vmem:[%s2650_s23] sm:$0xff] %vm401_vm0, %v1459_v24  ;;  %v1445_v56 = vadd.f32 %v2640_v32, %v1422_v28  ;;  %v1401_v13 = vmul.f32 %v1873_v22, %v2562_v16  ;;  %v1371_v63 = vadd.f32 1e-05, %v1355_v42  ;;  %v1330_v11 = vpop.xlane.xlu1 %1329 }
 0x456   : > { %v1462_v61 = vadd.f32 %v1446_v9, %v2198_v55  ;;  %v1425_v44 = vmul.f32 %v2634_v30, %v1402_v57  ;;  %1874 = vrsqrt.f32 %v1372_v14  ;;  %v1358_v3 = vmul.f32 0.03125, %v1330_v11  ;;  %v1327_v6 = vpop.xlane.xlu0 %1326 }
 0x457   : > { %v1461_v7 = vadd.f32 %v1445_v56, %v2190_v27  ;;  %v1424_v45 = vmul.f32 %v2634_v30, %v1401_v13  ;;  %1876 = vrsqrt.f32 %v1371_v63  ;;  %v1357_v20 = vmul.f32 0.03125, %v1327_v6 }
 0x458   : > { %1478 = vst.msk [vmem:[%s2650_s23 + $0x18] sm:$0xff] %vm401_vm0, %v1462_v61  ;;  %v1448_v16 = vadd.f32 %v2640_v32, %v1425_v44  ;;  %v1374_v18 = vadd.f32 1e-05, %v1358_v3 }
 0x459   : > { %1477 = vst.msk [vmem:[%s2650_s23 + $0x10] sm:$0xff] %vm401_vm0, %v1461_v7  ;;  %v1447_v55 = vadd.f32 %v2640_v32, %v1424_v45  ;;  %v1373_v60 = vadd.f32 1e-05, %v1357_v20  ;;  %v1336_v31 = vpop.xlane.xlu1 %1335 }
 0x45a   : > { %v1464_v52 = vadd.f32 %v1448_v16, %v2215_v1  ;;  %1878 = vrsqrt.f32 %v1374_v18  ;;  %v1360_v27 = vmul.f32 0.03125, %v1336_v31  ;;  %v1333_v19 = vpop.xlane.xlu0 %1332 }
 0x45b   : > { %v1463_v29 = vadd.f32 %v1447_v55, %v2207_v49  ;;  %1880 = vrsqrt.f32 %v1373_v60  ;;  %v1359_v53 = vmul.f32 0.03125, %v1333_v19 }
 0x45c   : > { %1480 = vst.msk [vmem:[%s2650_s23 + $0x28] sm:$0xff] %vm401_vm0, %v1464_v52  ;;  %v1376_v21 = vadd.f32 1e-05, %v1360_v27 }
 0x45d   : > { %1479 = vst.msk [vmem:[%s2650_s23 + $0x20] sm:$0xff] %vm401_vm0, %v1463_v29  ;;  %v1375_v54 = vadd.f32 1e-05, %v1359_v53  ;;  %v1342_v25 = vpop.xlane.xlu1 %1341 }
 0x45e   : > { %1882 = vrsqrt.f32 %v1376_v21  ;;  %v1362_v2 = vmul.f32 0.03125, %v1342_v25  ;;  %v1339_v48 = vpop.xlane.xlu0 %1338 }
 0x45f   : > { %1884 = vrsqrt.f32 %v1375_v54  ;;  %v1361_v36 = vmul.f32 0.03125, %v1339_v48 }
 0x460   : > { %v1875_v1 = vpop.eup %1874  ;;  %v1378_v10 = vadd.f32 1e-05, %v1362_v2 }
 0x461   : > { %v1877_v43 = vpop.eup %1876  ;;  %v1404_v24 = vmul.f32 %v1875_v1, %v2572_v35  ;;  %v1377_v49 = vadd.f32 1e-05, %v1361_v36  ;;  %v1348_v51 = vpop.xlane.xlu1 %1347 }
 0x462   : > { %v1403_v0 = vmul.f32 %v1877_v43, %v2575_v47  ;;  %1886 = vrsqrt.f32 %v1378_v10  ;;  %v1364_v8 = vmul.f32 0.03125, %v1348_v51  ;;  %v1345_v41 = vpop.xlane.xlu0 %1344 }
 0x463   : > { %v1427_v28 = vmul.f32 %v2634_v30, %v1404_v24  ;;  %1888 = vrsqrt.f32 %v1377_v49  ;;  %v1363_v42 = vmul.f32 0.03125, %v1345_v41 }
 0x464   : > { %v1879_v22 = vpop.eup %1878  ;;  %v1426_v9 = vmul.f32 %v2634_v30, %v1403_v0  ;;  %v1380_v57 = vadd.f32 1e-05, %v1364_v8 }
 0x465   : > { %v1881_v14 = vpop.eup %1880  ;;  %v1450_v56 = vadd.f32 %v2640_v32, %v1427_v28  ;;  %v1406_v35 = vmul.f32 %v1879_v22, %v2582_v4  ;;  %v1379_v13 = vadd.f32 1e-05, %v1363_v42 }
 0x466   : > { %v1449_v47 = vadd.f32 %v2640_v32, %v1426_v9  ;;  %v1405_v63 = vmul.f32 %v1881_v14, %v2586_v12  ;;  %1890 = vrsqrt.f32 %v1380_v57 }
 0x467   : > { %v1466_v11 = vadd.f32 %v1450_v56, %v2231_v37  ;;  %v1429_v61 = vmul.f32 %v2634_v30, %v1406_v35  ;;  %1892 = vrsqrt.f32 %v1379_v13 }
 0x468   : > { %v1883_v44 = vpop.eup %1882  ;;  %v1465_v3 = vadd.f32 %v1449_v47, %v2218_v58  ;;  %v1428_v6 = vmul.f32 %v2634_v30, %v1405_v63 }
 0x469   : > { %v1885_v7 = vpop.eup %1884  ;;  %1482 = vst.msk [vmem:[%s2650_s23 + $0x38] sm:$0xff] %vm401_vm0, %v1466_v11  ;;  %v1452_v4 = vadd.f32 %v2640_v32, %v1429_v61  ;;  %v1408_v12 = vmul.f32 %v1883_v44, %v2594_v39 }
 0x46a   : > { %1481 = vst.msk [vmem:[%s2650_s23 + $0x30] sm:$0xff] %vm401_vm0, %v1465_v3  ;;  %v1451_v37 = vadd.f32 %v2640_v32, %v1428_v6  ;;  %v1407_v45 = vmul.f32 %v1885_v7, %v2598_v59 }
 0x46b   : > { %v1468_v20 = vadd.f32 %v1452_v4, %v2247_v15  ;;  %v1431_v58 = vmul.f32 %v2634_v30, %v1408_v12 }
 0x46c   : > { %v1887_v16 = vpop.eup %1886  ;;  %v1467_v18 = vadd.f32 %v1451_v37, %v2234_v5  ;;  %v1430_v55 = vmul.f32 %v2634_v30, %v1407_v45 }
 0x46d   : > { %v1889_v60 = vpop.eup %1888  ;;  %1484 = vst.msk [vmem:[%s2650_s23 + $0x48] sm:$0xff] %vm401_vm0, %v1468_v20  ;;  %v1454_v39 = vadd.f32 %v2640_v32, %v1431_v58  ;;  %v1410_v31 = vmul.f32 %v1887_v16, %v2606_v33 }
 0x46e   : > { %1483 = vst.msk [vmem:[%s2650_s23 + $0x40] sm:$0xff] %vm401_vm0, %v1467_v18  ;;  %v1453_v15 = vadd.f32 %v2640_v32, %v1430_v55  ;;  %v1409_v59 = vmul.f32 %v1889_v60, %v2610_v26 }
 0x46f   : > { %v1470_v52 = vadd.f32 %v1454_v39, %v2263_v34  ;;  %v1433_v5 = vmul.f32 %v2634_v30, %v1410_v31 }
 0x470   : > { %v1891_v27 = vpop.eup %1890  ;;  %v1469_v19 = vadd.f32 %v1453_v15, %v2250_v17  ;;  %v1432_v29 = vmul.f32 %v2634_v30, %v1409_v59 }
 0x471   : > { %v1893_v53 = vpop.eup %1892  ;;  %1486 = vst.msk [vmem:[%s2650_s23 + $0x58] sm:$0xff] %vm401_vm0, %v1470_v52  ;;  %v1456_v33 = vadd.f32 %v2640_v32, %v1433_v5  ;;  %v1412_v26 = vmul.f32 %v1891_v27, %v2618_v40 }
 0x472   : > { %1485 = vst.msk [vmem:[%s2650_s23 + $0x50] sm:$0xff] %vm401_vm0, %v1469_v19  ;;  %v1455_v34 = vadd.f32 %v2640_v32, %v1432_v29  ;;  %v1411_v21 = vmul.f32 %v1893_v53, %v2622_v23 }
 0x473   : > { %v1472_v54 = vadd.f32 %v1456_v33, %v2278_v46  ;;  %v1435_v17 = vmul.f32 %v2634_v30, %v1412_v26 }
 0x474   : > { %v1471_v25 = vadd.f32 %v1455_v34, %v2266_v38  ;;  %v1434_v2 = vmul.f32 %v2634_v30, %v1411_v21 }
 0x475   : > { %1488 = vst.msk [vmem:[%s2650_s23 + $0x68] sm:$0xff] %vm401_vm0, %v1472_v54  ;;  %v1458_v48 = vadd.f32 %v2640_v32, %v1435_v17 }
 0x476   : > { %1487 = vst.msk [vmem:[%s2650_s23 + $0x60] sm:$0xff] %vm401_vm0, %v1471_v25  ;;  %v1457_v40 = vadd.f32 %v2640_v32, %v1434_v2 }
 0x477   : > { %v1474_v36 = vadd.f32 %v1458_v48, %v2289_v50 }
 0x478   : > { %v1473_v23 = vadd.f32 %v1457_v40, %v2281_v62 }
 0x479   : > { %1490 = vst.msk [vmem:[%s2650_s23 + $0x78] sm:$0xff] %vm401_vm0, %v1474_v36 }
 0x47a   : > { %1489 = vst.msk [vmem:[%s2650_s23 + $0x70] sm:$0xff] %vm401_vm0, %v1473_v23 }
 0x47b PF: > { %s20_s13 = sadd.s32 1, %s1900_s13  }
 0x47c   : > { %p17_p4 = scmp.ge.s32.totalorder %s20_s13, 4  }
 0x47e   :  { %19 = sbr.rel (!%p17_p4) target bundleno = 1 (0x1), region = 93 }

// kernel: attn_block_forward.2
= control target key start
LH: loop header
LB: loop body
LE: loop exit
PB: predicated region body
PF: predicated region fallthrough
CT: control target
= control target key end

     0   :  { %s12869_s21 = smov 0   ;;  %s16817_s0 = inlined_call_operand.vmem [shape: f32[512,32], index: 0, kind: input, shape index: {}]   ;;  %s16818_s1 = inlined_call_operand.vmem [shape: f32[32,32], index: 1, kind: input, shape index: {}]   ;;  %s16819_s2 = inlined_call_operand.vmem [shape: f32[32,32], index: 2, kind: input, shape index: {}]   ;;  %s16820_s3 = inlined_call_operand.vmem [shape: f32[32,32], index: 3, kind: input, shape index: {}]   ;;  %s16821_s4 = inlined_call_operand.vmem [shape: f32[1,32], index: 4, kind: input, shape index: {}]   ;;  %s16822_s5 = inlined_call_operand.vmem [shape: f32[1,32], index: 5, kind: input, shape index: {}]   ;;  %s16823_s6 = inlined_call_operand.vmem [shape: f32[32,32], index: 6, kind: input, shape index: {}]   ;;  %s16824_s7 = inlined_call_operand.vmem [shape: f32[4,32], index: 7, kind: input, shape index: {}]   ;;  %s16825_s8 = inlined_call_operand.vmem [shape: f32[4,32], index: 8, kind: input, shape index: {}]   ;;  %s16826_s9 = inlined_call_operand.vmem [shape: f32[36,128,128], index: 9, kind: input, shape index: {}]   ;;  %s16827_s10 = inlined_call_operand.vmem [shape: f32[32,32], index: 10, kind: input, shape index: {}]   ;;  %s16828_s11 = inlined_call_operand.vmem [shape: f32[1,32], index: 11, kind: input, shape index: {}]   ;;  %s16829_s12 = inlined_call_operand.vmem [shape: f32[512,32], index: 12, kind: output, shape index: {}]  }
   0x1 LB: > { %s8057_s22 = sadd.s32 4294967295, %s12801_s21   ;;  %p8061_p0 = scmp.ge.s32.totalorder %s12801_s21, 1  ;;  %s12801_s21 = sphi %s12869_s21, %s22_s21  }
   0x2   : > { %p363_p1 = scmp.lt.s32.totalorder %s12801_s21, 3 }
   0x4   : > { %p364_p2 = pnand %p8061_p0, %p363_p1 }
   0x6   : > { %367 = sbr.rel (%p364_p2) target bundleno = 2293 (0x8f5), region = 68 }
   0xd   : > { %v449_v0 = vld [vmem:[%s16818_s1] sm:$0xff]  ;;  %v450_v1 = vld [vmem:[%s16818_s1 + $0x8] sm:$0xff]  ;;  %v451_v2 = vld [vmem:[%s16818_s1 + $0x10] sm:$0xff]  ;;  %s8062_s29 = sshll.u32 %s8057_s22, 5  ;;  %vm460_vm0 = vcmask 261120   ;;  %s14034_s13 = sshll.u32 %s8057_s22, 1 }
   0xe   : > { %v11318_v3 = vpack.c.bf16 %v450_v1, %v449_v0  ;;  %v452_v4 = vld [vmem:[%s16818_s1 + $0x18] sm:$0xff]  ;;  %p406_p3 = scmp.lt.s32.totalorder %s8062_s29, 63  ;;  %v782_v5 = vld [vmem:[%s16819_s2] sm:$0xff]  ;;  %v783_v6 = vld [vmem:[%s16819_s2 + $0x8] sm:$0xff]  ;;  %s2151_s18 = ssub.s32 0, %s14034_s13 }
   0xf   : > { %v11322_v7 = vpack.c.bf16 %v452_v4, %v451_v2  ;;  %v11326_v8 = vpack.c.bf16 %v783_v6, %v782_v5  ;;  %v784_v9 = vld [vmem:[%s16819_s2 + $0x10] sm:$0xff]  ;;  %v785_v10 = vld [vmem:[%s16819_s2 + $0x18] sm:$0xff]  ;;  %v1247_v12 = vld [vmem:[%s16823_s6] sm:$0xff]  ;;  %s8229_s22 = smin.u32 %s14034_s13, %s2151_s18  ;;  %p2150_p4 = scmp.lt.s32.totalorder %s14034_s13, 0 }
  0x10   : > { %11319 = vmatprep.subr.bf16.mxu0 %v11318_v3  ;;  %s17322_s29 = smov (!%p406_p3, %s8062_s29), 63  ;;  %v11330_v11 = vpack.c.bf16 %v785_v10, %v784_v9  ;;  %v1248_v13 = vld [vmem:[%s16823_s6 + $0x8] sm:$0xff]  ;;  %v1011_v19 = vld [vmem:[%s16820_s3] sm:$0xff]  ;;  %v1013_v50 = vld [vmem:[%s16820_s3 + $0x10] sm:$0xff]  ;;  %12148 = sdivrem.u32 %s8229_s22, 9 }
  0x11   : > { %11321 = vmatpush3.bf16.msra.mxu0 %v11318_v3  ;;  %12134 = vmatprep.subr.bf16.mxu1 %v11326_v8  ;;  %s8063_s28 = sshll.u32 %s17322_s29, 3  ;;  %v12919_v14 = vpack.c.bf16 %v1248_v13, %v1247_v12  ;;  %v1012_v20 = vld [vmem:[%s16820_s3 + $0x8] sm:$0xff]  ;;  %v1014_v51 = vld [vmem:[%s16820_s3 + $0x18] sm:$0xff]  ;;  %v1249_v53 = vld [vmem:[%s16823_s6 + $0x10] sm:$0xff]  ;;  %s15000_s20 = sadd.s32 1, %s14034_s13 }
  0x12   : > { %11323 = vmatprep.subr.bf16.mxu0 %v11322_v7  ;;  %12136 = vmatpush3.bf16.msra.mxu1 %v11326_v8  ;;  %s12917_s14 = scalar_lea.vmem %s16817_s0, %s8063_s28  ;;  %v12962_v25 = vpack.c.bf16 %v1012_v20, %v1011_v19  ;;  %v11338_v52 = vpack.c.bf16 %v1014_v51, %v1013_v50  ;;  %v1250_v54 = vld [vmem:[%s16823_s6 + $0x18] sm:$0xff]  ;;  %v13238_v56 = vld [vmem:[%s16821_s4] ss:$0 sm:$0xff]  ;;  %vm14251_vm1 = vmpackc.low %vm460_vm0, %vm460_vm0  ;;  %p4900_p6 = scmp.lt.s32.totalorder %s15000_s20, 0 }
  0x13   : > { %12135 = vmatprep.subr.bf16.mxu1 %v11330_v11  ;;  %v12922_v15 = vld [vmem:[%s12917_s14] sm:$0xff]  ;;  %v12927_v16 = vld [vmem:[%s12917_s14 + $0x8] sm:$0xff]  ;;  %v12930_v17 = vld [vmem:[%s12917_s14 + $0x10] sm:$0xff]  ;;  %v11346_v55 = vpack.c.bf16 %v1250_v54, %v1249_v53  ;;  %s16672_s30 = scalar_lea.vmem %s16829_s12, %s8063_s28 }
  0x14   : > { %9646 = vmatprep.mubr.msk.f32.mxu0 %vm460_vm0, %v12922_v15  ;;  %v12933_v18 = vld [vmem:[%s12917_s14 + $0x40] sm:$0xff]  ;;  %v12949_v21 = vld [vmem:[%s12917_s14 + $0x18] sm:$0xff]  ;;  %v12952_v22 = vld [vmem:[%s12917_s14 + $0x48] sm:$0xff] }
  0x15   : > { %11325 = vmatpush3.bf16.msra.mxu0 %v11322_v7  ;;  %9714 = vmatprep.mubr.msk.f32.mxu1 %vm460_vm0, %v12933_v18  ;;  %v12955_v23 = vld [vmem:[%s12917_s14 + $0x20] sm:$0xff]  ;;  %v12958_v24 = vld [vmem:[%s12917_s14 + $0x50] sm:$0xff]  ;;  %v12972_v26 = vld [vmem:[%s12917_s14 + $0x28] sm:$0xff] }
  0x16   : > { %11327 = vmatprep.subr.bf16.mxu0 %v11326_v8  ;;  %12137 = vmatpush3.bf16.msra.mxu1 %v11330_v11  ;;  %v12975_v27 = vld [vmem:[%s12917_s14 + $0x58] sm:$0xff]  ;;  %v12978_v28 = vld [vmem:[%s12917_s14 + $0x30] sm:$0xff]  ;;  %v12981_v29 = vld [vmem:[%s12917_s14 + $0x60] sm:$0xff] }
  0x17   : > { %11343 = vmatprep.subr.bf16.mxu1 %v12919_v14  ;;  %v12993_v30 = vld [vmem:[%s12917_s14 + $0x38] sm:$0xff]  ;;  %v12996_v31 = vld [vmem:[%s12917_s14 + $0x68] sm:$0xff]  ;;  %v12999_v32 = vld [vmem:[%s12917_s14 + $0x70] sm:$0xff] }
  0x18   : > { %9647 = vmatmul.mubr.msk.f32.vlgmr.msra.gmra.mrb[0].mxu0 %vm460_vm0, %v12927_v16  ;;  %v13010_v33 = vld [vmem:[%s12917_s14 + $0x78] sm:$0xff]  ;;  %v13013_v34 = vld [vmem:[%s12917_s14 + $0x80] sm:$0xff]  ;;  %v13024_v35 = vld [vmem:[%s12917_s14 + $0x88] sm:$0xff] }
  0x19   : > { %11329 = vmatpush3.bf16.msra.mxu0 %v11326_v8  ;;  %9649 = vmatprep.mubr.msk.f32.mxu0 %vm460_vm0, %v12930_v17  ;;  %v13027_v36 = vld [vmem:[%s12917_s14 + $0x90] sm:$0xff]  ;;  %v13038_v37 = vld [vmem:[%s12917_s14 + $0x98] sm:$0xff]  ;;  %v13041_v38 = vld [vmem:[%s12917_s14 + $0xa0] sm:$0xff]  ;;  %s12149_s23 = spop.drf %12148 }
  0x1a   : > { %11331 = vmatprep.subr.bf16.mxu0 %v11330_v11  ;;  %9715 = vmatmul.mubr.msk.f32.vlgmr.msra.gmra.mrb[0].mxu1 %vm460_vm0, %v12952_v22  ;;  %v13052_v39 = vld [vmem:[%s12917_s14 + $0xa8] sm:$0xff]  ;;  %v13055_v40 = vld [vmem:[%s12917_s14 + $0xb0] sm:$0xff]  ;;  %v13066_v41 = vld [vmem:[%s12917_s14 + $0xb8] sm:$0xff]  ;;  %s2155_s24 = ssub.s32 0, %s12149_s23 }
  0x1b   : > { %9717 = vmatprep.mubr.msk.f32.mxu1 %vm460_vm0, %v12958_v24  ;;  %11345 = vmatpush3.bf16.msra.mxu1 %v12919_v14  ;;  %v13069_v42 = vld [vmem:[%s12917_s14 + $0xc0] sm:$0xff]  ;;  %v13080_v43 = vld [vmem:[%s12917_s14 + $0xc8] sm:$0xff]  ;;  %v13083_v44 = vld [vmem:[%s12917_s14 + $0xd0] sm:$0xff]  ;;  %s17324_s24 = smov (!%p2150_p4, %s2155_s24), %s12149_s23  ;;  %s4901_s23 = ssub.s32 0, %s15000_s20 }
  0x1c   : > { %9650 = vmatmul.mubr.msk.f32.gmra.mrb[2].mxu0 %vm460_vm0, %v12949_v21  ;;  %v13094_v45 = vld [vmem:[%s12917_s14 + $0xd8] sm:$0xff]  ;;  %v13097_v46 = vld [vmem:[%s12917_s14 + $0xe0] sm:$0xff]  ;;  %v13108_v47 = vld [vmem:[%s12917_s14 + $0xe8] sm:$0xff]  ;;  %11347 = vmatprep.subr.bf16.mxu1 %v11346_v55  ;;  %p8231_p5 = scmp.lt.s32.totalorder %s17324_s24, 0  ;;  %s2161_s25 = sadd.s32 9, %s17324_s24 }
  0x1d   : > { %9652 = vmatprep.mubr.msk.f32.mxu0 %vm460_vm0, %v12955_v23  ;;  %11333 = vmatpush3.bf16.msra.mxu0 %v11330_v11  ;;  %v13111_v48 = vld [vmem:[%s12917_s14 + $0xf0] sm:$0xff]  ;;  %v13122_v49 = vld [vmem:[%s12917_s14 + $0xf8] sm:$0xff] }
  0x1e   : > { %9718 = vmatmul.mubr.msk.f32.gmra.mrb[2].mxu1 %vm460_vm0, %v12975_v27  ;;  %11335 = vmatprep.subr.bf16.mxu0 %v12962_v25  ;;  %s17326_s25 = smov (!%p8231_p5, %s2161_s25), %s17324_s24  ;;  %s8424_s24 = smin.u32 %s4901_s23, %s15000_s20 }
  0x1f   : > { %9720 = vmatprep.mubr.msk.f32.mxu1 %vm460_vm0, %v12981_v29  ;;  %11349 = vmatpush3.bf16.msra.mxu1 %v11346_v55  ;;  %s8646_s26 = sshll.u32 %s17326_s25, 9  ;;  %12150 = sdivrem.u32 %s8424_s24, 9 }
  0x20   : > { %9653 = vmatmul.mubr.msk.f32.gmra.mrb[4].mxu0 %vm460_vm0, %v12972_v26  ;;  %s14430_s14 = scalar_lea.vmem %s16826_s9, %s8646_s26 }
  0x21   : > { %9655 = vmatprep.mubr.msk.f32.mxu0 %vm460_vm0, %v12978_v28 }
  0x22   : > { %9721 = vmatmul.mubr.msk.f32.gmra.mrb[4].mxu1 %vm460_vm0, %v12996_v31 }
  0x23   : > { %9723 = vmatprep.mubr.msk.f32.mxu1 %vm460_vm0, %v12999_v32 }
  0x24   : > { %9656 = vmatmul.mubr.msk.f32.gmra.mrb[6].mxu0 %vm460_vm0, %v12993_v30 }
  0x25   : > { %9658 = vmatprep.mubr.msk.f32.mxu0 %vm460_vm0, %v12933_v18 }
  0x26   : > { %9724 = vmatmul.mubr.msk.f32.gmra.mrb[6].mxu1 %vm460_vm0, %v13010_v33 }
  0x27   : > { %9726 = vmatprep.mubr.msk.f32.mxu1 %vm460_vm0, %v13013_v34 }
  0x28   : > { %9659 = vmatmul.mubr.msk.f32.gmra.mrb[8].mxu0 %vm460_vm0, %v12952_v22  ;;  %s12151_s13 = spop.drf %12150 }
  0x29   : > { %9661 = vmatprep.mubr.msk.f32.mxu0 %vm460_vm0, %v12958_v24  ;;  %s4905_s25 = ssub.s32 0, %s12151_s13 }
  0x2a   : > { %9727 = vmatmul.mubr.msk.f32.gmra.mrb[8].mxu1 %vm460_vm0, %v13024_v35  ;;  %s17328_s25 = smov (!%p4900_p6, %s4905_s25), %s12151_s13 }
  0x2b   : > { %9729 = vmatprep.mubr.msk.f32.mxu1 %vm460_vm0, %v13027_v36  ;;  %p8426_p7 = scmp.lt.s32.totalorder %s17328_s25, 0  ;;  %s4911_s26 = sadd.s32 9, %s17328_s25 }
  0x2c   : > { %9662 = vmatmul.mubr.msk.f32.gmra.mrb[10].mxu0 %vm460_vm0, %v12975_v27 }
  0x2d   : > { %9664 = vmatprep.mubr.msk.f32.mxu0 %vm460_vm0, %v12981_v29  ;;  %s17330_s26 = smov (!%p8426_p7, %s4911_s26), %s17328_s25 }
  0x2e   : > { %9730 = vmatmul.mubr.msk.f32.gmra.mrb[10].mxu1 %vm460_vm0, %v13038_v37  ;;  %s8650_s27 = sshll.u32 %s17330_s26, 9 }
  0x2f   : > { %9732 = vmatprep.mubr.msk.f32.mxu1 %vm460_vm0, %v13041_v38  ;;  %s15390_s15 = scalar_lea.vmem %s16826_s9, %s8650_s27 }
  0x30   : > { %9665 = vmatmul.mubr.msk.f32.gmra.mrb[12].mxu0 %vm460_vm0, %v12996_v31 }
  0x31   : > { %9667 = vmatprep.mubr.msk.f32.mxu0 %vm460_vm0, %v12999_v32 }
  0x32   : > { %9733 = vmatmul.mubr.msk.f32.gmra.mrb[12].mxu1 %vm460_vm0, %v13052_v39 }
  0x33   : > { %9735 = vmatprep.mubr.msk.f32.mxu1 %vm460_vm0, %v13055_v40 }
  0x34   : > { %9668 = vmatmul.mubr.msk.f32.gmra.mrb[14].mxu0 %vm460_vm0, %v13010_v33 }
  0x35   : > { %9670 = vmatprep.mubr.msk.f32.mxu0 %vm460_vm0, %v13013_v34 }
  0x36   : > { %9736 = vmatmul.mubr.msk.f32.gmra.mrb[14].mxu1 %vm460_vm0, %v13066_v41 }
  0x37   : > { %9738 = vmatprep.mubr.msk.f32.mxu1 %vm460_vm0, %v13069_v42 }
  0x38   : > { %9671 = vmatmul.mubr.msk.f32.gmra.mrb[16].mxu0 %vm460_vm0, %v13024_v35 }
  0x39   : > { %9673 = vmatprep.mubr.msk.f32.mxu0 %vm460_vm0, %v13027_v36 }
  0x3a   : > { %9739 = vmatmul.mubr.msk.f32.gmra.mrb[16].mxu1 %vm460_vm0, %v13080_v43 }
  0x3b   : > { %9741 = vmatprep.mubr.msk.f32.mxu1 %vm460_vm0, %v13083_v44 }
  0x3c   : > { %9674 = vmatmul.mubr.msk.f32.gmra.mrb[18].mxu0 %vm460_vm0, %v13038_v37 }
  0x3d   : > { %9676 = vmatprep.mubr.msk.f32.mxu0 %vm460_vm0, %v13041_v38 }
  0x3e   : > { %9742 = vmatmul.mubr.msk.f32.gmra.mrb[18].mxu1 %vm460_vm0, %v13094_v45 }
  0x3f   : > { %9744 = vmatprep.mubr.msk.f32.mxu1 %vm460_vm0, %v13097_v46 }
  0x40   : > { %9677 = vmatmul.mubr.msk.f32.gmra.mrb[20].mxu0 %vm460_vm0, %v13052_v39 }
  0x41   : > { %9679 = vmatprep.mubr.msk.f32.mxu0 %vm460_vm0, %v13055_v40 }
  0x42   : > { %9745 = vmatmul.mubr.msk.f32.gmra.mrb[20].mxu1 %vm460_vm0, %v13108_v47 }
  0x43   : > { %9747 = vmatprep.mubr.msk.f32.mxu1 %vm460_vm0, %v13111_v48 }
  0x44   : > { %9680 = vmatmul.mubr.msk.f32.gmra.mrb[22].mxu0 %vm460_vm0, %v13066_v41 }
  0x45   : > { %9682 = vmatprep.mubr.msk.f32.mxu0 %vm460_vm0, %v13069_v42 }
  0x46   : > { %9748 = vmatmul.mubr.msk.f32.gmra.mrb[22].mxu1 %vm460_vm0, %v13122_v49 }
  0x48   : > { %9683 = vmatmul.mubr.msk.f32.gmra.mrb[24].mxu0 %vm460_vm0, %v13080_v43 }
  0x49   : > { %9685 = vmatprep.mubr.msk.f32.mxu0 %vm460_vm0, %v13083_v44 }
  0x4c   : > { %9686 = vmatmul.mubr.msk.f32.gmra.mrb[26].mxu0 %vm460_vm0, %v13094_v45 }
  0x4d   : > { %9688 = vmatprep.mubr.msk.f32.mxu0 %vm460_vm0, %v13097_v46 }
  0x50   : > { %9689 = vmatmul.mubr.msk.f32.gmra.mrb[28].mxu0 %vm460_vm0, %v13108_v47 }
  0x51   : > { %9691 = vmatprep.mubr.msk.f32.mxu0 %vm460_vm0, %v13111_v48 }
  0x54   : > { %9692 = vmatmul.mubr.msk.f32.gmra.mrb[30].mxu0 %vm460_vm0, %v13122_v49 }
  0x55   : > { %9702 = vmatprep.mubr.msk.f32.mxu0 %vm460_vm0, %v12922_v15 }
  0x58   : > { %9703 = vmatmul.mubr.msk.f32.vlgmr.msra.gmra.mrb[32].mxu0 %vm460_vm0, %v12927_v16 }
  0x59   : > { %9705 = vmatprep.mubr.msk.f32.mxu0 %vm460_vm0, %v12930_v17  ;;  %11337 = vmatpush3.bf16.msra.mxu0 %v12962_v25 }
  0x5a   : > { %11339 = vmatprep.subr.bf16.mxu0 %v11338_v52 }
  0x5c   : > { %9706 = vmatmul.mubr.msk.f32.gmra.mrb[34].mxu0 %vm460_vm0, %v12949_v21 }
  0x5d   : > { %9708 = vmatprep.mubr.msk.f32.mxu0 %vm460_vm0, %v12955_v23  ;;  %11341 = vmatpush3.bf16.msra.mxu0 %v11338_v52 }
  0x5e   : > { %11351 = vmatprep.subr.bf16.mxu0 %v12919_v14 }
  0x60   : > { %9709 = vmatmul.mubr.msk.f32.gmra.mrb[36].mxu0 %vm460_vm0, %v12972_v26 }
  0x61   : > { %9711 = vmatprep.mubr.msk.f32.mxu0 %vm460_vm0, %v12978_v28 }
  0x64   : > { %9712 = vmatmul.mubr.msk.f32.gmra.mrb[38].mxu0 %vm460_vm0, %v12993_v30 }
  0x65   : > { %9758 = vmatprep.mubr.msk.f32.mxu0 %vm460_vm0, %v12922_v15 }
  0x68   : > { %9759 = vmatmul.mubr.msk.f32.vlgmr.msra.gmra.mrb[40].mxu0 %vm460_vm0, %v12927_v16 }
  0x69   : > { %9761 = vmatprep.mubr.msk.f32.mxu0 %vm460_vm0, %v12930_v17  ;;  %11353 = vmatpush3.bf16.msra.mxu0 %v12919_v14 }
  0x6a   : > { %11355 = vmatprep.subr.bf16.mxu0 %v11346_v55 }
  0x6c   : > { %9762 = vmatmul.mubr.msk.f32.gmra.mrb[42].mxu0 %vm460_vm0, %v12949_v21 }
  0x6d   : > { %9764 = vmatprep.mubr.msk.f32.mxu0 %vm460_vm0, %v12955_v23  ;;  %11357 = vmatpush3.bf16.msra.mxu0 %v11346_v55 }
  0x70   : > { %9765 = vmatmul.mubr.msk.f32.gmra.mrb[44].mxu0 %vm460_vm0, %v12972_v26 }
  0x71   : > { %9767 = vmatprep.mubr.msk.f32.mxu0 %vm460_vm0, %v12978_v28 }
  0x74   : > { %9768 = vmatmul.mubr.msk.f32.gmra.mrb[46].mxu0 %vm460_vm0, %v12993_v30 }
  0x75   : > { %9770 = vmatprep.mubr.msk.f32.mxu0 %vm460_vm0, %v12933_v18 }
  0x78   : > { %9771 = vmatmul.mubr.msk.f32.gmra.mrb[48].mxu0 %vm460_vm0, %v12952_v22 }
  0x79   : > { %9773 = vmatprep.mubr.msk.f32.mxu0 %vm460_vm0, %v12958_v24 }
  0x7c   : > { %9774 = vmatmul.mubr.msk.f32.gmra.mrb[50].mxu0 %vm460_vm0, %v12975_v27 }
  0x7d   : > { %9776 = vmatprep.mubr.msk.f32.mxu0 %vm460_vm0, %v12981_v29 }
  0x80   : > { %9777 = vmatmul.mubr.msk.f32.gmra.mrb[52].mxu0 %vm460_vm0, %v12996_v31 }
  0x81   : > { %9779 = vmatprep.mubr.msk.f32.mxu0 %vm460_vm0, %v12999_v32 }
  0x84   : > { %9780 = vmatmul.mubr.msk.f32.gmra.mrb[54].mxu0 %vm460_vm0, %v13010_v33 }
  0x85   : > { %9782 = vmatprep.mubr.msk.f32.mxu0 %vm460_vm0, %v13013_v34 }
  0x88   : > { %9783 = vmatmul.mubr.msk.f32.gmra.mrb[56].mxu0 %vm460_vm0, %v13024_v35 }
  0x89   : > { %9785 = vmatprep.mubr.msk.f32.mxu0 %vm460_vm0, %v13027_v36 }
  0x8c   : > { %9786 = vmatmul.mubr.msk.f32.gmra.mrb[58].mxu0 %vm460_vm0, %v13038_v37 }
  0x8d   : > { %9788 = vmatprep.mubr.msk.f32.mxu0 %vm460_vm0, %v13041_v38 }
  0x90   : > { %9789 = vmatmul.mubr.msk.f32.gmra.mrb[60].mxu0 %vm460_vm0, %v13052_v39 }
  0x91   : > { %9791 = vmatprep.mubr.msk.f32.mxu0 %vm460_vm0, %v13055_v40 }
  0x94   : > { %9792 = vmatmul.mubr.msk.f32.gmra.mrb[62].mxu0 %vm460_vm0, %v13066_v41 }
  0x95   : > { %9794 = vmatprep.mubr.msk.f32.mxu0 %vm460_vm0, %v13069_v42 }
  0x98   : > { %9795 = vmatmul.mubr.msk.f32.gmra.mrb[64].mxu0 %vm460_vm0, %v13080_v43 }
  0x99   : > { %9797 = vmatprep.mubr.msk.f32.mxu0 %vm460_vm0, %v13083_v44 }
  0x9c   : > { %9798 = vmatmul.mubr.msk.f32.gmra.mrb[66].mxu0 %vm460_vm0, %v13094_v45 }
  0x9d   : > { %9800 = vmatprep.mubr.msk.f32.mxu0 %vm460_vm0, %v13097_v46 }
  0xa0   : > { %9801 = vmatmul.mubr.msk.f32.gmra.mrb[68].mxu0 %vm460_vm0, %v13108_v47 }
  0xa1   : > { %9803 = vmatprep.mubr.msk.f32.mxu0 %vm460_vm0, %v13111_v48 }
  0xa4   : > { %9804 = vmatmul.mubr.msk.f32.gmra.mrb[70].mxu0 %vm460_vm0, %v13122_v49 }
  0xeb   : > { %v9648_v57 = vpop.f32.mrb[0].mxu0 }
  0xec   : > { %v13241_v58 = vadd.f32 %v9648_v57, %v13238_v56  ;;  %v623_v59 = vpop.f32.mrb[1].mxu0 }
  0xed   : > { %v13244_v60 = vadd.f32 %v13238_v56, %v623_v59  ;;  %v13246_v61 = vpop.f32.mrb[0].mxu1 }
  0xee   : > { %16944 = vst [vmem:[#allocation2_spill] sm:$0xff] %v13246_v61  ;;  %v13248_v62 = vpop.f32.mrb[1].mxu1  ;;  %v1252_v1 = vmul.f32 %v13241_v58, %v13241_v58 }
  0xef   : > { %16945 = vst [vmem:[#allocation3_spill] sm:$0xff] %v13248_v62  ;;  %v1251_v63 = vmul.f32 %v13244_v60, %v13244_v60  ;;  %v9651_v0 = vpop.f32.mrb[2].mxu0 }
  0xf0   : > { %v13255_v2 = vadd.f32 %v9651_v0, %v13238_v56  ;;  %v633_v3 = vpop.f32.mrb[3].mxu0 }
  0xf1   : > { %v13258_v4 = vadd.f32 %v13238_v56, %v633_v3  ;;  %9814 = vmatprep.mubr.msk.f32.mxu1 %vm460_vm0, %v1251_v63  ;;  %v13261_v5 = vpop.f32.mrb[2].mxu1 }
  0xf2   : > { %16946 = vst [vmem:[#allocation4_spill] sm:$0xff] %v13261_v5  ;;  %9815 = vmatmul.mubr.msk.f32.vlgmr.msra.gmra.mrb[24].mxu1 %vm460_vm0, %v1252_v1  ;;  %v13264_v6 = vpop.f32.mrb[3].mxu1  ;;  %v1254_v9 = vmul.f32 %v13255_v2, %v13255_v2 }
  0xf3   : > { %16947 = vst [vmem:[#allocation5_spill] sm:$0xff] %v13264_v6  ;;  %v1253_v7 = vmul.f32 %v13258_v4, %v13258_v4  ;;  %v9654_v8 = vpop.f32.mrb[4].mxu0 }
  0xf4   : > { %v13271_v10 = vadd.f32 %v9654_v8, %v13238_v56  ;;  %v643_v11 = vpop.f32.mrb[5].mxu0 }
  0xf5   : > { %v13274_v12 = vadd.f32 %v13238_v56, %v643_v11  ;;  %9817 = vmatprep.mubr.msk.f32.mxu1 %vm460_vm0, %v1253_v7  ;;  %v13277_v13 = vpop.f32.mrb[4].mxu1 }
  0xf6   : > { %16948 = vst [vmem:[#allocation6_spill] sm:$0xff] %v13277_v13  ;;  %9818 = vmatmul.mubr.msk.f32.gmra.mrb[26].mxu1 %vm460_vm0, %v1254_v9  ;;  %v13280_v14 = vpop.f32.mrb[5].mxu1  ;;  %v1256_v17 = vmul.f32 %v13271_v10, %v13271_v10 }
  0xf7   : > { %16949 = vst [vmem:[#allocation7_spill] sm:$0xff] %v13280_v14  ;;  %v1255_v15 = vmul.f32 %v13274_v12, %v13274_v12  ;;  %v9657_v16 = vpop.f32.mrb[6].mxu0 }
  0xf8   : > { %v13287_v18 = vadd.f32 %v9657_v16, %v13238_v56  ;;  %v653_v19 = vpop.f32.mrb[7].mxu0 }
  0xf9   : > { %v13290_v20 = vadd.f32 %v13238_v56, %v653_v19  ;;  %9820 = vmatprep.mubr.msk.f32.mxu1 %vm460_vm0, %v1255_v15  ;;  %v13293_v21 = vpop.f32.mrb[6].mxu1 }
  0xfa   : > { %16950 = vst [vmem:[#allocation8_spill] sm:$0xff] %v13293_v21  ;;  %9821 = vmatmul.mubr.msk.f32.gmra.mrb[28].mxu1 %vm460_vm0, %v1256_v17  ;;  %v13296_v22 = vpop.f32.mrb[7].mxu1  ;;  %v1258_v25 = vmul.f32 %v13287_v18, %v13287_v18 }
  0xfb   : > { %16951 = vst [vmem:[#allocation9_spill] sm:$0xff] %v13296_v22  ;;  %v1257_v23 = vmul.f32 %v13290_v20, %v13290_v20  ;;  %v9660_v24 = vpop.f32.mrb[8].mxu0 }
  0xfc   : > { %v13303_v26 = vadd.f32 %v9660_v24, %v13238_v56  ;;  %v663_v27 = vpop.f32.mrb[9].mxu0 }
  0xfd   : > { %v13306_v28 = vadd.f32 %v13238_v56, %v663_v27  ;;  %9823 = vmatprep.mubr.msk.f32.mxu1 %vm460_vm0, %v1257_v23  ;;  %v13309_v29 = vpop.f32.mrb[8].mxu1 }
  0xfe   : > { %16952 = vst [vmem:[#allocation10_spill] sm:$0xff] %v13309_v29  ;;  %9824 = vmatmul.mubr.msk.f32.gmra.mrb[30].mxu1 %vm460_vm0, %v1258_v25  ;;  %v13312_v30 = vpop.f32.mrb[9].mxu1  ;;  %v1260_v33 = vmul.f32 %v13303_v26, %v13303_v26 }
  0xff   : > { %16953 = vst [vmem:[#allocation11_spill] sm:$0xff] %v13312_v30  ;;  %v1259_v31 = vmul.f32 %v13306_v28, %v13306_v28  ;;  %v9663_v32 = vpop.f32.mrb[10].mxu0 }
 0x100   : > { %v13319_v34 = vadd.f32 %v9663_v32, %v13238_v56  ;;  %v673_v35 = vpop.f32.mrb[11].mxu0 }
 0x101   : > { %v13322_v36 = vadd.f32 %v13238_v56, %v673_v35  ;;  %9826 = vmatprep.mubr.msk.f32.mxu1 %vm460_vm0, %v1259_v31  ;;  %v13325_v37 = vpop.f32.mrb[10].mxu1 }
 0x102   : > { %16954 = vst [vmem:[#allocation12_spill] sm:$0xff] %v13325_v37  ;;  %9827 = vmatmul.mubr.msk.f32.gmra.mrb[32].mxu1 %vm460_vm0, %v1260_v33  ;;  %v13328_v38 = vpop.f32.mrb[11].mxu1  ;;  %v1262_v41 = vmul.f32 %v13319_v34, %v13319_v34 }
 0x103   : > { %16955 = vst [vmem:[#allocation13_spill] sm:$0xff] %v13328_v38  ;;  %v1261_v39 = vmul.f32 %v13322_v36, %v13322_v36  ;;  %v9666_v40 = vpop.f32.mrb[12].mxu0 }
 0x104   : > { %v13335_v42 = vadd.f32 %v9666_v40, %v13238_v56  ;;  %v683_v43 = vpop.f32.mrb[13].mxu0 }
 0x105   : > { %v13338_v44 = vadd.f32 %v13238_v56, %v683_v43  ;;  %9829 = vmatprep.mubr.msk.f32.mxu1 %vm460_vm0, %v1261_v39  ;;  %v13341_v45 = vpop.f32.mrb[12].mxu1 }
 0x106   : > { %16956 = vst [vmem:[#allocation14_spill] sm:$0xff] %v13341_v45  ;;  %9830 = vmatmul.mubr.msk.f32.gmra.mrb[34].mxu1 %vm460_vm0, %v1262_v41  ;;  %v13344_v46 = vpop.f32.mrb[13].mxu1  ;;  %v1264_v49 = vmul.f32 %v13335_v42, %v13335_v42 }
 0x107   : > { %16957 = vst [vmem:[#allocation15_spill] sm:$0xff] %v13344_v46  ;;  %v1263_v47 = vmul.f32 %v13338_v44, %v13338_v44  ;;  %v9669_v48 = vpop.f32.mrb[14].mxu0 }
 0x108   : > { %v13351_v50 = vadd.f32 %v9669_v48, %v13238_v56  ;;  %v693_v51 = vpop.f32.mrb[15].mxu0 }
 0x109   : > { %v13354_v52 = vadd.f32 %v13238_v56, %v693_v51  ;;  %9832 = vmatprep.mubr.msk.f32.mxu1 %vm460_vm0, %v1263_v47  ;;  %v13357_v53 = vpop.f32.mrb[14].mxu1 }
 0x10a   : > { %16958 = vst [vmem:[#allocation16_spill] sm:$0xff] %v13357_v53  ;;  %9833 = vmatmul.mubr.msk.f32.gmra.mrb[36].mxu1 %vm460_vm0, %v1264_v49  ;;  %v13360_v54 = vpop.f32.mrb[15].mxu1  ;;  %v1266_v59 = vmul.f32 %v13351_v50, %v13351_v50 }
 0x10b   : > { %16959 = vst [vmem:[#allocation17_spill] sm:$0xff] %v13360_v54  ;;  %v1265_v55 = vmul.f32 %v13354_v52, %v13354_v52  ;;  %v9672_v57 = vpop.f32.mrb[16].mxu0 }
 0x10c   : > { %v13367_v63 = vadd.f32 %v9672_v57, %v13238_v56  ;;  %v703_v0 = vpop.f32.mrb[17].mxu0 }
 0x10d   : > { %v13370_v1 = vadd.f32 %v13238_v56, %v703_v0  ;;  %9835 = vmatprep.mubr.msk.f32.mxu1 %vm460_vm0, %v1265_v55  ;;  %v13373_v3 = vpop.f32.mrb[16].mxu1 }
 0x10e   : > { %16960 = vst [vmem:[#allocation18_spill] sm:$0xff] %v13373_v3  ;;  %9836 = vmatmul.mubr.msk.f32.gmra.mrb[38].mxu1 %vm460_vm0, %v1266_v59  ;;  %v13376_v7 = vpop.f32.mrb[17].mxu1  ;;  %v1268_v11 = vmul.f32 %v13367_v63, %v13367_v63 }
 0x10f   : > { %v1267_v8 = vmul.f32 %v13370_v1, %v13370_v1  ;;  %v9675_v9 = vpop.f32.mrb[18].mxu0 }
 0x110   : > { %v13383_v15 = vadd.f32 %v9675_v9, %v13238_v56  ;;  %v713_v16 = vpop.f32.mrb[19].mxu0 }
 0x111   : > { %v13386_v17 = vadd.f32 %v13238_v56, %v713_v16  ;;  %9838 = vmatprep.mubr.msk.f32.mxu1 %vm460_vm0, %v1267_v8  ;;  %v13389_v19 = vpop.f32.mrb[18].mxu1 }
 0x112   : > { %9839 = vmatmul.mubr.msk.f32.gmra.mrb[40].mxu1 %vm460_vm0, %v1268_v11  ;;  %v13392_v23 = vpop.f32.mrb[19].mxu1  ;;  %v1270_v27 = vmul.f32 %v13383_v15, %v13383_v15 }
 0x113   : > { %v1269_v24 = vmul.f32 %v13386_v17, %v13386_v17  ;;  %v9678_v25 = vpop.f32.mrb[20].mxu0 }
 0x114   : > { %v13399_v31 = vadd.f32 %v9678_v25, %v13238_v56  ;;  %v723_v32 = vpop.f32.mrb[21].mxu0 }
 0x115   : > { %v13402_v33 = vadd.f32 %v13238_v56, %v723_v32  ;;  %9841 = vmatprep.mubr.msk.f32.mxu1 %vm460_vm0, %v1269_v24  ;;  %v13405_v35 = vpop.f32.mrb[20].mxu1 }
 0x116   : > { %9842 = vmatmul.mubr.msk.f32.gmra.mrb[42].mxu1 %vm460_vm0, %v1270_v27  ;;  %v13408_v39 = vpop.f32.mrb[21].mxu1  ;;  %v1272_v43 = vmul.f32 %v13399_v31, %v13399_v31 }
 0x117   : > { %v1271_v40 = vmul.f32 %v13402_v33, %v13402_v33  ;;  %v9681_v41 = vpop.f32.mrb[22].mxu0 }
 0x118   : > { %v13415_v47 = vadd.f32 %v9681_v41, %v13238_v56  ;;  %v733_v48 = vpop.f32.mrb[23].mxu0 }
 0x119   : > { %v13418_v49 = vadd.f32 %v13238_v56, %v733_v48  ;;  %9844 = vmatprep.mubr.msk.f32.mxu1 %vm460_vm0, %v1271_v40  ;;  %v13421_v51 = vpop.f32.mrb[22].mxu1 }
 0x11a   : > { %16961 = vst [vmem:[#allocation19_spill] sm:$0xff] %v13415_v47  ;;  %9845 = vmatmul.mubr.msk.f32.gmra.mrb[44].mxu1 %vm460_vm0, %v1272_v43  ;;  %v13424_v55 = vpop.f32.mrb[23].mxu1  ;;  %v1274_v0 = vmul.f32 %v13415_v47, %v13415_v47 }
 0x11b   : > { %16962 = vst [vmem:[#allocation20_spill] sm:$0xff] %v13418_v49  ;;  %v1273_v57 = vmul.f32 %v13418_v49, %v13418_v49  ;;  %v9684_v59 = vpop.f32.mrb[24].mxu0  ;;  %v13613_v49 = vmul.f32 %v13373_v3, %v13373_v3 }
 0x11c   : > { %v13431_v8 = vadd.f32 %v9684_v59, %v13238_v56  ;;  %v743_v9 = vpop.f32.mrb[25].mxu0 }
 0x11d   : > { %v13434_v11 = vadd.f32 %v13238_v56, %v743_v9  ;;  %9847 = vmatprep.mubr.msk.f32.mxu1 %vm460_vm0, %v1273_v57 }
 0x11e   : > { %16963 = vst [vmem:[#allocation21_spill] sm:$0xff] %v13431_v8  ;;  %9848 = vmatmul.mubr.msk.f32.gmra.mrb[46].mxu1 %vm460_vm0, %v1274_v0  ;;  %v1276_v25 = vmul.f32 %v13431_v8, %v13431_v8 }
 0x11f   : > { %16964 = vst [vmem:[#allocation22_spill] sm:$0xff] %v13434_v11  ;;  %v1275_v16 = vmul.f32 %v13434_v11, %v13434_v11  ;;  %v9687_v24 = vpop.f32.mrb[26].mxu0 }
 0x120   : > { %v13443_v27 = vadd.f32 %v9687_v24, %v13238_v56  ;;  %v753_v32 = vpop.f32.mrb[27].mxu0 }
 0x121   : > { %v13446_v40 = vadd.f32 %v13238_v56, %v753_v32  ;;  %9850 = vmatprep.mubr.msk.f32.mxu1 %vm460_vm0, %v1275_v16 }
 0x122   : > { %16965 = vst [vmem:[#allocation23_spill] sm:$0xff] %v13443_v27  ;;  %9851 = vmatmul.mubr.msk.f32.gmra.mrb[48].mxu1 %vm460_vm0, %v1276_v25  ;;  %v1278_v48 = vmul.f32 %v13443_v27, %v13443_v27 }
 0x123   : > { %16966 = vst [vmem:[#allocation24_spill] sm:$0xff] %v13446_v40  ;;  %v1277_v41 = vmul.f32 %v13446_v40, %v13446_v40  ;;  %v9690_v43 = vpop.f32.mrb[28].mxu0 }
 0x124   : > { %v13455_v57 = vadd.f32 %v9690_v43, %v13238_v56  ;;  %v763_v59 = vpop.f32.mrb[29].mxu0 }
 0x125   : > { %v13458_v0 = vadd.f32 %v13238_v56, %v763_v59  ;;  %9853 = vmatprep.mubr.msk.f32.mxu1 %vm460_vm0, %v1277_v41 }
 0x126   : > { %16967 = vst [vmem:[#allocation25_spill] sm:$0xff] %v13455_v57  ;;  %9854 = vmatmul.mubr.msk.f32.gmra.mrb[50].mxu1 %vm460_vm0, %v1278_v48  ;;  %v1280_v24 = vmul.f32 %v13455_v57, %v13455_v57 }
 0x127   : > { %16968 = vst [vmem:[#allocation26_spill] sm:$0xff] %v13458_v0  ;;  %v1279_v9 = vmul.f32 %v13458_v0, %v13458_v0  ;;  %v9693_v16 = vpop.f32.mrb[30].mxu0 }
 0x128   : > { %v13467_v25 = vadd.f32 %v9693_v16, %v13238_v56  ;;  %v773_v32 = vpop.f32.mrb[31].mxu0 }
 0x129   : > { %v13470_v43 = vadd.f32 %v13238_v56, %v773_v32  ;;  %9856 = vmatprep.mubr.msk.f32.mxu1 %vm460_vm0, %v1279_v9 }
 0x12a   : > { %16969 = vst [vmem:[#allocation27_spill] sm:$0xff] %v13467_v25  ;;  %9857 = vmatmul.mubr.msk.f32.gmra.mrb[52].mxu1 %vm460_vm0, %v1280_v24  ;;  %v1282_v59 = vmul.f32 %v13467_v25, %v13467_v25 }
 0x12b   : > { %16970 = vst [vmem:[#allocation28_spill] sm:$0xff] %v13470_v43  ;;  %v1281_v41 = vmul.f32 %v13470_v43, %v13470_v43  ;;  %v13476_v48 = vpop.f32.mrb[32].mxu0  ;;  %v1718_v43 = vmul.f32 %v13328_v38, %v13328_v38 }
 0x12c   : > { %16971 = vst [vmem:[#allocation29_spill] sm:$0xff] %v13476_v48  ;;  %v13480_v0 = vpop.f32.mrb[33].mxu0  ;;  %v1701_v56 = vmul.f32 %v13476_v48, %v13476_v48 }
 0x12d   : > { %16972 = vst [vmem:[#allocation30_spill] sm:$0xff] %v13480_v0  ;;  %v1700_v16 = vmul.f32 %v13480_v0, %v13480_v0  ;;  %9859 = vmatprep.mubr.msk.f32.mxu1 %vm460_vm0, %v1281_v41 }
 0x12e   : > { %9860 = vmatmul.mubr.msk.f32.gmra.mrb[54].mxu1 %vm460_vm0, %v1282_v59 }
 0x12f   : > { %v13488_v9 = vpop.f32.mrb[34].mxu0  ;;  %9870 = vmatprep.mubr.msk.f32.mxu0 %vm460_vm0, %v1700_v16 }
 0x130   : > { %16973 = vst [vmem:[#allocation31_spill] sm:$0xff] %v13488_v9  ;;  %v1703_v24 = vmul.f32 %v13488_v9, %v13488_v9  ;;  %v13493_v32 = vpop.f32.mrb[35].mxu0  ;;  %9871 = vmatmul.mubr.msk.f32.vlgmr.msra.gmra.mrb[72].mxu0 %vm460_vm0, %v1701_v56 }
 0x131   : > { %16974 = vst [vmem:[#allocation32_spill] sm:$0xff] %v13493_v32  ;;  %v1702_v0 = vmul.f32 %v13493_v32, %v13493_v32 }
 0x133   : > { %v13498_v41 = vpop.f32.mrb[36].mxu0  ;;  %9873 = vmatprep.mubr.msk.f32.mxu0 %vm460_vm0, %v1702_v0 }
 0x134   : > { %16975 = vst [vmem:[#allocation33_spill] sm:$0xff] %v13498_v41  ;;  %v1705_v59 = vmul.f32 %v13498_v41, %v13498_v41  ;;  %v13503_v48 = vpop.f32.mrb[37].mxu0  ;;  %9874 = vmatmul.mubr.msk.f32.gmra.mrb[74].mxu0 %vm460_vm0, %v1703_v24  ;;  %v1708_v24 = vmul.f32 %v13248_v62, %v13248_v62  ;;  %v1709_v41 = vmul.f32 %v13246_v61, %v13246_v61 }
 0x135   : > { %16976 = vst [vmem:[#allocation34_spill] sm:$0xff] %v13503_v48  ;;  %v1704_v16 = vmul.f32 %v13503_v48, %v13503_v48  ;;  %v1713_v61 = vmul.f32 %v13277_v13, %v13277_v13 }
 0x137   : > { %v13508_v9 = vpop.f32.mrb[38].mxu0  ;;  %9876 = vmatprep.mubr.msk.f32.mxu0 %vm460_vm0, %v1704_v16 }
 0x138   : > { %16977 = vst [vmem:[#allocation35_spill] sm:$0xff] %v13508_v9  ;;  %v1707_v56 = vmul.f32 %v13508_v9, %v13508_v9  ;;  %v13513_v32 = vpop.f32.mrb[39].mxu0  ;;  %9877 = vmatmul.mubr.msk.f32.gmra.mrb[76].mxu0 %vm460_vm0, %v1705_v59  ;;  %v1710_v59 = vmul.f32 %v13264_v6, %v13264_v6  ;;  %v1716_v9 = vmul.f32 %v13312_v30, %v13312_v30 }
 0x139   : > { %16978 = vst [vmem:[#allocation36_spill] sm:$0xff] %v13513_v32  ;;  %v1706_v0 = vmul.f32 %v13513_v32, %v13513_v32  ;;  %v13530_v32 = vld [vmem:[%s16822_s5] ss:$0 sm:$0xff] }
 0x13b   : > { %9879 = vmatprep.mubr.msk.f32.mxu0 %vm460_vm0, %v1706_v0  ;;  %v9760_v48 = vpop.f32.mrb[40].mxu0  ;;  %v1711_v0 = vmul.f32 %v13261_v5, %v13261_v5  ;;  %v13546_v5 = vld [vmem:[%s16825_s8] ss:$0 sm:$0xff] }
 0x13c   : > { %9880 = vmatmul.mubr.msk.f32.gmra.mrb[78].mxu0 %vm460_vm0, %v1707_v56  ;;  %v1088_v16 = vpop.f32.mrb[41].mxu0  ;;  %v1712_v56 = vmul.f32 %v13280_v14, %v13280_v14  ;;  %v1715_v14 = vmul.f32 %v13293_v21, %v13293_v21  ;;  %v13570_v21 = vmul.f32 %v13341_v45, %v13341_v45 }
 0x13d   : > { %9882 = vmatprep.mubr.msk.f32.mxu0 %vm460_vm0, %v1708_v24  ;;  %v1094_v24 = vadd.f32 %v9760_v48, %v13530_v32  ;;  %v1089_v6 = vadd.f32 %v13530_v32, %v1088_v16 }
 0x13f   : > { %v9763_v62 = vpop.f32.mrb[42].mxu0  ;;  %v2674_v48 = vmul.f32 %v13546_v5, %v1089_v6  ;;  %v2675_v16 = vmul.f32 %v13546_v5, %v1094_v24 }
 0x140   : > { %9883 = vmatmul.mubr.msk.f32.gmra.mrb[80].mxu0 %vm460_vm0, %v1709_v41  ;;  %v1714_v41 = vmul.f32 %v13296_v22, %v13296_v22  ;;  %v1098_v13 = vpop.f32.mrb[43].mxu0 }
 0x141   : > { %9885 = vmatprep.mubr.msk.f32.mxu0 %vm460_vm0, %v1710_v59  ;;  %v1104_v59 = vadd.f32 %v9763_v62, %v13530_v32  ;;  %v1099_v62 = vadd.f32 %v13530_v32, %v1098_v13  ;;  %v11422_v22 = vpack.c.bf16 %v2675_v16, %v2674_v48  ;;  %v13583_v13 = vld [vmem:[%s16825_s8 + $0x1] ss:$0 sm:$0xff]  ;;  %v13593_v48 = vld [vmem:[%s16825_s8 + $0x3] ss:$0 sm:$0xff] }
 0x142   : > { %v3346_v45 = vmul.f32 %v13583_v13, %v1089_v6  ;;  %v3347_v30 = vmul.f32 %v13583_v13, %v1094_v24  ;;  %v4690_v40 = vmul.f32 %v13593_v48, %v1089_v6  ;;  %v4691_v8 = vmul.f32 %v13593_v48, %v1094_v24 }
 0x143   : > { %v9766_v16 = vpop.f32.mrb[44].mxu0  ;;  %11423 = vmatprep.subr.bf16.mxu0 %v11422_v22 }
 0x144   : > { %9886 = vmatmul.mubr.msk.f32.gmra.mrb[82].mxu0 %vm460_vm0, %v1711_v0  ;;  %v1717_v0 = vmul.f32 %v13309_v29, %v13309_v29  ;;  %v13574_v29 = vmul.f32 %v13344_v46, %v13344_v46  ;;  %v2677_v46 = vmul.f32 %v13546_v5, %v1104_v59  ;;  %v1108_v38 = vpop.f32.mrb[45].mxu0  ;;  %v13615_v47 = vpack.c.bf16 %v3347_v30, %v3346_v45 }
 0x145   : > { %9888 = vmatprep.mubr.msk.f32.mxu0 %vm460_vm0, %v1712_v56  ;;  %v13562_v56 = vmul.f32 %v13325_v37, %v13325_v37  ;;  %v13578_v37 = vmul.f32 %v13357_v53, %v13357_v53  ;;  %v2676_v53 = vmul.f32 %v13546_v5, %v1099_v62  ;;  %11425 = vmatpush3.bf16.msra.mxu0 %v11422_v22 }
 0x146   : > { %v1109_v27 = vadd.f32 %v13530_v32, %v1108_v38  ;;  %v13609_v22 = vmul.f32 %v13360_v54, %v13360_v54  ;;  %16979 = vst [vmem:[#allocation37_spill] sm:$0xff] %v13615_v47  ;;  %v13626_v45 = vpack.c.bf16 %v4691_v8, %v4690_v40  ;;  %v4693_v8 = vmul.f32 %v13593_v48, %v1104_v59 }
 0x147   : > { %v11426_v11 = vpack.c.bf16 %v2677_v46, %v2676_v53  ;;  %v9769_v38 = vpop.f32.mrb[46].mxu0  ;;  %v3348_v53 = vmul.f32 %v13583_v13, %v1099_v62 }
 0x148   : > { %9889 = vmatmul.mubr.msk.f32.gmra.mrb[84].mxu0 %vm460_vm0, %v1713_v61  ;;  %v13588_v61 = vld [vmem:[%s16825_s8 + $0x2] ss:$0 sm:$0xff]  ;;  %v2678_v46 = vmul.f32 %v13546_v5, %v1109_v27  ;;  %16981 = vst [vmem:[#allocation39_spill] sm:$0xff] %v13626_v45 }
 0x149   : > { %9891 = vmatprep.mubr.msk.f32.mxu0 %vm460_vm0, %v1714_v41  ;;  %v4018_v25 = vmul.f32 %v13588_v61, %v1089_v6  ;;  %v4019_v57 = vmul.f32 %v13588_v61, %v1094_v24  ;;  %v1114_v41 = vadd.f32 %v9766_v16, %v13530_v32  ;;  %11427 = vmatprep.subr.bf16.mxu0 %v11426_v11  ;;  %v1118_v24 = vpop.f32.mrb[47].mxu0 }
 0x14a   : > { %11429 = vmatpush3.bf16.msra.mxu0 %v11426_v11  ;;  %v3349_v16 = vmul.f32 %v13583_v13, %v1104_v59  ;;  %v4020_v3 = vmul.f32 %v13588_v61, %v1099_v62  ;;  %v4021_v30 = vmul.f32 %v13588_v61, %v1104_v59  ;;  %v13634_v11 = vmul.f32 %v13376_v7, %v13376_v7 }
 0x14b   : > { %v13617_v6 = vpack.c.bf16 %v4019_v57, %v4018_v25  ;;  %v1124_v57 = vadd.f32 %v9769_v38, %v13530_v32  ;;  %v1119_v25 = vadd.f32 %v13530_v32, %v1118_v24  ;;  %v9772_v40 = vpop.f32.mrb[48].mxu0 }
 0x14c   : > { %9892 = vmatmul.mubr.msk.f32.gmra.mrb[86].mxu0 %vm460_vm0, %v1715_v14  ;;  %v2679_v14 = vmul.f32 %v13546_v5, %v1114_v41  ;;  %v13636_v47 = vpack.c.bf16 %v3349_v16, %v3348_v53  ;;  %v13638_v54 = vpack.c.bf16 %v4021_v30, %v4020_v3  ;;  %v4022_v53 = vmul.f32 %v13588_v61, %v1109_v27 }
 0x14d   : > { %16980 = vst [vmem:[#allocation38_spill] sm:$0xff] %v13617_v6  ;;  %9894 = vmatprep.mubr.msk.f32.mxu0 %vm460_vm0, %v1716_v9  ;;  %v4692_v6 = vmul.f32 %v13593_v48, %v1099_v62  ;;  %v2680_v38 = vmul.f32 %v13546_v5, %v1119_v25  ;;  %v2681_v62 = vmul.f32 %v13546_v5, %v1124_v57 }
 0x14e   : > { %v11430_v9 = vpack.c.bf16 %v2679_v14, %v2678_v46  ;;  %16982 = vst [vmem:[#allocation40_spill] sm:$0xff] %v13636_v47  ;;  %16983 = vst [vmem:[#allocation41_spill] sm:$0xff] %v13638_v54  ;;  %v1128_v46 = vpop.f32.mrb[49].mxu0  ;;  %v3351_v14 = vmul.f32 %v13583_v13, %v1114_v41  ;;  %v4023_v3 = vmul.f32 %v13588_v61, %v1114_v41 }
 0x14f   : > { %v13648_v24 = vpack.c.bf16 %v4693_v8, %v4692_v6  ;;  %v1129_v59 = vadd.f32 %v13530_v32, %v1128_v46  ;;  %v11434_v16 = vpack.c.bf16 %v2681_v62, %v2680_v38  ;;  %v4694_v30 = vmul.f32 %v13593_v48, %v1109_v27  ;;  %v9775_v8 = vpop.f32.mrb[50].mxu0 }
 0x150   : > { %9895 = vmatmul.mubr.msk.f32.gmra.mrb[88].mxu0 %vm460_vm0, %v1717_v0  ;;  %11431 = vmatprep.subr.bf16.mxu0 %v11430_v9  ;;  %v3350_v0 = vmul.f32 %v13583_v13, %v1109_v27  ;;  %v13661_v54 = vpack.c.bf16 %v4023_v3, %v4022_v53  ;;  %v4695_v6 = vmul.f32 %v13593_v48, %v1114_v41  ;;  %v1138_v38 = vpop.f32.mrb[51].mxu0 }
 0x151   : > { %9897 = vmatprep.mubr.msk.f32.mxu0 %vm460_vm0, %v1718_v43  ;;  %11433 = vmatpush3.bf16.msra.mxu0 %v11430_v9  ;;  %16984 = vst [vmem:[#allocation42_spill] sm:$0xff] %v13648_v24  ;;  %v1134_v43 = vadd.f32 %v9772_v40, %v13530_v32  ;;  %v13657_v9 = vmul.f32 %v13389_v19, %v13389_v19 }
 0x152   : > { %v13659_v45 = vpack.c.bf16 %v3351_v14, %v3350_v0  ;;  %16986 = vst [vmem:[#allocation44_spill] sm:$0xff] %v13661_v54  ;;  %11435 = vmatprep.subr.bf16.mxu0 %v11434_v16  ;;  %v2682_v27 = vmul.f32 %v13546_v5, %v1129_v59  ;;  %v3353_v62 = vmul.f32 %v13583_v13, %v1124_v57 }
 0x153   : > { %v2683_v40 = vmul.f32 %v13546_v5, %v1134_v43  ;;  %v4024_v0 = vmul.f32 %v13588_v61, %v1119_v25  ;;  %v4025_v46 = vmul.f32 %v13588_v61, %v1124_v57  ;;  %v13672_v41 = vpack.c.bf16 %v4695_v6, %v4694_v30  ;;  %v9778_v6 = vpop.f32.mrb[52].mxu0 }
 0x154   : > { %9898 = vmatmul.mubr.msk.f32.gmra.mrb[90].mxu0 %vm460_vm0, %v13562_v56  ;;  %16985 = vst [vmem:[#allocation43_spill] sm:$0xff] %v13659_v45  ;;  %v3352_v56 = vmul.f32 %v13583_v13, %v1119_v25  ;;  %v1139_v14 = vadd.f32 %v13530_v32, %v1138_v38  ;;  %v4696_v3 = vmul.f32 %v13593_v48, %v1119_v25 }
 0x155   : > { %9900 = vmatprep.mubr.msk.f32.mxu0 %vm460_vm0, %v13574_v29  ;;  %11437 = vmatpush3.bf16.msra.mxu0 %v11434_v16  ;;  %16987 = vst [vmem:[#allocation45_spill] sm:$0xff] %v13672_v41  ;;  %v1144_v29 = vadd.f32 %v9775_v8, %v13530_v32  ;;  %v11438_v53 = vpack.c.bf16 %v2683_v40, %v2682_v27  ;;  %v1148_v27 = vpop.f32.mrb[53].mxu0 }
 0x156   : > { %v1726_v16 = vmul.f32 %v13392_v23, %v13392_v23  ;;  %v13681_v24 = vpack.c.bf16 %v3353_v62, %v3352_v56  ;;  %v13683_v54 = vpack.c.bf16 %v4025_v46, %v4024_v0  ;;  %v4697_v30 = vmul.f32 %v13593_v48, %v1124_v57 }
 0x157   : > { %11439 = vmatprep.subr.bf16.mxu0 %v11438_v53  ;;  %v2684_v8 = vmul.f32 %v13546_v5, %v1139_v14  ;;  %v2685_v25 = vmul.f32 %v13546_v5, %v1144_v29  ;;  %v3355_v40 = vmul.f32 %v13583_v13, %v1134_v43  ;;  %v4026_v56 = vmul.f32 %v13588_v61, %v1129_v59 }
 0x158   : > { %9901 = vmatmul.mubr.msk.f32.gmra.mrb[92].mxu0 %vm460_vm0, %v13570_v21  ;;  %16988 = vst [vmem:[#allocation46_spill] sm:$0xff] %v13681_v24  ;;  %16989 = vst [vmem:[#allocation47_spill] sm:$0xff] %v13683_v54  ;;  %v3354_v21 = vmul.f32 %v13583_v13, %v1129_v59  ;;  %v4027_v38 = vmul.f32 %v13588_v61, %v1134_v43  ;;  %v13694_v57 = vpack.c.bf16 %v4697_v30, %v4696_v3  ;;  %v9781_v30 = vpop.f32.mrb[54].mxu0 }
 0x159   : > { %9903 = vmatprep.mubr.msk.f32.mxu0 %vm460_vm0, %v13609_v22  ;;  %11441 = vmatpush3.bf16.msra.mxu0 %v11438_v53  ;;  %v1154_v22 = vadd.f32 %v9778_v6, %v13530_v32  ;;  %v1149_v62 = vadd.f32 %v13530_v32, %v1148_v27  ;;  %v11442_v0 = vpack.c.bf16 %v2685_v25, %v2684_v8  ;;  %v1158_v8 = vpop.f32.mrb[55].mxu0 }
 0x15a   : > { %16990 = vst [vmem:[#allocation48_spill] sm:$0xff] %v13694_v57  ;;  %v4698_v46 = vmul.f32 %v13593_v48, %v1129_v59  ;;  %v1729_v53 = vmul.f32 %v13405_v35, %v13405_v35  ;;  %v13703_v41 = vpack.c.bf16 %v3355_v40, %v3354_v21  ;;  %v13705_v54 = vpack.c.bf16 %v4027_v38, %v4026_v56 }
 0x15b   : > { %v4699_v3 = vmul.f32 %v13593_v48, %v1134_v43  ;;  %11443 = vmatprep.subr.bf16.mxu0 %v11442_v0  ;;  %v2686_v6 = vmul.f32 %v13546_v5, %v1149_v62  ;;  %v2687_v59 = vmul.f32 %v13546_v5, %v1154_v22  ;;  %v3357_v25 = vmul.f32 %v13583_v13, %v1144_v29 }
 0x15c   : > { %9904 = vmatmul.mubr.msk.f32.gmra.mrb[94].mxu0 %vm460_vm0, %v13578_v37  ;;  %16991 = vst [vmem:[#allocation49_spill] sm:$0xff] %v13703_v41  ;;  %16992 = vst [vmem:[#allocation50_spill] sm:$0xff] %v13705_v54  ;;  %v3356_v37 = vmul.f32 %v13583_v13, %v1139_v14  ;;  %v4028_v21 = vmul.f32 %v13588_v61, %v1139_v14  ;;  %v4029_v27 = vmul.f32 %v13588_v61, %v1144_v29 }
 0x15d   : > { %9906 = vmatprep.mubr.msk.f32.mxu0 %vm460_vm0, %v13634_v11  ;;  %11445 = vmatpush3.bf16.msra.mxu0 %v11442_v0  ;;  %v13716_v43 = vpack.c.bf16 %v4699_v3, %v4698_v46  ;;  %v1164_v11 = vadd.f32 %v9781_v30, %v13530_v32  ;;  %v1159_v40 = vadd.f32 %v13530_v32, %v1158_v8 }
 0x15e   : > { %v11446_v56 = vpack.c.bf16 %v2687_v59, %v2686_v6  ;;  %v4700_v38 = vmul.f32 %v13593_v48, %v1139_v14  ;;  %v1728_v0 = vmul.f32 %v13408_v39, %v13408_v39  ;;  %v13725_v57 = vpack.c.bf16 %v3357_v25, %v3356_v37  ;;  %v9784_v6 = vpop.f32.mrb[56].mxu0 }
 0x15f   : > { %16993 = vst [vmem:[#allocation51_spill] sm:$0xff] %v13716_v43  ;;  %v13727_v54 = vpack.c.bf16 %v4029_v27, %v4028_v21  ;;  %v4701_v46 = vmul.f32 %v13593_v48, %v1144_v29  ;;  %v2688_v3 = vmul.f32 %v13546_v5, %v1159_v40  ;;  %v2689_v30 = vmul.f32 %v13546_v5, %v1164_v11 }
 0x160   : > { %9907 = vmatmul.mubr.msk.f32.gmra.mrb[96].mxu0 %vm460_vm0, %v13613_v49  ;;  %16994 = vst [vmem:[#allocation52_spill] sm:$0xff] %v13725_v57  ;;  %11447 = vmatprep.subr.bf16.mxu0 %v11446_v56  ;;  %v3358_v14 = vmul.f32 %v13583_v13, %v1149_v62  ;;  %v3359_v49 = vmul.f32 %v13583_v13, %v1154_v22 }
 0x161   : > { %16995 = vst [vmem:[#allocation53_spill] sm:$0xff] %v13727_v54  ;;  %9909 = vmatprep.mubr.msk.f32.mxu0 %vm460_vm0, %v1726_v16  ;;  %11449 = vmatpush3.bf16.msra.mxu0 %v11446_v56  ;;  %v4030_v59 = vmul.f32 %v13588_v61, %v1149_v62  ;;  %v4031_v37 = vmul.f32 %v13588_v61, %v1154_v22  ;;  %v1168_v16 = vpop.f32.mrb[57].mxu0 }
 0x162   : > { %v13737_v8 = vpack.c.bf16 %v4701_v46, %v4700_v38  ;;  %v1730_v29 = vmul.f32 %v13424_v55, %v13424_v55  ;;  %v11450_v25 = vpack.c.bf16 %v2689_v30, %v2688_v3  ;;  %v4702_v21 = vmul.f32 %v13593_v48, %v1149_v62  ;;  %v9787_v3 = vpop.f32.mrb[58].mxu0 }
 0x163   : > { %v4703_v27 = vmul.f32 %v13593_v48, %v1154_v22  ;;  %v1174_v56 = vadd.f32 %v9784_v6, %v13530_v32  ;;  %v1169_v43 = vadd.f32 %v13530_v32, %v1168_v16  ;;  %v13747_v54 = vpack.c.bf16 %v3359_v49, %v3358_v14  ;;  %v1178_v49 = vpop.f32.mrb[59].mxu0 }
 0x164   : > { %16996 = vst [vmem:[#allocation54_spill] sm:$0xff] %v13737_v8  ;;  %9910 = vmatmul.mubr.msk.f32.gmra.mrb[98].mxu0 %vm460_vm0, %v13657_v9  ;;  %v13749_v38 = vpack.c.bf16 %v4031_v37, %v4030_v59  ;;  %11451 = vmatprep.subr.bf16.mxu0 %v11450_v25  ;;  %v3360_v46 = vmul.f32 %v13583_v13, %v1159_v40 }
 0x165   : > { %16997 = vst [vmem:[#allocation55_spill] sm:$0xff] %v13747_v54  ;;  %9912 = vmatprep.mubr.msk.f32.mxu0 %vm460_vm0, %v1728_v0  ;;  %v3361_v62 = vmul.f32 %v13583_v13, %v1164_v11  ;;  %v4032_v22 = vmul.f32 %v13588_v61, %v1159_v40  ;;  %11453 = vmatpush3.bf16.msra.mxu0 %v11450_v25 }
 0x166   : > { %16998 = vst [vmem:[#allocation56_spill] sm:$0xff] %v13749_v38  ;;  %v4033_v9 = vmul.f32 %v13588_v61, %v1164_v11  ;;  %v13756_v30 = vpack.c.bf16 %v4703_v27, %v4702_v21  ;;  %v4704_v14 = vmul.f32 %v13593_v48, %v1159_v40  ;;  %v4705_v6 = vmul.f32 %v13593_v48, %v1164_v11 }
 0x167   : > { %v1731_v0 = vmul.f32 %v13421_v51, %v13421_v51  ;;  %v13762_v59 = vpack.c.bf16 %v3361_v62, %v3360_v46  ;;  %v1184_v37 = vadd.f32 %v9787_v3, %v13530_v32  ;;  %v1179_v16 = vadd.f32 %v13530_v32, %v1178_v49  ;;  %v9790_v62 = vpop.f32.mrb[60].mxu0 }
 0x168   : > { %16999 = vst [vmem:[#allocation57_spill] sm:$0xff] %v13756_v30  ;;  %9913 = vmatmul.mubr.msk.f32.gmra.mrb[100].mxu0 %vm460_vm0, %v1729_v53  ;;  %v13767_v25 = vpack.c.bf16 %v4033_v9, %v4032_v22  ;;  %v13769_v21 = vpack.c.bf16 %v4705_v6, %v4704_v14  ;;  %v5414_v11 = vmul.f32 %v13546_v5, %v1169_v43  ;;  %v1188_v14 = vpop.f32.mrb[61].mxu0 }
 0x169   : > { %17000 = vst [vmem:[#allocation58_spill] sm:$0xff] %v13762_v59  ;;  %9915 = vmatprep.mubr.msk.f32.mxu0 %vm460_vm0, %v1730_v29  ;;  %v5415_v40 = vmul.f32 %v13546_v5, %v1174_v56  ;;  %v6076_v27 = vmul.f32 %v13583_v13, %v1169_v43  ;;  %v6077_v46 = vmul.f32 %v13583_v13, %v1174_v56 }
 0x16a   : > { %17001 = vst [vmem:[#allocation59_spill] sm:$0xff] %v13767_v25  ;;  %17002 = vst [vmem:[#allocation60_spill] sm:$0xff] %v13769_v21  ;;  %v6738_v53 = vmul.f32 %v13588_v61, %v1169_v43  ;;  %v6739_v3 = vmul.f32 %v13588_v61, %v1174_v56  ;;  %v7400_v22 = vmul.f32 %v13593_v48, %v1169_v43 }
 0x16b   : > { %v7401_v9 = vmul.f32 %v13593_v48, %v1174_v56  ;;  %v13780_v6 = vpack.c.bf16 %v5415_v40, %v5414_v11  ;;  %v13782_v29 = vpack.c.bf16 %v6077_v46, %v6076_v27  ;;  %v1194_v30 = vadd.f32 %v9790_v62, %v13530_v32  ;;  %v9793_v56 = vpop.f32.mrb[62].mxu0 }
 0x16c   : > { %9916 = vmatmul.mubr.msk.f32.gmra.mrb[102].mxu0 %vm460_vm0, %v1731_v0  ;;  %v13785_v49 = vpack.c.bf16 %v6739_v3, %v6738_v53  ;;  %v1189_v8 = vadd.f32 %v13530_v32, %v1188_v14  ;;  %v5416_v25 = vmul.f32 %v13546_v5, %v1179_v16  ;;  %v5417_v43 = vmul.f32 %v13546_v5, %v1184_v37  ;;  %v1198_v46 = vpop.f32.mrb[63].mxu0 }
 0x16d   : > { %17003 = vst [vmem:[#allocation61_spill] sm:$0xff] %v13780_v6  ;;  %17004 = vst [vmem:[#allocation62_spill] sm:$0xff] %v13782_v29  ;;  %v13787_v21 = vpack.c.bf16 %v7401_v9, %v7400_v22  ;;  %v6078_v11 = vmul.f32 %v13583_v13, %v1179_v16  ;;  %v6079_v40 = vmul.f32 %v13583_v13, %v1184_v37 }
 0x16e   : > { %17005 = vst [vmem:[#allocation63_spill] sm:$0xff] %v13785_v49  ;;  %v6740_v27 = vmul.f32 %v13588_v61, %v1179_v16  ;;  %v6741_v0 = vmul.f32 %v13588_v61, %v1184_v37  ;;  %v13797_v53 = vpack.c.bf16 %v5417_v43, %v5416_v25  ;;  %v7402_v62 = vmul.f32 %v13593_v48, %v1179_v16  ;;  %v9796_v25 = vpop.f32.mrb[64].mxu0 }
 0x16f   : > { %17006 = vst [vmem:[#allocation64_spill] sm:$0xff] %v13787_v21  ;;  %v7403_v3 = vmul.f32 %v13593_v48, %v1184_v37  ;;  %v1204_v22 = vadd.f32 %v9793_v56, %v13530_v32  ;;  %v13802_v9 = vpack.c.bf16 %v6079_v40, %v6078_v11  ;;  %v1199_v21 = vadd.f32 %v13530_v32, %v1198_v46  ;;  %v1208_v11 = vpop.f32.mrb[65].mxu0 }
 0x170   : > { %17007 = vst [vmem:[#allocation65_spill] sm:$0xff] %v13797_v53  ;;  %v13804_v14 = vpack.c.bf16 %v6741_v0, %v6740_v27  ;;  %v5418_v49 = vmul.f32 %v13546_v5, %v1189_v8  ;;  %v5419_v29 = vmul.f32 %v13546_v5, %v1194_v30  ;;  %v6080_v43 = vmul.f32 %v13583_v13, %v1189_v8 }
 0x171   : > { %17008 = vst [vmem:[#allocation66_spill] sm:$0xff] %v13802_v9  ;;  %v13809_v6 = vpack.c.bf16 %v7403_v3, %v7402_v62  ;;  %v6081_v16 = vmul.f32 %v13583_v13, %v1194_v30  ;;  %v6742_v37 = vmul.f32 %v13588_v61, %v1189_v8  ;;  %v6743_v56 = vmul.f32 %v13588_v61, %v1194_v30 }
 0x172   : > { %17009 = vst [vmem:[#allocation67_spill] sm:$0xff] %v13804_v14  ;;  %v13815_v40 = vpack.c.bf16 %v5419_v29, %v5418_v49  ;;  %v7404_v27 = vmul.f32 %v13593_v48, %v1189_v8  ;;  %v7405_v0 = vmul.f32 %v13593_v48, %v1194_v30  ;;  %v1214_v46 = vadd.f32 %v9796_v25, %v13530_v32  ;;  %v9799_v29 = vpop.f32.mrb[66].mxu0 }
 0x173   : > { %17010 = vst [vmem:[#allocation68_spill] sm:$0xff] %v13809_v6  ;;  %v13820_v62 = vpack.c.bf16 %v6081_v16, %v6080_v43  ;;  %v13822_v3 = vpack.c.bf16 %v6743_v56, %v6742_v37  ;;  %v1209_v6 = vadd.f32 %v13530_v32, %v1208_v11  ;;  %v5420_v14 = vmul.f32 %v13546_v5, %v1199_v21  ;;  %v1218_v43 = vpop.f32.mrb[67].mxu0 }
 0x174   : > { %17011 = vst [vmem:[#allocation69_spill] sm:$0xff] %v13815_v40  ;;  %v5421_v9 = vmul.f32 %v13546_v5, %v1204_v22  ;;  %v13827_v53 = vpack.c.bf16 %v7405_v0, %v7404_v27  ;;  %v6082_v49 = vmul.f32 %v13583_v13, %v1199_v21  ;;  %v6083_v8 = vmul.f32 %v13583_v13, %v1204_v22 }
 0x175   : > { %17012 = vst [vmem:[#allocation70_spill] sm:$0xff] %v13820_v62  ;;  %17013 = vst [vmem:[#allocation71_spill] sm:$0xff] %v13822_v3  ;;  %v6744_v30 = vmul.f32 %v13588_v61, %v1199_v21  ;;  %v6745_v25 = vmul.f32 %v13588_v61, %v1204_v22  ;;  %v7406_v37 = vmul.f32 %v13593_v48, %v1199_v21 }
 0x176   : > { %17014 = vst [vmem:[#allocation72_spill] sm:$0xff] %v13827_v53  ;;  %v13833_v16 = vpack.c.bf16 %v5421_v9, %v5420_v14  ;;  %v7407_v56 = vmul.f32 %v13593_v48, %v1204_v22  ;;  %v1224_v11 = vadd.f32 %v9799_v29, %v13530_v32  ;;  %v13838_v27 = vpack.c.bf16 %v6083_v8, %v6082_v49  ;;  %v9802_v9 = vpop.f32.mrb[68].mxu0 }
 0x177   : > { %v13840_v0 = vpack.c.bf16 %v6745_v25, %v6744_v30  ;;  %v1219_v53 = vadd.f32 %v13530_v32, %v1218_v43  ;;  %v5422_v3 = vmul.f32 %v13546_v5, %v1209_v6  ;;  %v5423_v62 = vmul.f32 %v13546_v5, %v1214_v46  ;;  %v1228_v49 = vpop.f32.mrb[69].mxu0 }
 0x178   : > { %17015 = vst [vmem:[#allocation73_spill] sm:$0xff] %v13833_v16  ;;  %17016 = vst [vmem:[#allocation74_spill] sm:$0xff] %v13838_v27  ;;  %v13845_v40 = vpack.c.bf16 %v7407_v56, %v7406_v37  ;;  %v6084_v14 = vmul.f32 %v13583_v13, %v1209_v6  ;;  %v6085_v21 = vmul.f32 %v13583_v13, %v1214_v46 }
 0x179   : > { %17017 = vst [vmem:[#allocation75_spill] sm:$0xff] %v13840_v0  ;;  %v6746_v22 = vmul.f32 %v13588_v61, %v1209_v6  ;;  %v6747_v29 = vmul.f32 %v13588_v61, %v1214_v46  ;;  %v13851_v8 = vpack.c.bf16 %v5423_v62, %v5422_v3  ;;  %v7408_v30 = vmul.f32 %v13593_v48, %v1209_v6  ;;  %v9805_v62 = vpop.f32.mrb[70].mxu0 }
 0x17a   : > { %17018 = vst [vmem:[#allocation76_spill] sm:$0xff] %v13845_v40  ;;  %v7409_v25 = vmul.f32 %v13593_v48, %v1214_v46  ;;  %v1234_v43 = vadd.f32 %v9802_v9, %v13530_v32  ;;  %v13856_v37 = vpack.c.bf16 %v6085_v21, %v6084_v14  ;;  %v1229_v40 = vadd.f32 %v13530_v32, %v1228_v49  ;;  %v1238_v14 = vpop.f32.mrb[71].mxu0 }
 0x17b   : > { %17019 = vst [vmem:[#allocation77_spill] sm:$0xff] %v13851_v8  ;;  %v13858_v56 = vpack.c.bf16 %v6747_v29, %v6746_v22  ;;  %v5424_v0 = vmul.f32 %v13546_v5, %v1219_v53  ;;  %v5425_v27 = vmul.f32 %v13546_v5, %v1224_v11  ;;  %v6086_v3 = vmul.f32 %v13583_v13, %v1219_v53 }
 0x17c   : > { %17020 = vst [vmem:[#allocation78_spill] sm:$0xff] %v13856_v37  ;;  %v13863_v16 = vpack.c.bf16 %v7409_v25, %v7408_v30  ;;  %v6087_v6 = vmul.f32 %v13583_v13, %v1224_v11  ;;  %v6748_v46 = vmul.f32 %v13588_v61, %v1219_v53  ;;  %v6749_v9 = vmul.f32 %v13588_v61, %v1224_v11 }
 0x17d   : > { %17021 = vst [vmem:[#allocation79_spill] sm:$0xff] %v13858_v56  ;;  %v13869_v21 = vpack.c.bf16 %v5425_v27, %v5424_v0  ;;  %v7410_v22 = vmul.f32 %v13593_v48, %v1219_v53  ;;  %v7411_v29 = vmul.f32 %v13593_v48, %v1224_v11  ;;  %v1244_v49 = vadd.f32 %v9805_v62, %v13530_v32 }
 0x17e   : > { %17022 = vst [vmem:[#allocation80_spill] sm:$0xff] %v13863_v16  ;;  %v13874_v30 = vpack.c.bf16 %v6087_v6, %v6086_v3  ;;  %v13876_v25 = vpack.c.bf16 %v6749_v9, %v6748_v46  ;;  %v1239_v16 = vadd.f32 %v13530_v32, %v1238_v14  ;;  %v5426_v56 = vmul.f32 %v13546_v5, %v1229_v40 }
 0x17f   : > { %17023 = vst [vmem:[#allocation81_spill] sm:$0xff] %v13869_v21  ;;  %v5427_v37 = vmul.f32 %v13546_v5, %v1234_v43  ;;  %v13881_v8 = vpack.c.bf16 %v7411_v29, %v7410_v22  ;;  %v6088_v27 = vmul.f32 %v13583_v13, %v1229_v40  ;;  %v6089_v53 = vmul.f32 %v13583_v13, %v1234_v43 }
 0x180   : > { %17024 = vst [vmem:[#allocation82_spill] sm:$0xff] %v13874_v30  ;;  %17025 = vst [vmem:[#allocation83_spill] sm:$0xff] %v13876_v25  ;;  %v6750_v11 = vmul.f32 %v13588_v61, %v1229_v40  ;;  %v6751_v0 = vmul.f32 %v13588_v61, %v1234_v43  ;;  %v7412_v3 = vmul.f32 %v13593_v48, %v1229_v40 }
 0x181   : > { %17026 = vst [vmem:[#allocation84_spill] sm:$0xff] %v13881_v8  ;;  %v13887_v62 = vpack.c.bf16 %v5427_v37, %v5426_v56  ;;  %v7413_v32 = vmul.f32 %v13593_v48, %v1234_v43  ;;  %v13891_v6 = vpack.c.bf16 %v6089_v53, %v6088_v27  ;;  %v5428_v9 = vmul.f32 %v13546_v5, %v1239_v16 }
 0x182   : > { %v13893_v46 = vpack.c.bf16 %v6751_v0, %v6750_v11  ;;  %v5429_v14 = vmul.f32 %v13546_v5, %v1244_v49  ;;  %v6090_v29 = vmul.f32 %v13583_v13, %v1239_v16  ;;  %v6091_v8 = vmul.f32 %v13583_v13, %v1244_v49 }
 0x183   : > { %17027 = vst [vmem:[#allocation85_spill] sm:$0xff] %v13887_v62  ;;  %17028 = vst [vmem:[#allocation86_spill] sm:$0xff] %v13891_v6  ;;  %v13897_v22 = vpack.c.bf16 %v7413_v32, %v7412_v3  ;;  %v6752_v37 = vmul.f32 %v13588_v61, %v1239_v16  ;;  %v6753_v40 = vmul.f32 %v13588_v61, %v1244_v49 }
 0x184   : > { %17029 = vst [vmem:[#allocation87_spill] sm:$0xff] %v13893_v46  ;;  %v13903_v56 = vpack.c.bf16 %v5429_v14, %v5428_v9  ;;  %v7414_v43 = vmul.f32 %v13593_v48, %v1239_v16  ;;  %v7415_v27 = vmul.f32 %v13593_v48, %v1244_v49  ;;  %v13907_v53 = vpack.c.bf16 %v6091_v8, %v6090_v29 }
 0x185   : > { %17030 = vst [vmem:[#allocation88_spill] sm:$0xff] %v13897_v22  ;;  %v13909_v11 = vpack.c.bf16 %v6753_v40, %v6752_v37 }
 0x186   : > { %17031 = vst [vmem:[#allocation89_spill] sm:$0xff] %v13903_v56  ;;  %17032 = vst [vmem:[#allocation90_spill] sm:$0xff] %v13907_v53  ;;  %v13911_v5 = vpack.c.bf16 %v7415_v27, %v7414_v43  ;;  %v13916_v27 = vld [vmem:[%s16824_s7] ss:$0 sm:$0xff] }
 0x187   : > { %17033 = vst [vmem:[#allocation91_spill] sm:$0xff] %v13909_v11 }
 0x188   : > { %17034 = vst [vmem:[#allocation92_spill] sm:$0xff] %v13911_v5 }
 0x1c5   : > { %v9816_v0 = vpop.f32.mrb[24].mxu1 }
 0x1c6   : > { %v1605_v3 = vmax.f32 %v9816_v0, 1e-24  ;;  %v1445_v32 = vpop.f32.mrb[25].mxu1 }
 0x1c7   : > { %v1604_v13 = vmax.f32 %v1445_v32, 1e-24 }
 0x1c8   : > { %12152 = vrsqrt.f32 %v1605_v3 }
 0x1c9   : > { %12154 = vrsqrt.f32 %v1604_v13  ;;  %v9819_v22 = vpop.f32.mrb[26].mxu1 }
 0x1ca   : > { %v1607_v61 = vmax.f32 %v9819_v22, 1e-24  ;;  %v1455_v9 = vpop.f32.mrb[27].mxu1 }
 0x1cb   : > { %v1606_v14 = vmax.f32 %v1455_v9, 1e-24 }
 0x1cc   : > { %12156 = vrsqrt.f32 %v1607_v61 }
 0x1cd   : > { %12158 = vrsqrt.f32 %v1606_v14  ;;  %v9822_v16 = vpop.f32.mrb[28].mxu1 }
 0x1ce   : > { %v1609_v48 = vmax.f32 %v9822_v16, 1e-24  ;;  %v1465_v8 = vpop.f32.mrb[29].mxu1 }
 0x1cf   : > { %v1608_v49 = vmax.f32 %v1465_v8, 1e-24  ;;  %v16903_v8 = vmov 1.0|1.0  }
 0x1d0   : > { %12160 = vrsqrt.f32 %v1609_v48  ;;  %11502 = vmatprep.subr.bf16.mxu0 %v16903_v8 }
 0x1d1   : > { %12162 = vrsqrt.f32 %v1608_v49  ;;  %v9825_v29 = vpop.f32.mrb[30].mxu1 }
 0x1d2   : > { %v12153_v37 = vpop.eup %12152  ;;  %v1611_v40 = vmax.f32 %v9825_v29, 1e-24  ;;  %v1475_v43 = vpop.f32.mrb[31].mxu1 }
 0x1d3   : > { %v12155_v22 = vpop.eup %12154  ;;  %v13919_v0 = vmul.f32 %v12153_v37, %v13241_v58  ;;  %v1610_v3 = vmax.f32 %v1475_v43, 1e-24 }
 0x1d4   : > { %v13922_v32 = vmul.f32 %v12155_v22, %v13244_v60  ;;  %12164 = vrsqrt.f32 %v1611_v40 }
 0x1d5   : > { %12166 = vrsqrt.f32 %v1610_v3  ;;  %v9828_v13 = vpop.f32.mrb[32].mxu1  ;;  %v13926_v61 = vmul.f32 %v13916_v27, %v13919_v0 }
 0x1d6   : > { %v12157_v9 = vpop.eup %12156  ;;  %v1613_v14 = vmax.f32 %v9828_v13, 1e-24  ;;  %v1485_v16 = vpop.f32.mrb[33].mxu1  ;;  %v2169_v48 = vmul.f32 %v13916_v27, %v13922_v32 }
 0x1d7   : > { %v12159_v58 = vpop.eup %12158  ;;  %v13932_v60 = vmul.f32 %v12157_v9, %v13255_v2  ;;  %v1612_v49 = vmax.f32 %v1485_v16, 1e-24 }
 0x1d8   : > { %v13935_v29 = vmul.f32 %v12159_v58, %v13258_v4  ;;  %12168 = vrsqrt.f32 %v1613_v14  ;;  %9950 = vmatprep.mubr.msk.f32.mxu1 %vm460_vm0, %v2169_v48 }
 0x1d9   : > { %12170 = vrsqrt.f32 %v1612_v49  ;;  %v9831_v37 = vpop.f32.mrb[34].mxu1  ;;  %v13940_v40 = vmul.f32 %v13916_v27, %v13932_v60 }
 0x1da   : > { %v12161_v43 = vpop.eup %12160  ;;  %v1615_v22 = vmax.f32 %v9831_v37, 1e-24  ;;  %v1495_v3 = vpop.f32.mrb[35].mxu1  ;;  %v13944_v2 = vmul.f32 %v13916_v27, %v13935_v29 }
 0x1db   : > { %v12163_v13 = vpop.eup %12162  ;;  %v13947_v4 = vmul.f32 %v12161_v43, %v13271_v10  ;;  %v1614_v9 = vmax.f32 %v1495_v3, 1e-24 }
 0x1dc   : > { %v13950_v14 = vmul.f32 %v12163_v13, %v13274_v12  ;;  %12172 = vrsqrt.f32 %v1615_v22 }
 0x1dd   : > { %12174 = vrsqrt.f32 %v1614_v9  ;;  %v9834_v16 = vpop.f32.mrb[36].mxu1  ;;  %v13954_v48 = vmul.f32 %v13916_v27, %v13947_v4 }
 0x1de   : > { %v12165_v58 = vpop.eup %12164  ;;  %v1617_v49 = vmax.f32 %v9834_v16, 1e-24  ;;  %v1505_v37 = vpop.f32.mrb[37].mxu1  ;;  %v13958_v8 = vmul.f32 %v13916_v27, %v13950_v14 }
 0x1df   : > { %v12167_v10 = vpop.eup %12166  ;;  %v13961_v43 = vmul.f32 %v12165_v58, %v13287_v18  ;;  %v1616_v12 = vmax.f32 %v1505_v37, 1e-24 }
 0x1e0   : > { %v13964_v22 = vmul.f32 %v12167_v10, %v13290_v20  ;;  %12176 = vrsqrt.f32 %v1617_v49 }
 0x1e1   : > { %12178 = vrsqrt.f32 %v1616_v12  ;;  %v9837_v3 = vpop.f32.mrb[38].mxu1  ;;  %v13968_v13 = vmul.f32 %v13916_v27, %v13961_v43 }
 0x1e2   : > { %v12169_v9 = vpop.eup %12168  ;;  %v1619_v16 = vmax.f32 %v9837_v3, 1e-24  ;;  %v1515_v5 = vpop.f32.mrb[39].mxu1  ;;  %v13972_v11 = vmul.f32 %v13916_v27, %v13964_v22 }
 0x1e3   : > { %v12171_v18 = vpop.eup %12170  ;;  %v13975_v58 = vmul.f32 %v12169_v9, %v13303_v26  ;;  %v1618_v20 = vmax.f32 %v1515_v5, 1e-24 }
 0x1e4   : > { %v13978_v49 = vmul.f32 %v12171_v18, %v13306_v28  ;;  %12180 = vrsqrt.f32 %v1619_v16 }
 0x1e5   : > { %12182 = vrsqrt.f32 %v1618_v20  ;;  %v9840_v37 = vpop.f32.mrb[40].mxu1  ;;  %v13982_v10 = vmul.f32 %v13916_v27, %v13975_v58 }
 0x1e6   : > { %v12173_v12 = vpop.eup %12172  ;;  %v1621_v3 = vmax.f32 %v9840_v37, 1e-24  ;;  %v1525_v46 = vpop.f32.mrb[41].mxu1  ;;  %v13986_v25 = vmul.f32 %v13916_v27, %v13978_v49 }
 0x1e7   : > { %v12175_v26 = vpop.eup %12174  ;;  %v13989_v5 = vmul.f32 %v12173_v12, %v13319_v34  ;;  %v1620_v28 = vmax.f32 %v1525_v46, 1e-24 }
 0x1e8   : > { %v13992_v9 = vmul.f32 %v12175_v26, %v13322_v36  ;;  %12184 = vrsqrt.f32 %v1621_v3 }
 0x1e9   : > { %12186 = vrsqrt.f32 %v1620_v28  ;;  %v9843_v16 = vpop.f32.mrb[42].mxu1  ;;  %v13996_v18 = vmul.f32 %v13916_v27, %v13989_v5 }
 0x1ea   : > { %v12177_v20 = vpop.eup %12176  ;;  %v1623_v37 = vmax.f32 %v9843_v16, 1e-24  ;;  %v1535_v53 = vpop.f32.mrb[43].mxu1  ;;  %v14000_v6 = vmul.f32 %v13916_v27, %v13992_v9 }
 0x1eb   : > { %v12179_v34 = vpop.eup %12178  ;;  %v14003_v46 = vmul.f32 %v12177_v20, %v13335_v42  ;;  %v1622_v36 = vmax.f32 %v1535_v53, 1e-24 }
 0x1ec   : > { %v14006_v12 = vmul.f32 %v12179_v34, %v13338_v44  ;;  %12188 = vrsqrt.f32 %v1623_v37 }
 0x1ed   : > { %17035 = vst [vmem:[#allocation93_spill] sm:$0xff] %v14003_v46  ;;  %12190 = vrsqrt.f32 %v1622_v36  ;;  %v9846_v3 = vpop.f32.mrb[44].mxu1  ;;  %v14010_v26 = vmul.f32 %v13916_v27, %v14003_v46 }
 0x1ee   : > { %v12181_v28 = vpop.eup %12180  ;;  %v1625_v16 = vmax.f32 %v9846_v3, 1e-24  ;;  %v1545_v30 = vpop.f32.mrb[45].mxu1  ;;  %v14014_v56 = vmul.f32 %v13916_v27, %v14006_v12 }
 0x1ef   : > { %v12183_v42 = vpop.eup %12182  ;;  %v14017_v53 = vmul.f32 %v12181_v28, %v13351_v50  ;;  %v1624_v44 = vmax.f32 %v1545_v30, 1e-24 }
 0x1f0   : > { %v14020_v20 = vmul.f32 %v12183_v42, %v13354_v52  ;;  %12192 = vrsqrt.f32 %v1625_v16  ;;  %v14039_v16 = vld [vmem:[%s16824_s7 + $0x1] ss:$0 sm:$0xff]  ;;  %v14044_v42 = vld [vmem:[%s16824_s7 + $0x2] ss:$0 sm:$0xff] }
 0x1f1   : > { %17036 = vst [vmem:[#allocation94_spill] sm:$0xff] %v14017_v53  ;;  %12194 = vrsqrt.f32 %v1624_v44  ;;  %v9849_v37 = vpop.f32.mrb[46].mxu1  ;;  %v14024_v34 = vmul.f32 %v13916_v27, %v14017_v53 }
 0x1f2   : > { %17037 = vst [vmem:[#allocation95_spill] sm:$0xff] %v14020_v20  ;;  %v12185_v36 = vpop.eup %12184  ;;  %v1627_v3 = vmax.f32 %v9849_v37, 1e-24  ;;  %v1555_v62 = vpop.f32.mrb[47].mxu1  ;;  %v14028_v21 = vmul.f32 %v13916_v27, %v14020_v20  ;;  %v17134_v20 = vld [vmem:[#allocation13_spill] sm:$0xff] }
 0x1f3   : > { %v12187_v50 = vpop.eup %12186  ;;  %v1685_v30 = vmul.f32 %v12185_v36, %v13367_v63  ;;  %v1626_v28 = vmax.f32 %v1555_v62, 1e-24 }
 0x1f4   : > { %v1684_v52 = vmul.f32 %v12187_v50, %v13370_v1  ;;  %12196 = vrsqrt.f32 %v1627_v3  ;;  %v14060_v50 = vld [vmem:[%s16824_s7 + $0x3] ss:$0 sm:$0xff] }
 0x1f5   : > { %12198 = vrsqrt.f32 %v1626_v28  ;;  %v9852_v63 = vpop.f32.mrb[48].mxu1  ;;  %v14048_v1 = vmul.f32 %v13916_v27, %v1685_v30  ;;  %v14051_v62 = vmul.f32 %v14039_v16, %v1685_v30  ;;  %v14054_v44 = vmul.f32 %v14044_v42, %v1685_v30 }
 0x1f6   : > { %v12189_v37 = vpop.eup %12188  ;;  %v1629_v36 = vmax.f32 %v9852_v63, 1e-24  ;;  %v1565_v3 = vpop.f32.mrb[49].mxu1  ;;  %v14063_v28 = vmul.f32 %v13916_v27, %v1684_v52  ;;  %v14066_v38 = vmul.f32 %v14039_v16, %v1684_v52  ;;  %v14069_v59 = vmul.f32 %v14044_v42, %v1684_v52 }
 0x1f7   : > { %17038 = vst [vmem:[#allocation96_spill] sm:$0xff] %v14048_v1  ;;  %17039 = vst [vmem:[#allocation97_spill] sm:$0xff] %v14051_v62  ;;  %v12191_v54 = vpop.eup %12190  ;;  %v1687_v57 = vmul.f32 %v12189_v37, %v13383_v15  ;;  %v1628_v63 = vmax.f32 %v1565_v3, 1e-24  ;;  %v14073_v41 = vmul.f32 %v14060_v50, %v1684_v52  ;;  %v14076_v24 = vmul.f32 %v14060_v50, %v1685_v30 }
 0x1f8   : > { %17040 = vst [vmem:[#allocation98_spill] sm:$0xff] %v14054_v44  ;;  %17041 = vst [vmem:[#allocation99_spill] sm:$0xff] %v14063_v28  ;;  %v1686_v45 = vmul.f32 %v12191_v54, %v13386_v17  ;;  %12200 = vrsqrt.f32 %v1629_v36  ;;  %v17129_v28 = vld [vmem:[#allocation9_spill] sm:$0xff] }
 0x1f9   : > { %17042 = vst [vmem:[#allocation100_spill] sm:$0xff] %v14066_v38  ;;  %17043 = vst [vmem:[#allocation101_spill] sm:$0xff] %v14069_v59  ;;  %12202 = vrsqrt.f32 %v1628_v63  ;;  %v9855_v47 = vpop.f32.mrb[50].mxu1  ;;  %v14080_v44 = vmul.f32 %v13916_v27, %v1687_v57  ;;  %v14083_v59 = vmul.f32 %v14039_v16, %v1687_v57  ;;  %v14086_v15 = vmul.f32 %v14044_v42, %v1687_v57 }
 0x1fa   : > { %17044 = vst [vmem:[#allocation102_spill] sm:$0xff] %v14073_v41  ;;  %17045 = vst [vmem:[#allocation103_spill] sm:$0xff] %v14076_v24  ;;  %v12193_v37 = vpop.eup %12192  ;;  %v1631_v52 = vmax.f32 %v9855_v47, 1e-24  ;;  %v1575_v3 = vpop.f32.mrb[51].mxu1  ;;  %v14089_v30 = vmul.f32 %v13916_v27, %v1686_v45  ;;  %v14092_v54 = vmul.f32 %v14039_v16, %v1686_v45  ;;  %v14095_v17 = vmul.f32 %v14044_v42, %v1686_v45 }
 0x1fb   : > { %17046 = vst [vmem:[#allocation104_spill] sm:$0xff] %v14080_v44  ;;  %17047 = vst [vmem:[#allocation105_spill] sm:$0xff] %v14083_v59  ;;  %v12195_v36 = vpop.eup %12194  ;;  %v1689_v63 = vmul.f32 %v12193_v37, %v13399_v31  ;;  %v1630_v24 = vmax.f32 %v1575_v3, 1e-24  ;;  %v14099_v41 = vmul.f32 %v14060_v50, %v1686_v45 }
 0x1fc   : > { %17048 = vst [vmem:[#allocation106_spill] sm:$0xff] %v14086_v15  ;;  %17049 = vst [vmem:[#allocation107_spill] sm:$0xff] %v14089_v30  ;;  %v14102_v15 = vmul.f32 %v14060_v50, %v1687_v57  ;;  %v1688_v47 = vmul.f32 %v12195_v36, %v13402_v33  ;;  %12204 = vrsqrt.f32 %v1631_v52  ;;  %v17060_v36 = vld [vmem:[#allocation19_spill] sm:$0xff] }
 0x1fd   : > { %17050 = vst [vmem:[#allocation108_spill] sm:$0xff] %v14092_v54  ;;  %17051 = vst [vmem:[#allocation109_spill] sm:$0xff] %v14095_v17  ;;  %12206 = vrsqrt.f32 %v1630_v24  ;;  %v9858_v59 = vpop.f32.mrb[52].mxu1  ;;  %v14106_v54 = vmul.f32 %v13916_v27, %v1689_v63  ;;  %v14109_v17 = vmul.f32 %v14039_v16, %v1689_v63  ;;  %v14112_v31 = vmul.f32 %v14044_v42, %v1689_v63 }
 0x1fe   : > { %17052 = vst [vmem:[#allocation110_spill] sm:$0xff] %v14099_v41  ;;  %17053 = vst [vmem:[#allocation111_spill] sm:$0xff] %v14102_v15  ;;  %v12197_v37 = vpop.eup %12196  ;;  %v1633_v45 = vmax.f32 %v9858_v59, 1e-24  ;;  %v1585_v3 = vpop.f32.mrb[53].mxu1  ;;  %v14115_v57 = vmul.f32 %v13916_v27, %v1688_v47  ;;  %v14118_v33 = vmul.f32 %v14039_v16, %v1688_v47  ;;  %v14121_v24 = vmul.f32 %v14044_v42, %v1688_v47  ;;  %v17063_v59 = vld [vmem:[#allocation20_spill] sm:$0xff] }
 0x1ff   : > { %17054 = vst [vmem:[#allocation112_spill] sm:$0xff] %v14106_v54  ;;  %17055 = vst [vmem:[#allocation113_spill] sm:$0xff] %v14109_v17  ;;  %v12199_v52 = vpop.eup %12198  ;;  %v1691_v15 = vmul.f32 %v12197_v37, %v17060_v36  ;;  %v1632_v41 = vmax.f32 %v1585_v3, 1e-24  ;;  %v14125_v17 = vmul.f32 %v14060_v50, %v1688_v47 }
 0x200   : > { %17056 = vst [vmem:[#allocation114_spill] sm:$0xff] %v14112_v31  ;;  %17057 = vst [vmem:[#allocation115_spill] sm:$0xff] %v14115_v57  ;;  %v14128_v31 = vmul.f32 %v14060_v50, %v1689_v63  ;;  %v1690_v62 = vmul.f32 %v12199_v52, %v17063_v59  ;;  %12208 = vrsqrt.f32 %v1633_v45  ;;  %v17070_v59 = vld [vmem:[#allocation21_spill] sm:$0xff] }
 0x201   : > { %17058 = vst [vmem:[#allocation116_spill] sm:$0xff] %v14118_v33  ;;  %17059 = vst [vmem:[#allocation117_spill] sm:$0xff] %v14121_v24  ;;  %12210 = vrsqrt.f32 %v1632_v41  ;;  %v9861_v38 = vpop.f32.mrb[54].mxu1  ;;  %v14132_v33 = vmul.f32 %v13916_v27, %v1691_v15  ;;  %v14135_v24 = vmul.f32 %v14039_v16, %v1691_v15  ;;  %v14138_v37 = vmul.f32 %v14044_v42, %v1691_v15 }
 0x202   : > { %17061 = vst [vmem:[#allocation19_spill] sm:$0xff] %v14125_v17  ;;  %17062 = vst [vmem:[#allocation118_spill] sm:$0xff] %v14128_v31  ;;  %v12201_v3 = vpop.eup %12200  ;;  %v1635_v47 = vmax.f32 %v9861_v38, 1e-24  ;;  %v1595_v36 = vpop.f32.mrb[55].mxu1  ;;  %v14141_v63 = vmul.f32 %v13916_v27, %v1690_v62  ;;  %v14144_v52 = vmul.f32 %v14039_v16, %v1690_v62  ;;  %v14147_v41 = vmul.f32 %v14044_v42, %v1690_v62 }
 0x203   : > { %17064 = vst [vmem:[#allocation20_spill] sm:$0xff] %v14132_v33  ;;  %17065 = vst [vmem:[#allocation119_spill] sm:$0xff] %v14135_v24  ;;  %v12203_v45 = vpop.eup %12202  ;;  %v1693_v31 = vmul.f32 %v12201_v3, %v17070_v59  ;;  %v1634_v17 = vmax.f32 %v1595_v36, 1e-24  ;;  %v9872_v24 = vpop.f32.mrb[72].mxu0  ;;  %v14151_v33 = vmul.f32 %v14060_v50, %v1690_v62  ;;  %v14154_v38 = vmul.f32 %v14060_v50, %v1691_v15 }
 0x204   : > { %17066 = vst [vmem:[#allocation120_spill] sm:$0xff] %v14138_v37  ;;  %17067 = vst [vmem:[#allocation121_spill] sm:$0xff] %v14141_v63  ;;  %v17073_v37 = vld [vmem:[#allocation22_spill] sm:$0xff]  ;;  %12212 = vrsqrt.f32 %v1635_v47  ;;  %v2054_v63 = vmax.f32 %v9872_v24, 1e-24  ;;  %v1894_v57 = vpop.f32.mrb[73].mxu0 }
 0x205   : > { %17068 = vst [vmem:[#allocation122_spill] sm:$0xff] %v14144_v52  ;;  %17069 = vst [vmem:[#allocation123_spill] sm:$0xff] %v14147_v41  ;;  %v1692_v54 = vmul.f32 %v12203_v45, %v17073_v37  ;;  %12214 = vrsqrt.f32 %v1634_v17  ;;  %v2053_v52 = vmax.f32 %v1894_v57, 1e-24  ;;  %v14158_v41 = vmul.f32 %v13916_v27, %v1693_v31  ;;  %v17079_v17 = vld [vmem:[#allocation23_spill] sm:$0xff] }
 0x206   : > { %17071 = vst [vmem:[#allocation21_spill] sm:$0xff] %v14151_v33  ;;  %17072 = vst [vmem:[#allocation124_spill] sm:$0xff] %v14154_v38  ;;  %v14161_v3 = vmul.f32 %v14039_v16, %v1693_v31  ;;  %v12205_v36 = vpop.eup %12204  ;;  %12216 = vrsqrt.f32 %v2054_v63  ;;  %v14174_v45 = vmul.f32 %v14044_v42, %v1693_v31  ;;  %v17082_v63 = vld [vmem:[#allocation24_spill] sm:$0xff] }
 0x207   : > { %17074 = vst [vmem:[#allocation22_spill] sm:$0xff] %v14158_v41  ;;  %v14164_v62 = vmul.f32 %v13916_v27, %v1692_v54  ;;  %v14167_v15 = vmul.f32 %v14039_v16, %v1692_v54  ;;  %v14170_v37 = vmul.f32 %v14044_v42, %v1692_v54  ;;  %v12207_v24 = vpop.eup %12206  ;;  %v1695_v57 = vmul.f32 %v12205_v36, %v17079_v17  ;;  %v9875_v47 = vpop.f32.mrb[74].mxu0 }
 0x208   : > { %17075 = vst [vmem:[#allocation125_spill] sm:$0xff] %v14161_v3  ;;  %12218 = vrsqrt.f32 %v2053_v52  ;;  %17080 = vst [vmem:[#allocation23_spill] sm:$0xff] %v14174_v45  ;;  %v14177_v59 = vmul.f32 %v14060_v50, %v1692_v54  ;;  %v1694_v38 = vmul.f32 %v12207_v24, %v17082_v63  ;;  %v2056_v33 = vmax.f32 %v9875_v47, 1e-24  ;;  %v1904_v3 = vpop.f32.mrb[75].mxu0  ;;  %v17090_v47 = vld [vmem:[#allocation25_spill] sm:$0xff] }
 0x209   : > { %17076 = vst [vmem:[#allocation126_spill] sm:$0xff] %v14164_v62  ;;  %17077 = vst [vmem:[#allocation127_spill] sm:$0xff] %v14167_v15  ;;  %v14181_v15 = vmul.f32 %v14060_v50, %v1693_v31  ;;  %v2055_v41 = vmax.f32 %v1904_v3, 1e-24  ;;  %v14187_v52 = vmul.f32 %v14039_v16, %v1695_v57  ;;  %v14190_v36 = vmul.f32 %v14044_v42, %v1695_v57  ;;  %v17104_v62 = vld [vmem:[#allocation29_spill] sm:$0xff] }
 0x20a   : > { %17078 = vst [vmem:[#allocation128_spill] sm:$0xff] %v14170_v37  ;;  %17081 = vst [vmem:[#allocation129_spill] sm:$0xff] %v14177_v59  ;;  %v14184_v37 = vmul.f32 %v13916_v27, %v1695_v57  ;;  %v12209_v17 = vpop.eup %12208  ;;  %12220 = vrsqrt.f32 %v2056_v33  ;;  %v14193_v54 = vmul.f32 %v13916_v27, %v1694_v38  ;;  %v14196_v24 = vmul.f32 %v14039_v16, %v1694_v38  ;;  %v17093_v33 = vld [vmem:[#allocation26_spill] sm:$0xff] }
 0x20b   : > { %17083 = vst [vmem:[#allocation24_spill] sm:$0xff] %v14181_v15  ;;  %17085 = vst [vmem:[#allocation131_spill] sm:$0xff] %v14187_v52  ;;  %v14199_v31 = vmul.f32 %v14044_v42, %v1694_v38  ;;  %v12211_v3 = vpop.eup %12210  ;;  %v1697_v63 = vmul.f32 %v12209_v17, %v17090_v47  ;;  %12222 = vrsqrt.f32 %v2055_v41  ;;  %v9878_v15 = vpop.f32.mrb[76].mxu0  ;;  %v14203_v59 = vmul.f32 %v14060_v50, %v1694_v38 }
 0x20c   : > { %17084 = vst [vmem:[#allocation130_spill] sm:$0xff] %v14184_v37  ;;  %17086 = vst [vmem:[#allocation132_spill] sm:$0xff] %v14190_v36  ;;  %v14206_v36 = vmul.f32 %v14060_v50, %v1695_v57  ;;  %v1696_v45 = vmul.f32 %v12211_v3, %v17093_v33  ;;  %v2058_v52 = vmax.f32 %v9878_v15, 1e-24  ;;  %v1914_v37 = vpop.f32.mrb[77].mxu0  ;;  %v17100_v3 = vld [vmem:[#allocation27_spill] sm:$0xff] }
 0x20d   : > { %17087 = vst [vmem:[#allocation133_spill] sm:$0xff] %v14193_v54  ;;  %17088 = vst [vmem:[#allocation134_spill] sm:$0xff] %v14196_v24  ;;  %v2057_v54 = vmax.f32 %v1914_v37, 1e-24  ;;  %v14210_v24 = vmul.f32 %v13916_v27, %v1697_v63  ;;  %v14216_v41 = vmul.f32 %v14044_v42, %v1697_v63 }
 0x20e   : > { %17089 = vst [vmem:[#allocation135_spill] sm:$0xff] %v14199_v31  ;;  %17091 = vst [vmem:[#allocation25_spill] sm:$0xff] %v14203_v59  ;;  %v14213_v31 = vmul.f32 %v14039_v16, %v1697_v63  ;;  %v12213_v17 = vpop.eup %12212  ;;  %12224 = vrsqrt.f32 %v2058_v52  ;;  %v14219_v38 = vmul.f32 %v13916_v27, %v1696_v45  ;;  %v14222_v57 = vmul.f32 %v14039_v16, %v1696_v45 }
 0x20f   : > { %17092 = vst [vmem:[#allocation136_spill] sm:$0xff] %v14206_v36  ;;  %17094 = vst [vmem:[#allocation26_spill] sm:$0xff] %v14210_v24  ;;  %v14225_v15 = vmul.f32 %v14044_v42, %v1696_v45  ;;  %v12215_v37 = vpop.eup %12214  ;;  %v1699_v47 = vmul.f32 %v12213_v17, %v17100_v3  ;;  %12226 = vrsqrt.f32 %v2057_v54  ;;  %v9881_v33 = vpop.f32.mrb[78].mxu0  ;;  %v14229_v36 = vmul.f32 %v14060_v50, %v1696_v45  ;;  %v17107_v45 = vld [vmem:[#allocation30_spill] sm:$0xff] }
 0x210   : > { %17095 = vst [vmem:[#allocation137_spill] sm:$0xff] %v14213_v31  ;;  %17096 = vst [vmem:[#allocation138_spill] sm:$0xff] %v14216_v41  ;;  %v14232_v59 = vmul.f32 %v14060_v50, %v1697_v63  ;;  %v12217_v52 = vpop.eup %12216  ;;  %v17103_v41 = vld [vmem:[#allocation28_spill] sm:$0xff]  ;;  %v2060_v24 = vmax.f32 %v9881_v33, 1e-24 }
 0x211   : > { %17097 = vst [vmem:[#allocation139_spill] sm:$0xff] %v14219_v38  ;;  %17098 = vst [vmem:[#allocation140_spill] sm:$0xff] %v14222_v57  ;;  %v1698_v31 = vmul.f32 %v12215_v37, %v17103_v41  ;;  %v1924_v38 = vpop.f32.mrb[79].mxu0  ;;  %v2118_v44 = vmul.f32 %v12217_v52, %v17104_v62  ;;  %v14237_v30 = vmul.f32 %v13916_v27, %v1699_v47 }
 0x212   : > { %17099 = vst [vmem:[#allocation141_spill] sm:$0xff] %v14225_v15  ;;  %17101 = vst [vmem:[#allocation27_spill] sm:$0xff] %v14229_v36  ;;  %v12219_v57 = vpop.eup %12218  ;;  %v2059_v15 = vmax.f32 %v1924_v38, 1e-24  ;;  %v14240_v54 = vmul.f32 %v14039_v16, %v1699_v47  ;;  %12228 = vrsqrt.f32 %v2060_v24  ;;  %v14267_v33 = vmul.f32 %v14060_v50, %v1699_v47 }
 0x213   : > { %17102 = vst [vmem:[#allocation142_spill] sm:$0xff] %v14232_v59  ;;  %17105 = vst [vmem:[#allocation28_spill] sm:$0xff] %v14237_v30  ;;  %v2117_v17 = vmul.f32 %v12219_v57, %v17107_v45  ;;  %v14244_v63 = vmul.f32 %v13916_v27, %v1698_v31  ;;  %v14247_v41 = vmul.f32 %v14039_v16, %v1698_v31  ;;  %v9884_v37 = vpop.f32.mrb[80].mxu0  ;;  %v17116_v45 = vld [vmem:[#allocation31_spill] sm:$0xff] }
 0x214   : > { %17106 = vst [vmem:[#allocation29_spill] sm:$0xff] %v14240_v54  ;;  %12230 = vrsqrt.f32 %v2059_v15  ;;  %v14256_v38 = vmul.f32 %v14044_v42, %v1698_v31  ;;  %v14259_v57 = vmul.f32 %v14044_v42, %v1699_v47  ;;  %v14262_v27 = vmul.f32 %v14060_v50, %v1698_v31  ;;  %v12221_v24 = vpop.eup %12220  ;;  %v1934_v3 = vpop.f32.mrb[81].mxu0  ;;  %17115 = vst [vmem:[#allocation147_spill] sm:$0xff] %v14267_v33  ;;  %v17117_v54 = vld [vmem:[#allocation32_spill] sm:$0xff]  ;;  %v17120_v33 = vld [vmem:[#allocation35_spill] sm:$0xff] }
 0x215   : > { %17108 = vst [vmem:[#allocation30_spill] sm:$0xff] %v14244_v63  ;;  %17109 = vst [vmem:[#allocation143_spill] sm:$0xff] %v14247_v41  ;;  %v14264_v16 = vpack.c.bf16 %v2118_v44, %v2117_v17  ;;  %v2062_v15 = vmax.f32 %v9884_v37, 1e-24  ;;  %v12223_v52 = vpop.eup %12222  ;;  %v2120_v59 = vmul.f32 %v12221_v24, %v17116_v45  ;;  %v2061_v36 = vmax.f32 %v1934_v3, 1e-24 }
 0x216   : > { %17112 = vst [vmem:[#allocation144_spill] sm:$0xff] %v14256_v38  ;;  %17113 = vst [vmem:[#allocation145_spill] sm:$0xff] %v14259_v57  ;;  %v2119_v38 = vmul.f32 %v12223_v52, %v17117_v54  ;;  %v17118_v37 = vld [vmem:[#allocation33_spill] sm:$0xff] }
 0x217   : > { %17114 = vst [vmem:[#allocation146_spill] sm:$0xff] %v14262_v27  ;;  %12232 = vrsqrt.f32 %v2062_v15  ;;  %11360 = vmatprep.subr.msk.bf16.mxu1 %vm14251_vm1, %v14264_v16  ;;  %v9887_v42 = vpop.f32.mrb[82].mxu0  ;;  %v17119_v15 = vld [vmem:[#allocation34_spill] sm:$0xff]  ;;  %v17125_v63 = vld [vmem:[#allocation5_spill] sm:$0xff] }
 0x218   : > { %12234 = vrsqrt.f32 %v2061_v36  ;;  %11363 = vmatpush3.bf16.xpose.msk.msra.mxu1 %vm14251_vm1, %v14264_v16  ;;  %v12225_v44 = vpop.eup %12224  ;;  %v14277_v50 = vpack.c.bf16 %v2120_v59, %v2119_v38  ;;  %v2064_v31 = vmax.f32 %v9887_v42, 1e-24  ;;  %v1944_v47 = vpop.f32.mrb[83].mxu0 }
 0x219   : > { %v12227_v17 = vpop.eup %12226  ;;  %v2122_v24 = vmul.f32 %v12225_v44, %v17118_v37  ;;  %v2063_v54 = vmax.f32 %v1944_v47, 1e-24  ;;  %v17121_v44 = vld [vmem:[#allocation36_spill] sm:$0xff] }
 0x21a   : > { %v2121_v3 = vmul.f32 %v12227_v17, %v17119_v15  ;;  %12236 = vrsqrt.f32 %v2064_v31  ;;  %11366 = vmatprep.subr.msk.bf16.mxu1 %vm14251_vm1, %v14277_v50  ;;  %v17122_v15 = vld [vmem:[#allocation2_spill] sm:$0xff] }
 0x21b   : > { %12238 = vrsqrt.f32 %v2063_v54  ;;  %v9890_v36 = vpop.f32.mrb[84].mxu0 }
 0x21c   : > { %v12229_v52 = vpop.eup %12228  ;;  %v14284_v45 = vpack.c.bf16 %v2122_v24, %v2121_v3  ;;  %v2066_v59 = vmax.f32 %v9890_v36, 1e-24  ;;  %v1954_v38 = vpop.f32.mrb[85].mxu0 }
 0x21d   : > { %v2124_v27 = vmul.f32 %v12229_v52, %v17120_v33  ;;  %v2065_v57 = vmax.f32 %v1954_v38, 1e-24  ;;  %v17123_v52 = vld [vmem:[#allocation3_spill] sm:$0xff] }
 0x21e   : > { %v12231_v42 = vpop.eup %12230  ;;  %12240 = vrsqrt.f32 %v2066_v59 }
 0x21f   : > { %v2123_v47 = vmul.f32 %v12231_v42, %v17121_v44  ;;  %12242 = vrsqrt.f32 %v2065_v57  ;;  %v9893_v31 = vpop.f32.mrb[86].mxu0 }
 0x220   : > { %11369 = vmatpush3.bf16.xpose.msk.msra.mxu1 %vm14251_vm1, %v14277_v50  ;;  %v2068_v24 = vmax.f32 %v9893_v31, 1e-24  ;;  %v1964_v54 = vpop.f32.mrb[87].mxu0  ;;  %v17124_v31 = vld [vmem:[#allocation4_spill] sm:$0xff] }
 0x221   : > { %v12233_v17 = vpop.eup %12232  ;;  %v14291_v37 = vpack.c.bf16 %v2124_v27, %v2123_v47  ;;  %11372 = vmatprep.subr.msk.bf16.mxu1 %vm14251_vm1, %v14284_v45  ;;  %v2067_v36 = vmax.f32 %v1964_v54, 1e-24 }
 0x222   : > { %v12235_v33 = vpop.eup %12234  ;;  %v2126_v3 = vmul.f32 %v12233_v17, %v17122_v15  ;;  %12244 = vrsqrt.f32 %v2068_v24 }
 0x223   : > { %v2125_v57 = vmul.f32 %v12235_v33, %v17123_v52  ;;  %12246 = vrsqrt.f32 %v2067_v36  ;;  %v9896_v59 = vpop.f32.mrb[88].mxu0  ;;  %v17126_v36 = vld [vmem:[#allocation6_spill] sm:$0xff] }
 0x224   : > { %v12237_v38 = vpop.eup %12236  ;;  %v2070_v27 = vmax.f32 %v9896_v59, 1e-24  ;;  %v1974_v44 = vpop.f32.mrb[89].mxu0 }
 0x225   : > { %v14298_v42 = vpack.c.bf16 %v2126_v3, %v2125_v57  ;;  %v12239_v47 = vpop.eup %12238  ;;  %v2128_v41 = vmul.f32 %v12237_v38, %v17124_v31  ;;  %v2069_v30 = vmax.f32 %v1974_v44, 1e-24  ;;  %v17127_v57 = vld [vmem:[#allocation7_spill] sm:$0xff] }
 0x226   : > { %v2127_v1 = vmul.f32 %v12239_v47, %v17125_v63  ;;  %12248 = vrsqrt.f32 %v2070_v27  ;;  %v17128_v47 = vld [vmem:[#allocation8_spill] sm:$0xff] }
 0x227   : > { %12250 = vrsqrt.f32 %v2069_v30  ;;  %v9899_v17 = vpop.f32.mrb[90].mxu0 }
 0x228   : > { %11375 = vmatpush3.bf16.xpose.msk.msra.mxu1 %vm14251_vm1, %v14284_v45  ;;  %v12241_v24 = vpop.eup %12240  ;;  %v14305_v54 = vpack.c.bf16 %v2128_v41, %v2127_v1  ;;  %v2072_v33 = vmax.f32 %v9899_v17, 1e-24  ;;  %v1984_v15 = vpop.f32.mrb[91].mxu0 }
 0x229   : > { %11378 = vmatprep.subr.msk.bf16.mxu1 %vm14251_vm1, %v14291_v37  ;;  %v12243_v3 = vpop.eup %12242  ;;  %v2130_v52 = vmul.f32 %v12241_v24, %v17126_v36  ;;  %v2071_v63 = vmax.f32 %v1984_v15, 1e-24 }
 0x22a   : > { %v2129_v30 = vmul.f32 %v12243_v3, %v17127_v57  ;;  %12252 = vrsqrt.f32 %v2072_v33 }
 0x22b   : > { %12254 = vrsqrt.f32 %v2071_v63  ;;  %v9902_v59 = vpop.f32.mrb[92].mxu0  ;;  %v17130_v63 = vld [vmem:[#allocation10_spill] sm:$0xff] }
 0x22c   : > { %v12245_v38 = vpop.eup %12244  ;;  %v14312_v27 = vpack.c.bf16 %v2130_v52, %v2129_v30  ;;  %v2074_v1 = vmax.f32 %v9902_v59, 1e-24  ;;  %v1994_v41 = vpop.f32.mrb[93].mxu0  ;;  %v17131_v30 = vld [vmem:[#allocation11_spill] sm:$0xff] }
 0x22d   : > { %v12247_v44 = vpop.eup %12246  ;;  %v2132_v31 = vmul.f32 %v12245_v38, %v17128_v47  ;;  %v2073_v17 = vmax.f32 %v1994_v41, 1e-24 }
 0x22e   : > { %v2131_v53 = vmul.f32 %v12247_v44, %v17129_v28  ;;  %12256 = vrsqrt.f32 %v2074_v1 }
 0x22f   : > { %12258 = vrsqrt.f32 %v2073_v17  ;;  %v9905_v24 = vpop.f32.mrb[94].mxu0 }
 0x230   : > { %11381 = vmatpush3.bf16.xpose.msk.msra.mxu1 %vm14251_vm1, %v14291_v37  ;;  %v12249_v33 = vpop.eup %12248  ;;  %v14319_v15 = vpack.c.bf16 %v2132_v31, %v2131_v53  ;;  %v2076_v3 = vmax.f32 %v9905_v24, 1e-24  ;;  %v2004_v36 = vpop.f32.mrb[95].mxu0  ;;  %v17133_v31 = vld [vmem:[#allocation12_spill] sm:$0xff] }
 0x231   : > { %11384 = vmatprep.subr.msk.bf16.mxu1 %vm14251_vm1, %v14298_v42  ;;  %v12251_v52 = vpop.eup %12250  ;;  %v2134_v57 = vmul.f32 %v12249_v33, %v17130_v63  ;;  %v2075_v28 = vmax.f32 %v2004_v36, 1e-24 }
 0x232   : > { %v2133_v59 = vmul.f32 %v12251_v52, %v17131_v30  ;;  %12260 = vrsqrt.f32 %v2076_v3 }
 0x233   : > { %12262 = vrsqrt.f32 %v2075_v28  ;;  %v9908_v38 = vpop.f32.mrb[96].mxu0  ;;  %v17136_v28 = vld [vmem:[#allocation14_spill] sm:$0xff] }
 0x234   : > { %v12253_v1 = vpop.eup %12252  ;;  %v14326_v41 = vpack.c.bf16 %v2134_v57, %v2133_v59  ;;  %v2078_v53 = vmax.f32 %v9908_v38, 1e-24  ;;  %v2014_v44 = vpop.f32.mrb[97].mxu0  ;;  %v17137_v59 = vld [vmem:[#allocation15_spill] sm:$0xff] }
 0x235   : > { %v12255_v47 = vpop.eup %12254  ;;  %v2136_v17 = vmul.f32 %v12253_v1, %v17133_v31  ;;  %v2077_v24 = vmax.f32 %v2014_v44, 1e-24 }
 0x236   : > { %17132 = vst [vmem:[#allocation31_spill] sm:$0xff] %v14326_v41  ;;  %v2135_v46 = vmul.f32 %v12255_v47, %v17134_v20  ;;  %12264 = vrsqrt.f32 %v2078_v53 }
 0x237   : > { %12266 = vrsqrt.f32 %v2077_v24  ;;  %v9911_v33 = vpop.f32.mrb[98].mxu0 }
 0x238   : > { %11387 = vmatpush3.bf16.xpose.msk.msra.mxu1 %vm14251_vm1, %v14298_v42  ;;  %v12257_v3 = vpop.eup %12256  ;;  %v14333_v36 = vpack.c.bf16 %v2136_v17, %v2135_v46  ;;  %v2080_v52 = vmax.f32 %v9911_v33, 1e-24  ;;  %v2024_v63 = vpop.f32.mrb[99].mxu0  ;;  %v17138_v17 = vld [vmem:[#allocation16_spill] sm:$0xff] }
 0x239   : > { %11390 = vmatprep.subr.msk.bf16.mxu1 %vm14251_vm1, %v14305_v54  ;;  %v12259_v57 = vpop.eup %12258  ;;  %v2138_v30 = vmul.f32 %v12257_v3, %v17136_v28  ;;  %v2079_v20 = vmax.f32 %v2024_v63, 1e-24 }
 0x23a   : > { %17135 = vst [vmem:[#allocation32_spill] sm:$0xff] %v14333_v36  ;;  %v2137_v38 = vmul.f32 %v12259_v57, %v17137_v59  ;;  %12268 = vrsqrt.f32 %v2080_v52  ;;  %v17139_v36 = vld [vmem:[#allocation17_spill] sm:$0xff] }
 0x23b   : > { %12270 = vrsqrt.f32 %v2079_v20  ;;  %v9914_v1 = vpop.f32.mrb[100].mxu0  ;;  %v17140_v20 = vld [vmem:[#allocation18_spill] sm:$0xff] }
 0x23c   : > { %v12261_v53 = vpop.eup %12260  ;;  %v14340_v44 = vpack.c.bf16 %v2138_v30, %v2137_v38  ;;  %v2082_v46 = vmax.f32 %v9914_v1, 1e-24  ;;  %v2034_v47 = vpop.f32.mrb[101].mxu0 }
 0x23d   : > { %v12263_v31 = vpop.eup %12262  ;;  %v2140_v24 = vmul.f32 %v12261_v53, %v17138_v17  ;;  %v2081_v33 = vmax.f32 %v2034_v47, 1e-24 }
 0x23e   : > { %v2139_v41 = vmul.f32 %v12263_v31, %v17139_v36  ;;  %12272 = vrsqrt.f32 %v2082_v46 }
 0x23f   : > { %12274 = vrsqrt.f32 %v2081_v33  ;;  %v9917_v3 = vpop.f32.mrb[102].mxu0 }
 0x240   : > { %11393 = vmatpush3.bf16.xpose.msk.msra.mxu1 %vm14251_vm1, %v14305_v54  ;;  %v12265_v52 = vpop.eup %12264  ;;  %v14347_v63 = vpack.c.bf16 %v2140_v24, %v2139_v41  ;;  %v2084_v57 = vmax.f32 %v9917_v3, 1e-24  ;;  %v2044_v28 = vpop.f32.mrb[103].mxu0 }
 0x241   : > { %11396 = vmatprep.subr.msk.bf16.mxu1 %vm14251_vm1, %v14312_v27  ;;  %v12267_v30 = vpop.eup %12266  ;;  %v2142_v59 = vmul.f32 %v12265_v52, %v17140_v20  ;;  %v2083_v36 = vmax.f32 %v2044_v28, 1e-24  ;;  %v2193_v20 = vld [vmem:[%s14430_s14 + $0x30] sm:$0xff] }
 0x242   : > { %v2141_v38 = vmul.f32 %v12267_v30, %v13376_v7  ;;  %12276 = vrsqrt.f32 %v2084_v57  ;;  %v17141_v30 = vmov 1.0|1.0  }
 0x243   : > { %12278 = vrsqrt.f32 %v2083_v36 }
 0x244   : > { %v12269_v1 = vpop.eup %12268  ;;  %v14354_v53 = vpack.c.bf16 %v2142_v59, %v2141_v38 }
 0x245   : > { %v12271_v46 = vpop.eup %12270  ;;  %v2144_v41 = vmul.f32 %v12269_v1, %v13389_v19  ;;  %v2194_v1 = vld [vmem:[%s14430_s14 + $0x38] sm:$0xff] }
 0x246   : > { %v2143_v47 = vmul.f32 %v12271_v46, %v13392_v23 }
 0x248   : > { %11399 = vmatpush3.bf16.xpose.msk.msra.mxu1 %vm14251_vm1, %v14312_v27  ;;  %v12273_v31 = vpop.eup %12272  ;;  %v14361_v17 = vpack.c.bf16 %v2144_v41, %v2143_v47  ;;  %v2195_v41 = vld [vmem:[%s14430_s14 + $0x40] sm:$0xff] }
 0x249   : > { %11402 = vmatprep.subr.msk.bf16.mxu1 %vm14251_vm1, %v14319_v15  ;;  %v12275_v7 = vpop.eup %12274  ;;  %v2146_v24 = vmul.f32 %v12273_v31, %v13405_v35 }
 0x24a   : > { %v2145_v33 = vmul.f32 %v12275_v7, %v13408_v39 }
 0x24c   : > { %v12277_v3 = vpop.eup %12276  ;;  %v14368_v19 = vpack.c.bf16 %v2146_v24, %v2145_v33  ;;  %v2196_v24 = vld [vmem:[%s14430_s14 + $0x48] sm:$0xff] }
 0x24d   : > { %v12279_v23 = vpop.eup %12278  ;;  %v2148_v52 = vmul.f32 %v12277_v3, %v13421_v51  ;;  %v2187_v51 = vld [vmem:[%s14430_s14] sm:$0xff]  ;;  %v2197_v3 = vld [vmem:[%s14430_s14 + $0x50] sm:$0xff] }
 0x24e   : > { %v2147_v57 = vmul.f32 %v12279_v23, %v13424_v55 }
 0x250   : > { %11405 = vmatpush3.bf16.xpose.msk.msra.mxu1 %vm14251_vm1, %v14319_v15  ;;  %v14375_v28 = vpack.c.bf16 %v2148_v52, %v2147_v57 }
 0x251   : > { %11406 = vmatprep.subr.bf16.mxu1 %v17141_v30 }
 0x257   : > { %9951 = vmatmul.mubr.msk.f32.vlgmr.msra.gmra.mrb[56].mxu1 %vm460_vm0, %v13926_v61 }
 0x258   : > { %9953 = vmatprep.mubr.msk.f32.mxu1 %vm460_vm0, %v13944_v2  ;;  %11407 = vmatpush3.bf16.msra.mxu1 %v17141_v30 }
 0x259   : > { %11408 = vmatprep.subr.bf16.mxu1 %v17141_v30 }
 0x25b   : > { %9954 = vmatmul.mubr.msk.f32.gmra.mrb[58].mxu1 %vm460_vm0, %v13940_v40  ;;  %v2190_v40 = vld [vmem:[%s14430_s14 + $0x18] sm:$0xff] }
 0x25c   : > { %9956 = vmatprep.mubr.msk.f32.mxu1 %vm460_vm0, %v13958_v8  ;;  %11409 = vmatpush3.bf16.msra.mxu1 %v17141_v30 }
 0x25d   : > { %11410 = vmatprep.subr.bf16.mxu1 %v17141_v30 }
 0x25f   : > { %9957 = vmatmul.mubr.msk.f32.gmra.mrb[60].mxu1 %vm460_vm0, %v13954_v48  ;;  %v2191_v48 = vld [vmem:[%s14430_s14 + $0x20] sm:$0xff] }
 0x260   : > { %9959 = vmatprep.mubr.msk.f32.mxu1 %vm460_vm0, %v13972_v11  ;;  %11411 = vmatpush3.bf16.msra.mxu1 %v17141_v30 }
 0x261   : > { %11412 = vmatprep.subr.bf16.mxu1 %v17141_v30 }
 0x263   : > { %9960 = vmatmul.mubr.msk.f32.gmra.mrb[62].mxu1 %vm460_vm0, %v13968_v13 }
 0x264   : > { %9962 = vmatprep.mubr.msk.f32.mxu1 %vm460_vm0, %v13986_v25  ;;  %11413 = vmatpush3.bf16.msra.mxu1 %v17141_v30  ;;  %v2188_v25 = vld [vmem:[%s14430_s14 + $0x8] sm:$0xff] }
 0x265   : > { %11414 = vmatprep.subr.bf16.mxu1 %v17141_v30 }
 0x267   : > { %9963 = vmatmul.mubr.msk.f32.gmra.mrb[64].mxu1 %vm460_vm0, %v13982_v10 }
 0x268   : > { %9965 = vmatprep.mubr.msk.f32.mxu1 %vm460_vm0, %v14000_v6  ;;  %11415 = vmatpush3.bf16.msra.mxu1 %v17141_v30 }
 0x269   : > { %11416 = vmatprep.subr.bf16.mxu1 %v17141_v30 }
 0x26b   : > { %9966 = vmatmul.mubr.msk.f32.gmra.mrb[66].mxu1 %vm460_vm0, %v13996_v18 }
 0x26c   : > { %9968 = vmatprep.mubr.msk.f32.mxu1 %vm460_vm0, %v14014_v56  ;;  %11417 = vmatpush3.bf16.msra.mxu1 %v17141_v30  ;;  %v2189_v56 = vld [vmem:[%s14430_s14 + $0x10] sm:$0xff] }
 0x26d   : > { %11418 = vmatprep.subr.bf16.mxu1 %v17141_v30 }
 0x26f   : > { %9969 = vmatmul.mubr.msk.f32.gmra.mrb[68].mxu1 %vm460_vm0, %v14010_v26  ;;  %v2192_v26 = vld [vmem:[%s14430_s14 + $0x28] sm:$0xff] }
 0x270   : > { %9971 = vmatprep.mubr.msk.f32.mxu1 %vm460_vm0, %v14028_v21  ;;  %11419 = vmatpush3.bf16.msra.mxu1 %v17141_v30 }
 0x271   : > { %11420 = vmatprep.subr.bf16.mxu1 %v17141_v30 }
 0x273   : > { %9972 = vmatmul.mubr.msk.f32.gmra.mrb[70].mxu1 %vm460_vm0, %v14024_v34 }
 0x274   : > { %11421 = vmatpush3.bf16.msra.mxu1 %v17141_v30 }
 0x275   : > { %11456 = vmatprep.subr.msk.bf16.mxu1 %vm14251_vm1, %v14264_v16 }
 0x32a   : > { %v9952_v35 = vpop.f32.mrb[56].mxu1 }
 0x32b   : > { %v2365_v39 = vpop.f32.mrb[57].mxu1  ;;  %v14438_v11 = vadd.f32 %v9952_v35, %v2188_v25  ;;  %v2198_v35 = vld [vmem:[%s14430_s14 + $0x58] sm:$0xff] }
 0x32c   : > { %v14433_v55 = vadd.f32 %v2365_v39, %v2187_v51  ;;  %v2199_v51 = vld [vmem:[%s14430_s14 + $0x60] sm:$0xff] }
 0x32e   : > { %v9955_v21 = vpop.f32.mrb[58].mxu1  ;;  %2444 = vmax.xlane.f32.xlu0 %v14433_v55 }
 0x32f   : > { %v2375_v6 = vpop.f32.mrb[59].mxu1  ;;  %v14443_v13 = vadd.f32 %v9955_v21, %v2190_v40  ;;  %v2201_v40 = vld [vmem:[%s14430_s14 + $0x70] sm:$0xff] }
 0x330   : > { %v2376_v61 = vadd.f32 %v2375_v6, %v2189_v56  ;;  %v2200_v56 = vld [vmem:[%s14430_s14 + $0x68] sm:$0xff] }
 0x332   : > { %v9958_v8 = vpop.f32.mrb[60].mxu1  ;;  %2448 = vmax.xlane.f32.xlu1 %v2376_v61  ;;  %2446 = vmax.xlane.f32.xlu0 %v14438_v11 }
 0x333   : > { %v2385_v2 = vpop.f32.mrb[61].mxu1  ;;  %v14451_v59 = vadd.f32 %v9958_v8, %v2192_v26 }
 0x334   : > { %v14445_v10 = vadd.f32 %v2385_v2, %v2191_v48 }
 0x336   : > { %v9961_v18 = vpop.f32.mrb[62].mxu1  ;;  %2450 = vmax.xlane.f32.xlu1 %v14443_v13  ;;  %2452 = vmax.xlane.f32.xlu0 %v14445_v10 }
 0x337   : > { %v2395_v34 = vpop.f32.mrb[63].mxu1  ;;  %v14459_v47 = vadd.f32 %v9961_v18, %v2194_v1  ;;  %v2202_v18 = vld [vmem:[%s14430_s14 + $0x78] sm:$0xff] }
 0x338   : > { %v14453_v36 = vadd.f32 %v2395_v34, %v2193_v20 }
 0x33a   : > { %v9964_v38 = vpop.f32.mrb[64].mxu1  ;;  %2454 = vmax.xlane.f32.xlu1 %v14451_v59  ;;  %2456 = vmax.xlane.f32.xlu0 %v14453_v36 }
 0x33b   : > { %v2405_v46 = vpop.f32.mrb[65].mxu1  ;;  %v14467_v23 = vadd.f32 %v9964_v38, %v2196_v24 }
 0x33c   : > { %v14461_v31 = vadd.f32 %v2405_v46, %v2195_v41 }
 0x33e   : > { %v9967_v7 = vpop.f32.mrb[66].mxu1  ;;  %2458 = vmax.xlane.f32.xlu1 %v14459_v47  ;;  %2460 = vmax.xlane.f32.xlu0 %v14461_v31 }
 0x33f   : > { %v2415_v33 = vpop.f32.mrb[67].mxu1  ;;  %v14475_v21 = vadd.f32 %v9967_v7, %v2198_v35 }
 0x340   : > { %v14469_v52 = vadd.f32 %v2415_v33, %v2197_v3 }
 0x342   : > { %v9970_v57 = vpop.f32.mrb[68].mxu1  ;;  %2462 = vmax.xlane.f32.xlu1 %v14467_v23  ;;  %2464 = vmax.xlane.f32.xlu0 %v14469_v52 }
 0x343   : > { %v2425_v39 = vpop.f32.mrb[69].mxu1  ;;  %v14483_v2 = vadd.f32 %v9970_v57, %v2200_v56 }
 0x344   : > { %v14477_v25 = vadd.f32 %v2425_v39, %v2199_v51 }
 0x346   : > { %v9973_v6 = vpop.f32.mrb[70].mxu1  ;;  %2466 = vmax.xlane.f32.xlu1 %v14475_v21  ;;  %2468 = vmax.xlane.f32.xlu0 %v14477_v25 }
 0x347   : > { %v2435_v8 = vpop.f32.mrb[71].mxu1  ;;  %v14490_v26 = vadd.f32 %v9973_v6, %v2202_v18 }
 0x348   : > { %v14485_v48 = vadd.f32 %v2435_v8, %v2201_v40 }
 0x34a   : > { %2470 = vmax.xlane.f32.xlu1 %v14483_v2  ;;  %2472 = vmax.xlane.f32.xlu0 %v14485_v48 }
 0x34e   : > { %2474 = vmax.xlane.f32.xlu1 %v14490_v26 }
 0x3bb   : > { %v2445_v34 = vpop.xlane.xlu0 %2444 }
 0x3bc   : > { %v2476_v20 = vsub.f32 %v14433_v55, %v2445_v34 }
 0x3be   : > { %v2492_v38 = vmul.f32 1.442695, %v2476_v20 }
 0x3bf   : > { %v2449_v1 = vpop.xlane.xlu1 %2448  ;;  %v2447_v46 = vpop.xlane.xlu0 %2446 }
 0x3c0   : > { %12280 = vpow2.f32 %v2492_v38  ;;  %v2478_v41 = vsub.f32 %v2376_v61, %v2449_v1  ;;  %v2477_v7 = vsub.f32 %v14438_v11, %v2447_v46 }
 0x3c2   : > { %v2496_v24 = vmul.f32 1.442695, %v2478_v41  ;;  %v2494_v33 = vmul.f32 1.442695, %v2477_v7 }
 0x3c3   : > { %v2451_v3 = vpop.xlane.xlu1 %2450  ;;  %v2453_v57 = vpop.xlane.xlu0 %2452 }
 0x3c4   : > { %12282 = vpow2.f32 %v2496_v24  ;;  %v2479_v35 = vsub.f32 %v14443_v13, %v2451_v3  ;;  %v2480_v39 = vsub.f32 %v14445_v10, %v2453_v57 }
 0x3c5   : > { %12284 = vpow2.f32 %v2494_v33 }
 0x3c6   : > { %v2498_v51 = vmul.f32 1.442695, %v2479_v35  ;;  %v2500_v6 = vmul.f32 1.442695, %v2480_v39 }
 0x3c7   : > { %v2455_v55 = vpop.xlane.xlu1 %2454  ;;  %v2457_v56 = vpop.xlane.xlu0 %2456 }
 0x3c8   : > { %12286 = vpow2.f32 %v2498_v51  ;;  %v2481_v8 = vsub.f32 %v14451_v59, %v2455_v55  ;;  %v2482_v61 = vsub.f32 %v14453_v36, %v2457_v56 }
 0x3c9   : > { %12288 = vpow2.f32 %v2500_v6 }
 0x3ca   : > { %v12281_v11 = vpop.eup %12280  ;;  %v2502_v40 = vmul.f32 1.442695, %v2481_v8  ;;  %v2504_v18 = vmul.f32 1.442695, %v2482_v61 }
 0x3cb   : > { %v2459_v34 = vpop.xlane.xlu1 %2458  ;;  %10006 = vmatprep.mubr.f32.mxu1 %v12281_v11  ;;  %10062 = vmatprep.mubr.f32.mxu0 %v12281_v11  ;;  %v2461_v13 = vpop.xlane.xlu0 %2460 }
 0x3cc   : > { %12290 = vpow2.f32 %v2502_v40  ;;  %v2483_v10 = vsub.f32 %v14459_v47, %v2459_v34  ;;  %v2484_v20 = vsub.f32 %v14461_v31, %v2461_v13 }
 0x3cd   : > { %12292 = vpow2.f32 %v2504_v18 }
 0x3ce   : > { %v12283_v38 = vpop.eup %12282  ;;  %v2506_v1 = vmul.f32 1.442695, %v2483_v10  ;;  %v2508_v46 = vmul.f32 1.442695, %v2484_v20 }
 0x3cf   : > { %v12285_v59 = vpop.eup %12284  ;;  %v2463_v41 = vpop.xlane.xlu1 %2462 }
 0x3d0   : > { %v2465_v36 = vpop.xlane.xlu0 %2464  ;;  %12294 = vpow2.f32 %v2506_v1  ;;  %v2485_v7 = vsub.f32 %v14467_v23, %v2463_v41  ;;  %10007 = vmatmul.mubr.f32.vlgmr.msra.gmra.mrb[72].mxu1 %v12285_v59  ;;  %10063 = vmatmul.mubr.f32.vlgmr.msra.gmra.mrb[104].mxu0 %v12285_v59  ;;  %v12792_v59 = vld [vmem:[%s16824_s7 + $0x1] ss:$0 sm:$0xff] }
 0x3d1   : > { %v2486_v24 = vsub.f32 %v14469_v52, %v2465_v36  ;;  %12296 = vpow2.f32 %v2508_v46  ;;  %11459 = vmatpush3.bf16.xpose.msk.msra.mxu1 %vm14251_vm1, %v14264_v16  ;;  %11503 = vmatpush3.bf16.msra.mxu0 %v17141_v30  ;;  %v2888_v41 = vmul.f32 %v12792_v59, %v13922_v32  ;;  %v17142_v36 = vld [vmem:[#allocation37_spill] sm:$0xff] }
 0x3d2   : > { %v12287_v47 = vpop.eup %12286  ;;  %v2510_v31 = vmul.f32 1.442695, %v2485_v7  ;;  %10009 = vmatprep.mubr.f32.mxu1 %v12283_v38  ;;  %10065 = vmatprep.mubr.f32.mxu0 %v12283_v38  ;;  %v2889_v7 = vmul.f32 %v12792_v59, %v13919_v0 }
 0x3d3   : > { %v2512_v33 = vmul.f32 1.442695, %v2486_v24  ;;  %v12289_v3 = vpop.eup %12288  ;;  %11462 = vmatprep.subr.msk.bf16.mxu1 %vm14251_vm1, %v14277_v50  ;;  %11504 = vmatprep.subr.bf16.mxu0 %v17141_v30  ;;  %v2467_v23 = vpop.xlane.xlu1 %2466  ;;  %v2890_v24 = vmul.f32 %v12792_v59, %v13935_v29 }
 0x3d4   : > { %v2469_v52 = vpop.xlane.xlu0 %2468  ;;  %12298 = vpow2.f32 %v2510_v31  ;;  %v2487_v57 = vsub.f32 %v14475_v21, %v2467_v23  ;;  %10010 = vmatmul.mubr.f32.gmra.mrb[74].mxu1 %v12287_v47  ;;  %10066 = vmatmul.mubr.f32.gmra.mrb[106].mxu0 %v12287_v47  ;;  %v2891_v47 = vmul.f32 %v12792_v59, %v13932_v60  ;;  %v2892_v31 = vmul.f32 %v12792_v59, %v13950_v14 }
 0x3d5   : > { %v2488_v35 = vsub.f32 %v14477_v25, %v2469_v52  ;;  %12300 = vpow2.f32 %v2512_v33  ;;  %11505 = vmatpush3.bf16.msra.mxu0 %v17141_v30  ;;  %10012 = vmatprep.mubr.f32.mxu1 %v12289_v3  ;;  %v2893_v33 = vmul.f32 %v12792_v59, %v13947_v4  ;;  %v2895_v23 = vmul.f32 %v12792_v59, %v13961_v43 }
 0x3d6   : > { %v12291_v39 = vpop.eup %12290  ;;  %v2514_v51 = vmul.f32 1.442695, %v2487_v57  ;;  %10068 = vmatprep.mubr.f32.mxu0 %v12289_v3  ;;  %11506 = vmatprep.subr.bf16.mxu0 %v17141_v30  ;;  %v2894_v3 = vmul.f32 %v12792_v59, %v13964_v22  ;;  %v2896_v52 = vmul.f32 %v12792_v59, %v13978_v49  ;;  %v2897_v57 = vmul.f32 %v12792_v59, %v13975_v58 }
 0x3d7   : > { %v2516_v6 = vmul.f32 1.442695, %v2488_v35  ;;  %v12293_v55 = vpop.eup %12292  ;;  %v2471_v56 = vpop.xlane.xlu1 %2470  ;;  %v2898_v35 = vmul.f32 %v12792_v59, %v13992_v9 }
 0x3d8   : > { %v2473_v8 = vpop.xlane.xlu0 %2472  ;;  %12302 = vpow2.f32 %v2514_v51  ;;  %v2489_v21 = vsub.f32 %v14483_v2, %v2471_v56  ;;  %10013 = vmatmul.mubr.f32.gmra.mrb[76].mxu1 %v12291_v39  ;;  %10069 = vmatmul.mubr.f32.gmra.mrb[108].mxu0 %v12291_v39  ;;  %v2899_v39 = vmul.f32 %v12792_v59, %v13989_v5  ;;  %v2900_v51 = vmul.f32 %v12792_v59, %v14006_v12  ;;  %v17144_v56 = vld [vmem:[#allocation95_spill] sm:$0xff] }
 0x3d9   : > { %v2490_v25 = vsub.f32 %v14485_v48, %v2473_v8  ;;  %12304 = vpow2.f32 %v2516_v6  ;;  %11465 = vmatpush3.bf16.xpose.msk.msra.mxu1 %vm14251_vm1, %v14277_v50  ;;  %11507 = vmatpush3.bf16.msra.mxu0 %v17141_v30  ;;  %v17143_v6 = vld [vmem:[#allocation93_spill] sm:$0xff]  ;;  %v2902_v8 = vmul.f32 %v12792_v59, %v17144_v56 }
 0x3da   : > { %v12295_v61 = vpop.eup %12294  ;;  %v2518_v11 = vmul.f32 1.442695, %v2489_v21  ;;  %10015 = vmatprep.mubr.f32.mxu1 %v12293_v55  ;;  %10071 = vmatprep.mubr.f32.mxu0 %v12293_v55  ;;  %v2901_v55 = vmul.f32 %v12792_v59, %v17143_v6  ;;  %v17145_v21 = vld [vmem:[#allocation94_spill] sm:$0xff] }
 0x3db   : > { %v2520_v40 = vmul.f32 1.442695, %v2490_v25  ;;  %v12297_v18 = vpop.eup %12296  ;;  %11468 = vmatprep.subr.msk.bf16.mxu1 %vm14251_vm1, %v14284_v45  ;;  %11508 = vmatprep.subr.bf16.mxu0 %v17141_v30  ;;  %v2475_v2 = vpop.xlane.xlu1 %2474  ;;  %v2903_v25 = vmul.f32 %v12792_v59, %v17145_v21  ;;  %v12794_v59 = vld [vmem:[%s16824_s7 + $0x3] ss:$0 sm:$0xff] }
 0x3dc   : > { %12306 = vpow2.f32 %v2518_v11  ;;  %v2491_v48 = vsub.f32 %v14490_v26, %v2475_v2  ;;  %10016 = vmatmul.mubr.f32.gmra.mrb[78].mxu1 %v12295_v61  ;;  %10072 = vmatmul.mubr.f32.gmra.mrb[110].mxu0 %v12295_v61  ;;  %v12793_v61 = vld [vmem:[%s16824_s7 + $0x2] ss:$0 sm:$0xff] }
 0x3dd   : > { %12308 = vpow2.f32 %v2520_v40  ;;  %11509 = vmatpush3.bf16.msra.mxu0 %v17141_v30  ;;  %10018 = vmatprep.mubr.f32.mxu1 %v12297_v18  ;;  %v3560_v11 = vmul.f32 %v12793_v61, %v13922_v32  ;;  %v3561_v40 = vmul.f32 %v12793_v61, %v13919_v0  ;;  %v3563_v2 = vmul.f32 %v12793_v61, %v13932_v60 }
 0x3de   : > { %v12299_v34 = vpop.eup %12298  ;;  %v2522_v13 = vmul.f32 1.442695, %v2491_v48  ;;  %10074 = vmatprep.mubr.f32.mxu0 %v12297_v18  ;;  %11510 = vmatprep.subr.bf16.mxu0 %v17141_v30  ;;  %v3562_v18 = vmul.f32 %v12793_v61, %v13935_v29  ;;  %v3564_v48 = vmul.f32 %v12793_v61, %v13950_v14 }
 0x3df   : > { %v12301_v10 = vpop.eup %12300 }
 0x3e0   : > { %12310 = vpow2.f32 %v2522_v13  ;;  %10019 = vmatmul.mubr.f32.gmra.mrb[80].mxu1 %v12299_v34  ;;  %10075 = vmatmul.mubr.f32.gmra.mrb[112].mxu0 %v12299_v34  ;;  %v3565_v34 = vmul.f32 %v12793_v61, %v13947_v4  ;;  %v3566_v13 = vmul.f32 %v12793_v61, %v13964_v22 }
 0x3e1   : > { %11471 = vmatpush3.bf16.xpose.msk.msra.mxu1 %vm14251_vm1, %v14284_v45  ;;  %11511 = vmatpush3.bf16.msra.mxu0 %v17141_v30 }
 0x3e2   : > { %v12303_v26 = vpop.eup %12302  ;;  %10021 = vmatprep.mubr.f32.mxu1 %v12301_v10  ;;  %10077 = vmatprep.mubr.f32.mxu0 %v12301_v10  ;;  %v3568_v10 = vmul.f32 %v12793_v61, %v13978_v49 }
 0x3e3   : > { %v12305_v20 = vpop.eup %12304  ;;  %11474 = vmatprep.subr.msk.bf16.mxu1 %vm14251_vm1, %v14291_v37  ;;  %11512 = vmatprep.subr.bf16.mxu0 %v17141_v30 }
 0x3e4   : > { %10022 = vmatmul.mubr.f32.gmra.mrb[82].mxu1 %v12303_v26  ;;  %10078 = vmatmul.mubr.f32.gmra.mrb[114].mxu0 %v12303_v26  ;;  %v3569_v26 = vmul.f32 %v12793_v61, %v13975_v58 }
 0x3e5   : > { %11513 = vmatpush3.bf16.msra.mxu0 %v17141_v30  ;;  %10024 = vmatprep.mubr.f32.mxu1 %v12305_v20 }
 0x3e6   : > { %v12307_v38 = vpop.eup %12306  ;;  %10080 = vmatprep.mubr.f32.mxu0 %v12305_v20  ;;  %11514 = vmatprep.subr.bf16.mxu0 %v17141_v30  ;;  %v3570_v20 = vmul.f32 %v12793_v61, %v13992_v9 }
 0x3e7   : > { %v12309_v1 = vpop.eup %12308 }
 0x3e8   : > { %10025 = vmatmul.mubr.f32.gmra.mrb[84].mxu1 %v12307_v38  ;;  %10081 = vmatmul.mubr.f32.gmra.mrb[116].mxu0 %v12307_v38  ;;  %v3572_v38 = vmul.f32 %v12793_v61, %v14006_v12 }
 0x3e9   : > { %11477 = vmatpush3.bf16.xpose.msk.msra.mxu1 %vm14251_vm1, %v14291_v37  ;;  %11515 = vmatpush3.bf16.msra.mxu0 %v17141_v30 }
 0x3ea   : > { %v12311_v46 = vpop.eup %12310  ;;  %10027 = vmatprep.mubr.f32.mxu1 %v12309_v1  ;;  %10083 = vmatprep.mubr.f32.mxu0 %v12309_v1  ;;  %v3573_v1 = vmul.f32 %v12793_v61, %v17143_v6 }
 0x3eb   : > { %11480 = vmatprep.subr.msk.bf16.mxu1 %vm14251_vm1, %v14298_v42  ;;  %11516 = vmatprep.subr.bf16.mxu0 %v17141_v30 }
 0x3ec   : > { %10028 = vmatmul.mubr.f32.gmra.mrb[86].mxu1 %v12311_v46  ;;  %10084 = vmatmul.mubr.f32.gmra.mrb[118].mxu0 %v12311_v46  ;;  %v3574_v46 = vmul.f32 %v12793_v61, %v17144_v56 }
 0x3ed   : > { %11517 = vmatpush3.bf16.msra.mxu0 %v17141_v30  ;;  %10118 = vmatprep.mubr.msk.f32.mxu1 %vm460_vm0, %v2888_v41  ;;  %v4232_v41 = vmul.f32 %v12794_v59, %v13922_v32  ;;  %v17146_v32 = vld [vmem:[#allocation31_spill] sm:$0xff] }
 0x3ee   : > { %11519 = vmatprep.subr.bf16.mxu0 %v17142_v36 }
 0x3f1   : > { %11483 = vmatpush3.bf16.xpose.msk.msra.mxu1 %vm14251_vm1, %v14298_v42 }
 0x3f2   : > { %11486 = vmatprep.subr.msk.bf16.mxu1 %vm14251_vm1, %v14305_v54 }
 0x3f9   : > { %11489 = vmatpush3.bf16.xpose.msk.msra.mxu1 %vm14251_vm1, %v14305_v54 }
 0x3fa   : > { %11492 = vmatprep.subr.msk.bf16.mxu1 %vm14251_vm1, %v14312_v27 }
 0x401   : > { %11495 = vmatpush3.bf16.xpose.msk.msra.mxu1 %vm14251_vm1, %v14312_v27 }
 0x402   : > { %11498 = vmatprep.subr.msk.bf16.mxu1 %vm14251_vm1, %v14319_v15 }
 0x409   : > { %11501 = vmatpush3.bf16.xpose.msk.msra.mxu1 %vm14251_vm1, %v14319_v15 }
 0x40a   : > { %11552 = vmatprep.subr.msk.bf16.mxu1 %vm14251_vm1, %v14264_v16 }
 0x410   : > { %10119 = vmatmul.mubr.msk.f32.vlgmr.msra.gmra.mrb[88].mxu1 %vm460_vm0, %v2889_v7 }
 0x411   : > { %10121 = vmatprep.mubr.msk.f32.mxu1 %vm460_vm0, %v2890_v24  ;;  %11555 = vmatpush3.bf16.xpose.msk.msra.mxu1 %vm14251_vm1, %v14264_v16 }
 0x412   : > { %11558 = vmatprep.subr.msk.bf16.mxu1 %vm14251_vm1, %v14277_v50 }
 0x414   : > { %10122 = vmatmul.mubr.msk.f32.gmra.mrb[90].mxu1 %vm460_vm0, %v2891_v47  ;;  %v4245_v47 = vmul.f32 %v12794_v59, %v17143_v6 }
 0x415   : > { %10124 = vmatprep.mubr.msk.f32.mxu1 %vm460_vm0, %v2892_v31 }
 0x418   : > { %10125 = vmatmul.mubr.msk.f32.gmra.mrb[92].mxu1 %vm460_vm0, %v2893_v33 }
 0x419   : > { %10127 = vmatprep.mubr.msk.f32.mxu1 %vm460_vm0, %v2894_v3  ;;  %11561 = vmatpush3.bf16.xpose.msk.msra.mxu1 %vm14251_vm1, %v14277_v50  ;;  %v4246_v3 = vmul.f32 %v12794_v59, %v17144_v56 }
 0x41a   : > { %11564 = vmatprep.subr.msk.bf16.mxu1 %vm14251_vm1, %v14284_v45 }
 0x41c   : > { %10128 = vmatmul.mubr.msk.f32.gmra.mrb[94].mxu1 %vm460_vm0, %v2895_v23 }
 0x41d   : > { %10130 = vmatprep.mubr.msk.f32.mxu1 %vm460_vm0, %v2896_v52 }
 0x420   : > { %10131 = vmatmul.mubr.msk.f32.gmra.mrb[96].mxu1 %vm460_vm0, %v2897_v57 }
 0x421   : > { %10133 = vmatprep.mubr.msk.f32.mxu1 %vm460_vm0, %v2898_v35  ;;  %11567 = vmatpush3.bf16.xpose.msk.msra.mxu1 %vm14251_vm1, %v14284_v45 }
 0x422   : > { %11570 = vmatprep.subr.msk.bf16.mxu1 %vm14251_vm1, %v14291_v37 }
 0x424   : > { %10134 = vmatmul.mubr.msk.f32.gmra.mrb[98].mxu1 %vm460_vm0, %v2899_v39 }
 0x425   : > { %10136 = vmatprep.mubr.msk.f32.mxu1 %vm460_vm0, %v2900_v51  ;;  %v17148_v51 = vld [vmem:[#allocation99_spill] sm:$0xff] }
 0x428   : > { %10137 = vmatmul.mubr.msk.f32.gmra.mrb[100].mxu1 %vm460_vm0, %v2901_v55 }
 0x429   : > { %10139 = vmatprep.mubr.msk.f32.mxu1 %vm460_vm0, %v2902_v8  ;;  %11573 = vmatpush3.bf16.xpose.msk.msra.mxu1 %vm14251_vm1, %v14291_v37 }
 0x42a   : > { %11576 = vmatprep.subr.msk.bf16.mxu1 %vm14251_vm1, %v14298_v42 }
 0x42c   : > { %10140 = vmatmul.mubr.msk.f32.gmra.mrb[102].mxu1 %vm460_vm0, %v2903_v25 }
 0x42d   : > { %10286 = vmatprep.mubr.msk.f32.mxu1 %vm460_vm0, %v3560_v11 }
 0x431   : > { %11579 = vmatpush3.bf16.xpose.msk.msra.mxu1 %vm14251_vm1, %v14298_v42 }
 0x432   : > { %11582 = vmatprep.subr.msk.bf16.mxu1 %vm14251_vm1, %v14305_v54 }
 0x439   : > { %11585 = vmatpush3.bf16.xpose.msk.msra.mxu1 %vm14251_vm1, %v14305_v54 }
 0x43a   : > { %11588 = vmatprep.subr.msk.bf16.mxu1 %vm14251_vm1, %v14312_v27 }
 0x441   : > { %11591 = vmatpush3.bf16.xpose.msk.msra.mxu1 %vm14251_vm1, %v14312_v27 }
 0x442   : > { %11594 = vmatprep.subr.msk.bf16.mxu1 %vm14251_vm1, %v14319_v15 }
 0x449   : > { %11597 = vmatpush3.bf16.xpose.msk.msra.mxu1 %vm14251_vm1, %v14319_v15 }
 0x44a   : > { %11648 = vmatprep.subr.msk.bf16.mxu1 %vm14251_vm1, %v14264_v16 }
 0x450   : > { %10287 = vmatmul.mubr.msk.f32.vlgmr.msra.gmra.mrb[104].mxu1 %vm460_vm0, %v3561_v40 }
 0x451   : > { %10289 = vmatprep.mubr.msk.f32.mxu1 %vm460_vm0, %v3562_v18  ;;  %11651 = vmatpush3.bf16.xpose.msk.msra.mxu1 %vm14251_vm1, %v14264_v16  ;;  %v3567_v16 = vmul.f32 %v12793_v61, %v13961_v43 }
 0x452   : > { %11654 = vmatprep.subr.msk.bf16.mxu1 %vm14251_vm1, %v14277_v50 }
 0x454   : > { %10290 = vmatmul.mubr.msk.f32.gmra.mrb[106].mxu1 %vm460_vm0, %v3563_v2 }
 0x455   : > { %10292 = vmatprep.mubr.msk.f32.mxu1 %vm460_vm0, %v3564_v48 }
 0x458   : > { %10293 = vmatmul.mubr.msk.f32.gmra.mrb[108].mxu1 %vm460_vm0, %v3565_v34 }
 0x459   : > { %10295 = vmatprep.mubr.msk.f32.mxu1 %vm460_vm0, %v3566_v13  ;;  %11657 = vmatpush3.bf16.xpose.msk.msra.mxu1 %vm14251_vm1, %v14277_v50  ;;  %v3571_v50 = vmul.f32 %v12793_v61, %v13989_v5 }
 0x45a   : > { %11660 = vmatprep.subr.msk.bf16.mxu1 %vm14251_vm1, %v14284_v45 }
 0x45c   : > { %10296 = vmatmul.mubr.msk.f32.gmra.mrb[110].mxu1 %vm460_vm0, %v3567_v16 }
 0x45d   : > { %10298 = vmatprep.mubr.msk.f32.mxu1 %vm460_vm0, %v3568_v10 }
 0x460   : > { %10299 = vmatmul.mubr.msk.f32.gmra.mrb[112].mxu1 %vm460_vm0, %v3569_v26 }
 0x461   : > { %10301 = vmatprep.mubr.msk.f32.mxu1 %vm460_vm0, %v3570_v20  ;;  %11663 = vmatpush3.bf16.xpose.msk.msra.mxu1 %vm14251_vm1, %v14284_v45  ;;  %v3575_v45 = vmul.f32 %v12793_v61, %v17145_v21 }
 0x462   : > { %11666 = vmatprep.subr.msk.bf16.mxu1 %vm14251_vm1, %v14291_v37 }
 0x464   : > { %10302 = vmatmul.mubr.msk.f32.gmra.mrb[114].mxu1 %vm460_vm0, %v3571_v50 }
 0x465   : > { %10304 = vmatprep.mubr.msk.f32.mxu1 %vm460_vm0, %v3572_v38 }
 0x468   : > { %10305 = vmatmul.mubr.msk.f32.gmra.mrb[116].mxu1 %vm460_vm0, %v3573_v1 }
 0x469   : > { %10307 = vmatprep.mubr.msk.f32.mxu1 %vm460_vm0, %v3574_v46  ;;  %11669 = vmatpush3.bf16.xpose.msk.msra.mxu1 %vm14251_vm1, %v14291_v37  ;;  %v4233_v37 = vmul.f32 %v12794_v59, %v13919_v0  ;;  %v4237_v0 = vmul.f32 %v12794_v59, %v13947_v4  ;;  %v4241_v4 = vmul.f32 %v12794_v59, %v13975_v58 }
 0x46a   : > { %11672 = vmatprep.subr.msk.bf16.mxu1 %vm14251_vm1, %v14298_v42  ;;  %v4244_v58 = vmul.f32 %v12794_v59, %v14006_v12  ;;  %v4247_v12 = vmul.f32 %v12794_v59, %v17145_v21 }
 0x46c   : > { %10308 = vmatmul.mubr.msk.f32.gmra.mrb[118].mxu1 %vm460_vm0, %v3575_v45 }
 0x46d   : > { %10454 = vmatprep.mubr.msk.f32.mxu1 %vm460_vm0, %v4232_v41 }
 0x471   : > { %11675 = vmatpush3.bf16.xpose.msk.msra.mxu1 %vm14251_vm1, %v14298_v42  ;;  %v4234_v42 = vmul.f32 %v12794_v59, %v13935_v29  ;;  %v4238_v29 = vmul.f32 %v12794_v59, %v13964_v22  ;;  %v4242_v22 = vmul.f32 %v12794_v59, %v13992_v9 }
 0x472   : > { %11678 = vmatprep.subr.msk.bf16.mxu1 %vm14251_vm1, %v14305_v54 }
 0x479   : > { %11681 = vmatpush3.bf16.xpose.msk.msra.mxu1 %vm14251_vm1, %v14305_v54  ;;  %v17147_v54 = vld [vmem:[#allocation32_spill] sm:$0xff] }
 0x47a   : > { %11684 = vmatprep.subr.msk.bf16.mxu1 %vm14251_vm1, %v14312_v27 }
 0x481   : > { %11687 = vmatpush3.bf16.xpose.msk.msra.mxu1 %vm14251_vm1, %v14312_v27  ;;  %v4235_v27 = vmul.f32 %v12794_v59, %v13932_v60  ;;  %v4239_v60 = vmul.f32 %v12794_v59, %v13961_v43  ;;  %v4243_v43 = vmul.f32 %v12794_v59, %v13989_v5 }
 0x482   : > { %11690 = vmatprep.subr.msk.bf16.mxu1 %vm14251_vm1, %v14319_v15 }
 0x489   : > { %11693 = vmatpush3.bf16.xpose.msk.msra.mxu1 %vm14251_vm1, %v14319_v15  ;;  %v4236_v15 = vmul.f32 %v12794_v59, %v13950_v14  ;;  %v4240_v14 = vmul.f32 %v12794_v59, %v13978_v49 }
 0x48a   : > { %11744 = vmatprep.subr.msk.bf16.mxu1 %vm14251_vm1, %v17146_v32 }
 0x490   : > { %10455 = vmatmul.mubr.msk.f32.vlgmr.msra.gmra.mrb[120].mxu1 %vm460_vm0, %v4233_v37 }
 0x491   : > { %10457 = vmatprep.mubr.msk.f32.mxu1 %vm460_vm0, %v4234_v42  ;;  %11747 = vmatpush3.bf16.xpose.msk.msra.mxu1 %vm14251_vm1, %v17146_v32 }
 0x492   : > { %11750 = vmatprep.subr.msk.bf16.mxu1 %vm14251_vm1, %v17147_v54 }
 0x494   : > { %10458 = vmatmul.mubr.msk.f32.gmra.mrb[122].mxu1 %vm460_vm0, %v4235_v27 }
 0x495   : > { %10460 = vmatprep.mubr.msk.f32.mxu1 %vm460_vm0, %v4236_v15 }
 0x498   : > { %10461 = vmatmul.mubr.msk.f32.gmra.mrb[124].mxu1 %vm460_vm0, %v4237_v0 }
 0x499   : > { %10463 = vmatprep.mubr.msk.f32.mxu1 %vm460_vm0, %v4238_v29  ;;  %11753 = vmatpush3.bf16.xpose.msk.msra.mxu1 %vm14251_vm1, %v17147_v54 }
 0x49a   : > { %11756 = vmatprep.subr.msk.bf16.mxu1 %vm14251_vm1, %v14340_v44 }
 0x49c   : > { %10464 = vmatmul.mubr.msk.f32.gmra.mrb[126].mxu1 %vm460_vm0, %v4239_v60 }
 0x49d   : > { %10466 = vmatprep.mubr.msk.f32.mxu1 %vm460_vm0, %v4240_v14 }
 0x4a0   : > { %10467 = vmatmul.mubr.msk.f32.gmra.mrb[128].mxu1 %vm460_vm0, %v4241_v4 }
 0x4a1   : > { %10469 = vmatprep.mubr.msk.f32.mxu1 %vm460_vm0, %v4242_v22  ;;  %11759 = vmatpush3.bf16.xpose.msk.msra.mxu1 %vm14251_vm1, %v14340_v44 }
 0x4a2   : > { %11762 = vmatprep.subr.msk.bf16.mxu1 %vm14251_vm1, %v14347_v63 }
 0x4a3   : > { %v10008_v49 = vpop.f32.mrb[72].mxu1  ;;  %v10064_v7 = vpop.f32.mrb[104].mxu0 }
 0x4a4   : > { %12312 = vrcp.f32 %v10008_v49  ;;  %10470 = vmatmul.mubr.msk.f32.gmra.mrb[130].mxu1 %vm460_vm0, %v4243_v43  ;;  %v2590_v9 = vpop.f32.mrb[73].mxu1  ;;  %v2756_v24 = vpop.f32.mrb[105].mxu0 }
 0x4a5   : > { %12314 = vrcp.f32 %v2590_v9  ;;  %10472 = vmatprep.mubr.msk.f32.mxu1 %vm460_vm0, %v4244_v58 }
 0x4a7   : > { %v10011_v31 = vpop.f32.mrb[74].mxu1  ;;  %v10067_v33 = vpop.f32.mrb[106].mxu0 }
 0x4a8   : > { %12316 = vrcp.f32 %v10011_v31  ;;  %10473 = vmatmul.mubr.msk.f32.gmra.mrb[132].mxu1 %vm460_vm0, %v4245_v47  ;;  %v2600_v5 = vpop.f32.mrb[75].mxu1  ;;  %v2766_v23 = vpop.f32.mrb[107].mxu0 }
 0x4a9   : > { %12318 = vrcp.f32 %v2600_v5  ;;  %10475 = vmatprep.mubr.msk.f32.mxu1 %vm460_vm0, %v4246_v3  ;;  %11765 = vmatpush3.bf16.xpose.msk.msra.mxu1 %vm14251_vm1, %v14347_v63 }
 0x4aa   : > { %11768 = vmatprep.subr.msk.bf16.mxu1 %vm14251_vm1, %v14354_v53 }
 0x4ab   : > { %v10014_v52 = vpop.f32.mrb[76].mxu1  ;;  %v10070_v57 = vpop.f32.mrb[108].mxu0 }
 0x4ac   : > { %12320 = vrcp.f32 %v10014_v52  ;;  %10476 = vmatmul.mubr.msk.f32.gmra.mrb[134].mxu1 %vm460_vm0, %v4247_v12  ;;  %v2610_v35 = vpop.f32.mrb[77].mxu1  ;;  %v2776_v39 = vpop.f32.mrb[109].mxu0 }
 0x4ad   : > { %12322 = vrcp.f32 %v2610_v35  ;;  %10622 = vmatprep.mubr.msk.f32.mxu1 %vm460_vm0, %v17148_v51  ;;  %v17163_v51 = vld [vmem:[#allocation96_spill] sm:$0xff] }
 0x4ae   : > { %v12313_v6 = vpop.eup %12312 }
 0x4af   : > { %v12315_v55 = vpop.eup %12314  ;;  %v14799_v56 = vmul.f32 %v12313_v6, %v10064_v7  ;;  %v10017_v8 = vpop.f32.mrb[78].mxu1  ;;  %v17164_v6 = vld [vmem:[#allocation107_spill] sm:$0xff] }
 0x4b0   : > { %v10073_v25 = vpop.f32.mrb[110].mxu0  ;;  %v14801_v61 = vmul.f32 %v12315_v55, %v2756_v24  ;;  %12324 = vrcp.f32 %v10017_v8  ;;  %v2620_v21 = vpop.f32.mrb[79].mxu1  ;;  %v17165_v55 = vld [vmem:[#allocation104_spill] sm:$0xff]  ;;  %v17166_v8 = vld [vmem:[#allocation115_spill] sm:$0xff] }
 0x4b1   : > { %v2786_v11 = vpop.f32.mrb[111].mxu0  ;;  %12326 = vrcp.f32 %v2620_v21  ;;  %11771 = vmatpush3.bf16.xpose.msk.msra.mxu1 %vm14251_vm1, %v14354_v53  ;;  %v17168_v21 = vld [vmem:[#allocation121_spill] sm:$0xff] }
 0x4b2   : > { %v12317_v40 = vpop.eup %12316  ;;  %11774 = vmatprep.subr.msk.bf16.mxu1 %vm14251_vm1, %v14361_v17 }
 0x4b3   : > { %v12319_v18 = vpop.eup %12318  ;;  %v14809_v2 = vmul.f32 %v12317_v40, %v10067_v33  ;;  %v10020_v48 = vpop.f32.mrb[80].mxu1  ;;  %v17170_v40 = vld [vmem:[#allocation126_spill] sm:$0xff] }
 0x4b4   : > { %v10076_v34 = vpop.f32.mrb[112].mxu0  ;;  %v14811_v13 = vmul.f32 %v12319_v18, %v2766_v23  ;;  %12328 = vrcp.f32 %v10020_v48  ;;  %v2630_v16 = vpop.f32.mrb[81].mxu1  ;;  %v17171_v18 = vld [vmem:[#allocation22_spill] sm:$0xff]  ;;  %v17172_v48 = vld [vmem:[#allocation133_spill] sm:$0xff] }
 0x4b5   : > { %17149 = vst [vmem:[#allocation33_spill] sm:$0xff] %v14809_v2  ;;  %v2796_v10 = vpop.f32.mrb[113].mxu0  ;;  %12330 = vrcp.f32 %v2630_v16 }
 0x4b6   : > { %17150 = vst [vmem:[#allocation34_spill] sm:$0xff] %v14811_v13  ;;  %v12321_v26 = vpop.eup %12320 }
 0x4b7   : > { %v12323_v20 = vpop.eup %12322  ;;  %v14813_v50 = vmul.f32 %v12321_v26, %v10070_v57  ;;  %v10023_v38 = vpop.f32.mrb[82].mxu1 }
 0x4b8   : > { %v10079_v1 = vpop.f32.mrb[114].mxu0  ;;  %v14815_v46 = vmul.f32 %v12323_v20, %v2776_v39  ;;  %12332 = vrcp.f32 %v10023_v38  ;;  %v2640_v45 = vpop.f32.mrb[83].mxu1  ;;  %v8271_v20 = vld [vmem:[%s14430_s14 + $0x80] sm:$0xff] }
 0x4b9   : > { %17151 = vst [vmem:[#allocation35_spill] sm:$0xff] %v14813_v50  ;;  %v2806_v59 = vpop.f32.mrb[115].mxu0  ;;  %12334 = vrcp.f32 %v2640_v45  ;;  %11777 = vmatpush3.bf16.xpose.msk.msra.mxu1 %vm14251_vm1, %v14361_v17  ;;  %v17173_v38 = vld [vmem:[#allocation130_spill] sm:$0xff]  ;;  %v17174_v45 = vld [vmem:[#allocation139_spill] sm:$0xff]  ;;  %v8386_v50 = vld [vmem:[%s14430_s14 + $0x1d8] sm:$0xff] }
 0x4ba   : > { %17152 = vst [vmem:[#allocation36_spill] sm:$0xff] %v14815_v46  ;;  %v12325_v41 = vpop.eup %12324  ;;  %11780 = vmatprep.subr.msk.bf16.mxu1 %vm14251_vm1, %v14368_v19 }
 0x4bb   : > { %v12327_v37 = vpop.eup %12326  ;;  %v14823_v42 = vmul.f32 %v12325_v41, %v10073_v25  ;;  %v10026_v27 = vpop.f32.mrb[84].mxu1  ;;  %v17167_v25 = vld [vmem:[#allocation112_spill] sm:$0xff] }
 0x4bc   : > { %v10082_v15 = vpop.f32.mrb[116].mxu0  ;;  %v14825_v0 = vmul.f32 %v12327_v37, %v2786_v11  ;;  %12336 = vrcp.f32 %v10026_v27  ;;  %v2650_v29 = vpop.f32.mrb[85].mxu1  ;;  %v17169_v11 = vld [vmem:[#allocation20_spill] sm:$0xff] }
 0x4bd   : > { %17153 = vst [vmem:[#allocation2_spill] sm:$0xff] %v14823_v42  ;;  %v2816_v60 = vpop.f32.mrb[117].mxu0  ;;  %12338 = vrcp.f32 %v2650_v29  ;;  %v17175_v29 = vld [vmem:[#allocation26_spill] sm:$0xff] }
 0x4be   : > { %17154 = vst [vmem:[#allocation3_spill] sm:$0xff] %v14825_v0  ;;  %v12329_v14 = vpop.eup %12328 }
 0x4bf   : > { %v12331_v4 = vpop.eup %12330  ;;  %v14827_v22 = vmul.f32 %v12329_v14, %v10076_v34  ;;  %v10029_v43 = vpop.f32.mrb[86].mxu1  ;;  %v8272_v34 = vld [vmem:[%s14430_s14 + $0x88] sm:$0xff]  ;;  %v17176_v14 = vld [vmem:[#allocation30_spill] sm:$0xff] }
 0x4c0   : > { %v10085_v49 = vpop.f32.mrb[118].mxu0  ;;  %v14829_v7 = vmul.f32 %v12331_v4, %v2796_v10  ;;  %12340 = vrcp.f32 %v10029_v43  ;;  %v2660_v58 = vpop.f32.mrb[87].mxu1  ;;  %v8276_v4 = vld [vmem:[%s14430_s14 + $0xa8] sm:$0xff] }
 0x4c1   : > { %17155 = vst [vmem:[#allocation4_spill] sm:$0xff] %v14827_v22  ;;  %v2826_v9 = vpop.f32.mrb[119].mxu0  ;;  %12342 = vrcp.f32 %v2660_v58  ;;  %11783 = vmatpush3.bf16.xpose.msk.msra.mxu1 %vm14251_vm1, %v14368_v19 }
 0x4c2   : > { %17156 = vst [vmem:[#allocation5_spill] sm:$0xff] %v14829_v7  ;;  %v12333_v24 = vpop.eup %12332  ;;  %11786 = vmatprep.subr.msk.bf16.mxu1 %vm14251_vm1, %v14375_v28 }
 0x4c3   : > { %v12335_v47 = vpop.eup %12334  ;;  %v14837_v31 = vmul.f32 %v12333_v24, %v10079_v1  ;;  %v17177_v24 = vld [vmem:[#allocation28_spill] sm:$0xff] }
 0x4c4   : > { %v14839_v33 = vmul.f32 %v12335_v47, %v2806_v59  ;;  %v8274_v59 = vld [vmem:[%s14430_s14 + $0x98] sm:$0xff] }
 0x4c5   : > { %17157 = vst [vmem:[#allocation6_spill] sm:$0xff] %v14837_v31  ;;  %v8381_v31 = vld [vmem:[%s14430_s14 + $0x1b0] sm:$0xff] }
 0x4c6   : > { %17158 = vst [vmem:[#allocation7_spill] sm:$0xff] %v14839_v33  ;;  %v12337_v3 = vpop.eup %12336 }
 0x4c7   : > { %v12339_v5 = vpop.eup %12338  ;;  %v14841_v23 = vmul.f32 %v12337_v3, %v10082_v15  ;;  %v8273_v15 = vld [vmem:[%s14430_s14 + $0x90] sm:$0xff] }
 0x4c8   : > { %v14843_v12 = vmul.f32 %v12339_v5, %v2816_v60  ;;  %v17178_v3 = vld [vmem:[#allocation100_spill] sm:$0xff]  ;;  %v8278_v5 = vld [vmem:[%s14430_s14 + $0xb8] sm:$0xff] }
 0x4c9   : > { %17159 = vst [vmem:[#allocation8_spill] sm:$0xff] %v14841_v23  ;;  %11789 = vmatpush3.bf16.xpose.msk.msra.mxu1 %vm14251_vm1, %v14375_v28  ;;  %v17207_v23 = vld [vmem:[#allocation138_spill] sm:$0xff] }
 0x4ca   : > { %17160 = vst [vmem:[#allocation9_spill] sm:$0xff] %v14843_v12  ;;  %v12341_v52 = vpop.eup %12340  ;;  %11840 = vmatprep.subr.msk.bf16.mxu1 %vm14251_vm1, %v17146_v32 }
 0x4cb   : > { %v12343_v57 = vpop.eup %12342  ;;  %v14851_v35 = vmul.f32 %v12341_v52, %v10085_v49 }
 0x4cc   : > { %v14853_v39 = vmul.f32 %v12343_v57, %v2826_v9  ;;  %v8275_v9 = vld [vmem:[%s14430_s14 + $0xa0] sm:$0xff] }
 0x4cd   : > { %17161 = vst [vmem:[#allocation10_spill] sm:$0xff] %v14851_v35  ;;  %v8337_v35 = vld [vmem:[%s14430_s14 + $0x170] sm:$0xff] }
 0x4ce   : > { %17162 = vst [vmem:[#allocation11_spill] sm:$0xff] %v14853_v39 }
 0x4d0   : > { %10623 = vmatmul.mubr.msk.f32.vlgmr.msra.gmra.mrb[136].mxu1 %vm460_vm0, %v17163_v51 }
 0x4d1   : > { %10625 = vmatprep.mubr.msk.f32.mxu1 %vm460_vm0, %v17164_v6  ;;  %11843 = vmatpush3.bf16.xpose.msk.msra.mxu1 %vm14251_vm1, %v17146_v32  ;;  %v8277_v6 = vld [vmem:[%s14430_s14 + $0xb0] sm:$0xff] }
 0x4d2   : > { %11846 = vmatprep.subr.msk.bf16.mxu1 %vm14251_vm1, %v17147_v54 }
 0x4d4   : > { %10626 = vmatmul.mubr.msk.f32.gmra.mrb[138].mxu1 %vm460_vm0, %v17165_v55 }
 0x4d5   : > { %10628 = vmatprep.mubr.msk.f32.mxu1 %vm460_vm0, %v17166_v8  ;;  %v8280_v8 = vld [vmem:[%s14430_s14 + $0xc8] sm:$0xff] }
 0x4d8   : > { %10629 = vmatmul.mubr.msk.f32.gmra.mrb[140].mxu1 %vm460_vm0, %v17167_v25 }
 0x4d9   : > { %10631 = vmatprep.mubr.msk.f32.mxu1 %vm460_vm0, %v17168_v21  ;;  %11849 = vmatpush3.bf16.xpose.msk.msra.mxu1 %vm14251_vm1, %v17147_v54 }
 0x4da   : > { %11852 = vmatprep.subr.msk.bf16.mxu1 %vm14251_vm1, %v14340_v44 }
 0x4dc   : > { %10632 = vmatmul.mubr.msk.f32.gmra.mrb[142].mxu1 %vm460_vm0, %v17169_v11 }
 0x4dd   : > { %10634 = vmatprep.mubr.msk.f32.mxu1 %vm460_vm0, %v17170_v40  ;;  %v8279_v40 = vld [vmem:[%s14430_s14 + $0xc0] sm:$0xff] }
 0x4e0   : > { %10635 = vmatmul.mubr.msk.f32.gmra.mrb[144].mxu1 %vm460_vm0, %v17171_v18 }
 0x4e1   : > { %10637 = vmatprep.mubr.msk.f32.mxu1 %vm460_vm0, %v17172_v48  ;;  %11855 = vmatpush3.bf16.xpose.msk.msra.mxu1 %vm14251_vm1, %v14340_v44  ;;  %v8282_v48 = vld [vmem:[%s14430_s14 + $0xd8] sm:$0xff] }
 0x4e2   : > { %11858 = vmatprep.subr.msk.bf16.mxu1 %vm14251_vm1, %v14347_v63 }
 0x4e3   : > { %v10120_v16 = vpop.f32.mrb[88].mxu1 }
 0x4e4   : > { %v14894_v10 = vadd.f32 %v10120_v16, %v8272_v34  ;;  %v3037_v26 = vpop.f32.mrb[89].mxu1  ;;  %10638 = vmatmul.mubr.msk.f32.gmra.mrb[146].mxu1 %vm460_vm0, %v17173_v38 }
 0x4e5   : > { %v14899_v1 = vadd.f32 %v8271_v20, %v3037_v26  ;;  %10640 = vmatprep.mubr.msk.f32.mxu1 %vm460_vm0, %v17174_v45  ;;  %v8281_v20 = vld [vmem:[%s14430_s14 + $0xd0] sm:$0xff]  ;;  %v8284_v45 = vld [vmem:[%s14430_s14 + $0xe8] sm:$0xff] }
 0x4e6   : > { %3118 = vmax.xlane.f32.xlu1 %v14894_v10 }
 0x4e7   : > { %v10123_v41 = vpop.f32.mrb[90].mxu1  ;;  %3116 = vmax.xlane.f32.xlu0 %v14899_v1 }
 0x4e8   : > { %v14906_v37 = vadd.f32 %v10123_v41, %v8274_v59  ;;  %v3047_v27 = vpop.f32.mrb[91].mxu1  ;;  %10641 = vmatmul.mubr.msk.f32.gmra.mrb[148].mxu1 %vm460_vm0, %v17175_v29 }
 0x4e9   : > { %v14911_v60 = vadd.f32 %v8273_v15, %v3047_v27  ;;  %10643 = vmatprep.mubr.msk.f32.mxu1 %vm460_vm0, %v17176_v14  ;;  %11861 = vmatpush3.bf16.xpose.msk.msra.mxu1 %vm14251_vm1, %v14347_v63  ;;  %v8283_v15 = vld [vmem:[%s14430_s14 + $0xe0] sm:$0xff]  ;;  %v8286_v14 = vld [vmem:[%s14430_s14 + $0xf8] sm:$0xff] }
 0x4ea   : > { %11864 = vmatprep.subr.msk.bf16.mxu1 %vm14251_vm1, %v14354_v53  ;;  %3122 = vmax.xlane.f32.xlu1 %v14906_v37 }
 0x4eb   : > { %v10126_v43 = vpop.f32.mrb[92].mxu1  ;;  %3120 = vmax.xlane.f32.xlu0 %v14911_v60 }
 0x4ec   : > { %v14924_v49 = vadd.f32 %v10126_v43, %v8276_v4  ;;  %v3057_v58 = vpop.f32.mrb[93].mxu1  ;;  %10644 = vmatmul.mubr.msk.f32.gmra.mrb[150].mxu1 %vm460_vm0, %v17177_v24 }
 0x4ed   : > { %v14929_v47 = vadd.f32 %v8275_v9, %v3057_v58  ;;  %10790 = vmatprep.mubr.msk.f32.mxu1 %vm460_vm0, %v17178_v3  ;;  %v8285_v9 = vld [vmem:[%s14430_s14 + $0xf0] sm:$0xff]  ;;  %v17179_v3 = vld [vmem:[#allocation97_spill] sm:$0xff] }
 0x4ee   : > { %3126 = vmax.xlane.f32.xlu1 %v14924_v49 }
 0x4ef   : > { %v10129_v52 = vpop.f32.mrb[94].mxu1  ;;  %3124 = vmax.xlane.f32.xlu0 %v14929_v47 }
 0x4f0   : > { %v14936_v57 = vadd.f32 %v10129_v52, %v8278_v5  ;;  %v3067_v51 = vpop.f32.mrb[95].mxu1  ;;  %v17180_v5 = vld [vmem:[#allocation108_spill] sm:$0xff]  ;;  %v17181_v52 = vld [vmem:[#allocation105_spill] sm:$0xff] }
 0x4f1   : > { %v14939_v55 = vadd.f32 %v8277_v6, %v3067_v51  ;;  %11867 = vmatpush3.bf16.xpose.msk.msra.mxu1 %vm14251_vm1, %v14354_v53  ;;  %v17182_v51 = vld [vmem:[#allocation116_spill] sm:$0xff]  ;;  %v17183_v6 = vld [vmem:[#allocation113_spill] sm:$0xff] }
 0x4f2   : > { %11870 = vmatprep.subr.msk.bf16.mxu1 %vm14251_vm1, %v14361_v17  ;;  %3130 = vmax.xlane.f32.xlu1 %v14936_v57 }
 0x4f3   : > { %v10132_v25 = vpop.f32.mrb[96].mxu1  ;;  %3128 = vmax.xlane.f32.xlu0 %v14939_v55 }
 0x4f4   : > { %v14950_v21 = vadd.f32 %v10132_v25, %v8280_v8  ;;  %v3077_v11 = vpop.f32.mrb[97].mxu1  ;;  %v17184_v8 = vld [vmem:[#allocation122_spill] sm:$0xff]  ;;  %v17185_v25 = vld [vmem:[#allocation119_spill] sm:$0xff] }
 0x4f5   : > { %v14953_v18 = vadd.f32 %v8279_v40, %v3077_v11  ;;  %v17186_v11 = vld [vmem:[#allocation127_spill] sm:$0xff]  ;;  %v17187_v40 = vld [vmem:[#allocation125_spill] sm:$0xff] }
 0x4f6   : > { %3134 = vmax.xlane.f32.xlu1 %v14950_v21 }
 0x4f7   : > { %v10135_v34 = vpop.f32.mrb[98].mxu1  ;;  %3132 = vmax.xlane.f32.xlu0 %v14953_v18 }
 0x4f8   : > { %v14958_v16 = vadd.f32 %v10135_v34, %v8282_v48  ;;  %v3087_v26 = vpop.f32.mrb[99].mxu1  ;;  %v17188_v48 = vld [vmem:[#allocation134_spill] sm:$0xff]  ;;  %v8324_v34 = vld [vmem:[%s14430_s14 + $0x108] sm:$0xff] }
 0x4f9   : > { %v14961_v38 = vadd.f32 %v8281_v20, %v3087_v26  ;;  %11873 = vmatpush3.bf16.xpose.msk.msra.mxu1 %vm14251_vm1, %v14361_v17 }
 0x4fa   : > { %11876 = vmatprep.subr.msk.bf16.mxu1 %vm14251_vm1, %v14368_v19  ;;  %3138 = vmax.xlane.f32.xlu1 %v14958_v16 }
 0x4fb   : > { %v10138_v59 = vpop.f32.mrb[100].mxu1  ;;  %3136 = vmax.xlane.f32.xlu0 %v14961_v38 }
 0x4fc   : > { %v14972_v41 = vadd.f32 %v10138_v59, %v8284_v45  ;;  %v3097_v27 = vpop.f32.mrb[101].mxu1  ;;  %v8323_v59 = vld [vmem:[%s14430_s14 + $0x100] sm:$0xff] }
 0x4fd   : > { %v14975_v29 = vadd.f32 %v8283_v15, %v3097_v27  ;;  %v17189_v27 = vld [vmem:[#allocation131_spill] sm:$0xff] }
 0x4fe   : > { %3142 = vmax.xlane.f32.xlu1 %v14972_v41 }
 0x4ff   : > { %v10141_v4 = vpop.f32.mrb[102].mxu1  ;;  %3140 = vmax.xlane.f32.xlu0 %v14975_v29 }
 0x500   : > { %v14980_v43 = vadd.f32 %v10141_v4, %v8286_v14  ;;  %v3107_v58 = vpop.f32.mrb[103].mxu1  ;;  %v17190_v14 = vld [vmem:[#allocation140_spill] sm:$0xff]  ;;  %v8326_v4 = vld [vmem:[%s14430_s14 + $0x118] sm:$0xff] }
 0x501   : > { %v14983_v24 = vadd.f32 %v8285_v9, %v3107_v58  ;;  %11879 = vmatpush3.bf16.xpose.msk.msra.mxu1 %vm14251_vm1, %v14368_v19 }
 0x502   : > { %11882 = vmatprep.subr.msk.bf16.mxu1 %vm14251_vm1, %v14375_v28  ;;  %3146 = vmax.xlane.f32.xlu1 %v14980_v43 }
 0x503   : > { %3144 = vmax.xlane.f32.xlu0 %v14983_v24 }
 0x509   : > { %11885 = vmatpush3.bf16.xpose.msk.msra.mxu1 %vm14251_vm1, %v14375_v28 }
 0x50a   : > { %11936 = vmatprep.subr.msk.bf16.mxu1 %vm14251_vm1, %v17146_v32 }
 0x510   : > { %10791 = vmatmul.mubr.msk.f32.vlgmr.msra.gmra.mrb[152].mxu1 %vm460_vm0, %v17179_v3 }
 0x511   : > { %10793 = vmatprep.mubr.msk.f32.mxu1 %vm460_vm0, %v17180_v5  ;;  %11939 = vmatpush3.bf16.xpose.msk.msra.mxu1 %vm14251_vm1, %v17146_v32  ;;  %v8325_v5 = vld [vmem:[%s14430_s14 + $0x110] sm:$0xff] }
 0x512   : > { %11942 = vmatprep.subr.msk.bf16.mxu1 %vm14251_vm1, %v17147_v54 }
 0x514   : > { %10794 = vmatmul.mubr.msk.f32.gmra.mrb[154].mxu1 %vm460_vm0, %v17181_v52  ;;  %v17191_v52 = vld [vmem:[#allocation137_spill] sm:$0xff] }
 0x515   : > { %10796 = vmatprep.mubr.msk.f32.mxu1 %vm460_vm0, %v17182_v51 }
 0x518   : > { %10797 = vmatmul.mubr.msk.f32.gmra.mrb[156].mxu1 %vm460_vm0, %v17183_v6  ;;  %v17192_v6 = vld [vmem:[#allocation143_spill] sm:$0xff] }
 0x519   : > { %10799 = vmatprep.mubr.msk.f32.mxu1 %vm460_vm0, %v17184_v8  ;;  %11945 = vmatpush3.bf16.xpose.msk.msra.mxu1 %vm14251_vm1, %v17147_v54  ;;  %v8328_v8 = vld [vmem:[%s14430_s14 + $0x128] sm:$0xff] }
 0x51a   : > { %11948 = vmatprep.subr.msk.bf16.mxu1 %vm14251_vm1, %v14340_v44 }
 0x51c   : > { %10800 = vmatmul.mubr.msk.f32.gmra.mrb[158].mxu1 %vm460_vm0, %v17185_v25 }
 0x51d   : > { %10802 = vmatprep.mubr.msk.f32.mxu1 %vm460_vm0, %v17186_v11 }
 0x520   : > { %10803 = vmatmul.mubr.msk.f32.gmra.mrb[160].mxu1 %vm460_vm0, %v17187_v40 }
 0x521   : > { %10805 = vmatprep.mubr.msk.f32.mxu1 %vm460_vm0, %v17188_v48  ;;  %11951 = vmatpush3.bf16.xpose.msk.msra.mxu1 %vm14251_vm1, %v14340_v44  ;;  %v8327_v48 = vld [vmem:[%s14430_s14 + $0x120] sm:$0xff] }
 0x522   : > { %11954 = vmatprep.subr.msk.bf16.mxu1 %vm14251_vm1, %v14347_v63 }
 0x523   : > { %v10288_v26 = vpop.f32.mrb[104].mxu1 }
 0x524   : > { %v15043_v20 = vadd.f32 %v10288_v26, %v8324_v34  ;;  %v3709_v45 = vpop.f32.mrb[105].mxu1  ;;  %10806 = vmatmul.mubr.msk.f32.gmra.mrb[162].mxu1 %vm460_vm0, %v17189_v27  ;;  %v17193_v34 = vld [vmem:[#allocation29_spill] sm:$0xff] }
 0x525   : > { %v15048_v15 = vadd.f32 %v8323_v59, %v3709_v45  ;;  %10808 = vmatprep.mubr.msk.f32.mxu1 %vm460_vm0, %v17190_v14  ;;  %v17194_v45 = vld [vmem:[#allocation101_spill] sm:$0xff] }
 0x526   : > { %3790 = vmax.xlane.f32.xlu1 %v15043_v20  ;;  %v8330_v59 = vld [vmem:[%s14430_s14 + $0x138] sm:$0xff] }
 0x527   : > { %v10291_v58 = vpop.f32.mrb[106].mxu1  ;;  %3788 = vmax.xlane.f32.xlu0 %v15048_v15 }
 0x528   : > { %v15055_v9 = vadd.f32 %v10291_v58, %v8326_v4  ;;  %v3719_v3 = vpop.f32.mrb[107].mxu1  ;;  %10809 = vmatmul.mubr.msk.f32.gmra.mrb[164].mxu1 %vm460_vm0, %v17191_v52  ;;  %v8329_v58 = vld [vmem:[%s14430_s14 + $0x130] sm:$0xff] }
 0x529   : > { %v15060_v51 = vadd.f32 %v8325_v5, %v3719_v3  ;;  %10811 = vmatprep.mubr.msk.f32.mxu1 %vm460_vm0, %v17192_v6  ;;  %11957 = vmatpush3.bf16.xpose.msk.msra.mxu1 %vm14251_vm1, %v14347_v63  ;;  %v8332_v5 = vld [vmem:[%s14430_s14 + $0x148] sm:$0xff] }
 0x52a   : > { %3794 = vmax.xlane.f32.xlu1 %v15055_v9  ;;  %11960 = vmatprep.subr.msk.bf16.mxu1 %vm14251_vm1, %v14354_v53 }
 0x52b   : > { %v10294_v25 = vpop.f32.mrb[108].mxu1  ;;  %3792 = vmax.xlane.f32.xlu0 %v15060_v51 }
 0x52c   : > { %v15073_v11 = vadd.f32 %v10294_v25, %v8328_v8  ;;  %v3729_v40 = vpop.f32.mrb[109].mxu1  ;;  %10812 = vmatmul.mubr.msk.f32.gmra.mrb[166].mxu1 %vm460_vm0, %v17193_v34  ;;  %v8331_v25 = vld [vmem:[%s14430_s14 + $0x140] sm:$0xff] }
 0x52d   : > { %v15078_v26 = vadd.f32 %v8327_v48, %v3729_v40  ;;  %10958 = vmatprep.mubr.msk.f32.mxu1 %vm460_vm0, %v17194_v45  ;;  %v8334_v48 = vld [vmem:[%s14430_s14 + $0x158] sm:$0xff] }
 0x52e   : > { %3798 = vmax.xlane.f32.xlu1 %v15073_v11 }
 0x52f   : > { %v10297_v27 = vpop.f32.mrb[110].mxu1  ;;  %3796 = vmax.xlane.f32.xlu0 %v15078_v26 }
 0x530   : > { %v15085_v14 = vadd.f32 %v10297_v27, %v8330_v59  ;;  %v3739_v4 = vpop.f32.mrb[111].mxu1  ;;  %v8333_v27 = vld [vmem:[%s14430_s14 + $0x150] sm:$0xff] }
 0x531   : > { %v15088_v3 = vadd.f32 %v8329_v58, %v3739_v4  ;;  %11963 = vmatpush3.bf16.xpose.msk.msra.mxu1 %vm14251_vm1, %v14354_v53  ;;  %v8336_v58 = vld [vmem:[%s14430_s14 + $0x168] sm:$0xff] }
 0x532   : > { %3802 = vmax.xlane.f32.xlu1 %v15085_v14  ;;  %11966 = vmatprep.subr.msk.bf16.mxu1 %vm14251_vm1, %v14361_v17 }
 0x533   : > { %v10300_v52 = vpop.f32.mrb[112].mxu1  ;;  %3800 = vmax.xlane.f32.xlu0 %v15088_v3 }
 0x534   : > { %v15099_v6 = vadd.f32 %v10300_v52, %v8332_v5  ;;  %v3749_v8 = vpop.f32.mrb[113].mxu1 }
 0x535   : > { %v15102_v40 = vadd.f32 %v8331_v25, %v3749_v8  ;;  %v8335_v25 = vld [vmem:[%s14430_s14 + $0x160] sm:$0xff] }
 0x536   : > { %3806 = vmax.xlane.f32.xlu1 %v15099_v6 }
 0x537   : > { %v10303_v34 = vpop.f32.mrb[114].mxu1  ;;  %3804 = vmax.xlane.f32.xlu0 %v15102_v40 }
 0x538   : > { %v15107_v45 = vadd.f32 %v10303_v34, %v8334_v48  ;;  %v3759_v59 = vpop.f32.mrb[115].mxu1  ;;  %v8338_v34 = vld [vmem:[%s14430_s14 + $0x178] sm:$0xff] }
 0x539   : > { %v15110_v4 = vadd.f32 %v8333_v27, %v3759_v59  ;;  %11969 = vmatpush3.bf16.xpose.msk.msra.mxu1 %vm14251_vm1, %v14361_v17 }
 0x53a   : > { %3810 = vmax.xlane.f32.xlu1 %v15107_v45  ;;  %11972 = vmatprep.subr.msk.bf16.mxu1 %vm14251_vm1, %v14368_v19 }
 0x53b   : > { %v10306_v5 = vpop.f32.mrb[116].mxu1  ;;  %3808 = vmax.xlane.f32.xlu0 %v15110_v4 }
 0x53c   : > { %v15121_v52 = vadd.f32 %v10306_v5, %v8336_v58  ;;  %v3769_v8 = vpop.f32.mrb[117].mxu1  ;;  %v17197_v58 = vld [vmem:[#allocation106_spill] sm:$0xff]  ;;  %v17198_v5 = vld [vmem:[#allocation117_spill] sm:$0xff] }
 0x53d   : > { %v15124_v48 = vadd.f32 %v8335_v25, %v3769_v8  ;;  %v17199_v8 = vld [vmem:[#allocation114_spill] sm:$0xff]  ;;  %v17200_v25 = vld [vmem:[#allocation123_spill] sm:$0xff] }
 0x53e   : > { %3814 = vmax.xlane.f32.xlu1 %v15121_v52 }
 0x53f   : > { %v10309_v59 = vpop.f32.mrb[118].mxu1  ;;  %3812 = vmax.xlane.f32.xlu0 %v15124_v48 }
 0x540   : > { %v15129_v27 = vadd.f32 %v10309_v59, %v8338_v34  ;;  %v3779_v39 = vpop.f32.mrb[119].mxu1  ;;  %v17202_v34 = vld [vmem:[#allocation128_spill] sm:$0xff]  ;;  %v17203_v59 = vld [vmem:[#allocation23_spill] sm:$0xff] }
 0x541   : > { %v15132_v12 = vadd.f32 %v8337_v35, %v3779_v39  ;;  %11975 = vmatpush3.bf16.xpose.msk.msra.mxu1 %vm14251_vm1, %v14368_v19  ;;  %v17195_v35 = vld [vmem:[#allocation98_spill] sm:$0xff]  ;;  %v17196_v39 = vld [vmem:[#allocation109_spill] sm:$0xff] }
 0x542   : > { %3818 = vmax.xlane.f32.xlu1 %v15129_v27  ;;  %11978 = vmatprep.subr.msk.bf16.mxu1 %vm14251_vm1, %v14375_v28 }
 0x543   : > { %3816 = vmax.xlane.f32.xlu0 %v15132_v12 }
 0x549   : > { %11981 = vmatpush3.bf16.xpose.msk.msra.mxu1 %vm14251_vm1, %v14375_v28 }
 0x54a   : > { %12032 = vmatprep.subr.msk.bf16.mxu1 %vm14251_vm1, %v17146_v32 }
 0x550   : > { %10959 = vmatmul.mubr.msk.f32.vlgmr.msra.gmra.mrb[168].mxu1 %vm460_vm0, %v17195_v35  ;;  %v17204_v35 = vld [vmem:[#allocation135_spill] sm:$0xff] }
 0x551   : > { %10961 = vmatprep.mubr.msk.f32.mxu1 %vm460_vm0, %v17196_v39  ;;  %12035 = vmatpush3.bf16.xpose.msk.msra.mxu1 %vm14251_vm1, %v17146_v32  ;;  %v17201_v32 = vld [vmem:[#allocation120_spill] sm:$0xff] }
 0x552   : > { %12038 = vmatprep.subr.msk.bf16.mxu1 %vm14251_vm1, %v17147_v54 }
 0x554   : > { %10962 = vmatmul.mubr.msk.f32.gmra.mrb[170].mxu1 %vm460_vm0, %v17197_v58 }
 0x555   : > { %10964 = vmatprep.mubr.msk.f32.mxu1 %vm460_vm0, %v17198_v5 }
 0x558   : > { %10965 = vmatmul.mubr.msk.f32.gmra.mrb[172].mxu1 %vm460_vm0, %v17199_v8  ;;  %v8375_v8 = vld [vmem:[%s14430_s14 + $0x180] sm:$0xff] }
 0x559   : > { %10967 = vmatprep.mubr.msk.f32.mxu1 %vm460_vm0, %v17200_v25  ;;  %12041 = vmatpush3.bf16.xpose.msk.msra.mxu1 %vm14251_vm1, %v17147_v54  ;;  %v8376_v54 = vld [vmem:[%s14430_s14 + $0x188] sm:$0xff]  ;;  %v17205_v25 = vld [vmem:[#allocation132_spill] sm:$0xff] }
 0x55a   : > { %12044 = vmatprep.subr.msk.bf16.mxu1 %vm14251_vm1, %v14340_v44 }
 0x55c   : > { %10968 = vmatmul.mubr.msk.f32.gmra.mrb[174].mxu1 %vm460_vm0, %v17201_v32 }
 0x55d   : > { %10970 = vmatprep.mubr.msk.f32.mxu1 %vm460_vm0, %v17202_v34  ;;  %v17206_v34 = vld [vmem:[#allocation141_spill] sm:$0xff] }
 0x560   : > { %10971 = vmatmul.mubr.msk.f32.gmra.mrb[176].mxu1 %vm460_vm0, %v17203_v59 }
 0x561   : > { %10973 = vmatprep.mubr.msk.f32.mxu1 %vm460_vm0, %v17204_v35  ;;  %12047 = vmatpush3.bf16.xpose.msk.msra.mxu1 %vm14251_vm1, %v14340_v44  ;;  %v8378_v44 = vld [vmem:[%s14430_s14 + $0x198] sm:$0xff] }
 0x562   : > { %12050 = vmatprep.subr.msk.bf16.mxu1 %vm14251_vm1, %v14347_v63 }
 0x563   : > { %v10456_v39 = vpop.f32.mrb[120].mxu1 }
 0x564   : > { %v15187_v58 = vadd.f32 %v10456_v39, %v8376_v54  ;;  %v4381_v5 = vpop.f32.mrb[121].mxu1  ;;  %10974 = vmatmul.mubr.msk.f32.gmra.mrb[178].mxu1 %vm460_vm0, %v17205_v25  ;;  %v8377_v39 = vld [vmem:[%s14430_s14 + $0x190] sm:$0xff]  ;;  %v8380_v25 = vld [vmem:[%s14430_s14 + $0x1a8] sm:$0xff] }
 0x565   : > { %v15192_v32 = vadd.f32 %v8375_v8, %v4381_v5  ;;  %10976 = vmatprep.mubr.msk.f32.mxu1 %vm460_vm0, %v17206_v34  ;;  %v17208_v8 = vld [vmem:[#allocation144_spill] sm:$0xff] }
 0x566   : > { %4462 = vmax.xlane.f32.xlu1 %v15187_v58 }
 0x567   : > { %v10459_v59 = vpop.f32.mrb[122].mxu1  ;;  %4460 = vmax.xlane.f32.xlu0 %v15192_v32 }
 0x568   : > { %v15199_v35 = vadd.f32 %v10459_v59, %v8378_v44  ;;  %v4391_v54 = vpop.f32.mrb[123].mxu1  ;;  %10977 = vmatmul.mubr.msk.f32.gmra.mrb[180].mxu1 %vm460_vm0, %v17207_v23  ;;  %v8379_v59 = vld [vmem:[%s14430_s14 + $0x1a0] sm:$0xff] }
 0x569   : > { %v15204_v5 = vadd.f32 %v8377_v39, %v4391_v54  ;;  %10979 = vmatprep.mubr.msk.f32.mxu1 %vm460_vm0, %v17208_v8  ;;  %12053 = vmatpush3.bf16.xpose.msk.msra.mxu1 %vm14251_vm1, %v14347_v63  ;;  %v17209_v54 = vld [vmem:[#allocation145_spill] sm:$0xff]  ;;  %v17210_v39 = vld [vmem:[#allocation102_spill] sm:$0xff] }
 0x56a   : > { %4466 = vmax.xlane.f32.xlu1 %v15199_v35  ;;  %12056 = vmatprep.subr.msk.bf16.mxu1 %vm14251_vm1, %v14354_v53  ;;  %v8382_v8 = vld [vmem:[%s14430_s14 + $0x1b8] sm:$0xff] }
 0x56b   : > { %v10462_v34 = vpop.f32.mrb[124].mxu1  ;;  %4464 = vmax.xlane.f32.xlu0 %v15204_v5 }
 0x56c   : > { %v15217_v23 = vadd.f32 %v10462_v34, %v8380_v25  ;;  %v4401_v44 = vpop.f32.mrb[125].mxu1  ;;  %10980 = vmatmul.mubr.msk.f32.gmra.mrb[182].mxu1 %vm460_vm0, %v17209_v54 }
 0x56d   : > { %v15222_v63 = vadd.f32 %v8379_v59, %v4401_v44  ;;  %11126 = vmatprep.mubr.msk.f32.mxu1 %vm460_vm0, %v17210_v39  ;;  %v8384_v59 = vld [vmem:[%s14430_s14 + $0x1c8] sm:$0xff] }
 0x56e   : > { %4470 = vmax.xlane.f32.xlu1 %v15217_v23 }
 0x56f   : > { %v10465_v33 = vpop.f32.mrb[126].mxu1  ;;  %4468 = vmax.xlane.f32.xlu0 %v15222_v63 }
 0x570   : > { %v15229_v25 = vadd.f32 %v10465_v33, %v8382_v8  ;;  %v4411_v34 = vpop.f32.mrb[127].mxu1  ;;  %v8383_v8 = vld [vmem:[%s14430_s14 + $0x1c0] sm:$0xff] }
 0x571   : > { %v15232_v7 = vadd.f32 %v8381_v31, %v4411_v34  ;;  %12059 = vmatpush3.bf16.xpose.msk.msra.mxu1 %vm14251_vm1, %v14354_v53 }
 0x572   : > { %4474 = vmax.xlane.f32.xlu1 %v15229_v25  ;;  %12062 = vmatprep.subr.msk.bf16.mxu1 %vm14251_vm1, %v14361_v17 }
 0x573   : > { %v3119_v44 = vpop.xlane.xlu1 %3118  ;;  %v10468_v54 = vpop.f32.mrb[128].mxu1  ;;  %4472 = vmax.xlane.f32.xlu0 %v15232_v7 }
 0x574   : > { %v3149_v33 = vsub.f32 %v14894_v10, %v3119_v44  ;;  %v15244_v31 = vadd.f32 %v10468_v54, %v8384_v59  ;;  %v4421_v39 = vpop.f32.mrb[129].mxu1  ;;  %v3117_v53 = vpop.xlane.xlu0 %3116  ;;  %v8385_v54 = vld [vmem:[%s14430_s14 + $0x1d0] sm:$0xff] }
 0x575   : > { %v15247_v34 = vadd.f32 %v8383_v8, %v4421_v39  ;;  %v3148_v22 = vsub.f32 %v14899_v1, %v3117_v53 }
 0x576   : > { %v3166_v0 = vmul.f32 1.442695, %v3149_v33  ;;  %4478 = vmax.xlane.f32.xlu1 %v15244_v31 }
 0x577   : > { %v3164_v42 = vmul.f32 1.442695, %v3148_v22  ;;  %v3123_v46 = vpop.xlane.xlu1 %3122  ;;  %v10471_v13 = vpop.f32.mrb[130].mxu1  ;;  %4476 = vmax.xlane.f32.xlu0 %v15247_v34 }
 0x578   : > { %v3151_v10 = vsub.f32 %v14906_v37, %v3123_v46  ;;  %v15254_v44 = vadd.f32 %v10471_v13, %v8386_v50  ;;  %v4431_v59 = vpop.f32.mrb[131].mxu1  ;;  %v3121_v39 = vpop.xlane.xlu0 %3120  ;;  %v8388_v46 = vld [vmem:[%s14430_s14 + $0x1e8] sm:$0xff] }
 0x579   : > { %12344 = vpow2.f32 %v3164_v42  ;;  %v15257_v1 = vadd.f32 %v8385_v54, %v4431_v59  ;;  %v3150_v33 = vsub.f32 %v14911_v60, %v3121_v39  ;;  %12065 = vmatpush3.bf16.xpose.msk.msra.mxu1 %vm14251_vm1, %v14361_v17 }
 0x57a   : > { %12346 = vpow2.f32 %v3166_v0  ;;  %v3170_v22 = vmul.f32 1.442695, %v3151_v10  ;;  %4482 = vmax.xlane.f32.xlu1 %v15254_v44  ;;  %12068 = vmatprep.subr.msk.bf16.mxu1 %vm14251_vm1, %v14368_v19  ;;  %v8387_v0 = vld [vmem:[%s14430_s14 + $0x1e0] sm:$0xff] }
 0x57b   : > { %v3168_v13 = vmul.f32 1.442695, %v3150_v33  ;;  %v3127_v50 = vpop.xlane.xlu1 %3126  ;;  %v10474_v42 = vpop.f32.mrb[132].mxu1  ;;  %4480 = vmax.xlane.f32.xlu0 %v15257_v1  ;;  %v8390_v33 = vld [vmem:[%s14430_s14 + $0x1f8] sm:$0xff] }
 0x57c   : > { %v3153_v37 = vsub.f32 %v14924_v49, %v3127_v50  ;;  %v15270_v60 = vadd.f32 %v10474_v42, %v8388_v46  ;;  %v4441_v17 = vpop.f32.mrb[133].mxu1  ;;  %v3125_v8 = vpop.xlane.xlu0 %3124 }
 0x57d   : > { %12348 = vpow2.f32 %v3168_v13  ;;  %v15273_v53 = vadd.f32 %v8387_v0, %v4441_v17  ;;  %v3152_v10 = vsub.f32 %v14929_v47, %v3125_v8  ;;  %v8389_v13 = vld [vmem:[%s14430_s14 + $0x1f0] sm:$0xff] }
 0x57e   : > { %12350 = vpow2.f32 %v3170_v22  ;;  %v3174_v59 = vmul.f32 1.442695, %v3153_v37  ;;  %4486 = vmax.xlane.f32.xlu1 %v15270_v60 }
 0x57f   : > { %v3172_v54 = vmul.f32 1.442695, %v3152_v10  ;;  %v3131_v39 = vpop.xlane.xlu1 %3130  ;;  %v10477_v2 = vpop.f32.mrb[134].mxu1  ;;  %4484 = vmax.xlane.f32.xlu0 %v15273_v53 }
 0x580   : > { %v3155_v49 = vsub.f32 %v14936_v57, %v3131_v39  ;;  %v15280_v50 = vadd.f32 %v10477_v2, %v8390_v33  ;;  %v4451_v46 = vpop.f32.mrb[135].mxu1  ;;  %v3129_v42 = vpop.xlane.xlu0 %3128  ;;  %v17211_v39 = vld [vmem:[#allocation40_spill] sm:$0xff] }
 0x581   : > { %12352 = vpow2.f32 %v3172_v54  ;;  %v15283_v17 = vadd.f32 %v8389_v13, %v4451_v46  ;;  %v3154_v47 = vsub.f32 %v14939_v55, %v3129_v42  ;;  %12071 = vmatpush3.bf16.xpose.msk.msra.mxu1 %vm14251_vm1, %v14368_v19  ;;  %v17212_v42 = vld [vmem:[#allocation43_spill] sm:$0xff] }
 0x582   : > { %12354 = vpow2.f32 %v3174_v59  ;;  %v3178_v22 = vmul.f32 1.442695, %v3155_v49  ;;  %4490 = vmax.xlane.f32.xlu1 %v15280_v50  ;;  %12074 = vmatprep.subr.msk.bf16.mxu1 %vm14251_vm1, %v14375_v28 }
 0x583   : > { %v15293_v2 = vpop.eup %12344  ;;  %v3176_v57 = vmul.f32 1.442695, %v3154_v47  ;;  %v3135_v37 = vpop.xlane.xlu1 %3134  ;;  %4488 = vmax.xlane.f32.xlu0 %v15283_v17 }
 0x584   : > { %v15296_v0 = vpop.eup %12346  ;;  %v3157_v55 = vsub.f32 %v14950_v21, %v3135_v37  ;;  %10174 = vmatprep.mubr.f32.mxu0 %v15293_v2  ;;  %v3133_v19 = vpop.xlane.xlu0 %3132 }
 0x585   : > { %12356 = vpow2.f32 %v3176_v57  ;;  %v3156_v8 = vsub.f32 %v14953_v18, %v3133_v19  ;;  %10175 = vmatmul.mubr.f32.vlgmr.msra.gmra.mrb[120].mxu0 %v15296_v0  ;;  %v17213_v19 = vld [vmem:[#allocation46_spill] sm:$0xff] }
 0x586   : > { %12358 = vpow2.f32 %v3178_v22  ;;  %v3182_v10 = vmul.f32 1.442695, %v3157_v55  ;;  %11521 = vmatpush3.bf16.msra.mxu0 %v17142_v36 }
 0x587   : > { %v15303_v59 = vpop.eup %12348  ;;  %v3180_v54 = vmul.f32 1.442695, %v3156_v8  ;;  %11523 = vmatprep.subr.bf16.mxu0 %v17211_v39  ;;  %v3139_v33 = vpop.xlane.xlu1 %3138 }
 0x588   : > { %v15306_v49 = vpop.eup %12350  ;;  %v3159_v21 = vsub.f32 %v14958_v16, %v3139_v33  ;;  %10177 = vmatprep.mubr.f32.mxu0 %v15303_v59  ;;  %v3137_v46 = vpop.xlane.xlu0 %3136  ;;  %v17215_v33 = vld [vmem:[#allocation110_spill] sm:$0xff] }
 0x589   : > { %12360 = vpow2.f32 %v3180_v54  ;;  %v3158_v18 = vsub.f32 %v14961_v38, %v3137_v46  ;;  %10178 = vmatmul.mubr.f32.gmra.mrb[122].mxu0 %v15306_v49  ;;  %12077 = vmatpush3.bf16.xpose.msk.msra.mxu1 %vm14251_vm1, %v14375_v28  ;;  %v17214_v54 = vld [vmem:[#allocation103_spill] sm:$0xff] }
 0x58a   : > { %12362 = vpow2.f32 %v3182_v10  ;;  %v3186_v36 = vmul.f32 1.442695, %v3159_v21  ;;  %11525 = vmatpush3.bf16.msra.mxu0 %v17211_v39 }
 0x58b   : > { %v15316_v13 = vpop.eup %12352  ;;  %v3184_v16 = vmul.f32 1.442695, %v3158_v18  ;;  %11527 = vmatprep.subr.bf16.mxu0 %v17212_v42  ;;  %v3143_v47 = vpop.xlane.xlu1 %3142  ;;  %v17216_v18 = vld [vmem:[#allocation49_spill] sm:$0xff] }
 0x58c   : > { %v15319_v22 = vpop.eup %12354  ;;  %v3161_v38 = vsub.f32 %v14972_v41, %v3143_v47  ;;  %10180 = vmatprep.mubr.f32.mxu0 %v15316_v13  ;;  %v3141_v62 = vpop.xlane.xlu0 %3140  ;;  %v17219_v47 = vld [vmem:[#allocation52_spill] sm:$0xff] }
 0x58d   : > { %12364 = vpow2.f32 %v3184_v16  ;;  %v3160_v28 = vsub.f32 %v14975_v29, %v3141_v62  ;;  %10181 = vmatmul.mubr.f32.gmra.mrb[124].mxu0 %v15319_v22  ;;  %v17218_v16 = vld [vmem:[#allocation19_spill] sm:$0xff]  ;;  %v17220_v62 = vld [vmem:[#allocation118_spill] sm:$0xff] }
 0x58e   : > { %12366 = vpow2.f32 %v3186_v36  ;;  %v3190_v57 = vmul.f32 1.442695, %v3161_v38  ;;  %11529 = vmatpush3.bf16.msra.mxu0 %v17212_v42 }
 0x58f   : > { %v15327_v37 = vpop.eup %12356  ;;  %v3188_v55 = vmul.f32 1.442695, %v3160_v28  ;;  %11531 = vmatprep.subr.bf16.mxu0 %v17213_v19  ;;  %v3147_v41 = vpop.xlane.xlu1 %3146  ;;  %v17221_v28 = vld [vmem:[#allocation21_spill] sm:$0xff] }
 0x590   : > { %v15330_v8 = vpop.eup %12358  ;;  %v3163_v10 = vsub.f32 %v14980_v43, %v3147_v41  ;;  %10183 = vmatprep.mubr.f32.mxu0 %v15327_v37  ;;  %v3145_v29 = vpop.xlane.xlu0 %3144  ;;  %11127 = vmatmul.mubr.msk.f32.vlgmr.msra.gmra.mrb[184].mxu1 %vm460_vm0, %v17214_v54  ;;  %v17223_v41 = vld [vmem:[#allocation124_spill] sm:$0xff]  ;;  %v17225_v54 = vld [vmem:[#allocation58_spill] sm:$0xff] }
 0x591   : > { %12368 = vpow2.f32 %v3188_v55  ;;  %v3162_v39 = vsub.f32 %v14983_v24, %v3145_v29  ;;  %10184 = vmatmul.mubr.f32.gmra.mrb[126].mxu0 %v15330_v8  ;;  %11129 = vmatprep.mubr.msk.f32.mxu1 %vm460_vm0, %v17215_v33  ;;  %v17217_v24 = vld [vmem:[#allocation111_spill] sm:$0xff]  ;;  %v17226_v33 = vld [vmem:[#allocation24_spill] sm:$0xff] }
 0x592   : > { %12370 = vpow2.f32 %v3190_v57  ;;  %v3194_v21 = vmul.f32 1.442695, %v3163_v10  ;;  %11533 = vmatpush3.bf16.msra.mxu0 %v17213_v19  ;;  %v17222_v55 = vld [vmem:[#allocation55_spill] sm:$0xff]  ;;  %v17224_v10 = vld [vmem:[#allocation129_spill] sm:$0xff] }
 0x593   : > { %v15343_v43 = vpop.eup %12360  ;;  %v3192_v46 = vmul.f32 1.442695, %v3162_v39  ;;  %11535 = vmatprep.subr.bf16.mxu0 %v17216_v18 }
 0x594   : > { %v15346_v36 = vpop.eup %12362  ;;  %10186 = vmatprep.mubr.f32.mxu0 %v15343_v43  ;;  %11130 = vmatmul.mubr.msk.f32.gmra.mrb[186].mxu1 %vm460_vm0, %v17217_v24 }
 0x595   : > { %12372 = vpow2.f32 %v3192_v46  ;;  %10187 = vmatmul.mubr.f32.gmra.mrb[128].mxu0 %v15346_v36  ;;  %11132 = vmatprep.mubr.msk.f32.mxu1 %vm460_vm0, %v17218_v16  ;;  %v4933_v46 = vld [vmem:[%s15390_s15 + $0x8] sm:$0xff] }
 0x596   : > { %12374 = vpow2.f32 %v3194_v21  ;;  %11537 = vmatpush3.bf16.msra.mxu0 %v17216_v18  ;;  %v17227_v21 = vld [vmem:[#allocation25_spill] sm:$0xff] }
 0x597   : > { %v15355_v42 = vpop.eup %12364  ;;  %11539 = vmatprep.subr.bf16.mxu0 %v17219_v47 }
 0x598   : > { %v15358_v38 = vpop.eup %12366  ;;  %10189 = vmatprep.mubr.f32.mxu0 %v15355_v42  ;;  %11133 = vmatmul.mubr.msk.f32.gmra.mrb[188].mxu1 %vm460_vm0, %v17220_v62  ;;  %v17228_v62 = vld [vmem:[#allocation136_spill] sm:$0xff] }
 0x599   : > { %10190 = vmatmul.mubr.f32.gmra.mrb[130].mxu0 %v15358_v38  ;;  %11135 = vmatprep.mubr.msk.f32.mxu1 %vm460_vm0, %v17221_v28 }
 0x59a   : > { %11541 = vmatpush3.bf16.msra.mxu0 %v17219_v47  ;;  %v4932_v47 = vld [vmem:[%s15390_s15] sm:$0xff] }
 0x59b   : > { %v15367_v57 = vpop.eup %12368  ;;  %11543 = vmatprep.subr.bf16.mxu0 %v17222_v55 }
 0x59c   : > { %v15370_v19 = vpop.eup %12370  ;;  %10192 = vmatprep.mubr.f32.mxu0 %v15367_v57  ;;  %11136 = vmatmul.mubr.msk.f32.gmra.mrb[190].mxu1 %vm460_vm0, %v17223_v41 }
 0x59d   : > { %10193 = vmatmul.mubr.f32.gmra.mrb[132].mxu0 %v15370_v19  ;;  %11138 = vmatprep.mubr.msk.f32.mxu1 %vm460_vm0, %v17224_v10 }
 0x59e   : > { %11545 = vmatpush3.bf16.msra.mxu0 %v17222_v55  ;;  %v17229_v55 = vld [vmem:[#allocation27_spill] sm:$0xff] }
 0x59f   : > { %v15379_v29 = vpop.eup %12372  ;;  %11547 = vmatprep.subr.bf16.mxu0 %v17225_v54 }
 0x5a0   : > { %v15382_v39 = vpop.eup %12374  ;;  %10195 = vmatprep.mubr.f32.mxu0 %v15379_v29  ;;  %11139 = vmatmul.mubr.msk.f32.gmra.mrb[192].mxu1 %vm460_vm0, %v17226_v33  ;;  %v17230_v33 = vld [vmem:[#allocation142_spill] sm:$0xff] }
 0x5a1   : > { %10196 = vmatmul.mubr.f32.gmra.mrb[134].mxu0 %v15382_v39  ;;  %11141 = vmatprep.mubr.msk.f32.mxu1 %vm460_vm0, %v17227_v21 }
 0x5a2   : > { %11549 = vmatpush3.bf16.msra.mxu0 %v17225_v54  ;;  %10230 = vmatprep.mubr.f32.mxu0 %v15293_v2  ;;  %v4935_v2 = vld [vmem:[%s15390_s15 + $0x18] sm:$0xff]  ;;  %v4934_v54 = vld [vmem:[%s15390_s15 + $0x10] sm:$0xff] }
 0x5a3   : > { %v10624_v18 = vpop.f32.mrb[136].mxu1  ;;  %11598 = vmatprep.subr.bf16.mxu0 %v17141_v30 }
 0x5a4   : > { %v15399_v24 = vadd.f32 %v10624_v18, %v4933_v46  ;;  %v5110_v16 = vpop.f32.mrb[137].mxu1  ;;  %11142 = vmatmul.mubr.msk.f32.gmra.mrb[194].mxu1 %vm460_vm0, %v17228_v62  ;;  %v17231_v46 = vld [vmem:[#allocation146_spill] sm:$0xff]  ;;  %v17232_v62 = vld [vmem:[#allocation147_spill] sm:$0xff] }
 0x5a5   : > { %v15404_v28 = vadd.f32 %v5110_v16, %v4932_v47  ;;  %10231 = vmatmul.mubr.f32.vlgmr.msra.gmra.mrb[136].mxu0 %v15296_v0  ;;  %11144 = vmatprep.mubr.msk.f32.mxu1 %vm460_vm0, %v17229_v55  ;;  %v4936_v47 = vld [vmem:[%s15390_s15 + $0x20] sm:$0xff] }
 0x5a6   : > { %11599 = vmatpush3.bf16.msra.mxu0 %v17141_v30  ;;  %5191 = vmax.xlane.f32.xlu1 %v15399_v24 }
 0x5a7   : > { %10233 = vmatprep.mubr.f32.mxu0 %v15303_v59  ;;  %v10627_v41 = vpop.f32.mrb[138].mxu1  ;;  %5189 = vmax.xlane.f32.xlu0 %v15404_v28  ;;  %v4937_v59 = vld [vmem:[%s15390_s15 + $0x28] sm:$0xff] }
 0x5a8   : > { %v15414_v10 = vadd.f32 %v10627_v41, %v4935_v2  ;;  %11600 = vmatprep.subr.bf16.mxu0 %v17141_v30  ;;  %v5120_v0 = vpop.f32.mrb[139].mxu1  ;;  %11145 = vmatmul.mubr.msk.f32.gmra.mrb[196].mxu1 %vm460_vm0, %v17230_v33 }
 0x5a9   : > { %v15420_v21 = vadd.f32 %v5120_v0, %v4934_v54  ;;  %10234 = vmatmul.mubr.f32.gmra.mrb[138].mxu0 %v15306_v49  ;;  %11147 = vmatprep.mubr.msk.f32.mxu1 %vm460_vm0, %v17231_v46  ;;  %v4938_v54 = vld [vmem:[%s15390_s15 + $0x30] sm:$0xff] }
 0x5aa   : > { %11601 = vmatpush3.bf16.msra.mxu0 %v17141_v30  ;;  %5195 = vmax.xlane.f32.xlu1 %v15414_v10 }
 0x5ab   : > { %10236 = vmatprep.mubr.f32.mxu0 %v15316_v13  ;;  %v10630_v18 = vpop.f32.mrb[140].mxu1  ;;  %5193 = vmax.xlane.f32.xlu0 %v15420_v21  ;;  %v4939_v13 = vld [vmem:[%s15390_s15 + $0x38] sm:$0xff] }
 0x5ac   : > { %v15430_v16 = vadd.f32 %v10630_v18, %v4937_v59  ;;  %11602 = vmatprep.subr.bf16.mxu0 %v17141_v30  ;;  %v5130_v49 = vpop.f32.mrb[141].mxu1  ;;  %11148 = vmatmul.mubr.msk.f32.gmra.mrb[198].mxu1 %vm460_vm0, %v17232_v62 }
 0x5ad   : > { %v15436_v55 = vadd.f32 %v5130_v49, %v4936_v47  ;;  %10237 = vmatmul.mubr.f32.gmra.mrb[140].mxu0 %v15319_v22 }
 0x5ae   : > { %11603 = vmatpush3.bf16.msra.mxu0 %v17141_v30  ;;  %5199 = vmax.xlane.f32.xlu1 %v15430_v16 }
 0x5af   : > { %10239 = vmatprep.mubr.f32.mxu0 %v15327_v37  ;;  %v10633_v2 = vpop.f32.mrb[142].mxu1  ;;  %5197 = vmax.xlane.f32.xlu0 %v15436_v55  ;;  %v4941_v37 = vld [vmem:[%s15390_s15 + $0x48] sm:$0xff] }
 0x5b0   : > { %v15444_v41 = vadd.f32 %v10633_v2, %v4939_v13  ;;  %11604 = vmatprep.subr.bf16.mxu0 %v17141_v30  ;;  %v5140_v0 = vpop.f32.mrb[143].mxu1 }
 0x5b1   : > { %v15448_v33 = vadd.f32 %v5140_v0, %v4938_v54  ;;  %10240 = vmatmul.mubr.f32.gmra.mrb[142].mxu0 %v15330_v8  ;;  %v4940_v8 = vld [vmem:[%s15390_s15 + $0x40] sm:$0xff]  ;;  %v4943_v0 = vld [vmem:[%s15390_s15 + $0x58] sm:$0xff] }
 0x5b2   : > { %11605 = vmatpush3.bf16.msra.mxu0 %v17141_v30  ;;  %5203 = vmax.xlane.f32.xlu1 %v15444_v41 }
 0x5b3   : > { %10242 = vmatprep.mubr.f32.mxu0 %v15343_v43  ;;  %v3791_v22 = vpop.xlane.xlu1 %3790  ;;  %v10636_v46 = vpop.f32.mrb[144].mxu1  ;;  %5201 = vmax.xlane.f32.xlu0 %v15448_v33 }
 0x5b4   : > { %v3821_v59 = vsub.f32 %v15043_v20, %v3791_v22  ;;  %v15457_v18 = vadd.f32 %v10636_v46, %v4941_v37  ;;  %11606 = vmatprep.subr.bf16.mxu0 %v17141_v30  ;;  %v5150_v49 = vpop.f32.mrb[145].mxu1  ;;  %v3789_v47 = vpop.xlane.xlu0 %3788 }
 0x5b5   : > { %v15461_v62 = vadd.f32 %v5150_v49, %v4940_v8  ;;  %v3820_v43 = vsub.f32 %v15048_v15, %v3789_v47  ;;  %10243 = vmatmul.mubr.f32.gmra.mrb[144].mxu0 %v15346_v36  ;;  %v4942_v36 = vld [vmem:[%s15390_s15 + $0x50] sm:$0xff]  ;;  %v4945_v47 = vld [vmem:[%s15390_s15 + $0x68] sm:$0xff] }
 0x5b6   : > { %v3838_v13 = vmul.f32 1.442695, %v3821_v59  ;;  %11607 = vmatpush3.bf16.msra.mxu0 %v17141_v30  ;;  %5207 = vmax.xlane.f32.xlu1 %v15457_v18 }
 0x5b7   : > { %v3836_v20 = vmul.f32 1.442695, %v3820_v43  ;;  %10245 = vmatprep.mubr.f32.mxu0 %v15355_v42  ;;  %v3795_v2 = vpop.xlane.xlu1 %3794  ;;  %v10639_v54 = vpop.f32.mrb[146].mxu1  ;;  %5205 = vmax.xlane.f32.xlu0 %v15461_v62 }
 0x5b8   : > { %v3823_v22 = vsub.f32 %v15055_v9, %v3795_v2  ;;  %v15471_v37 = vadd.f32 %v10639_v54, %v4943_v0  ;;  %11608 = vmatprep.subr.bf16.mxu0 %v17141_v30  ;;  %v5160_v15 = vpop.f32.mrb[147].mxu1  ;;  %v3793_v46 = vpop.xlane.xlu0 %3792 }
 0x5b9   : > { %12376 = vpow2.f32 %v3836_v20  ;;  %v15475_v59 = vadd.f32 %v5160_v15, %v4942_v36  ;;  %v3822_v42 = vsub.f32 %v15060_v51, %v3793_v46  ;;  %10246 = vmatmul.mubr.f32.gmra.mrb[146].mxu0 %v15358_v38  ;;  %v4947_v15 = vld [vmem:[%s15390_s15 + $0x78] sm:$0xff] }
 0x5ba   : > { %12378 = vpow2.f32 %v3838_v13  ;;  %v3842_v49 = vmul.f32 1.442695, %v3823_v22  ;;  %11609 = vmatpush3.bf16.msra.mxu0 %v17141_v30  ;;  %5211 = vmax.xlane.f32.xlu1 %v15471_v37  ;;  %v4944_v13 = vld [vmem:[%s15390_s15 + $0x60] sm:$0xff] }
 0x5bb   : > { %v3840_v9 = vmul.f32 1.442695, %v3822_v42  ;;  %10248 = vmatprep.mubr.f32.mxu0 %v15367_v57  ;;  %v3799_v8 = vpop.xlane.xlu1 %3798  ;;  %v10642_v43 = vpop.f32.mrb[148].mxu1  ;;  %5209 = vmax.xlane.f32.xlu0 %v15475_v59 }
 0x5bc   : > { %v3825_v20 = vsub.f32 %v15073_v11, %v3799_v8  ;;  %v15485_v51 = vadd.f32 %v10642_v43, %v4945_v47  ;;  %11610 = vmatprep.subr.bf16.mxu0 %v17141_v30  ;;  %v5170_v38 = vpop.f32.mrb[149].mxu1  ;;  %v3797_v2 = vpop.xlane.xlu0 %3796  ;;  %v17233_v43 = vld [vmem:[#allocation38_spill] sm:$0xff] }
 0x5bd   : > { %12380 = vpow2.f32 %v3840_v9  ;;  %v15489_v0 = vadd.f32 %v5170_v38, %v4944_v13  ;;  %v3824_v57 = vsub.f32 %v15078_v26, %v3797_v2  ;;  %10249 = vmatmul.mubr.f32.gmra.mrb[148].mxu0 %v15370_v19 }
 0x5be   : > { %12382 = vpow2.f32 %v3842_v49  ;;  %v3846_v54 = vmul.f32 1.442695, %v3825_v20  ;;  %11611 = vmatpush3.bf16.msra.mxu0 %v17141_v30  ;;  %5215 = vmax.xlane.f32.xlu1 %v15485_v51  ;;  %v4946_v49 = vld [vmem:[%s15390_s15 + $0x70] sm:$0xff] }
 0x5bf   : > { %v3844_v11 = vmul.f32 1.442695, %v3824_v57  ;;  %10251 = vmatprep.mubr.f32.mxu0 %v15379_v29  ;;  %v3803_v22 = vpop.xlane.xlu1 %3802  ;;  %5213 = vmax.xlane.f32.xlu0 %v15489_v0  ;;  %v10645_v36 = vpop.f32.mrb[150].mxu1 }
 0x5c0   : > { %v3827_v46 = vsub.f32 %v15085_v14, %v3803_v22  ;;  %v15499_v26 = vadd.f32 %v10645_v36, %v4947_v15  ;;  %11612 = vmatprep.subr.bf16.mxu0 %v17141_v30  ;;  %v3801_v19 = vpop.xlane.xlu0 %3800  ;;  %v5180_v42 = vpop.f32.mrb[151].mxu1 }
 0x5c1   : > { %12384 = vpow2.f32 %v3844_v11  ;;  %v3826_v9 = vsub.f32 %v15088_v3, %v3801_v19  ;;  %v15504_v8 = vadd.f32 %v5180_v42, %v4946_v49  ;;  %10252 = vmatmul.mubr.f32.gmra.mrb[150].mxu0 %v15382_v39  ;;  %v17234_v11 = vld [vmem:[#allocation41_spill] sm:$0xff]  ;;  %v17235_v49 = vld [vmem:[#allocation44_spill] sm:$0xff] }
 0x5c2   : > { %12386 = vpow2.f32 %v3846_v54  ;;  %v3850_v29 = vmul.f32 1.442695, %v3827_v46  ;;  %11613 = vmatpush3.bf16.msra.mxu0 %v17141_v30  ;;  %5219 = vmax.xlane.f32.xlu1 %v15499_v26 }
 0x5c3   : > { %v15509_v14 = vpop.eup %12376  ;;  %v3848_v47 = vmul.f32 1.442695, %v3826_v9  ;;  %11615 = vmatprep.subr.bf16.mxu0 %v17233_v43  ;;  %v3807_v20 = vpop.xlane.xlu1 %3806  ;;  %5217 = vmax.xlane.f32.xlu0 %v15504_v8 }
 0x5c4   : > { %v15513_v38 = vpop.eup %12378  ;;  %v3829_v3 = vsub.f32 %v15099_v6, %v3807_v20  ;;  %10342 = vmatprep.mubr.f32.mxu0 %v15509_v14  ;;  %v3805_v39 = vpop.xlane.xlu0 %3804 }
 0x5c5   : > { %12388 = vpow2.f32 %v3848_v47  ;;  %v3828_v13 = vsub.f32 %v15102_v40, %v3805_v39  ;;  %10343 = vmatmul.mubr.f32.vlgmr.msra.gmra.mrb[152].mxu0 %v15513_v38  ;;  %v17236_v39 = vld [vmem:[#allocation47_spill] sm:$0xff] }
 0x5c6   : > { %12390 = vpow2.f32 %v3850_v29  ;;  %v3854_v2 = vmul.f32 1.442695, %v3829_v3  ;;  %11617 = vmatpush3.bf16.msra.mxu0 %v17233_v43 }
 0x5c7   : > { %v15520_v57 = vpop.eup %12380  ;;  %v3852_v54 = vmul.f32 1.442695, %v3828_v13  ;;  %11619 = vmatprep.subr.bf16.mxu0 %v17234_v11  ;;  %v3811_v22 = vpop.xlane.xlu1 %3810 }
 0x5c8   : > { %v15523_v15 = vpop.eup %12382  ;;  %v3831_v6 = vsub.f32 %v15107_v45, %v3811_v22  ;;  %10345 = vmatprep.mubr.f32.mxu0 %v15520_v57  ;;  %v3809_v36 = vpop.xlane.xlu0 %3808 }
 0x5c9   : > { %12392 = vpow2.f32 %v3852_v54  ;;  %v3830_v40 = vsub.f32 %v15110_v4, %v3809_v36  ;;  %10346 = vmatmul.mubr.f32.gmra.mrb[154].mxu0 %v15523_v15  ;;  %v17237_v36 = vld [vmem:[#allocation50_spill] sm:$0xff] }
 0x5ca   : > { %12394 = vpow2.f32 %v3854_v2  ;;  %v3858_v46 = vmul.f32 1.442695, %v3831_v6  ;;  %11621 = vmatpush3.bf16.msra.mxu0 %v17234_v11 }
 0x5cb   : > { %v15530_v19 = vpop.eup %12384  ;;  %v3856_v42 = vmul.f32 1.442695, %v3830_v40  ;;  %11623 = vmatprep.subr.bf16.mxu0 %v17235_v49  ;;  %v3815_v9 = vpop.xlane.xlu1 %3814 }
 0x5cc   : > { %v15533_v29 = vpop.eup %12386  ;;  %v3833_v45 = vsub.f32 %v15121_v52, %v3815_v9  ;;  %10348 = vmatprep.mubr.f32.mxu0 %v15530_v19  ;;  %v3813_v47 = vpop.xlane.xlu0 %3812 }
 0x5cd   : > { %12396 = vpow2.f32 %v3856_v42  ;;  %v3832_v4 = vsub.f32 %v15124_v48, %v3813_v47  ;;  %10349 = vmatmul.mubr.f32.gmra.mrb[156].mxu0 %v15533_v29  ;;  %v17240_v47 = vld [vmem:[#allocation59_spill] sm:$0xff] }
 0x5ce   : > { %12398 = vpow2.f32 %v3858_v46  ;;  %v3862_v43 = vmul.f32 1.442695, %v3833_v45  ;;  %11625 = vmatpush3.bf16.msra.mxu0 %v17235_v49  ;;  %v17239_v49 = vld [vmem:[#allocation56_spill] sm:$0xff] }
 0x5cf   : > { %v15540_v20 = vpop.eup %12388  ;;  %v3860_v3 = vmul.f32 1.442695, %v3832_v4  ;;  %11627 = vmatprep.subr.bf16.mxu0 %v17236_v39  ;;  %v3819_v13 = vpop.xlane.xlu1 %3818 }
 0x5d0   : > { %v15543_v2 = vpop.eup %12390  ;;  %v3835_v52 = vsub.f32 %v15129_v27, %v3819_v13  ;;  %10351 = vmatprep.mubr.f32.mxu0 %v15540_v20  ;;  %v3817_v54 = vpop.xlane.xlu0 %3816  ;;  %v17238_v27 = vld [vmem:[#allocation53_spill] sm:$0xff] }
 0x5d1   : > { %12400 = vpow2.f32 %v3860_v3  ;;  %v3834_v48 = vsub.f32 %v15132_v12, %v3817_v54  ;;  %10352 = vmatmul.mubr.f32.gmra.mrb[158].mxu0 %v15543_v2 }
 0x5d2   : > { %12402 = vpow2.f32 %v3862_v43  ;;  %v3866_v11 = vmul.f32 1.442695, %v3835_v52  ;;  %11629 = vmatpush3.bf16.msra.mxu0 %v17236_v39  ;;  %v8464_v43 = vld [vmem:[%s15390_s15 + $0x88] sm:$0xff]  ;;  %v8463_v52 = vld [vmem:[%s15390_s15 + $0x80] sm:$0xff] }
 0x5d3   : > { %v15550_v22 = vpop.eup %12392  ;;  %v3864_v6 = vmul.f32 1.442695, %v3834_v48  ;;  %11631 = vmatprep.subr.bf16.mxu0 %v17237_v36 }
 0x5d4   : > { %v15553_v40 = vpop.eup %12394  ;;  %10354 = vmatprep.mubr.f32.mxu0 %v15550_v22 }
 0x5d5   : > { %12404 = vpow2.f32 %v3864_v6  ;;  %10355 = vmatmul.mubr.f32.gmra.mrb[160].mxu0 %v15553_v40 }
 0x5d6   : > { %12406 = vpow2.f32 %v3866_v11  ;;  %11633 = vmatpush3.bf16.msra.mxu0 %v17237_v36  ;;  %v8465_v36 = vld [vmem:[%s15390_s15 + $0x90] sm:$0xff] }
 0x5d7   : > { %v15558_v12 = vpop.eup %12396  ;;  %11635 = vmatprep.subr.bf16.mxu0 %v17238_v27 }
 0x5d8   : > { %v15561_v46 = vpop.eup %12398  ;;  %10357 = vmatprep.mubr.f32.mxu0 %v15558_v12 }
 0x5d9   : > { %10358 = vmatmul.mubr.f32.gmra.mrb[162].mxu0 %v15561_v46 }
 0x5da   : > { %11637 = vmatpush3.bf16.msra.mxu0 %v17238_v27 }
 0x5db   : > { %v15566_v42 = vpop.eup %12400  ;;  %11639 = vmatprep.subr.bf16.mxu0 %v17239_v49 }
 0x5dc   : > { %v15569_v9 = vpop.eup %12402  ;;  %10360 = vmatprep.mubr.f32.mxu0 %v15566_v42 }
 0x5dd   : > { %10361 = vmatmul.mubr.f32.gmra.mrb[164].mxu0 %v15569_v9 }
 0x5de   : > { %11641 = vmatpush3.bf16.msra.mxu0 %v17239_v49 }
 0x5df   : > { %v15574_v45 = vpop.eup %12404  ;;  %11643 = vmatprep.subr.bf16.mxu0 %v17240_v47 }
 0x5e0   : > { %v15577_v4 = vpop.eup %12406  ;;  %10363 = vmatprep.mubr.f32.mxu0 %v15574_v45 }
 0x5e1   : > { %10364 = vmatmul.mubr.f32.gmra.mrb[166].mxu0 %v15577_v4 }
 0x5e2   : > { %11645 = vmatpush3.bf16.msra.mxu0 %v17240_v47  ;;  %10398 = vmatprep.mubr.f32.mxu0 %v15509_v14  ;;  %v8466_v14 = vld [vmem:[%s15390_s15 + $0x98] sm:$0xff] }
 0x5e3   : > { %v10792_v3 = vpop.f32.mrb[152].mxu1  ;;  %11694 = vmatprep.subr.bf16.mxu0 %v17141_v30 }
 0x5e4   : > { %v15585_v39 = vadd.f32 %v10792_v3, %v8464_v43  ;;  %v5772_v13 = vpop.f32.mrb[153].mxu1  ;;  %v8467_v43 = vld [vmem:[%s15390_s15 + $0xa0] sm:$0xff] }
 0x5e5   : > { %v15588_v54 = vadd.f32 %v8463_v52, %v5772_v13  ;;  %10399 = vmatmul.mubr.f32.vlgmr.msra.gmra.mrb[168].mxu0 %v15513_v38  ;;  %v8468_v38 = vld [vmem:[%s15390_s15 + $0xa8] sm:$0xff] }
 0x5e6   : > { %11695 = vmatpush3.bf16.msra.mxu0 %v17141_v30  ;;  %10401 = vmatprep.mubr.f32.mxu0 %v15520_v57 }
 0x5e7   : > { %5853 = vmax.xlane.f32.xlu1 %v15585_v39  ;;  %v10795_v48 = vpop.f32.mrb[154].mxu1  ;;  %5851 = vmax.xlane.f32.xlu0 %v15588_v54 }
 0x5e8   : > { %v15596_v11 = vadd.f32 %v10795_v48, %v8466_v14  ;;  %11696 = vmatprep.subr.bf16.mxu0 %v17141_v30  ;;  %v5782_v6 = vpop.f32.mrb[155].mxu1  ;;  %v8469_v14 = vld [vmem:[%s15390_s15 + $0xb0] sm:$0xff] }
 0x5e9   : > { %v15600_v27 = vadd.f32 %v8465_v36, %v5782_v6  ;;  %10402 = vmatmul.mubr.f32.gmra.mrb[170].mxu0 %v15523_v15  ;;  %v8470_v15 = vld [vmem:[%s15390_s15 + $0xb8] sm:$0xff] }
 0x5ea   : > { %11697 = vmatpush3.bf16.msra.mxu0 %v17141_v30  ;;  %10404 = vmatprep.mubr.f32.mxu0 %v15530_v19 }
 0x5eb   : > { %5857 = vmax.xlane.f32.xlu1 %v15596_v11  ;;  %v10798_v57 = vpop.f32.mrb[156].mxu1  ;;  %5855 = vmax.xlane.f32.xlu0 %v15600_v27 }
 0x5ec   : > { %v15608_v49 = vadd.f32 %v10798_v57, %v8468_v38  ;;  %11698 = vmatprep.subr.bf16.mxu0 %v17141_v30  ;;  %v5792_v47 = vpop.f32.mrb[157].mxu1 }
 0x5ed   : > { %v15612_v3 = vadd.f32 %v8467_v43, %v5792_v47  ;;  %10405 = vmatmul.mubr.f32.gmra.mrb[172].mxu0 %v15533_v29  ;;  %v8471_v47 = vld [vmem:[%s15390_s15 + $0xc0] sm:$0xff] }
 0x5ee   : > { %11699 = vmatpush3.bf16.msra.mxu0 %v17141_v30  ;;  %10407 = vmatprep.mubr.f32.mxu0 %v15540_v20  ;;  %v8472_v20 = vld [vmem:[%s15390_s15 + $0xc8] sm:$0xff] }
 0x5ef   : > { %5861 = vmax.xlane.f32.xlu1 %v15608_v49  ;;  %v10801_v19 = vpop.f32.mrb[158].mxu1  ;;  %5859 = vmax.xlane.f32.xlu0 %v15612_v3 }
 0x5f0   : > { %v15620_v13 = vadd.f32 %v10801_v19, %v8470_v15  ;;  %11700 = vmatprep.subr.bf16.mxu0 %v17141_v30  ;;  %v5802_v52 = vpop.f32.mrb[159].mxu1 }
 0x5f1   : > { %v15624_v48 = vadd.f32 %v8469_v14, %v5802_v52  ;;  %10408 = vmatmul.mubr.f32.gmra.mrb[174].mxu0 %v15543_v2  ;;  %v8474_v52 = vld [vmem:[%s15390_s15 + $0xd8] sm:$0xff] }
 0x5f2   : > { %11701 = vmatpush3.bf16.msra.mxu0 %v17141_v30  ;;  %10410 = vmatprep.mubr.f32.mxu0 %v15550_v22 }
 0x5f3   : > { %5865 = vmax.xlane.f32.xlu1 %v15620_v13  ;;  %v4463_v29 = vpop.xlane.xlu1 %4462  ;;  %v10804_v6 = vpop.f32.mrb[160].mxu1  ;;  %5863 = vmax.xlane.f32.xlu0 %v15624_v48 }
 0x5f4   : > { %v4493_v36 = vsub.f32 %v15187_v58, %v4463_v29  ;;  %v15633_v38 = vadd.f32 %v10804_v6, %v8472_v20  ;;  %11702 = vmatprep.subr.bf16.mxu0 %v17141_v30  ;;  %v4461_v57 = vpop.xlane.xlu0 %4460  ;;  %v5812_v2 = vpop.f32.mrb[161].mxu1  ;;  %v8473_v6 = vld [vmem:[%s15390_s15 + $0xd0] sm:$0xff] }
 0x5f5   : > { %v4492_v43 = vsub.f32 %v15192_v32, %v4461_v57  ;;  %v15638_v22 = vadd.f32 %v8471_v47, %v5812_v2  ;;  %10411 = vmatmul.mubr.f32.gmra.mrb[176].mxu0 %v15553_v40  ;;  %v8476_v47 = vld [vmem:[%s15390_s15 + $0xe8] sm:$0xff] }
 0x5f6   : > { %v4510_v15 = vmul.f32 1.442695, %v4493_v36  ;;  %11703 = vmatpush3.bf16.msra.mxu0 %v17141_v30  ;;  %10413 = vmatprep.mubr.f32.mxu0 %v15558_v12 }
 0x5f7   : > { %v4508_v58 = vmul.f32 1.442695, %v4492_v43  ;;  %5869 = vmax.xlane.f32.xlu1 %v15633_v38  ;;  %v4467_v19 = vpop.xlane.xlu1 %4466  ;;  %v10807_v14 = vpop.f32.mrb[162].mxu1  ;;  %5867 = vmax.xlane.f32.xlu0 %v15638_v22 }
 0x5f8   : > { %v4495_v32 = vsub.f32 %v15199_v35, %v4467_v19  ;;  %v15647_v29 = vadd.f32 %v10807_v14, %v8474_v52  ;;  %11704 = vmatprep.subr.bf16.mxu0 %v17141_v30  ;;  %v4465_v40 = vpop.xlane.xlu0 %4464  ;;  %v5822_v20 = vpop.f32.mrb[163].mxu1  ;;  %v8475_v19 = vld [vmem:[%s15390_s15 + $0xe0] sm:$0xff] }
 0x5f9   : > { %12408 = vpow2.f32 %v4508_v58  ;;  %v4494_v12 = vsub.f32 %v15204_v5, %v4465_v40  ;;  %v15652_v36 = vadd.f32 %v8473_v6, %v5822_v20  ;;  %10414 = vmatmul.mubr.f32.gmra.mrb[178].mxu0 %v15561_v46  ;;  %v8478_v40 = vld [vmem:[%s15390_s15 + $0xf8] sm:$0xff] }
 0x5fa   : > { %12410 = vpow2.f32 %v4510_v15  ;;  %v4514_v57 = vmul.f32 1.442695, %v4495_v32  ;;  %11705 = vmatpush3.bf16.msra.mxu0 %v17141_v30  ;;  %10416 = vmatprep.mubr.f32.mxu0 %v15566_v42 }
 0x5fb   : > { %v4512_v35 = vmul.f32 1.442695, %v4494_v12  ;;  %5873 = vmax.xlane.f32.xlu1 %v15647_v29  ;;  %v4471_v2 = vpop.xlane.xlu1 %4470  ;;  %v10810_v43 = vpop.f32.mrb[164].mxu1  ;;  %5871 = vmax.xlane.f32.xlu0 %v15652_v36 }
 0x5fc   : > { %v4497_v5 = vsub.f32 %v15217_v23, %v4471_v2  ;;  %v15661_v58 = vadd.f32 %v10810_v43, %v8476_v47  ;;  %11706 = vmatprep.subr.bf16.mxu0 %v17141_v30  ;;  %v4469_v46 = vpop.xlane.xlu0 %4468  ;;  %v5832_v15 = vpop.f32.mrb[165].mxu1  ;;  %v17241_v43 = vld [vmem:[#allocation39_spill] sm:$0xff] }
 0x5fd   : > { %12412 = vpow2.f32 %v4512_v35  ;;  %v4496_v42 = vsub.f32 %v15222_v63, %v4469_v46  ;;  %v15666_v52 = vadd.f32 %v8475_v19, %v5832_v15  ;;  %10417 = vmatmul.mubr.f32.gmra.mrb[180].mxu0 %v15569_v9 }
 0x5fe   : > { %12414 = vpow2.f32 %v4514_v57  ;;  %v4518_v14 = vmul.f32 1.442695, %v4497_v5  ;;  %11707 = vmatpush3.bf16.msra.mxu0 %v17141_v30  ;;  %10419 = vmatprep.mubr.f32.mxu0 %v15574_v45  ;;  %v8477_v57 = vld [vmem:[%s15390_s15 + $0xf0] sm:$0xff] }
 0x5ff   : > { %v4516_v23 = vmul.f32 1.442695, %v4496_v42  ;;  %5877 = vmax.xlane.f32.xlu1 %v15661_v58  ;;  %v4475_v32 = vpop.xlane.xlu1 %4474  ;;  %v10813_v20 = vpop.f32.mrb[166].mxu1  ;;  %5875 = vmax.xlane.f32.xlu0 %v15666_v52 }
 0x600   : > { %v4499_v63 = vsub.f32 %v15229_v25, %v4475_v32  ;;  %v15675_v6 = vadd.f32 %v10813_v20, %v8478_v40  ;;  %11708 = vmatprep.subr.bf16.mxu0 %v17141_v30  ;;  %v4473_v9 = vpop.xlane.xlu0 %4472  ;;  %v5842_v12 = vpop.f32.mrb[167].mxu1 }
 0x601   : > { %12416 = vpow2.f32 %v4516_v23  ;;  %v4498_v45 = vsub.f32 %v15232_v7, %v4473_v9  ;;  %v15680_v35 = vadd.f32 %v8477_v57, %v5842_v12  ;;  %10420 = vmatmul.mubr.f32.gmra.mrb[182].mxu0 %v15577_v4  ;;  %v17242_v23 = vld [vmem:[#allocation42_spill] sm:$0xff]  ;;  %v17243_v57 = vld [vmem:[#allocation45_spill] sm:$0xff] }
 0x602   : > { %12418 = vpow2.f32 %v4518_v14  ;;  %v4522_v2 = vmul.f32 1.442695, %v4499_v63  ;;  %11709 = vmatpush3.bf16.msra.mxu0 %v17141_v30 }
 0x603   : > { %v15684_v47 = vpop.eup %12408  ;;  %v4520_v25 = vmul.f32 1.442695, %v4498_v45  ;;  %11711 = vmatprep.subr.bf16.mxu0 %v17241_v43  ;;  %5881 = vmax.xlane.f32.xlu1 %v15675_v6  ;;  %v4479_v5 = vpop.xlane.xlu1 %4478 }
 0x604   : > { %v15688_v46 = vpop.eup %12410  ;;  %v4501_v7 = vsub.f32 %v15244_v31, %v4479_v5  ;;  %5879 = vmax.xlane.f32.xlu0 %v15680_v35  ;;  %10510 = vmatprep.mubr.f32.mxu0 %v15684_v47  ;;  %v4477_v4 = vpop.xlane.xlu0 %4476 }
 0x605   : > { %12420 = vpow2.f32 %v4520_v25  ;;  %v4500_v15 = vsub.f32 %v15247_v34, %v4477_v4  ;;  %10511 = vmatmul.mubr.f32.vlgmr.msra.gmra.mrb[184].mxu0 %v15688_v46  ;;  %v17244_v4 = vld [vmem:[#allocation48_spill] sm:$0xff] }
 0x606   : > { %12422 = vpow2.f32 %v4522_v2  ;;  %v4526_v19 = vmul.f32 1.442695, %v4501_v7  ;;  %11713 = vmatpush3.bf16.msra.mxu0 %v17241_v43 }
 0x607   : > { %v15696_v42 = vpop.eup %12412  ;;  %v4524_v14 = vmul.f32 1.442695, %v4500_v15  ;;  %11715 = vmatprep.subr.bf16.mxu0 %v17242_v23  ;;  %v4483_v31 = vpop.xlane.xlu1 %4482 }
 0x608   : > { %v15699_v32 = vpop.eup %12414  ;;  %v4503_v40 = vsub.f32 %v15254_v44, %v4483_v31  ;;  %10513 = vmatprep.mubr.f32.mxu0 %v15696_v42  ;;  %v4481_v20 = vpop.xlane.xlu0 %4480 }
 0x609   : > { %12424 = vpow2.f32 %v4524_v14  ;;  %v4502_v34 = vsub.f32 %v15257_v1, %v4481_v20  ;;  %10514 = vmatmul.mubr.f32.gmra.mrb[186].mxu0 %v15699_v32  ;;  %v17245_v20 = vld [vmem:[#allocation51_spill] sm:$0xff] }
 0x60a   : > { %12426 = vpow2.f32 %v4526_v19  ;;  %v4530_v63 = vmul.f32 1.442695, %v4503_v40  ;;  %11717 = vmatpush3.bf16.msra.mxu0 %v17242_v23 }
 0x60b   : > { %v15706_v9 = vpop.eup %12416  ;;  %v4528_v12 = vmul.f32 1.442695, %v4502_v34  ;;  %11719 = vmatprep.subr.bf16.mxu0 %v17243_v57  ;;  %v4487_v45 = vpop.xlane.xlu1 %4486 }
 0x60c   : > { %v15709_v2 = vpop.eup %12418  ;;  %v4505_v44 = vsub.f32 %v15270_v60, %v4487_v45  ;;  %10516 = vmatprep.mubr.f32.mxu0 %v15706_v9  ;;  %v4485_v25 = vpop.xlane.xlu0 %4484 }
 0x60d   : > { %12428 = vpow2.f32 %v4528_v12  ;;  %v4504_v1 = vsub.f32 %v15273_v53, %v4485_v25  ;;  %10517 = vmatmul.mubr.f32.gmra.mrb[188].mxu0 %v15709_v2  ;;  %v17248_v25 = vld [vmem:[#allocation60_spill] sm:$0xff] }
 0x60e   : > { %12430 = vpow2.f32 %v4530_v63  ;;  %v4534_v43 = vmul.f32 1.442695, %v4505_v44  ;;  %11721 = vmatpush3.bf16.msra.mxu0 %v17243_v57  ;;  %v17247_v57 = vld [vmem:[#allocation57_spill] sm:$0xff] }
 0x60f   : > { %v15716_v5 = vpop.eup %12420  ;;  %v4532_v7 = vmul.f32 1.442695, %v4504_v1  ;;  %11723 = vmatprep.subr.bf16.mxu0 %v17244_v4  ;;  %v4491_v15 = vpop.xlane.xlu1 %4490 }
 0x610   : > { %v15719_v19 = vpop.eup %12422  ;;  %v4507_v60 = vsub.f32 %v15280_v50, %v4491_v15  ;;  %10519 = vmatprep.mubr.f32.mxu0 %v15716_v5  ;;  %v4489_v14 = vpop.xlane.xlu0 %4488 }
 0x611   : > { %12432 = vpow2.f32 %v4532_v7  ;;  %v4506_v53 = vsub.f32 %v15283_v17, %v4489_v14  ;;  %10520 = vmatmul.mubr.f32.gmra.mrb[190].mxu0 %v15719_v19  ;;  %v17246_v17 = vld [vmem:[#allocation54_spill] sm:$0xff] }
 0x612   : > { %12434 = vpow2.f32 %v4534_v43  ;;  %v4538_v23 = vmul.f32 1.442695, %v4507_v60  ;;  %11725 = vmatpush3.bf16.msra.mxu0 %v17244_v4  ;;  %v8514_v43 = vld [vmem:[%s15390_s15 + $0x108] sm:$0xff]  ;;  %v8513_v60 = vld [vmem:[%s15390_s15 + $0x100] sm:$0xff] }
 0x613   : > { %v15726_v31 = vpop.eup %12424  ;;  %v4536_v40 = vmul.f32 1.442695, %v4506_v53  ;;  %11727 = vmatprep.subr.bf16.mxu0 %v17245_v20 }
 0x614   : > { %v15729_v34 = vpop.eup %12426  ;;  %10522 = vmatprep.mubr.f32.mxu0 %v15726_v31 }
 0x615   : > { %12436 = vpow2.f32 %v4536_v40  ;;  %10523 = vmatmul.mubr.f32.gmra.mrb[192].mxu0 %v15729_v34 }
 0x616   : > { %12438 = vpow2.f32 %v4538_v23  ;;  %11729 = vmatpush3.bf16.msra.mxu0 %v17245_v20  ;;  %v8515_v20 = vld [vmem:[%s15390_s15 + $0x110] sm:$0xff] }
 0x617   : > { %v15734_v50 = vpop.eup %12428  ;;  %11731 = vmatprep.subr.bf16.mxu0 %v17246_v17 }
 0x618   : > { %v15737_v63 = vpop.eup %12430  ;;  %10525 = vmatprep.mubr.f32.mxu0 %v15734_v50 }
 0x619   : > { %10526 = vmatmul.mubr.f32.gmra.mrb[194].mxu0 %v15737_v63 }
 0x61a   : > { %11733 = vmatpush3.bf16.msra.mxu0 %v17246_v17 }
 0x61b   : > { %v15742_v12 = vpop.eup %12432  ;;  %11735 = vmatprep.subr.bf16.mxu0 %v17247_v57 }
 0x61c   : > { %v15745_v45 = vpop.eup %12434  ;;  %10528 = vmatprep.mubr.f32.mxu0 %v15742_v12 }
 0x61d   : > { %10529 = vmatmul.mubr.f32.gmra.mrb[196].mxu0 %v15745_v45 }
 0x61e   : > { %11737 = vmatpush3.bf16.msra.mxu0 %v17247_v57 }
 0x61f   : > { %v15750_v44 = vpop.eup %12436  ;;  %11739 = vmatprep.subr.bf16.mxu0 %v17248_v25 }
 0x620   : > { %v15753_v1 = vpop.eup %12438  ;;  %10531 = vmatprep.mubr.f32.mxu0 %v15750_v44 }
 0x621   : > { %10532 = vmatmul.mubr.f32.gmra.mrb[198].mxu0 %v15753_v1 }
 0x622   : > { %11741 = vmatpush3.bf16.msra.mxu0 %v17248_v25  ;;  %10566 = vmatprep.mubr.f32.mxu0 %v15684_v47  ;;  %v8516_v47 = vld [vmem:[%s15390_s15 + $0x118] sm:$0xff] }
 0x623   : > { %v10960_v7 = vpop.f32.mrb[168].mxu1  ;;  %11790 = vmatprep.subr.bf16.mxu0 %v17141_v30 }
 0x624   : > { %v15761_v4 = vadd.f32 %v10960_v7, %v8514_v43  ;;  %v6434_v15 = vpop.f32.mrb[169].mxu1  ;;  %v8517_v43 = vld [vmem:[%s15390_s15 + $0x120] sm:$0xff] }
 0x625   : > { %v15764_v14 = vadd.f32 %v8513_v60, %v6434_v15  ;;  %10567 = vmatmul.mubr.f32.vlgmr.msra.gmra.mrb[200].mxu0 %v15688_v46  ;;  %v8518_v46 = vld [vmem:[%s15390_s15 + $0x128] sm:$0xff] }
 0x626   : > { %11791 = vmatpush3.bf16.msra.mxu0 %v17141_v30  ;;  %10569 = vmatprep.mubr.f32.mxu0 %v15696_v42 }
 0x627   : > { %6515 = vmax.xlane.f32.xlu1 %v15761_v4  ;;  %v10963_v53 = vpop.f32.mrb[170].mxu1  ;;  %6513 = vmax.xlane.f32.xlu0 %v15764_v14 }
 0x628   : > { %v15772_v23 = vadd.f32 %v10963_v53, %v8516_v47  ;;  %11792 = vmatprep.subr.bf16.mxu0 %v17141_v30  ;;  %v6444_v40 = vpop.f32.mrb[171].mxu1  ;;  %v8519_v47 = vld [vmem:[%s15390_s15 + $0x130] sm:$0xff] }
 0x629   : > { %v15776_v17 = vadd.f32 %v8515_v20, %v6444_v40  ;;  %10570 = vmatmul.mubr.f32.gmra.mrb[202].mxu0 %v15699_v32  ;;  %v8520_v32 = vld [vmem:[%s15390_s15 + $0x138] sm:$0xff] }
 0x62a   : > { %11793 = vmatpush3.bf16.msra.mxu0 %v17141_v30  ;;  %10572 = vmatprep.mubr.f32.mxu0 %v15706_v9 }
 0x62b   : > { %6519 = vmax.xlane.f32.xlu1 %v15772_v23  ;;  %v10966_v42 = vpop.f32.mrb[172].mxu1  ;;  %6517 = vmax.xlane.f32.xlu0 %v15776_v17 }
 0x62c   : > { %v15784_v57 = vadd.f32 %v10966_v42, %v8518_v46  ;;  %11794 = vmatprep.subr.bf16.mxu0 %v17141_v30  ;;  %v6454_v25 = vpop.f32.mrb[173].mxu1 }
 0x62d   : > { %v15788_v7 = vadd.f32 %v8517_v43, %v6454_v25  ;;  %10573 = vmatmul.mubr.f32.gmra.mrb[204].mxu0 %v15709_v2  ;;  %v8521_v25 = vld [vmem:[%s15390_s15 + $0x140] sm:$0xff] }
 0x62e   : > { %11795 = vmatpush3.bf16.msra.mxu0 %v17141_v30  ;;  %10575 = vmatprep.mubr.f32.mxu0 %v15716_v5  ;;  %v8522_v5 = vld [vmem:[%s15390_s15 + $0x148] sm:$0xff] }
 0x62f   : > { %6523 = vmax.xlane.f32.xlu1 %v15784_v57  ;;  %v10969_v9 = vpop.f32.mrb[174].mxu1  ;;  %6521 = vmax.xlane.f32.xlu0 %v15788_v7 }
 0x630   : > { %v15796_v15 = vadd.f32 %v10969_v9, %v8520_v32  ;;  %11796 = vmatprep.subr.bf16.mxu0 %v17141_v30  ;;  %v6464_v60 = vpop.f32.mrb[175].mxu1 }
 0x631   : > { %v15800_v53 = vadd.f32 %v8519_v47, %v6464_v60  ;;  %10576 = vmatmul.mubr.f32.gmra.mrb[206].mxu0 %v15719_v19  ;;  %v8524_v60 = vld [vmem:[%s15390_s15 + $0x158] sm:$0xff] }
 0x632   : > { %11797 = vmatpush3.bf16.msra.mxu0 %v17141_v30  ;;  %10578 = vmatprep.mubr.f32.mxu0 %v15726_v31 }
 0x633   : > { %6527 = vmax.xlane.f32.xlu1 %v15796_v15  ;;  %v5192_v2 = vpop.xlane.xlu1 %5191  ;;  %v10972_v40 = vpop.f32.mrb[176].mxu1  ;;  %6525 = vmax.xlane.f32.xlu0 %v15800_v53 }
 0x634   : > { %v5222_v20 = vsub.f32 %v15399_v24, %v5192_v2  ;;  %v15809_v46 = vadd.f32 %v10972_v40, %v8522_v5  ;;  %11798 = vmatprep.subr.bf16.mxu0 %v17141_v30  ;;  %v5190_v42 = vpop.xlane.xlu0 %5189  ;;  %v6474_v19 = vpop.f32.mrb[177].mxu1  ;;  %v8523_v40 = vld [vmem:[%s15390_s15 + $0x150] sm:$0xff] }
 0x635   : > { %v5221_v43 = vsub.f32 %v15404_v28, %v5190_v42  ;;  %v15814_v31 = vadd.f32 %v8521_v25, %v6474_v19  ;;  %10579 = vmatmul.mubr.f32.gmra.mrb[208].mxu0 %v15729_v34  ;;  %v8526_v25 = vld [vmem:[%s15390_s15 + $0x168] sm:$0xff] }
 0x636   : > { %v5239_v32 = vmul.f32 1.442695, %v5222_v20  ;;  %11799 = vmatpush3.bf16.msra.mxu0 %v17141_v30  ;;  %10581 = vmatprep.mubr.f32.mxu0 %v15734_v50 }
 0x637   : > { %v5237_v24 = vmul.f32 1.442695, %v5221_v43  ;;  %6531 = vmax.xlane.f32.xlu1 %v15809_v46  ;;  %v5196_v9 = vpop.xlane.xlu1 %5195  ;;  %v10975_v47 = vpop.f32.mrb[178].mxu1  ;;  %6529 = vmax.xlane.f32.xlu0 %v15814_v31 }
 0x638   : > { %v5224_v28 = vsub.f32 %v15414_v10, %v5196_v9  ;;  %v15823_v2 = vadd.f32 %v10975_v47, %v8524_v60  ;;  %11800 = vmatprep.subr.bf16.mxu0 %v17141_v30  ;;  %v5194_v34 = vpop.xlane.xlu0 %5193  ;;  %v6484_v5 = vpop.f32.mrb[179].mxu1  ;;  %v8525_v9 = vld [vmem:[%s15390_s15 + $0x160] sm:$0xff] }
 0x639   : > { %12440 = vpow2.f32 %v5237_v24  ;;  %v5223_v50 = vsub.f32 %v15420_v21, %v5194_v34  ;;  %v15828_v20 = vadd.f32 %v8523_v40, %v6484_v5  ;;  %10582 = vmatmul.mubr.f32.gmra.mrb[210].mxu0 %v15737_v63  ;;  %v8528_v34 = vld [vmem:[%s15390_s15 + $0x178] sm:$0xff] }
 0x63a   : > { %12442 = vpow2.f32 %v5239_v32  ;;  %v5243_v42 = vmul.f32 1.442695, %v5224_v28  ;;  %11801 = vmatpush3.bf16.msra.mxu0 %v17141_v30  ;;  %10584 = vmatprep.mubr.f32.mxu0 %v15742_v12 }
 0x63b   : > { %v5241_v10 = vmul.f32 1.442695, %v5223_v50  ;;  %6535 = vmax.xlane.f32.xlu1 %v15823_v2  ;;  %v5200_v19 = vpop.xlane.xlu1 %5199  ;;  %v10978_v43 = vpop.f32.mrb[180].mxu1  ;;  %6533 = vmax.xlane.f32.xlu0 %v15828_v20 }
 0x63c   : > { %v5226_v21 = vsub.f32 %v15430_v16, %v5200_v19  ;;  %v15837_v24 = vadd.f32 %v10978_v43, %v8526_v25  ;;  %11802 = vmatprep.subr.bf16.mxu0 %v17141_v30  ;;  %v5198_v63 = vpop.xlane.xlu0 %5197  ;;  %v6494_v32 = vpop.f32.mrb[181].mxu1  ;;  %v17252_v43 = vld [vmem:[#allocation61_spill] sm:$0xff] }
 0x63d   : > { %12444 = vpow2.f32 %v5241_v10  ;;  %v5225_v12 = vsub.f32 %v15436_v55, %v5198_v63  ;;  %v15842_v60 = vadd.f32 %v8525_v9, %v6494_v32  ;;  %10585 = vmatmul.mubr.f32.gmra.mrb[212].mxu0 %v15745_v45 }
 0x63e   : > { %12446 = vpow2.f32 %v5243_v42  ;;  %v5247_v47 = vmul.f32 1.442695, %v5226_v21  ;;  %11803 = vmatpush3.bf16.msra.mxu0 %v17141_v30  ;;  %10587 = vmatprep.mubr.f32.mxu0 %v15750_v44  ;;  %v8527_v42 = vld [vmem:[%s15390_s15 + $0x170] sm:$0xff] }
 0x63f   : > { %17249 = vst [vmem:[#allocation12_spill] sm:$0xff] %v15842_v60  ;;  %v5245_v16 = vmul.f32 1.442695, %v5225_v12  ;;  %6539 = vmax.xlane.f32.xlu1 %v15837_v24  ;;  %v5204_v28 = vpop.xlane.xlu1 %5203  ;;  %v10981_v5 = vpop.f32.mrb[182].mxu1  ;;  %6537 = vmax.xlane.f32.xlu0 %v15842_v60 }
 0x640   : > { %v5228_v55 = vsub.f32 %v15444_v41, %v5204_v28  ;;  %v15851_v40 = vadd.f32 %v10981_v5, %v8528_v34  ;;  %11804 = vmatprep.subr.bf16.mxu0 %v17141_v30  ;;  %v5202_v45 = vpop.xlane.xlu0 %5201  ;;  %v6504_v50 = vpop.f32.mrb[183].mxu1 }
 0x641   : > { %12448 = vpow2.f32 %v5245_v16  ;;  %v5227_v44 = vsub.f32 %v15448_v33, %v5202_v45  ;;  %v15856_v10 = vadd.f32 %v8527_v42, %v6504_v50  ;;  %10588 = vmatmul.mubr.f32.gmra.mrb[214].mxu0 %v15753_v1  ;;  %v17253_v16 = vld [vmem:[#allocation65_spill] sm:$0xff] }
 0x642   : > { %17250 = vst [vmem:[#allocation13_spill] sm:$0xff] %v15851_v40  ;;  %12450 = vpow2.f32 %v5247_v47  ;;  %v5251_v19 = vmul.f32 1.442695, %v5228_v55  ;;  %11805 = vmatpush3.bf16.msra.mxu0 %v17141_v30  ;;  %v17254_v42 = vld [vmem:[#allocation69_spill] sm:$0xff] }
 0x643   : > { %17251 = vst [vmem:[#allocation14_spill] sm:$0xff] %v15856_v10  ;;  %v15860_v25 = vpop.eup %12440  ;;  %v5249_v41 = vmul.f32 1.442695, %v5227_v44  ;;  %11807 = vmatprep.subr.bf16.mxu0 %v17252_v43  ;;  %6543 = vmax.xlane.f32.xlu1 %v15851_v40  ;;  %v5208_v21 = vpop.xlane.xlu1 %5207 }
 0x644   : > { %v15864_v63 = vpop.eup %12442  ;;  %v5230_v33 = vsub.f32 %v15457_v18, %v5208_v21  ;;  %6541 = vmax.xlane.f32.xlu0 %v15856_v10  ;;  %10678 = vmatprep.mubr.f32.mxu0 %v15860_v25  ;;  %v5206_v1 = vpop.xlane.xlu0 %5205 }
 0x645   : > { %12452 = vpow2.f32 %v5249_v41  ;;  %v5229_v32 = vsub.f32 %v15461_v62, %v5206_v1  ;;  %10679 = vmatmul.mubr.f32.vlgmr.msra.gmra.mrb[216].mxu0 %v15864_v63  ;;  %v17255_v1 = vld [vmem:[#allocation73_spill] sm:$0xff] }
 0x646   : > { %12454 = vpow2.f32 %v5251_v19  ;;  %v5255_v9 = vmul.f32 1.442695, %v5230_v33  ;;  %11809 = vmatpush3.bf16.msra.mxu0 %v17252_v43 }
 0x647   : > { %v15872_v12 = vpop.eup %12444  ;;  %v5253_v47 = vmul.f32 1.442695, %v5229_v32  ;;  %11811 = vmatprep.subr.bf16.mxu0 %v17253_v16  ;;  %v5212_v18 = vpop.xlane.xlu1 %5211 }
 0x648   : > { %v15875_v28 = vpop.eup %12446  ;;  %v5232_v34 = vsub.f32 %v15471_v37, %v5212_v18  ;;  %10681 = vmatprep.mubr.f32.mxu0 %v15872_v12  ;;  %v5210_v5 = vpop.xlane.xlu0 %5209 }
 0x649   : > { %12456 = vpow2.f32 %v5253_v47  ;;  %v5231_v62 = vsub.f32 %v15475_v59, %v5210_v5  ;;  %10682 = vmatmul.mubr.f32.gmra.mrb[218].mxu0 %v15875_v28  ;;  %v17256_v5 = vld [vmem:[#allocation77_spill] sm:$0xff] }
 0x64a   : > { %12458 = vpow2.f32 %v5255_v9  ;;  %v5259_v55 = vmul.f32 1.442695, %v5232_v34  ;;  %11813 = vmatpush3.bf16.msra.mxu0 %v17253_v16 }
 0x64b   : > { %v15882_v45 = vpop.eup %12448  ;;  %v5257_v50 = vmul.f32 1.442695, %v5231_v62  ;;  %11815 = vmatprep.subr.bf16.mxu0 %v17254_v42  ;;  %v5216_v44 = vpop.xlane.xlu1 %5215 }
 0x64c   : > { %v15885_v19 = vpop.eup %12450  ;;  %v5234_v37 = vsub.f32 %v15485_v51, %v5216_v44  ;;  %10684 = vmatprep.mubr.f32.mxu0 %v15882_v45  ;;  %v5214_v41 = vpop.xlane.xlu0 %5213 }
 0x64d   : > { %12460 = vpow2.f32 %v5257_v50  ;;  %v5233_v59 = vsub.f32 %v15489_v0, %v5214_v41  ;;  %10685 = vmatmul.mubr.f32.gmra.mrb[220].mxu0 %v15885_v19 }
 0x64e   : > { %12462 = vpow2.f32 %v5259_v55  ;;  %v5263_v43 = vmul.f32 1.442695, %v5234_v37  ;;  %11817 = vmatpush3.bf16.msra.mxu0 %v17254_v42  ;;  %v17258_v37 = vld [vmem:[#allocation85_spill] sm:$0xff] }
 0x64f   : > { %v15892_v21 = vpop.eup %12452  ;;  %v5261_v33 = vmul.f32 1.442695, %v5233_v59  ;;  %11819 = vmatprep.subr.bf16.mxu0 %v17255_v1  ;;  %v5220_v32 = vpop.xlane.xlu1 %5219 }
 0x650   : > { %v15895_v9 = vpop.eup %12454  ;;  %v5236_v51 = vsub.f32 %v15499_v26, %v5220_v32  ;;  %10687 = vmatprep.mubr.f32.mxu0 %v15892_v21  ;;  %v5218_v47 = vpop.xlane.xlu0 %5217 }
 0x651   : > { %12464 = vpow2.f32 %v5261_v33  ;;  %v5235_v0 = vsub.f32 %v15504_v8, %v5218_v47  ;;  %10688 = vmatmul.mubr.f32.gmra.mrb[222].mxu0 %v15895_v9  ;;  %v17257_v8 = vld [vmem:[#allocation81_spill] sm:$0xff] }
 0x652   : > { %12466 = vpow2.f32 %v5263_v43  ;;  %v5267_v16 = vmul.f32 1.442695, %v5236_v51  ;;  %11821 = vmatpush3.bf16.msra.mxu0 %v17255_v1  ;;  %v17259_v1 = vld [vmem:[#allocation89_spill] sm:$0xff] }
 0x653   : > { %v15902_v18 = vpop.eup %12456  ;;  %v5265_v34 = vmul.f32 1.442695, %v5235_v0  ;;  %11823 = vmatprep.subr.bf16.mxu0 %v17256_v5  ;;  %v8564_v0 = vld [vmem:[%s15390_s15 + $0x188] sm:$0xff] }
 0x654   : > { %v15905_v62 = vpop.eup %12458  ;;  %10690 = vmatprep.mubr.f32.mxu0 %v15902_v18 }
 0x655   : > { %12468 = vpow2.f32 %v5265_v34  ;;  %10691 = vmatmul.mubr.f32.gmra.mrb[224].mxu0 %v15905_v62 }
 0x656   : > { %12470 = vpow2.f32 %v5267_v16  ;;  %11825 = vmatpush3.bf16.msra.mxu0 %v17256_v5 }
 0x657   : > { %v15910_v26 = vpop.eup %12460  ;;  %11827 = vmatprep.subr.bf16.mxu0 %v17257_v8 }
 0x658   : > { %v15913_v55 = vpop.eup %12462  ;;  %v10176_v50 = vpop.f32.mrb[120].mxu0  ;;  %10693 = vmatprep.mubr.f32.mxu0 %v15910_v26 }
 0x659   : > { %v15916_v42 = vpop.f32.mrb[121].mxu0  ;;  %10694 = vmatmul.mubr.f32.gmra.mrb[226].mxu0 %v15913_v55  ;;  %12472 = vrcp.f32 %v10176_v50  ;;  %v8569_v50 = vld [vmem:[%s15390_s15 + $0x1b0] sm:$0xff] }
 0x65a   : > { %11829 = vmatpush3.bf16.msra.mxu0 %v17257_v8  ;;  %12474 = vrcp.f32 %v15916_v42 }
 0x65b   : > { %v15920_v44 = vpop.eup %12464  ;;  %11831 = vmatprep.subr.bf16.mxu0 %v17258_v37 }
 0x65c   : > { %v15923_v41 = vpop.eup %12466  ;;  %v15925_v59 = vpop.f32.mrb[122].mxu0  ;;  %10696 = vmatprep.mubr.f32.mxu0 %v15920_v44 }
 0x65d   : > { %v15928_v43 = vpop.f32.mrb[123].mxu0  ;;  %10697 = vmatmul.mubr.f32.gmra.mrb[228].mxu0 %v15923_v41  ;;  %12476 = vrcp.f32 %v15925_v59 }
 0x65e   : > { %11833 = vmatpush3.bf16.msra.mxu0 %v17258_v37  ;;  %v8563_v37 = vld [vmem:[%s15390_s15 + $0x180] sm:$0xff]  ;;  %12478 = vrcp.f32 %v15928_v43 }
 0x65f   : > { %v15932_v33 = vpop.eup %12468  ;;  %11835 = vmatprep.subr.bf16.mxu0 %v17259_v1 }
 0x660   : > { %v15935_v32 = vpop.eup %12470  ;;  %v15937_v51 = vpop.f32.mrb[124].mxu0  ;;  %10699 = vmatprep.mubr.f32.mxu0 %v15932_v33 }
 0x661   : > { %v15940_v47 = vpop.f32.mrb[125].mxu0  ;;  %10700 = vmatmul.mubr.f32.gmra.mrb[230].mxu0 %v15935_v32  ;;  %12480 = vrcp.f32 %v15937_v51 }
 0x662   : > { %11837 = vmatpush3.bf16.msra.mxu0 %v17259_v1  ;;  %10734 = vmatprep.mubr.f32.mxu0 %v15860_v25  ;;  %v8566_v25 = vld [vmem:[%s15390_s15 + $0x198] sm:$0xff]  ;;  %12482 = vrcp.f32 %v15940_v47 }
 0x663   : > { %v11128_v16 = vpop.f32.mrb[184].mxu1  ;;  %11886 = vmatprep.subr.bf16.mxu0 %v17141_v30 }
 0x664   : > { %v15947_v34 = vadd.f32 %v11128_v16, %v8564_v0  ;;  %v15949_v5 = vpop.f32.mrb[126].mxu0  ;;  %v7096_v8 = vpop.f32.mrb[185].mxu1 }
 0x665   : > { %v15952_v10 = vadd.f32 %v8563_v37, %v7096_v8  ;;  %v15954_v40 = vpop.f32.mrb[127].mxu0  ;;  %10735 = vmatmul.mubr.f32.vlgmr.msra.gmra.mrb[232].mxu0 %v15864_v63  ;;  %v8565_v63 = vld [vmem:[%s15390_s15 + $0x190] sm:$0xff]  ;;  %12484 = vrcp.f32 %v15949_v5 }
 0x666   : > { %17260 = vst [vmem:[#allocation15_spill] sm:$0xff] %v15947_v34  ;;  %11887 = vmatpush3.bf16.msra.mxu0 %v17141_v30  ;;  %7177 = vmax.xlane.f32.xlu1 %v15947_v34  ;;  %12486 = vrcp.f32 %v15954_v40 }
 0x667   : > { %17261 = vst [vmem:[#allocation16_spill] sm:$0xff] %v15952_v10  ;;  %10737 = vmatprep.mubr.f32.mxu0 %v15872_v12  ;;  %v11131_v1 = vpop.f32.mrb[186].mxu1  ;;  %7175 = vmax.xlane.f32.xlu0 %v15952_v10  ;;  %v8568_v12 = vld [vmem:[%s15390_s15 + $0x1a8] sm:$0xff] }
 0x668   : > { %v15962_v0 = vadd.f32 %v11131_v1, %v8566_v25  ;;  %v15964_v16 = vpop.f32.mrb[128].mxu0  ;;  %11888 = vmatprep.subr.bf16.mxu0 %v17141_v30  ;;  %v7106_v8 = vpop.f32.mrb[187].mxu1 }
 0x669   : > { %v15968_v37 = vadd.f32 %v8565_v63, %v7106_v8  ;;  %v15970_v60 = vpop.f32.mrb[129].mxu0  ;;  %10738 = vmatmul.mubr.f32.gmra.mrb[234].mxu0 %v15875_v28  ;;  %v8567_v63 = vld [vmem:[%s15390_s15 + $0x1a0] sm:$0xff] }
 0x66a   : > { %11889 = vmatpush3.bf16.msra.mxu0 %v17141_v30  ;;  %7181 = vmax.xlane.f32.xlu1 %v15962_v0 }
 0x66b   : > { %10740 = vmatprep.mubr.f32.mxu0 %v15882_v45  ;;  %v11134_v25 = vpop.f32.mrb[188].mxu1  ;;  %7179 = vmax.xlane.f32.xlu0 %v15968_v37  ;;  %v8570_v45 = vld [vmem:[%s15390_s15 + $0x1b8] sm:$0xff] }
 0x66c   : > { %v15978_v1 = vadd.f32 %v11134_v25, %v8568_v12  ;;  %v15980_v10 = vpop.f32.mrb[130].mxu0  ;;  %11890 = vmatprep.subr.bf16.mxu0 %v17141_v30  ;;  %v7116_v8 = vpop.f32.mrb[189].mxu1 }
 0x66d   : > { %v15984_v28 = vadd.f32 %v8567_v63, %v7116_v8  ;;  %v15986_v34 = vpop.f32.mrb[131].mxu0  ;;  %10741 = vmatmul.mubr.f32.gmra.mrb[236].mxu0 %v15885_v19 }
 0x66e   : > { %17262 = vst [vmem:[#allocation17_spill] sm:$0xff] %v15978_v1  ;;  %11891 = vmatpush3.bf16.msra.mxu0 %v17141_v30  ;;  %7185 = vmax.xlane.f32.xlu1 %v15978_v1 }
 0x66f   : > { %17263 = vst [vmem:[#allocation18_spill] sm:$0xff] %v15984_v28  ;;  %10743 = vmatprep.mubr.f32.mxu0 %v15892_v21  ;;  %v11137_v12 = vpop.f32.mrb[190].mxu1  ;;  %7183 = vmax.xlane.f32.xlu0 %v15984_v28  ;;  %v8572_v21 = vld [vmem:[%s15390_s15 + $0x1c8] sm:$0xff] }
 0x670   : > { %v15995_v25 = vadd.f32 %v11137_v12, %v8570_v45  ;;  %v15997_v8 = vpop.f32.mrb[132].mxu0  ;;  %11892 = vmatprep.subr.bf16.mxu0 %v17141_v30  ;;  %v7126_v19 = vpop.f32.mrb[191].mxu1 }
 0x671   : > { %v16001_v63 = vadd.f32 %v8569_v50, %v7126_v19  ;;  %v16003_v1 = vpop.f32.mrb[133].mxu0  ;;  %10744 = vmatmul.mubr.f32.gmra.mrb[238].mxu0 %v15895_v9 }
 0x672   : > { %17264 = vst [vmem:[#allocation37_spill] sm:$0xff] %v15995_v25  ;;  %11893 = vmatpush3.bf16.msra.mxu0 %v17141_v30  ;;  %7189 = vmax.xlane.f32.xlu1 %v15995_v25  ;;  %v8573_v25 = vld [vmem:[%s15390_s15 + $0x1d0] sm:$0xff] }
 0x673   : > { %17265 = vst [vmem:[#allocation93_spill] sm:$0xff] %v16001_v63  ;;  %10746 = vmatprep.mubr.f32.mxu0 %v15902_v18  ;;  %v11140_v42 = vpop.f32.mrb[192].mxu1  ;;  %7187 = vmax.xlane.f32.xlu0 %v16001_v63  ;;  %v8571_v18 = vld [vmem:[%s15390_s15 + $0x1c0] sm:$0xff] }
 0x674   : > { %v5854_v45 = vpop.xlane.xlu1 %5853  ;;  %v16013_v12 = vadd.f32 %v11140_v42, %v8572_v21  ;;  %v16015_v19 = vpop.f32.mrb[134].mxu0  ;;  %11894 = vmatprep.subr.bf16.mxu0 %v17141_v30 }
 0x675   : > { %v5884_v9 = vsub.f32 %v15585_v39, %v5854_v45  ;;  %v7136_v59 = vpop.f32.mrb[193].mxu1  ;;  %v5852_v50 = vpop.xlane.xlu0 %5851  ;;  %10747 = vmatmul.mubr.f32.gmra.mrb[240].mxu0 %v15905_v62  ;;  %v7609_v39 = vld [vmem:[%s16827_s10] sm:$0xff]  ;;  %v7610_v62 = vld [vmem:[%s16827_s10 + $0x8] sm:$0xff] }
 0x676   : > { %17266 = vst [vmem:[#allocation95_spill] sm:$0xff] %v16013_v12  ;;  %v16023_v43 = vadd.f32 %v8571_v18, %v7136_v59  ;;  %v5883_v21 = vsub.f32 %v15588_v54, %v5852_v50  ;;  %v16026_v42 = vpop.f32.mrb[135].mxu0  ;;  %11895 = vmatpush3.bf16.msra.mxu0 %v17141_v30  ;;  %7193 = vmax.xlane.f32.xlu1 %v16013_v12  ;;  %v8574_v54 = vld [vmem:[%s15390_s15 + $0x1d8] sm:$0xff]  ;;  %v12473_v59 = vpop.eup %12472 }
 0x677   : > { %v5901_v51 = vmul.f32 1.442695, %v5884_v9  ;;  %10749 = vmatprep.mubr.f32.mxu0 %v15910_v26  ;;  %v11143_v47 = vpop.f32.mrb[194].mxu1  ;;  %11896 = vmatprep.subr.bf16.mxu0 %v17141_v30  ;;  %v12126_v45 = vpack.c.bf16 %v7610_v62, %v7609_v39  ;;  %v12475_v39 = vpop.eup %12474 }
 0x678   : > { %v5899_v18 = vmul.f32 1.442695, %v5883_v21  ;;  %v5858_v50 = vpop.xlane.xlu1 %5857  ;;  %v16041_v12 = vadd.f32 %v11143_v47, %v8574_v54  ;;  %7191 = vmax.xlane.f32.xlu0 %v16023_v43  ;;  %v10232_v63 = vpop.f32.mrb[136].mxu0 }
 0x679   : > { %12488 = vpow2.f32 %v5901_v51  ;;  %v5886_v5 = vsub.f32 %v15596_v11, %v5858_v50  ;;  %v3524_v26 = vmul.f32 %v12473_v59, %v10232_v63  ;;  %v7146_v9 = vpop.f32.mrb[195].mxu1  ;;  %v5856_v28 = vpop.xlane.xlu0 %5855  ;;  %10750 = vmatmul.mubr.f32.gmra.mrb[242].mxu0 %v15913_v55  ;;  %12127 = vmatprep.subr.bf16.mxu1 %v12126_v45  ;;  %v7611_v11 = vld [vmem:[%s16827_s10 + $0x10] sm:$0xff]  ;;  %v7612_v55 = vld [vmem:[%s16827_s10 + $0x18] sm:$0xff] }
 0x67a   : > { %12490 = vpow2.f32 %v5899_v18  ;;  %v16047_v40 = vadd.f32 %v8573_v25, %v7146_v9  ;;  %v5885_v21 = vsub.f32 %v15600_v27, %v5856_v28  ;;  %v3428_v62 = vpop.f32.mrb[137].mxu0  ;;  %11897 = vmatpush3.bf16.msra.mxu0 %v17141_v30  ;;  %7197 = vmax.xlane.f32.xlu1 %v16041_v12  ;;  %v8576_v27 = vld [vmem:[%s15390_s15 + $0x1e8] sm:$0xff]  ;;  %v12130_v54 = vpack.c.bf16 %v7612_v55, %v7611_v11  ;;  %v12477_v47 = vpop.eup %12476  ;;  %v17268_v11 = vld [vmem:[#allocation33_spill] sm:$0xff] }
 0x67b   : > { %v5905_v63 = vmul.f32 1.442695, %v5886_v5  ;;  %v16059_v51 = vadd.f32 %v3524_v26, %v14799_v56  ;;  %v3523_v25 = vmul.f32 %v12475_v39, %v3428_v62  ;;  %10752 = vmatprep.mubr.f32.mxu0 %v15920_v44  ;;  %v11146_v28 = vpop.f32.mrb[196].mxu1  ;;  %11898 = vmatprep.subr.bf16.mxu0 %v17141_v30  ;;  %12492 = vrcp.f32 %v15964_v16  ;;  %v8575_v39 = vld [vmem:[%s15390_s15 + $0x1e0] sm:$0xff]  ;;  %v12479_v16 = vpop.eup %12478 }
 0x67c   : > { %v5903_v59 = vmul.f32 1.442695, %v5885_v21  ;;  %v5862_v18 = vpop.xlane.xlu1 %5861  ;;  %v16065_v50 = vadd.f32 %v11146_v28, %v8576_v27  ;;  %7195 = vmax.xlane.f32.xlu0 %v16047_v40  ;;  %v10235_v56 = vpop.f32.mrb[138].mxu0  ;;  %12129 = vmatpush3.bf16.msra.mxu1 %v12126_v45  ;;  %12494 = vrcp.f32 %v15970_v60 }
 0x67d   : > { %v16070_v44 = vadd.f32 %v3523_v25, %v14801_v61  ;;  %v5888_v5 = vsub.f32 %v15608_v49, %v5862_v18  ;;  %v3526_v26 = vmul.f32 %v12477_v47, %v10235_v56  ;;  %v7156_v9 = vpop.f32.mrb[197].mxu1  ;;  %v5860_v62 = vpop.xlane.xlu0 %5859  ;;  %10753 = vmatmul.mubr.f32.gmra.mrb[244].mxu0 %v15923_v41  ;;  %12131 = vmatprep.subr.bf16.mxu1 %v12130_v54  ;;  %v8578_v41 = vld [vmem:[%s15390_s15 + $0x1f8] sm:$0xff] }
 0x67e   : > { %12496 = vpow2.f32 %v5903_v59  ;;  %v16075_v21 = vadd.f32 %v8575_v39, %v7156_v9  ;;  %v5887_v45 = vsub.f32 %v15612_v3, %v5860_v62  ;;  %v3438_v60 = vpop.f32.mrb[139].mxu0  ;;  %11899 = vmatpush3.bf16.msra.mxu0 %v17141_v30  ;;  %7201 = vmax.xlane.f32.xlu1 %v16065_v50  ;;  %v12481_v61 = vpop.eup %12480  ;;  %v8577_v39 = vld [vmem:[%s15390_s15 + $0x1f0] sm:$0xff] }
 0x67f   : > { %12498 = vpow2.f32 %v5905_v63  ;;  %v5909_v49 = vmul.f32 1.442695, %v5888_v5  ;;  %v16081_v55 = vadd.f32 %v3526_v26, %v17268_v11  ;;  %v3525_v25 = vmul.f32 %v12479_v16, %v3438_v60  ;;  %10755 = vmatprep.mubr.f32.mxu0 %v15932_v33  ;;  %v11149_v27 = vpop.f32.mrb[198].mxu1  ;;  %11900 = vmatprep.subr.bf16.mxu0 %v17141_v30  ;;  %v12483_v3 = vpop.eup %12482  ;;  %v17270_v33 = vld [vmem:[#allocation34_spill] sm:$0xff]  ;;  %v17272_v60 = vld [vmem:[#allocation35_spill] sm:$0xff] }
 0x680   : > { %17267 = vst [vmem:[#allocation94_spill] sm:$0xff] %v16075_v21  ;;  %12500 = vrcp.f32 %v15980_v10  ;;  %v5907_v28 = vmul.f32 1.442695, %v5887_v45  ;;  %v5866_v47 = vpop.xlane.xlu1 %5865  ;;  %v16087_v59 = vadd.f32 %v11149_v27, %v8578_v41  ;;  %7199 = vmax.xlane.f32.xlu0 %v16075_v21  ;;  %v10238_v63 = vpop.f32.mrb[140].mxu0  ;;  %12133 = vmatpush3.bf16.msra.mxu1 %v12130_v54 }
 0x681   : > { %v12485_v18 = vpop.eup %12484  ;;  %12502 = vrcp.f32 %v15986_v34  ;;  %v16092_v56 = vadd.f32 %v3525_v25, %v17270_v33  ;;  %v5890_v5 = vsub.f32 %v15620_v13, %v5866_v47  ;;  %v3528_v26 = vmul.f32 %v12481_v61, %v10238_v63  ;;  %v7166_v9 = vpop.f32.mrb[199].mxu1  ;;  %10756 = vmatmul.mubr.f32.gmra.mrb[246].mxu0 %v15935_v32  ;;  %v17273_v32 = vld [vmem:[#allocation62_spill] sm:$0xff] }
 0x682   : > { %17269 = vst [vmem:[#allocation31_spill] sm:$0xff] %v16087_v59  ;;  %v5864_v10 = vpop.xlane.xlu0 %5863  ;;  %v12487_v62 = vpop.eup %12486  ;;  %12504 = vpow2.f32 %v5907_v28  ;;  %v16097_v16 = vadd.f32 %v8577_v39, %v7166_v9  ;;  %11901 = vmatpush3.bf16.msra.mxu0 %v17141_v30  ;;  %7205 = vmax.xlane.f32.xlu1 %v16087_v59  ;;  %v17274_v28 = vld [vmem:[#allocation36_spill] sm:$0xff]  ;;  %v17275_v39 = vld [vmem:[#allocation2_spill] sm:$0xff] }
 0x683   : > { %v5889_v54 = vsub.f32 %v15624_v48, %v5864_v10  ;;  %v3448_v45 = vpop.f32.mrb[141].mxu0  ;;  %v16102_v34 = vpop.eup %12488  ;;  %12506 = vpow2.f32 %v5909_v49  ;;  %v5913_v13 = vmul.f32 1.442695, %v5890_v5  ;;  %v16105_v61 = vadd.f32 %v3528_v26, %v17272_v60  ;;  %11903 = vmatprep.subr.bf16.mxu0 %v17273_v32 }
 0x684   : > { %17271 = vst [vmem:[#allocation32_spill] sm:$0xff] %v16097_v16  ;;  %v3527_v11 = vmul.f32 %v12483_v3, %v3448_v45  ;;  %v16108_v25 = vpop.eup %12490  ;;  %12508 = vrcp.f32 %v15997_v8  ;;  %v5870_v41 = vpop.xlane.xlu1 %5869  ;;  %7203 = vmax.xlane.f32.xlu0 %v16097_v16 }
 0x685   : > { %v5911_v48 = vmul.f32 1.442695, %v5889_v54  ;;  %v10241_v27 = vpop.f32.mrb[142].mxu0  ;;  %12510 = vrcp.f32 %v16003_v1  ;;  %v5892_v47 = vsub.f32 %v15633_v38, %v5870_v41  ;;  %10846 = vmatprep.mubr.f32.mxu0 %v16108_v25  ;;  %v12493_v5 = vpop.eup %12492  ;;  %v17276_v54 = vld [vmem:[#allocation3_spill] sm:$0xff] }
 0x686   : > { %v16114_v49 = vadd.f32 %v3527_v11, %v17274_v28  ;;  %v3530_v63 = vmul.f32 %v12485_v18, %v10241_v27  ;;  %v5868_v3 = vpop.xlane.xlu0 %5867  ;;  %v3458_v33 = vpop.f32.mrb[143].mxu0  ;;  %10847 = vmatmul.mubr.f32.vlgmr.msra.gmra.mrb[248].mxu0 %v16102_v34 }
 0x687   : > { %12512 = vpow2.f32 %v5911_v48  ;;  %v5891_v8 = vsub.f32 %v15638_v22, %v5868_v3  ;;  %v3529_v26 = vmul.f32 %v12487_v62, %v3458_v33  ;;  %v12495_v9 = vpop.eup %12494  ;;  %v5917_v1 = vmul.f32 1.442695, %v5892_v47  ;;  %11905 = vmatpush3.bf16.msra.mxu0 %v17273_v32  ;;  %v17277_v22 = vld [vmem:[#allocation66_spill] sm:$0xff]  ;;  %v17278_v3 = vld [vmem:[#allocation4_spill] sm:$0xff] }
 0x688   : > { %12514 = vpow2.f32 %v5913_v13  ;;  %v16121_v10 = vadd.f32 %v3530_v63, %v17275_v39  ;;  %v16124_v38 = vpop.eup %12496  ;;  %11907 = vmatprep.subr.bf16.mxu0 %v17277_v22  ;;  %v5874_v62 = vpop.xlane.xlu1 %5873 }
 0x689   : > { %12516 = vrcp.f32 %v16015_v19  ;;  %v5915_v18 = vmul.f32 1.442695, %v5891_v8  ;;  %v16128_v45 = vadd.f32 %v3529_v26, %v17276_v54  ;;  %v10244_v60 = vpop.f32.mrb[144].mxu0  ;;  %v16131_v11 = vpop.eup %12498  ;;  %v5894_v13 = vsub.f32 %v15647_v29, %v5874_v62  ;;  %10849 = vmatprep.mubr.f32.mxu0 %v16124_v38  ;;  %v17280_v26 = vld [vmem:[#allocation70_spill] sm:$0xff] }
 0x68a   : > { %12518 = vrcp.f32 %v16026_v42  ;;  %v3532_v48 = vmul.f32 %v12493_v5, %v10244_v60  ;;  %v5872_v32 = vpop.xlane.xlu0 %5871  ;;  %v3468_v41 = vpop.f32.mrb[145].mxu0  ;;  %10850 = vmatmul.mubr.f32.gmra.mrb[250].mxu0 %v16131_v11  ;;  %v17279_v5 = vld [vmem:[#allocation5_spill] sm:$0xff] }
 0x68b   : > { %v12501_v19 = vpop.eup %12500  ;;  %12520 = vpow2.f32 %v5915_v18  ;;  %v5893_v27 = vsub.f32 %v15652_v36, %v5872_v32  ;;  %v3531_v28 = vmul.f32 %v12495_v9, %v3468_v41  ;;  %v5921_v63 = vmul.f32 1.442695, %v5894_v13  ;;  %11909 = vmatpush3.bf16.msra.mxu0 %v17277_v22  ;;  %v17281_v41 = vld [vmem:[#allocation6_spill] sm:$0xff] }
 0x68c   : > { %v12503_v47 = vpop.eup %12502  ;;  %12522 = vpow2.f32 %v5917_v1  ;;  %v16139_v33 = vadd.f32 %v3532_v48, %v17278_v3  ;;  %11911 = vmatprep.subr.bf16.mxu0 %v17280_v26  ;;  %v5878_v36 = vpop.xlane.xlu1 %5877 }
 0x68d   : > { %v16142_v29 = vpop.eup %12504  ;;  %v5919_v42 = vmul.f32 1.442695, %v5893_v27  ;;  %v16145_v8 = vadd.f32 %v3531_v28, %v17279_v5  ;;  %v10247_v9 = vpop.f32.mrb[146].mxu0  ;;  %v5896_v1 = vsub.f32 %v15661_v58, %v5878_v36  ;;  %v17282_v28 = vld [vmem:[#allocation7_spill] sm:$0xff] }
 0x68e   : > { %v16148_v39 = vpop.eup %12506  ;;  %v3534_v18 = vmul.f32 %v12501_v19, %v10247_v9  ;;  %10852 = vmatprep.mubr.f32.mxu0 %v16142_v29  ;;  %v5876_v54 = vpop.xlane.xlu0 %5875 }
 0x68f   : > { %v3478_v62 = vpop.f32.mrb[147].mxu0  ;;  %v12509_v22 = vpop.eup %12508  ;;  %12524 = vpow2.f32 %v5919_v42  ;;  %v5895_v60 = vsub.f32 %v15666_v52, %v5876_v54  ;;  %10853 = vmatmul.mubr.f32.gmra.mrb[252].mxu0 %v16148_v39  ;;  %v5925_v32 = vmul.f32 1.442695, %v5896_v1  ;;  %v17283_v42 = vld [vmem:[#allocation74_spill] sm:$0xff] }
 0x690   : > { %v3533_v13 = vmul.f32 %v12503_v47, %v3478_v62  ;;  %v12511_v48 = vpop.eup %12510  ;;  %12526 = vpow2.f32 %v5921_v63  ;;  %v16155_v27 = vadd.f32 %v3534_v18, %v17281_v41  ;;  %11913 = vmatpush3.bf16.msra.mxu0 %v17280_v26  ;;  %v5882_v52 = vpop.xlane.xlu1 %5881 }
 0x691   : > { %v16158_v58 = vpop.eup %12512  ;;  %v5923_v19 = vmul.f32 1.442695, %v5895_v60  ;;  %11915 = vmatprep.subr.bf16.mxu0 %v17283_v42  ;;  %v10250_v47 = vpop.f32.mrb[148].mxu0  ;;  %v5898_v63 = vsub.f32 %v15675_v6, %v5882_v52 }
 0x692   : > { %v16161_v3 = vadd.f32 %v3533_v13, %v17282_v28  ;;  %v16164_v5 = vpop.eup %12514  ;;  %v3536_v36 = vmul.f32 %v12509_v22, %v10250_v47  ;;  %10855 = vmatprep.mubr.f32.mxu0 %v16158_v58  ;;  %v5880_v9 = vpop.xlane.xlu0 %5879  ;;  %v17284_v13 = vld [vmem:[#allocation8_spill] sm:$0xff]  ;;  %v17285_v28 = vld [vmem:[#allocation9_spill] sm:$0xff] }
 0x693   : > { %v3488_v1 = vpop.f32.mrb[149].mxu0  ;;  %v12517_v26 = vpop.eup %12516  ;;  %12528 = vpow2.f32 %v5923_v19  ;;  %v5897_v18 = vsub.f32 %v15680_v35, %v5880_v9  ;;  %10856 = vmatmul.mubr.f32.gmra.mrb[254].mxu0 %v16164_v5  ;;  %v5929_v60 = vmul.f32 1.442695, %v5898_v63  ;;  %v17286_v19 = vld [vmem:[#allocation78_spill] sm:$0xff] }
 0x694   : > { %v3535_v54 = vmul.f32 %v12511_v48, %v3488_v1  ;;  %v12519_v62 = vpop.eup %12518  ;;  %12530 = vpow2.f32 %v5925_v32  ;;  %v16171_v41 = vadd.f32 %v3536_v36, %v17284_v13  ;;  %11917 = vmatpush3.bf16.msra.mxu0 %v17283_v42  ;;  %v10253_v35 = vpop.f32.mrb[150].mxu0  ;;  %v17287_v42 = vld [vmem:[#allocation10_spill] sm:$0xff]  ;;  %v17288_v1 = vld [vmem:[#allocation11_spill] sm:$0xff] }
 0x695   : > { %v16174_v6 = vpop.eup %12520  ;;  %v5927_v22 = vmul.f32 1.442695, %v5897_v18  ;;  %11919 = vmatprep.subr.bf16.mxu0 %v17286_v19  ;;  %v3538_v47 = vmul.f32 %v12517_v26, %v10253_v35  ;;  %v3498_v32 = vpop.f32.mrb[151].mxu0 }
 0x696   : > { %v16177_v52 = vadd.f32 %v3535_v54, %v17285_v28  ;;  %v16180_v48 = vpop.eup %12522  ;;  %10858 = vmatprep.mubr.f32.mxu0 %v16174_v6  ;;  %v3537_v63 = vmul.f32 %v12519_v62, %v3498_v32  ;;  %v17289_v54 = vld [vmem:[#allocation82_spill] sm:$0xff] }
 0x697   : > { %12532 = vpow2.f32 %v5927_v22  ;;  %10859 = vmatmul.mubr.f32.gmra.mrb[0].mxu0 %v16180_v48  ;;  %v16185_v36 = vadd.f32 %v3538_v47, %v17287_v42  ;;  %v17290_v22 = vld [vmem:[#allocation86_spill] sm:$0xff] }
 0x698   : > { %12534 = vpow2.f32 %v5929_v60  ;;  %11921 = vmatpush3.bf16.msra.mxu0 %v17286_v19  ;;  %v16191_v18 = vadd.f32 %v3537_v63, %v17288_v1  ;;  %v10344_v26 = vpop.f32.mrb[152].mxu0  ;;  %v17291_v32 = vld [vmem:[#allocation90_spill] sm:$0xff] }
 0x699   : > { %v16188_v9 = vpop.eup %12524  ;;  %11923 = vmatprep.subr.bf16.mxu0 %v17289_v54  ;;  %v3934_v62 = vpop.f32.mrb[153].mxu0  ;;  %12536 = vrcp.f32 %v10344_v26 }
 0x69a   : > { %v16194_v13 = vpop.eup %12526  ;;  %10861 = vmatprep.mubr.f32.mxu0 %v16188_v9  ;;  %12538 = vrcp.f32 %v3934_v62 }
 0x69b   : > { %10862 = vmatmul.mubr.f32.gmra.mrb[2].mxu0 %v16194_v13 }
 0x69c   : > { %11925 = vmatpush3.bf16.msra.mxu0 %v17289_v54  ;;  %v10347_v28 = vpop.f32.mrb[154].mxu0 }
 0x69d   : > { %v16199_v60 = vpop.eup %12528  ;;  %11927 = vmatprep.subr.bf16.mxu0 %v17290_v22  ;;  %v3944_v35 = vpop.f32.mrb[155].mxu0  ;;  %12540 = vrcp.f32 %v10347_v28 }
 0x69e   : > { %v16202_v19 = vpop.eup %12530  ;;  %10864 = vmatprep.mubr.f32.mxu0 %v16199_v60  ;;  %12542 = vrcp.f32 %v3944_v35 }
 0x69f   : > { %10865 = vmatmul.mubr.f32.gmra.mrb[4].mxu0 %v16202_v19 }
 0x6a0   : > { %11929 = vmatpush3.bf16.msra.mxu0 %v17290_v22  ;;  %v10350_v63 = vpop.f32.mrb[156].mxu0 }
 0x6a1   : > { %v16207_v47 = vpop.eup %12532  ;;  %11931 = vmatprep.subr.bf16.mxu0 %v17291_v32  ;;  %v3954_v1 = vpop.f32.mrb[157].mxu0  ;;  %12544 = vrcp.f32 %v10350_v63 }
 0x6a2   : > { %v16210_v42 = vpop.eup %12534  ;;  %10867 = vmatprep.mubr.f32.mxu0 %v16207_v47  ;;  %12546 = vrcp.f32 %v3954_v1 }
 0x6a3   : > { %10868 = vmatmul.mubr.f32.gmra.mrb[6].mxu0 %v16210_v42 }
 0x6a4   : > { %11933 = vmatpush3.bf16.msra.mxu0 %v17291_v32  ;;  %10902 = vmatprep.mubr.f32.mxu0 %v16108_v25  ;;  %v10353_v54 = vpop.f32.mrb[158].mxu0 }
 0x6a5   : > { %11982 = vmatprep.subr.bf16.mxu0 %v17141_v30  ;;  %v3964_v22 = vpop.f32.mrb[159].mxu0  ;;  %12548 = vrcp.f32 %v10353_v54 }
 0x6a6   : > { %12550 = vrcp.f32 %v3964_v22 }
 0x6a7   : > { %10903 = vmatmul.mubr.f32.vlgmr.msra.gmra.mrb[8].mxu0 %v16102_v34 }
 0x6a8   : > { %11983 = vmatpush3.bf16.msra.mxu0 %v17141_v30  ;;  %10905 = vmatprep.mubr.f32.mxu0 %v16124_v38  ;;  %v10356_v16 = vpop.f32.mrb[160].mxu0 }
 0x6a9   : > { %11984 = vmatprep.subr.bf16.mxu0 %v17141_v30  ;;  %v3974_v59 = vpop.f32.mrb[161].mxu0 }
 0x6ab   : > { %10906 = vmatmul.mubr.f32.gmra.mrb[10].mxu0 %v16131_v11 }
 0x6ac   : > { %11985 = vmatpush3.bf16.msra.mxu0 %v17141_v30  ;;  %10908 = vmatprep.mubr.f32.mxu0 %v16142_v29  ;;  %v16224_v25 = vpop.f32.mrb[162].mxu0 }
 0x6ad   : > { %11986 = vmatprep.subr.bf16.mxu0 %v17141_v30  ;;  %v16227_v32 = vpop.f32.mrb[163].mxu0 }
 0x6af   : > { %10909 = vmatmul.mubr.f32.gmra.mrb[12].mxu0 %v16148_v39 }
 0x6b0   : > { %11987 = vmatpush3.bf16.msra.mxu0 %v17141_v30  ;;  %10911 = vmatprep.mubr.f32.mxu0 %v16158_v58  ;;  %v16232_v34 = vpop.f32.mrb[164].mxu0 }
 0x6b1   : > { %11988 = vmatprep.subr.bf16.mxu0 %v17141_v30  ;;  %v16235_v38 = vpop.f32.mrb[165].mxu0 }
 0x6b3   : > { %10912 = vmatmul.mubr.f32.gmra.mrb[14].mxu0 %v16164_v5 }
 0x6b4   : > { %11989 = vmatpush3.bf16.msra.mxu0 %v17141_v30  ;;  %10914 = vmatprep.mubr.f32.mxu0 %v16174_v6  ;;  %v6516_v11 = vpop.xlane.xlu1 %6515  ;;  %v16240_v29 = vpop.f32.mrb[166].mxu0 }
 0x6b5   : > { %11990 = vmatprep.subr.bf16.mxu0 %v17141_v30  ;;  %v6546_v39 = vsub.f32 %v15761_v4, %v6516_v11  ;;  %v6514_v58 = vpop.xlane.xlu0 %6513  ;;  %v16244_v26 = vpop.f32.mrb[167].mxu0 }
 0x6b6   : > { %v6545_v62 = vsub.f32 %v15764_v14, %v6514_v58  ;;  %v12537_v6 = vpop.eup %12536 }
 0x6b7   : > { %10915 = vmatmul.mubr.f32.gmra.mrb[16].mxu0 %v16180_v48  ;;  %v6563_v5 = vmul.f32 1.442695, %v6546_v39  ;;  %v12539_v4 = vpop.eup %12538 }
 0x6b8   : > { %11991 = vmatpush3.bf16.msra.mxu0 %v17141_v30  ;;  %10917 = vmatprep.mubr.f32.mxu0 %v16188_v9  ;;  %v6561_v28 = vmul.f32 1.442695, %v6545_v62  ;;  %v6520_v35 = vpop.xlane.xlu1 %6519  ;;  %v10400_v21 = vpop.f32.mrb[168].mxu0 }
 0x6b9   : > { %11992 = vmatprep.subr.bf16.mxu0 %v17141_v30  ;;  %v6548_v63 = vsub.f32 %v15772_v23, %v6520_v35  ;;  %v4196_v14 = vmul.f32 %v12537_v6, %v10400_v21  ;;  %v6518_v11 = vpop.xlane.xlu0 %6517  ;;  %v4100_v48 = vpop.f32.mrb[169].mxu0 }
 0x6ba   : > { %12552 = vpow2.f32 %v6561_v28  ;;  %v6547_v1 = vsub.f32 %v15776_v17, %v6518_v11  ;;  %v4195_v39 = vmul.f32 %v12539_v4, %v4100_v48  ;;  %v12541_v22 = vpop.eup %12540 }
 0x6bb   : > { %10918 = vmatmul.mubr.f32.gmra.mrb[18].mxu0 %v16194_v13  ;;  %12554 = vpow2.f32 %v6563_v5  ;;  %v6567_v9 = vmul.f32 1.442695, %v6548_v63  ;;  %v16255_v54 = vadd.f32 %v4196_v14, %v16059_v51  ;;  %v12543_v13 = vpop.eup %12542 }
 0x6bc   : > { %11993 = vmatpush3.bf16.msra.mxu0 %v17141_v30  ;;  %10920 = vmatprep.mubr.f32.mxu0 %v16199_v60  ;;  %12556 = vrcp.f32 %v10356_v16  ;;  %v6565_v23 = vmul.f32 1.442695, %v6547_v1  ;;  %v16260_v21 = vadd.f32 %v4195_v39, %v16070_v44  ;;  %v6524_v58 = vpop.xlane.xlu1 %6523  ;;  %v10403_v17 = vpop.f32.mrb[170].mxu0 }
 0x6bd   : > { %11994 = vmatprep.subr.bf16.mxu0 %v17141_v30  ;;  %12558 = vrcp.f32 %v3974_v59  ;;  %v6550_v62 = vsub.f32 %v15784_v57, %v6524_v58  ;;  %v4198_v51 = vmul.f32 %v12541_v22, %v10403_v17  ;;  %v6522_v5 = vpop.xlane.xlu0 %6521  ;;  %v4110_v6 = vpop.f32.mrb[171].mxu0 }
 0x6be   : > { %12560 = vpow2.f32 %v6565_v23  ;;  %v6549_v60 = vsub.f32 %v15788_v7, %v6522_v5  ;;  %v4197_v28 = vmul.f32 %v12543_v13, %v4110_v6  ;;  %v12545_v59 = vpop.eup %12544 }
 0x6bf   : > { %10921 = vmatmul.mubr.f32.gmra.mrb[20].mxu0 %v16202_v19  ;;  %12562 = vpow2.f32 %v6567_v9  ;;  %v6571_v44 = vmul.f32 1.442695, %v6550_v62  ;;  %v16267_v16 = vadd.f32 %v4198_v51, %v16081_v55  ;;  %v12547_v19 = vpop.eup %12546 }
 0x6c0   : > { %11995 = vmatpush3.bf16.msra.mxu0 %v17141_v30  ;;  %10923 = vmatprep.mubr.f32.mxu0 %v16207_v47  ;;  %12564 = vrcp.f32 %v16224_v25  ;;  %v6569_v57 = vmul.f32 1.442695, %v6549_v60  ;;  %v16273_v35 = vadd.f32 %v4197_v28, %v16092_v56  ;;  %v6528_v7 = vpop.xlane.xlu1 %6527  ;;  %v10406_v4 = vpop.f32.mrb[172].mxu0 }
 0x6c1   : > { %11996 = vmatprep.subr.bf16.mxu0 %v17141_v30  ;;  %12566 = vrcp.f32 %v16227_v32  ;;  %v6552_v55 = vsub.f32 %v15796_v15, %v6528_v7  ;;  %v4200_v63 = vmul.f32 %v12545_v59, %v10406_v4  ;;  %v6526_v14 = vpop.xlane.xlu0 %6525  ;;  %v4120_v11 = vpop.f32.mrb[173].mxu0 }
 0x6c2   : > { %v12549_v47 = vpop.eup %12548  ;;  %12568 = vpow2.f32 %v6569_v57  ;;  %v6551_v25 = vsub.f32 %v15800_v53, %v6526_v14  ;;  %v4199_v48 = vmul.f32 %v12547_v19, %v4120_v11  ;;  %v17292_v53 = vld [vmem:[#allocation63_spill] sm:$0xff] }
 0x6c3   : > { %10924 = vmatmul.mubr.f32.gmra.mrb[22].mxu0 %v16210_v42  ;;  %v12551_v56 = vpop.eup %12550  ;;  %12570 = vpow2.f32 %v6571_v44  ;;  %v6575_v1 = vmul.f32 1.442695, %v6552_v55  ;;  %v16281_v39 = vadd.f32 %v4200_v63, %v16105_v61 }
 0x6c4   : > { %11997 = vmatpush3.bf16.msra.mxu0 %v17141_v30  ;;  %v16284_v32 = vpop.eup %12552  ;;  %12572 = vrcp.f32 %v16232_v34  ;;  %v6573_v15 = vmul.f32 1.442695, %v6551_v25  ;;  %v16288_v9 = vadd.f32 %v4199_v48, %v16114_v49  ;;  %v6532_v22 = vpop.xlane.xlu1 %6531 }
 0x6c5   : > { %11999 = vmatprep.subr.bf16.mxu0 %v17292_v53  ;;  %v10409_v42 = vpop.f32.mrb[174].mxu0  ;;  %v16291_v23 = vpop.eup %12554  ;;  %12574 = vrcp.f32 %v16235_v38  ;;  %v6554_v61 = vsub.f32 %v15809_v46, %v6532_v22  ;;  %11014 = vmatprep.mubr.f32.mxu0 %v16284_v32  ;;  %v17295_v22 = vld [vmem:[#allocation12_spill] sm:$0xff] }
 0x6c6   : > { %v4202_v58 = vmul.f32 %v12549_v47, %v10409_v42  ;;  %v6530_v17 = vpop.xlane.xlu0 %6529  ;;  %v4130_v13 = vpop.f32.mrb[175].mxu0  ;;  %12576 = vpow2.f32 %v6573_v15  ;;  %v17294_v47 = vld [vmem:[#allocation71_spill] sm:$0xff] }
 0x6c7   : > { %v12557_v34 = vpop.eup %12556  ;;  %v6553_v49 = vsub.f32 %v15814_v31, %v6530_v17  ;;  %v4201_v62 = vmul.f32 %v12551_v56, %v4130_v13  ;;  %11015 = vmatmul.mubr.f32.vlgmr.msra.gmra.mrb[24].mxu0 %v16291_v23  ;;  %12578 = vpow2.f32 %v6575_v1  ;;  %v6579_v5 = vmul.f32 1.442695, %v6554_v61  ;;  %v17293_v31 = vld [vmem:[#allocation67_spill] sm:$0xff] }
 0x6c8   : > { %v12559_v51 = vpop.eup %12558  ;;  %v16299_v6 = vadd.f32 %v4202_v58, %v16121_v10  ;;  %12001 = vmatpush3.bf16.msra.mxu0 %v17292_v53  ;;  %12580 = vrcp.f32 %v16240_v29  ;;  %v6536_v28 = vpop.xlane.xlu1 %6535 }
 0x6c9   : > { %v16302_v46 = vpop.eup %12560  ;;  %v6577_v38 = vmul.f32 1.442695, %v6553_v49  ;;  %v16306_v60 = vadd.f32 %v4201_v62, %v16128_v45  ;;  %12003 = vmatprep.subr.bf16.mxu0 %v17293_v31  ;;  %v10412_v44 = vpop.f32.mrb[176].mxu0  ;;  %12582 = vrcp.f32 %v16244_v26  ;;  %v6556_v10 = vsub.f32 %v15823_v2, %v6536_v28  ;;  %v17296_v49 = vld [vmem:[#allocation75_spill] sm:$0xff] }
 0x6ca   : > { %v16309_v59 = vpop.eup %12562  ;;  %v4204_v57 = vmul.f32 %v12557_v34, %v10412_v44  ;;  %11017 = vmatprep.mubr.f32.mxu0 %v16302_v46  ;;  %v6534_v7 = vpop.xlane.xlu0 %6533 }
 0x6cb   : > { %v4140_v4 = vpop.f32.mrb[177].mxu0  ;;  %v12565_v29 = vpop.eup %12564  ;;  %12584 = vpow2.f32 %v6577_v38  ;;  %v6555_v45 = vsub.f32 %v15828_v20, %v6534_v7  ;;  %11018 = vmatmul.mubr.f32.gmra.mrb[26].mxu0 %v16309_v59  ;;  %v6583_v63 = vmul.f32 1.442695, %v6556_v10  ;;  %v17297_v38 = vld [vmem:[#allocation13_spill] sm:$0xff] }
 0x6cc   : > { %v4203_v19 = vmul.f32 %v12559_v51, %v4140_v4  ;;  %v12567_v55 = vpop.eup %12566  ;;  %12586 = vpow2.f32 %v6579_v5  ;;  %v16317_v14 = vadd.f32 %v4204_v57, %v16139_v33  ;;  %12005 = vmatpush3.bf16.msra.mxu0 %v17293_v31  ;;  %v6540_v20 = vpop.xlane.xlu1 %6539  ;;  %v17298_v57 = vld [vmem:[#allocation14_spill] sm:$0xff] }
 0x6cd   : > { %v16320_v2 = vpop.eup %12568  ;;  %v6581_v26 = vmul.f32 1.442695, %v6555_v45  ;;  %12007 = vmatprep.subr.bf16.mxu0 %v17294_v47  ;;  %v10415_v25 = vpop.f32.mrb[178].mxu0  ;;  %v6558_v56 = vsub.f32 %v15837_v24, %v6540_v20 }
 0x6ce   : > { %v16323_v11 = vadd.f32 %v4203_v19, %v16145_v8  ;;  %v16326_v48 = vpop.eup %12570  ;;  %v4206_v1 = vmul.f32 %v12565_v29, %v10415_v25  ;;  %11020 = vmatprep.mubr.f32.mxu0 %v16320_v2  ;;  %v6538_v33 = vpop.xlane.xlu0 %6537 }
 0x6cf   : > { %v4150_v15 = vpop.f32.mrb[179].mxu0  ;;  %v12573_v53 = vpop.eup %12572  ;;  %12588 = vpow2.f32 %v6581_v26  ;;  %v6557_v42 = vsub.f32 %v17295_v22, %v6538_v33  ;;  %11021 = vmatmul.mubr.f32.gmra.mrb[28].mxu0 %v16326_v48  ;;  %v6587_v58 = vmul.f32 1.442695, %v6558_v56  ;;  %v17299_v26 = vld [vmem:[#allocation79_spill] sm:$0xff] }
 0x6d0   : > { %v4205_v61 = vmul.f32 %v12567_v55, %v4150_v15  ;;  %v12575_v8 = vpop.eup %12574  ;;  %12590 = vpow2.f32 %v6583_v63  ;;  %v16333_v17 = vadd.f32 %v4206_v1, %v16155_v27  ;;  %12009 = vmatpush3.bf16.msra.mxu0 %v17294_v47  ;;  %v6544_v62 = vpop.xlane.xlu1 %6543  ;;  %v17300_v15 = vld [vmem:[#allocation83_spill] sm:$0xff] }
 0x6d1   : > { %v16336_v24 = vpop.eup %12576  ;;  %v6585_v13 = vmul.f32 1.442695, %v6557_v42  ;;  %12011 = vmatprep.subr.bf16.mxu0 %v17296_v49  ;;  %v10418_v51 = vpop.f32.mrb[180].mxu0  ;;  %v6560_v31 = vsub.f32 %v17297_v38, %v6544_v62 }
 0x6d2   : > { %v16339_v34 = vadd.f32 %v4205_v61, %v16161_v3  ;;  %v16342_v5 = vpop.eup %12578  ;;  %v4208_v28 = vmul.f32 %v12573_v53, %v10418_v51  ;;  %11023 = vmatprep.mubr.f32.mxu0 %v16336_v24  ;;  %v6542_v27 = vpop.xlane.xlu0 %6541  ;;  %v17301_v61 = vld [vmem:[#allocation87_spill] sm:$0xff] }
 0x6d3   : > { %v4160_v44 = vpop.f32.mrb[181].mxu0  ;;  %v12581_v10 = vpop.eup %12580  ;;  %12592 = vpow2.f32 %v6585_v13  ;;  %v6559_v7 = vsub.f32 %v17298_v57, %v6542_v27  ;;  %11024 = vmatmul.mubr.f32.gmra.mrb[30].mxu0 %v16342_v5  ;;  %v6591_v29 = vmul.f32 1.442695, %v6560_v31 }
 0x6d4   : > { %v4207_v4 = vmul.f32 %v12575_v8, %v4160_v44  ;;  %v12583_v3 = vpop.eup %12582  ;;  %12594 = vpow2.f32 %v6587_v58  ;;  %v16349_v45 = vadd.f32 %v4208_v28, %v16171_v41  ;;  %12013 = vmatpush3.bf16.msra.mxu0 %v17296_v49  ;;  %v10421_v47 = vpop.f32.mrb[182].mxu0  ;;  %v17302_v49 = vld [vmem:[#allocation91_spill] sm:$0xff] }
 0x6d5   : > { %v16352_v19 = vpop.eup %12584  ;;  %v6589_v55 = vmul.f32 1.442695, %v6559_v7  ;;  %12015 = vmatprep.subr.bf16.mxu0 %v17299_v26  ;;  %v4210_v25 = vmul.f32 %v12581_v10, %v10421_v47  ;;  %v4170_v56 = vpop.f32.mrb[183].mxu0  ;;  %v17304_v7 = vld [vmem:[#allocation16_spill] sm:$0xff] }
 0x6d6   : > { %v16355_v63 = vadd.f32 %v4207_v4, %v16177_v52  ;;  %v16358_v20 = vpop.eup %12586  ;;  %11026 = vmatprep.mubr.f32.mxu0 %v16352_v19  ;;  %v4209_v41 = vmul.f32 %v12583_v3, %v4170_v56 }
 0x6d7   : > { %12596 = vpow2.f32 %v6589_v55  ;;  %11027 = vmatmul.mubr.f32.gmra.mrb[32].mxu0 %v16358_v20  ;;  %v16363_v1 = vadd.f32 %v4210_v25, %v16185_v36 }
 0x6d8   : > { %12598 = vpow2.f32 %v6591_v29  ;;  %12017 = vmatpush3.bf16.msra.mxu0 %v17299_v26  ;;  %v16369_v33 = vadd.f32 %v4209_v41, %v16191_v18  ;;  %v10512_v53 = vpop.f32.mrb[184].mxu0 }
 0x6d9   : > { %v16366_v52 = vpop.eup %12588  ;;  %12019 = vmatprep.subr.bf16.mxu0 %v17300_v15  ;;  %v4606_v42 = vpop.f32.mrb[185].mxu0  ;;  %12600 = vrcp.f32 %v10512_v53 }
 0x6da   : > { %v16372_v22 = vpop.eup %12590  ;;  %11029 = vmatprep.mubr.f32.mxu0 %v16366_v52  ;;  %12602 = vrcp.f32 %v4606_v42 }
 0x6db   : > { %11030 = vmatmul.mubr.f32.gmra.mrb[34].mxu0 %v16372_v22 }
 0x6dc   : > { %12021 = vmatpush3.bf16.msra.mxu0 %v17300_v15  ;;  %v10515_v8 = vpop.f32.mrb[186].mxu0 }
 0x6dd   : > { %v16377_v36 = vpop.eup %12592  ;;  %12023 = vmatprep.subr.bf16.mxu0 %v17301_v61  ;;  %v4616_v18 = vpop.f32.mrb[187].mxu0  ;;  %12604 = vrcp.f32 %v10515_v8 }
 0x6de   : > { %v16380_v58 = vpop.eup %12594  ;;  %11032 = vmatprep.mubr.f32.mxu0 %v16377_v36  ;;  %12606 = vrcp.f32 %v4616_v18 }
 0x6df   : > { %11033 = vmatmul.mubr.f32.gmra.mrb[36].mxu0 %v16380_v58 }
 0x6e0   : > { %12025 = vmatpush3.bf16.msra.mxu0 %v17301_v61  ;;  %v10518_v62 = vpop.f32.mrb[188].mxu0 }
 0x6e1   : > { %v16385_v13 = vpop.eup %12596  ;;  %12027 = vmatprep.subr.bf16.mxu0 %v17302_v49  ;;  %v4626_v38 = vpop.f32.mrb[189].mxu0  ;;  %12608 = vrcp.f32 %v10518_v62 }
 0x6e2   : > { %v16388_v51 = vpop.eup %12598  ;;  %11035 = vmatprep.mubr.f32.mxu0 %v16385_v13  ;;  %12610 = vrcp.f32 %v4626_v38 }
 0x6e3   : > { %11036 = vmatmul.mubr.f32.gmra.mrb[38].mxu0 %v16388_v51  ;;  %v12601_v55 = vpop.eup %12600 }
 0x6e4   : > { %12029 = vmatpush3.bf16.msra.mxu0 %v17302_v49  ;;  %11070 = vmatprep.mubr.f32.mxu0 %v16284_v32  ;;  %v10521_v31 = vpop.f32.mrb[190].mxu0  ;;  %v12603_v56 = vpop.eup %12602 }
 0x6e5   : > { %12078 = vmatprep.subr.bf16.mxu0 %v17141_v30  ;;  %v4636_v28 = vpop.f32.mrb[191].mxu0  ;;  %12612 = vrcp.f32 %v10521_v31 }
 0x6e7   : > { %11071 = vmatmul.mubr.f32.vlgmr.msra.gmra.mrb[40].mxu0 %v16291_v23  ;;  %v12605_v8 = vpop.eup %12604 }
 0x6e8   : > { %12079 = vmatpush3.bf16.msra.mxu0 %v17141_v30  ;;  %11073 = vmatprep.mubr.f32.mxu0 %v16302_v46  ;;  %v10524_v27 = vpop.f32.mrb[192].mxu0  ;;  %v12607_v38 = vpop.eup %12606 }
 0x6e9   : > { %12080 = vmatprep.subr.bf16.mxu0 %v17141_v30  ;;  %v16399_v44 = vpop.f32.mrb[193].mxu0 }
 0x6eb   : > { %11074 = vmatmul.mubr.f32.gmra.mrb[42].mxu0 %v16309_v59 }
 0x6ec   : > { %12081 = vmatpush3.bf16.msra.mxu0 %v17141_v30  ;;  %11076 = vmatprep.mubr.f32.mxu0 %v16320_v2  ;;  %v16404_v32 = vpop.f32.mrb[194].mxu0 }
 0x6ed   : > { %12082 = vmatprep.subr.bf16.mxu0 %v17141_v30  ;;  %v16407_v23 = vpop.f32.mrb[195].mxu0 }
 0x6ef   : > { %11077 = vmatmul.mubr.f32.gmra.mrb[44].mxu0 %v16326_v48  ;;  %v17303_v48 = vld [vmem:[#allocation15_spill] sm:$0xff] }
 0x6f0   : > { %12083 = vmatpush3.bf16.msra.mxu0 %v17141_v30  ;;  %11079 = vmatprep.mubr.f32.mxu0 %v16336_v24  ;;  %v16412_v46 = vpop.f32.mrb[196].mxu0 }
 0x6f1   : > { %12084 = vmatprep.subr.bf16.mxu0 %v17141_v30  ;;  %v16415_v59 = vpop.f32.mrb[197].mxu0 }
 0x6f3   : > { %11080 = vmatmul.mubr.f32.gmra.mrb[46].mxu0 %v16342_v5  ;;  %v7178_v2 = vpop.xlane.xlu1 %7177 }
 0x6f4   : > { %12085 = vmatpush3.bf16.msra.mxu0 %v17141_v30  ;;  %11082 = vmatprep.mubr.f32.mxu0 %v16352_v19  ;;  %v7208_v10 = vsub.f32 %v17303_v48, %v7178_v2  ;;  %v16421_v57 = vpop.f32.mrb[198].mxu0  ;;  %v7176_v24 = vpop.xlane.xlu0 %7175 }
 0x6f5   : > { %12086 = vmatprep.subr.bf16.mxu0 %v17141_v30  ;;  %v7207_v4 = vsub.f32 %v17304_v7, %v7176_v24  ;;  %v16425_v3 = vpop.f32.mrb[199].mxu0  ;;  %v12609_v24 = vpop.eup %12608 }
 0x6f6   : > { %v7225_v5 = vmul.f32 1.442695, %v7208_v10 }
 0x6f7   : > { %11083 = vmatmul.mubr.f32.gmra.mrb[48].mxu0 %v16358_v20  ;;  %v7223_v29 = vmul.f32 1.442695, %v7207_v4  ;;  %v7182_v19 = vpop.xlane.xlu1 %7181 }
 0x6f8   : > { %12087 = vmatpush3.bf16.msra.mxu0 %v17141_v30  ;;  %11085 = vmatprep.mubr.f32.mxu0 %v16366_v52  ;;  %v7210_v26 = vsub.f32 %v15962_v0, %v7182_v19  ;;  %v10568_v47 = vpop.f32.mrb[200].mxu0  ;;  %v7180_v25 = vpop.xlane.xlu0 %7179  ;;  %v17308_v19 = vld [vmem:[#allocation93_spill] sm:$0xff] }
 0x6f9   : > { %12088 = vmatprep.subr.bf16.mxu0 %v17141_v30  ;;  %12614 = vpow2.f32 %v7223_v29  ;;  %v4868_v41 = vmul.f32 %v12601_v55, %v10568_v47  ;;  %v7209_v20 = vsub.f32 %v15968_v37, %v7180_v25  ;;  %v4772_v15 = vpop.f32.mrb[201].mxu0  ;;  %v17305_v37 = vld [vmem:[#allocation17_spill] sm:$0xff] }
 0x6fa   : > { %12616 = vrcp.f32 %v4636_v28  ;;  %v4867_v53 = vmul.f32 %v12603_v56, %v4772_v15  ;;  %v7229_v52 = vmul.f32 1.442695, %v7210_v26  ;;  %v17309_v15 = vld [vmem:[#allocation64_spill] sm:$0xff] }
 0x6fb   : > { %11086 = vmatmul.mubr.f32.gmra.mrb[50].mxu0 %v16372_v22  ;;  %12618 = vpow2.f32 %v7225_v5  ;;  %v4884_v42 = vadd.f32 %v4868_v41, %v16255_v54  ;;  %v7227_v61 = vmul.f32 1.442695, %v7209_v20  ;;  %v7186_v0 = vpop.xlane.xlu1 %7185  ;;  %v17306_v54 = vld [vmem:[#allocation18_spill] sm:$0xff] }
 0x6fc   : > { %12089 = vmatpush3.bf16.msra.mxu0 %v17141_v30  ;;  %11088 = vmatprep.mubr.f32.mxu0 %v16377_v36  ;;  %12620 = vrcp.f32 %v10524_v27  ;;  %v4883_v18 = vadd.f32 %v4867_v53, %v16260_v21  ;;  %v7212_v49 = vsub.f32 %v17305_v37, %v7186_v0  ;;  %v10571_v62 = vpop.f32.mrb[202].mxu0  ;;  %v7184_v22 = vpop.xlane.xlu0 %7183 }
 0x6fd   : > { %12090 = vmatprep.subr.bf16.mxu0 %v17141_v30  ;;  %12622 = vpow2.f32 %v7227_v61  ;;  %v4870_v31 = vmul.f32 %v12605_v8, %v10571_v62  ;;  %v7211_v28 = vsub.f32 %v17306_v54, %v7184_v22  ;;  %v4782_v2 = vpop.f32.mrb[203].mxu0  ;;  %v17311_v22 = vld [vmem:[#allocation68_spill] sm:$0xff] }
 0x6fe   : > { %12624 = vrcp.f32 %v16399_v44  ;;  %v4869_v36 = vmul.f32 %v12607_v38, %v4782_v2  ;;  %11270 = vmatprep.mubr.msk.f32.mxu1 %vm460_vm0, %v4883_v18  ;;  %v7233_v21 = vmul.f32 1.442695, %v7212_v49 }
 0x6ff   : > { %11089 = vmatmul.mubr.f32.gmra.mrb[52].mxu0 %v16380_v58  ;;  %12626 = vpow2.f32 %v7229_v52  ;;  %v4886_v27 = vadd.f32 %v4870_v31, %v16267_v16  ;;  %v7231_v48 = vmul.f32 1.442695, %v7211_v28  ;;  %v7190_v10 = vpop.xlane.xlu1 %7189  ;;  %11271 = vmatmul.mubr.msk.f32.vlgmr.msra.gmra.mrb[200].mxu1 %vm460_vm0, %v4884_v42  ;;  %v17307_v58 = vld [vmem:[#allocation37_spill] sm:$0xff]  ;;  %v12611_v16 = vpop.eup %12610 }
 0x700   : > { %12091 = vmatpush3.bf16.msra.mxu0 %v17141_v30  ;;  %11091 = vmatprep.mubr.f32.mxu0 %v16385_v13  ;;  %12628 = vrcp.f32 %v16404_v32  ;;  %v4885_v44 = vadd.f32 %v4869_v36, %v16273_v35  ;;  %v7214_v7 = vsub.f32 %v17307_v58, %v7190_v10  ;;  %v10574_v4 = vpop.f32.mrb[204].mxu0  ;;  %v7188_v5 = vpop.xlane.xlu0 %7187 }
 0x701   : > { %12092 = vmatprep.subr.bf16.mxu0 %v17141_v30  ;;  %12630 = vpow2.f32 %v7231_v48  ;;  %v4872_v29 = vmul.f32 %v12609_v24, %v10574_v4  ;;  %v7213_v55 = vsub.f32 %v17308_v19, %v7188_v5  ;;  %v4792_v13 = vpop.f32.mrb[205].mxu0  ;;  %v12613_v26 = vpop.eup %12612 }
 0x702   : > { %12632 = vrcp.f32 %v16407_v23  ;;  %v4871_v32 = vmul.f32 %v12611_v16, %v4792_v13  ;;  %11273 = vmatprep.mubr.msk.f32.mxu1 %vm460_vm0, %v4885_v44  ;;  %v7237_v47 = vmul.f32 1.442695, %v7214_v7  ;;  %v17312_v44 = vld [vmem:[#allocation72_spill] sm:$0xff] }
 0x703   : > { %11092 = vmatmul.mubr.f32.gmra.mrb[54].mxu0 %v16388_v51  ;;  %v16456_v35 = vpop.eup %12614  ;;  %12634 = vpow2.f32 %v7233_v21  ;;  %v4888_v25 = vadd.f32 %v4872_v29, %v16281_v39  ;;  %v7235_v56 = vmul.f32 1.442695, %v7213_v55  ;;  %v7194_v41 = vpop.xlane.xlu1 %7193  ;;  %11274 = vmatmul.mubr.msk.f32.gmra.mrb[202].mxu1 %vm460_vm0, %v4886_v27  ;;  %v17310_v51 = vld [vmem:[#allocation95_spill] sm:$0xff]  ;;  %v17313_v29 = vld [vmem:[#allocation94_spill] sm:$0xff] }
 0x704   : > { %12093 = vmatpush3.bf16.msra.mxu0 %v17141_v30  ;;  %v12617_v20 = vpop.eup %12616  ;;  %12636 = vrcp.f32 %v16412_v46  ;;  %v4887_v23 = vadd.f32 %v4871_v32, %v16288_v9  ;;  %v7216_v53 = vsub.f32 %v17310_v51, %v7194_v41  ;;  %v10577_v52 = vpop.f32.mrb[206].mxu0  ;;  %11182 = vmatprep.mubr.f32.mxu0 %v16456_v35  ;;  %v17315_v41 = vld [vmem:[#allocation31_spill] sm:$0xff] }
 0x705   : > { %12095 = vmatprep.subr.bf16.mxu0 %v17309_v15  ;;  %v16465_v42 = vpop.eup %12618  ;;  %12638 = vpow2.f32 %v7235_v56  ;;  %v4874_v39 = vmul.f32 %v12613_v26, %v10577_v52  ;;  %v7192_v30 = vpop.xlane.xlu0 %7191  ;;  %v17314_v56 = vld [vmem:[#allocation76_spill] sm:$0xff] }
 0x706   : > { %v4802_v61 = vpop.f32.mrb[207].mxu0  ;;  %v12621_v0 = vpop.eup %12620  ;;  %12640 = vrcp.f32 %v16415_v59  ;;  %v7215_v9 = vsub.f32 %v16023_v43, %v7192_v30  ;;  %11276 = vmatprep.mubr.msk.f32.mxu1 %vm460_vm0, %v4887_v23  ;;  %v7241_v18 = vmul.f32 1.442695, %v7216_v53 }
 0x707   : > { %v4873_v46 = vmul.f32 %v12617_v20, %v4802_v61  ;;  %11183 = vmatmul.mubr.f32.vlgmr.msra.gmra.mrb[56].mxu0 %v16465_v42  ;;  %v16472_v8 = vpop.eup %12622  ;;  %12642 = vpow2.f32 %v7237_v47  ;;  %v4890_v37 = vadd.f32 %v4874_v39, %v16299_v6  ;;  %v7198_v49 = vpop.xlane.xlu1 %7197  ;;  %11277 = vmatmul.mubr.msk.f32.gmra.mrb[204].mxu1 %vm460_vm0, %v4888_v25  ;;  %v17316_v39 = vld [vmem:[#allocation32_spill] sm:$0xff] }
 0x708   : > { %12097 = vmatpush3.bf16.msra.mxu0 %v17309_v15  ;;  %v12625_v62 = vpop.eup %12624  ;;  %12644 = vrcp.f32 %v16421_v57  ;;  %v7239_v59 = vmul.f32 1.442695, %v7215_v9  ;;  %v7218_v38 = vsub.f32 %v16041_v12, %v7198_v49  ;;  %v10580_v31 = vpop.f32.mrb[208].mxu0  ;;  %11185 = vmatprep.mubr.f32.mxu0 %v16472_v8  ;;  %v17317_v49 = vld [vmem:[#allocation80_spill] sm:$0xff] }
 0x709   : > { %v4889_v43 = vadd.f32 %v4873_v46, %v16306_v60  ;;  %12099 = vmatprep.subr.bf16.mxu0 %v17311_v22  ;;  %v16481_v54 = vpop.eup %12626  ;;  %12646 = vrcp.f32 %v16425_v3  ;;  %v4876_v6 = vmul.f32 %v12621_v0, %v10580_v31  ;;  %v7196_v28 = vpop.xlane.xlu0 %7195 }
 0x70a   : > { %v4812_v2 = vpop.f32.mrb[209].mxu0  ;;  %v12629_v57 = vpop.eup %12628  ;;  %12648 = vpow2.f32 %v7239_v59  ;;  %v7217_v60 = vsub.f32 %v16047_v40, %v7196_v28  ;;  %v7245_v21 = vmul.f32 1.442695, %v7218_v38 }
 0x70b   : > { %v4875_v36 = vmul.f32 %v12625_v62, %v4812_v2  ;;  %11186 = vmatmul.mubr.f32.gmra.mrb[58].mxu0 %v16481_v54  ;;  %11279 = vmatprep.mubr.msk.f32.mxu1 %vm460_vm0, %v4889_v43  ;;  %v16488_v12 = vpop.eup %12630  ;;  %12650 = vpow2.f32 %v7241_v18  ;;  %v4892_v3 = vadd.f32 %v4876_v6, %v16317_v14  ;;  %v7202_v27 = vpop.xlane.xlu1 %7201  ;;  %v17318_v6 = vld [vmem:[#allocation84_spill] sm:$0xff] }
 0x70c   : > { %12101 = vmatpush3.bf16.msra.mxu0 %v17311_v22  ;;  %v12633_v48 = vpop.eup %12632  ;;  %v7243_v10 = vmul.f32 1.442695, %v7217_v60  ;;  %11280 = vmatmul.mubr.msk.f32.gmra.mrb[206].mxu1 %vm460_vm0, %v4890_v37  ;;  %v7220_v40 = vsub.f32 %v16065_v50, %v7202_v27  ;;  %v10583_v58 = vpop.f32.mrb[210].mxu0  ;;  %v17320_v27 = vld [vmem:[#allocation92_spill] sm:$0xff] }
 0x70d   : > { %v4891_v24 = vadd.f32 %v4875_v36, %v16323_v11  ;;  %12103 = vmatprep.subr.bf16.mxu0 %v17312_v44  ;;  %v16496_v7 = vpop.eup %12634  ;;  %v4878_v4 = vmul.f32 %v12629_v57, %v10583_v58  ;;  %11188 = vmatprep.mubr.f32.mxu0 %v16488_v12  ;;  %v7200_v14 = vpop.xlane.xlu0 %7199 }
 0x70e   : > { %v4822_v5 = vpop.f32.mrb[211].mxu0  ;;  %v12637_v16 = vpop.eup %12636  ;;  %12652 = vpow2.f32 %v7243_v10  ;;  %v7219_v19 = vsub.f32 %v17313_v29, %v7200_v14  ;;  %v7249_v50 = vmul.f32 1.442695, %v7220_v40 }
 0x70f   : > { %v4877_v55 = vmul.f32 %v12633_v48, %v4822_v5  ;;  %11189 = vmatmul.mubr.f32.gmra.mrb[60].mxu0 %v16496_v7  ;;  %11282 = vmatprep.mubr.msk.f32.mxu1 %vm460_vm0, %v4891_v24  ;;  %v16502_v11 = vpop.eup %12638  ;;  %12654 = vpow2.f32 %v7245_v21  ;;  %v4894_v13 = vadd.f32 %v4878_v4, %v16333_v17  ;;  %v7206_v26 = vpop.xlane.xlu1 %7205 }
 0x710   : > { %12105 = vmatpush3.bf16.msra.mxu0 %v17312_v44  ;;  %v12641_v32 = vpop.eup %12640  ;;  %v7247_v47 = vmul.f32 1.442695, %v7219_v19  ;;  %11283 = vmatmul.mubr.msk.f32.gmra.mrb[208].mxu1 %vm460_vm0, %v4892_v3  ;;  %v7222_v20 = vsub.f32 %v17315_v41, %v7206_v26  ;;  %v10586_v23 = vpop.f32.mrb[212].mxu0 }
 0x711   : > { %v4893_v25 = vadd.f32 %v4877_v55, %v16339_v34  ;;  %12107 = vmatprep.subr.bf16.mxu0 %v17314_v56  ;;  %v16510_v15 = vpop.eup %12642  ;;  %v4880_v51 = vmul.f32 %v12637_v16, %v10586_v23  ;;  %11191 = vmatprep.mubr.f32.mxu0 %v16502_v11  ;;  %v7204_v17 = vpop.xlane.xlu0 %7203 }
 0x712   : > { %v4832_v53 = vpop.f32.mrb[213].mxu0  ;;  %v12645_v52 = vpop.eup %12644  ;;  %12656 = vpow2.f32 %v7247_v47  ;;  %v7221_v30 = vsub.f32 %v17316_v39, %v7204_v17  ;;  %v7253_v0 = vmul.f32 1.442695, %v7222_v20 }
 0x713   : > { %v4879_v61 = vmul.f32 %v12641_v32, %v4832_v53  ;;  %11192 = vmatmul.mubr.f32.gmra.mrb[62].mxu0 %v16510_v15  ;;  %11285 = vmatprep.mubr.msk.f32.mxu1 %vm460_vm0, %v4893_v25  ;;  %v12647_v34 = vpop.eup %12646  ;;  %12658 = vpow2.f32 %v7249_v50  ;;  %v4896_v9 = vadd.f32 %v4880_v51, %v16349_v45 }
 0x714   : > { %12109 = vmatpush3.bf16.msra.mxu0 %v17314_v56  ;;  %v16518_v46 = vpop.eup %12648  ;;  %v7251_v18 = vmul.f32 1.442695, %v7221_v30  ;;  %11286 = vmatmul.mubr.msk.f32.gmra.mrb[210].mxu1 %vm460_vm0, %v4894_v13  ;;  %v10589_v62 = vpop.f32.mrb[214].mxu0 }
 0x715   : > { %v4895_v37 = vadd.f32 %v4879_v61, %v16355_v63  ;;  %12111 = vmatprep.subr.bf16.mxu0 %v17317_v49  ;;  %v12651_v59 = vpop.eup %12650  ;;  %v4882_v43 = vmul.f32 %v12645_v52, %v10589_v62  ;;  %11194 = vmatprep.mubr.f32.mxu0 %v16518_v46  ;;  %v4842_v22 = vpop.f32.mrb[215].mxu0 }
 0x716   : > { %12660 = vpow2.f32 %v7251_v18  ;;  %v4881_v38 = vmul.f32 %v12647_v34, %v4842_v22 }
 0x717   : > { %11195 = vmatmul.mubr.f32.gmra.mrb[64].mxu0 %v12651_v59  ;;  %11288 = vmatprep.mubr.msk.f32.mxu1 %vm460_vm0, %v4895_v37  ;;  %12662 = vpow2.f32 %v7253_v0  ;;  %v4898_v45 = vadd.f32 %v4882_v43, %v16363_v1  ;;  %v17319_v1 = vld [vmem:[#allocation88_spill] sm:$0xff] }
 0x718   : > { %12113 = vmatpush3.bf16.msra.mxu0 %v17317_v49  ;;  %v12653_v63 = vpop.eup %12652  ;;  %v4897_v31 = vadd.f32 %v4881_v38, %v16369_v33  ;;  %11289 = vmatmul.mubr.msk.f32.gmra.mrb[212].mxu1 %vm460_vm0, %v4896_v9  ;;  %v10680_v28 = vpop.f32.mrb[216].mxu0 }
 0x719   : > { %12115 = vmatprep.subr.bf16.mxu0 %v17318_v6  ;;  %v12655_v2 = vpop.eup %12654  ;;  %11197 = vmatprep.mubr.f32.mxu0 %v12653_v63  ;;  %v5335_v57 = vpop.f32.mrb[217].mxu0  ;;  %12664 = vrcp.f32 %v10680_v28 }
 0x71a   : > { %11291 = vmatprep.mubr.msk.f32.mxu1 %vm460_vm0, %v4897_v31  ;;  %12666 = vrcp.f32 %v5335_v57 }
 0x71b   : > { %11198 = vmatmul.mubr.f32.gmra.mrb[66].mxu0 %v12655_v2 }
 0x71c   : > { %12117 = vmatpush3.bf16.msra.mxu0 %v17318_v6  ;;  %v12657_v60 = vpop.eup %12656  ;;  %11292 = vmatmul.mubr.msk.f32.gmra.mrb[214].mxu1 %vm460_vm0, %v4898_v45  ;;  %v10683_v36 = vpop.f32.mrb[218].mxu0 }
 0x71d   : > { %12119 = vmatprep.subr.bf16.mxu0 %v17319_v1  ;;  %v12659_v33 = vpop.eup %12658  ;;  %11200 = vmatprep.mubr.f32.mxu0 %v12657_v60  ;;  %v5345_v21 = vpop.f32.mrb[219].mxu0  ;;  %12668 = vrcp.f32 %v10683_v36 }
 0x71e   : > { %12670 = vrcp.f32 %v5345_v21 }
 0x71f   : > { %11201 = vmatmul.mubr.f32.gmra.mrb[68].mxu0 %v12659_v33 }
 0x720   : > { %12121 = vmatpush3.bf16.msra.mxu0 %v17319_v1  ;;  %v12661_v3 = vpop.eup %12660  ;;  %v10686_v48 = vpop.f32.mrb[220].mxu0 }
 0x721   : > { %12123 = vmatprep.subr.bf16.mxu0 %v17320_v27  ;;  %v12663_v10 = vpop.eup %12662  ;;  %11203 = vmatprep.mubr.f32.mxu0 %v12661_v3  ;;  %v5355_v24 = vpop.f32.mrb[221].mxu0  ;;  %12672 = vrcp.f32 %v10686_v48 }
 0x722   : > { %12674 = vrcp.f32 %v5355_v24 }
 0x723   : > { %11204 = vmatmul.mubr.f32.gmra.mrb[70].mxu0 %v12663_v10 }
 0x724   : > { %12125 = vmatpush3.bf16.msra.mxu0 %v17320_v27  ;;  %11238 = vmatprep.mubr.f32.mxu0 %v16456_v35  ;;  %v10689_v44 = vpop.f32.mrb[222].mxu0 }
 0x725   : > { %v5365_v40 = vpop.f32.mrb[223].mxu0  ;;  %12676 = vrcp.f32 %v10689_v44 }
 0x726   : > { %12678 = vrcp.f32 %v5365_v40 }
 0x727   : > { %11239 = vmatmul.mubr.f32.vlgmr.msra.gmra.mrb[72].mxu0 %v16465_v42 }
 0x728   : > { %11241 = vmatprep.mubr.f32.mxu0 %v16472_v8  ;;  %v10692_v58 = vpop.f32.mrb[224].mxu0 }
 0x729   : > { %v5375_v4 = vpop.f32.mrb[225].mxu0  ;;  %12680 = vrcp.f32 %v10692_v58 }
 0x72a   : > { %12682 = vrcp.f32 %v5375_v4 }
 0x72b   : > { %11242 = vmatmul.mubr.f32.gmra.mrb[74].mxu0 %v16481_v54  ;;  %v12665_v54 = vpop.eup %12664 }
 0x72c   : > { %11244 = vmatprep.mubr.f32.mxu0 %v16488_v12  ;;  %v10695_v14 = vpop.f32.mrb[226].mxu0 }
 0x72d   : > { %v5385_v5 = vpop.f32.mrb[227].mxu0  ;;  %12684 = vrcp.f32 %v10695_v14 }
 0x72e   : > { %12686 = vrcp.f32 %v5385_v5 }
 0x72f   : > { %11245 = vmatmul.mubr.f32.gmra.mrb[76].mxu0 %v16496_v7  ;;  %v12667_v7 = vpop.eup %12666 }
 0x730   : > { %11247 = vmatprep.mubr.f32.mxu0 %v16502_v11  ;;  %v10698_v35 = vpop.f32.mrb[228].mxu0  ;;  %v12669_v11 = vpop.eup %12668 }
 0x731   : > { %v5395_v16 = vpop.f32.mrb[229].mxu0  ;;  %v12671_v13 = vpop.eup %12670  ;;  %12688 = vrcp.f32 %v10698_v35 }
 0x732   : > { %v12673_v25 = vpop.eup %12672  ;;  %12690 = vrcp.f32 %v5395_v16 }
 0x733   : > { %11248 = vmatmul.mubr.f32.gmra.mrb[78].mxu0 %v16510_v15  ;;  %v12675_v41 = vpop.eup %12674 }
 0x734   : > { %11250 = vmatprep.mubr.f32.mxu0 %v16518_v46  ;;  %v10701_v42 = vpop.f32.mrb[230].mxu0  ;;  %v12677_v51 = vpop.eup %12676 }
 0x735   : > { %v5405_v8 = vpop.f32.mrb[231].mxu0  ;;  %v12679_v53 = vpop.eup %12678  ;;  %12692 = vrcp.f32 %v10701_v42 }
 0x736   : > { %v12681_v61 = vpop.eup %12680  ;;  %12694 = vrcp.f32 %v5405_v8 }
 0x737   : > { %11251 = vmatmul.mubr.f32.gmra.mrb[80].mxu0 %v12651_v59  ;;  %v12683_v0 = vpop.eup %12682 }
 0x738   : > { %11253 = vmatprep.mubr.f32.mxu0 %v12653_v63  ;;  %v10736_v12 = vpop.f32.mrb[232].mxu0  ;;  %v12685_v37 = vpop.eup %12684 }
 0x739   : > { %v16546_v29 = vmul.f32 %v12665_v54, %v10736_v12  ;;  %v5496_v19 = vpop.f32.mrb[233].mxu0  ;;  %v12687_v62 = vpop.eup %12686 }
 0x73a   : > { %v16548_v55 = vmul.f32 %v12667_v7, %v5496_v19 }
 0x73b   : > { %11254 = vmatmul.mubr.f32.gmra.mrb[82].mxu0 %v12655_v2  ;;  %v12689_v38 = vpop.eup %12688 }
 0x73c   : > { %11256 = vmatprep.mubr.f32.mxu0 %v12657_v60  ;;  %v10739_v50 = vpop.f32.mrb[234].mxu0  ;;  %v12691_v63 = vpop.eup %12690 }
 0x73d   : > { %v16550_v26 = vmul.f32 %v12669_v11, %v10739_v50  ;;  %v5506_v32 = vpop.f32.mrb[235].mxu0 }
 0x73e   : > { %v16552_v47 = vmul.f32 %v12671_v13, %v5506_v32 }
 0x73f   : > { %11257 = vmatmul.mubr.f32.gmra.mrb[84].mxu0 %v12659_v33  ;;  %v12693_v2 = vpop.eup %12692 }
 0x740   : > { %11259 = vmatprep.mubr.f32.mxu0 %v12661_v3  ;;  %v10742_v56 = vpop.f32.mrb[236].mxu0  ;;  %v12695_v60 = vpop.eup %12694 }
 0x741   : > { %v16554_v20 = vmul.f32 %v12673_v25, %v10742_v56  ;;  %v5516_v23 = vpop.f32.mrb[237].mxu0 }
 0x742   : > { %v16556_v15 = vmul.f32 %v12675_v41, %v5516_v23 }
 0x743   : > { %11260 = vmatmul.mubr.f32.gmra.mrb[86].mxu0 %v12663_v10 }
 0x744   : > { %v10745_v17 = vpop.f32.mrb[238].mxu0 }
 0x745   : > { %v16558_v52 = vmul.f32 %v12677_v51, %v10745_v17  ;;  %v5526_v39 = vpop.f32.mrb[239].mxu0 }
 0x746   : > { %v16560_v30 = vmul.f32 %v12679_v53, %v5526_v39 }
 0x748   : > { %v10748_v34 = vpop.f32.mrb[240].mxu0 }
 0x749   : > { %v16562_v9 = vmul.f32 %v12681_v61, %v10748_v34  ;;  %v5536_v46 = vpop.f32.mrb[241].mxu0 }
 0x74a   : > { %v16564_v18 = vmul.f32 %v12683_v0, %v5536_v46 }
 0x74c   : > { %v10751_v49 = vpop.f32.mrb[242].mxu0 }
 0x74d   : > { %v16566_v59 = vmul.f32 %v12685_v37, %v10751_v49  ;;  %v5546_v43 = vpop.f32.mrb[243].mxu0 }
 0x74e   : > { %v16568_v22 = vmul.f32 %v12687_v62, %v5546_v43 }
 0x750   : > { %v10754_v45 = vpop.f32.mrb[244].mxu0 }
 0x751   : > { %v16570_v31 = vmul.f32 %v12689_v38, %v10754_v45  ;;  %v5556_v6 = vpop.f32.mrb[245].mxu0 }
 0x752   : > { %v16572_v28 = vmul.f32 %v12691_v63, %v5556_v6 }
 0x754   : > { %v10757_v57 = vpop.f32.mrb[246].mxu0 }
 0x755   : > { %v16574_v1 = vmul.f32 %v12693_v2, %v10757_v57  ;;  %v5566_v36 = vpop.f32.mrb[247].mxu0 }
 0x756   : > { %v16576_v33 = vmul.f32 %v12695_v60, %v5566_v36 }
 0x759   : > { %v10848_v21 = vpop.f32.mrb[248].mxu0 }
 0x75a   : > { %v5997_v3 = vpop.f32.mrb[249].mxu0  ;;  %12696 = vrcp.f32 %v10848_v21 }
 0x75b   : > { %12698 = vrcp.f32 %v5997_v3 }
 0x75d   : > { %v10851_v27 = vpop.f32.mrb[250].mxu0 }
 0x75e   : > { %v6007_v48 = vpop.f32.mrb[251].mxu0  ;;  %12700 = vrcp.f32 %v10851_v27 }
 0x75f   : > { %12702 = vrcp.f32 %v6007_v48 }
 0x762   : > { %v10854_v10 = vpop.f32.mrb[252].mxu0 }
 0x763   : > { %v6017_v24 = vpop.f32.mrb[253].mxu0  ;;  %12704 = vrcp.f32 %v10854_v10 }
 0x764   : > { %12706 = vrcp.f32 %v6017_v24  ;;  %v12697_v54 = vpop.eup %12696 }
 0x765   : > { %v12699_v7 = vpop.eup %12698 }
 0x766   : > { %v10857_v44 = vpop.f32.mrb[254].mxu0 }
 0x767   : > { %v6027_v40 = vpop.f32.mrb[255].mxu0  ;;  %12708 = vrcp.f32 %v10857_v44 }
 0x768   : > { %12710 = vrcp.f32 %v6027_v40  ;;  %v12701_v32 = vpop.eup %12700 }
 0x769   : > { %v12703_v41 = vpop.eup %12702 }
 0x76a   : > { %v10860_v58 = vpop.f32.mrb[0].mxu0 }
 0x76b   : > { %v6037_v4 = vpop.f32.mrb[1].mxu0  ;;  %12712 = vrcp.f32 %v10860_v58 }
 0x76c   : > { %12714 = vrcp.f32 %v6037_v4 }
 0x76d   : > { %v12705_v39 = vpop.eup %12704 }
 0x76e   : > { %v10863_v14 = vpop.f32.mrb[2].mxu0  ;;  %v12707_v34 = vpop.eup %12706 }
 0x76f   : > { %v6047_v5 = vpop.f32.mrb[3].mxu0  ;;  %12716 = vrcp.f32 %v10863_v14 }
 0x770   : > { %12718 = vrcp.f32 %v6047_v5 }
 0x771   : > { %v12709_v49 = vpop.eup %12708 }
 0x772   : > { %v10866_v35 = vpop.f32.mrb[4].mxu0  ;;  %v12711_v43 = vpop.eup %12710 }
 0x773   : > { %v6057_v16 = vpop.f32.mrb[5].mxu0  ;;  %12720 = vrcp.f32 %v10866_v35 }
 0x774   : > { %12722 = vrcp.f32 %v6057_v16 }
 0x775   : > { %v12713_v6 = vpop.eup %12712 }
 0x776   : > { %v10869_v42 = vpop.f32.mrb[6].mxu0  ;;  %v12715_v57 = vpop.eup %12714 }
 0x777   : > { %v6067_v8 = vpop.f32.mrb[7].mxu0  ;;  %12724 = vrcp.f32 %v10869_v42 }
 0x778   : > { %12726 = vrcp.f32 %v6067_v8 }
 0x779   : > { %v12717_v3 = vpop.eup %12716 }
 0x77a   : > { %v10904_v12 = vpop.f32.mrb[8].mxu0  ;;  %v12719_v48 = vpop.eup %12718 }
 0x77b   : > { %v6254_v19 = vmul.f32 %v12697_v54, %v10904_v12  ;;  %v6158_v11 = vpop.f32.mrb[9].mxu0 }
 0x77c   : > { %v6253_v50 = vmul.f32 %v12699_v7, %v6158_v11 }
 0x77d   : > { %v16579_v13 = vadd.f32 %v6254_v19, %v16546_v29  ;;  %v12721_v40 = vpop.eup %12720 }
 0x77e   : > { %v16582_v25 = vadd.f32 %v6253_v50, %v16548_v55  ;;  %v10907_v56 = vpop.f32.mrb[10].mxu0  ;;  %v12723_v14 = vpop.eup %12722 }
 0x77f   : > { %v6256_v23 = vmul.f32 %v12701_v32, %v10907_v56  ;;  %v6168_v51 = vpop.f32.mrb[11].mxu0 }
 0x780   : > { %v6255_v17 = vmul.f32 %v12703_v41, %v6168_v51 }
 0x781   : > { %v16585_v53 = vadd.f32 %v6256_v23, %v16550_v26  ;;  %v12725_v16 = vpop.eup %12724 }
 0x782   : > { %v16588_v61 = vadd.f32 %v6255_v17, %v16552_v47  ;;  %v10910_v29 = vpop.f32.mrb[12].mxu0  ;;  %v12727_v54 = vpop.eup %12726 }
 0x783   : > { %v6258_v0 = vmul.f32 %v12705_v39, %v10910_v29  ;;  %v6178_v46 = vpop.f32.mrb[13].mxu0 }
 0x784   : > { %v6257_v55 = vmul.f32 %v12707_v34, %v6178_v46 }
 0x785   : > { %v16591_v37 = vadd.f32 %v6258_v0, %v16554_v20 }
 0x786   : > { %v16594_v62 = vadd.f32 %v6257_v55, %v16556_v15  ;;  %v10913_v26 = vpop.f32.mrb[14].mxu0 }
 0x787   : > { %v6260_v38 = vmul.f32 %v12709_v49, %v10913_v26  ;;  %v6188_v45 = vpop.f32.mrb[15].mxu0 }
 0x788   : > { %v6259_v47 = vmul.f32 %v12711_v43, %v6188_v45 }
 0x789   : > { %v16597_v63 = vadd.f32 %v6260_v38, %v16558_v52 }
 0x78a   : > { %v16600_v2 = vadd.f32 %v6259_v47, %v16560_v30  ;;  %v10916_v20 = vpop.f32.mrb[16].mxu0 }
 0x78b   : > { %v6262_v60 = vmul.f32 %v12713_v6, %v10916_v20  ;;  %v6198_v36 = vpop.f32.mrb[17].mxu0 }
 0x78c   : > { %v6261_v15 = vmul.f32 %v12715_v57, %v6198_v36 }
 0x78d   : > { %v16603_v21 = vadd.f32 %v6262_v60, %v16562_v9 }
 0x78e   : > { %v16606_v27 = vadd.f32 %v6261_v15, %v16564_v18  ;;  %v10919_v52 = vpop.f32.mrb[18].mxu0 }
 0x78f   : > { %v6264_v10 = vmul.f32 %v12717_v3, %v10919_v52  ;;  %v6208_v24 = vpop.f32.mrb[19].mxu0 }
 0x790   : > { %v6263_v30 = vmul.f32 %v12719_v48, %v6208_v24 }
 0x791   : > { %v16609_v44 = vadd.f32 %v6264_v10, %v16566_v59 }
 0x792   : > { %v16612_v58 = vadd.f32 %v6263_v30, %v16568_v22  ;;  %v10922_v4 = vpop.f32.mrb[20].mxu0 }
 0x793   : > { %v6266_v9 = vmul.f32 %v12721_v40, %v10922_v4  ;;  %v6218_v5 = vpop.f32.mrb[21].mxu0 }
 0x794   : > { %v6265_v35 = vmul.f32 %v12723_v14, %v6218_v5 }
 0x795   : > { %v16615_v18 = vadd.f32 %v6266_v9, %v16570_v31 }
 0x796   : > { %v16618_v42 = vadd.f32 %v6265_v35, %v16572_v28  ;;  %v10925_v8 = vpop.f32.mrb[22].mxu0 }
 0x797   : > { %v6268_v59 = vmul.f32 %v12725_v16, %v10925_v8  ;;  %v6228_v12 = vpop.f32.mrb[23].mxu0 }
 0x798   : > { %v6267_v7 = vmul.f32 %v12727_v54, %v6228_v12 }
 0x799   : > { %v16621_v22 = vadd.f32 %v6268_v59, %v16574_v1 }
 0x79a   : > { %v16624_v19 = vadd.f32 %v6267_v7, %v16576_v33  ;;  %v11016_v11 = vpop.f32.mrb[24].mxu0 }
 0x79b   : > { %v6659_v50 = vpop.f32.mrb[25].mxu0  ;;  %12728 = vrcp.f32 %v11016_v11 }
 0x79c   : > { %12730 = vrcp.f32 %v6659_v50 }
 0x79e   : > { %v11019_v32 = vpop.f32.mrb[26].mxu0 }
 0x79f   : > { %v6669_v31 = vpop.f32.mrb[27].mxu0  ;;  %12732 = vrcp.f32 %v11019_v32 }
 0x7a0   : > { %12734 = vrcp.f32 %v6669_v31 }
 0x7a2   : > { %v11022_v56 = vpop.f32.mrb[28].mxu0 }
 0x7a3   : > { %v6679_v41 = vpop.f32.mrb[29].mxu0  ;;  %12736 = vrcp.f32 %v11022_v56 }
 0x7a4   : > { %12738 = vrcp.f32 %v6679_v41 }
 0x7a5   : > { %v12729_v46 = vpop.eup %12728 }
 0x7a6   : > { %v11025_v23 = vpop.f32.mrb[30].mxu0  ;;  %v12731_v49 = vpop.eup %12730 }
 0x7a7   : > { %v6689_v28 = vpop.f32.mrb[31].mxu0  ;;  %12740 = vrcp.f32 %v11025_v23 }
 0x7a8   : > { %12742 = vrcp.f32 %v6689_v28 }
 0x7a9   : > { %v12733_v47 = vpop.eup %12732 }
 0x7aa   : > { %v11028_v51 = vpop.f32.mrb[32].mxu0  ;;  %v12735_v57 = vpop.eup %12734 }
 0x7ab   : > { %v6699_v17 = vpop.f32.mrb[33].mxu0  ;;  %12744 = vrcp.f32 %v11028_v51 }
 0x7ac   : > { %12746 = vrcp.f32 %v6699_v17 }
 0x7ad   : > { %v12737_v52 = vpop.eup %12736 }
 0x7ae   : > { %v11031_v39 = vpop.f32.mrb[34].mxu0  ;;  %v12739_v10 = vpop.eup %12738 }
 0x7af   : > { %v6709_v29 = vpop.f32.mrb[35].mxu0  ;;  %12748 = vrcp.f32 %v11031_v39 }
 0x7b0   : > { %12750 = vrcp.f32 %v6709_v29 }
 0x7b1   : > { %v12741_v4 = vpop.eup %12740 }
 0x7b2   : > { %v11034_v34 = vpop.f32.mrb[36].mxu0  ;;  %v12743_v9 = vpop.eup %12742 }
 0x7b3   : > { %v6719_v1 = vpop.f32.mrb[37].mxu0  ;;  %12752 = vrcp.f32 %v11034_v34 }
 0x7b4   : > { %12754 = vrcp.f32 %v6719_v1 }
 0x7b5   : > { %v12745_v8 = vpop.eup %12744 }
 0x7b6   : > { %v11037_v33 = vpop.f32.mrb[38].mxu0  ;;  %v12747_v59 = vpop.eup %12746 }
 0x7b7   : > { %v6729_v0 = vpop.f32.mrb[39].mxu0  ;;  %12756 = vrcp.f32 %v11037_v33 }
 0x7b8   : > { %12758 = vrcp.f32 %v6729_v0 }
 0x7b9   : > { %v12749_v50 = vpop.eup %12748 }
 0x7ba   : > { %v11072_v55 = vpop.f32.mrb[40].mxu0  ;;  %v12751_v31 = vpop.eup %12750 }
 0x7bb   : > { %v6916_v26 = vmul.f32 %v12729_v46, %v11072_v55  ;;  %v6820_v43 = vpop.f32.mrb[41].mxu0 }
 0x7bc   : > { %v6915_v38 = vmul.f32 %v12731_v49, %v6820_v43 }
 0x7bd   : > { %v16627_v45 = vadd.f32 %v6916_v26, %v16579_v13  ;;  %v12753_v28 = vpop.eup %12752 }
 0x7be   : > { %v16630_v6 = vadd.f32 %v6915_v38, %v16582_v25  ;;  %v11075_v20 = vpop.f32.mrb[42].mxu0 }
 0x7bf   : > { %v6918_v60 = vmul.f32 %v12733_v47, %v11075_v20  ;;  %v6830_v36 = vpop.f32.mrb[43].mxu0 }
 0x7c0   : > { %v6917_v15 = vmul.f32 %v12735_v57, %v6830_v36 }
 0x7c1   : > { %v16633_v3 = vadd.f32 %v6918_v60, %v16585_v53 }
 0x7c2   : > { %v16636_v48 = vadd.f32 %v6917_v15, %v16588_v61  ;;  %v11078_v13 = vpop.f32.mrb[44].mxu0 }
 0x7c3   : > { %v6920_v24 = vmul.f32 %v12737_v52, %v11078_v13  ;;  %v6840_v30 = vpop.f32.mrb[45].mxu0 }
 0x7c4   : > { %v6919_v25 = vmul.f32 %v12739_v10, %v6840_v30 }
 0x7c5   : > { %v16639_v40 = vadd.f32 %v6920_v24, %v16591_v37 }
 0x7c6   : > { %v16642_v14 = vadd.f32 %v6919_v25, %v16594_v62  ;;  %v11081_v53 = vpop.f32.mrb[46].mxu0 }
 0x7c7   : > { %v6922_v5 = vmul.f32 %v12741_v4, %v11081_v53  ;;  %v6850_v35 = vpop.f32.mrb[47].mxu0 }
 0x7c8   : > { %v6921_v61 = vmul.f32 %v12743_v9, %v6850_v35 }
 0x7c9   : > { %v16645_v16 = vadd.f32 %v6922_v5, %v16597_v63 }
 0x7ca   : > { %v16648_v54 = vadd.f32 %v6921_v61, %v16600_v2  ;;  %v11084_v37 = vpop.f32.mrb[48].mxu0 }
 0x7cb   : > { %v6924_v12 = vmul.f32 %v12745_v8, %v11084_v37  ;;  %v6860_v7 = vpop.f32.mrb[49].mxu0 }
 0x7cc   : > { %v6923_v62 = vmul.f32 %v12747_v59, %v6860_v7 }
 0x7cd   : > { %v16651_v11 = vadd.f32 %v6924_v12, %v16603_v21  ;;  %v16665_v21 = vld [vmem:[%s16828_s11] ss:$0 sm:$0xff] }
 0x7ce   : > { %v16654_v32 = vadd.f32 %v6923_v62, %v16606_v27  ;;  %v11087_v63 = vpop.f32.mrb[50].mxu0  ;;  %v12755_v27 = vpop.eup %12754 }
 0x7cf   : > { %v6926_v56 = vmul.f32 %v12749_v50, %v11087_v63  ;;  %v6870_v2 = vpop.f32.mrb[51].mxu0  ;;  %v12757_v0 = vpop.eup %12756 }
 0x7d0   : > { %v6925_v41 = vmul.f32 %v12751_v31, %v6870_v2  ;;  %v12759_v26 = vpop.eup %12758 }
 0x7d1   : > { %v16657_v23 = vadd.f32 %v6926_v56, %v16609_v44 }
 0x7d2   : > { %v16660_v51 = vadd.f32 %v6925_v41, %v16612_v58  ;;  %v11090_v17 = vpop.f32.mrb[52].mxu0  ;;  %v11272_v58 = vpop.f32.mrb[200].mxu1 }
 0x7d3   : > { %v6928_v39 = vmul.f32 %v12753_v28, %v11090_v17  ;;  %v6880_v29 = vpop.f32.mrb[53].mxu0  ;;  %v7788_v1 = vadd.f32 %v11272_v58, %v16665_v21  ;;  %v7782_v33 = vpop.f32.mrb[201].mxu1 }
 0x7d4   : > { %v6927_v44 = vmul.f32 %v12755_v27, %v6880_v29  ;;  %v7783_v55 = vadd.f32 %v16665_v21, %v7782_v33 }
 0x7d5   : > { %v16675_v34 = vadd.f32 %v6928_v39, %v16615_v18  ;;  %7942 = vst.msk [vmem:[%s16672_s30 + $0x8] sm:$0xff] %vm460_vm0, %v7788_v1 }
 0x7d6   : > { %v16679_v46 = vadd.f32 %v6927_v44, %v16618_v42  ;;  %v11093_v49 = vpop.f32.mrb[54].mxu0  ;;  %7941 = vst.msk [vmem:[%s16672_s30] sm:$0xff] %vm460_vm0, %v7783_v55  ;;  %v11275_v47 = vpop.f32.mrb[202].mxu1 }
 0x7d7   : > { %v6930_v43 = vmul.f32 %v12757_v0, %v11093_v49  ;;  %v6890_v38 = vpop.f32.mrb[55].mxu0  ;;  %v7798_v42 = vadd.f32 %v11275_v47, %v16665_v21  ;;  %v7792_v57 = vpop.f32.mrb[203].mxu1 }
 0x7d8   : > { %v6929_v18 = vmul.f32 %v12759_v26, %v6890_v38  ;;  %v7793_v36 = vadd.f32 %v16665_v21, %v7792_v57 }
 0x7d9   : > { %v16687_v20 = vadd.f32 %v6930_v43, %v16621_v22  ;;  %7944 = vst.msk [vmem:[%s16672_s30 + $0x18] sm:$0xff] %vm460_vm0, %v7798_v42 }
 0x7da   : > { %v16691_v60 = vadd.f32 %v6929_v18, %v16624_v19  ;;  %v11184_v15 = vpop.f32.mrb[56].mxu0  ;;  %7943 = vst.msk [vmem:[%s16672_s30 + $0x10] sm:$0xff] %vm460_vm0, %v7793_v36  ;;  %v11278_v13 = vpop.f32.mrb[204].mxu1 }
 0x7db   : > { %v7321_v52 = vpop.f32.mrb[57].mxu0  ;;  %v7808_v22 = vadd.f32 %v11278_v13, %v16665_v21  ;;  %v7802_v10 = vpop.f32.mrb[205].mxu1  ;;  %12760 = vrcp.f32 %v11184_v15 }
 0x7dc   : > { %v7803_v24 = vadd.f32 %v16665_v21, %v7802_v10  ;;  %12762 = vrcp.f32 %v7321_v52 }
 0x7dd   : > { %7946 = vst.msk [vmem:[%s16672_s30 + $0x28] sm:$0xff] %vm460_vm0, %v7808_v22 }
 0x7de   : > { %v11187_v30 = vpop.f32.mrb[58].mxu0  ;;  %7945 = vst.msk [vmem:[%s16672_s30 + $0x20] sm:$0xff] %vm460_vm0, %v7803_v24 }
 0x7df   : > { %v7331_v19 = vpop.f32.mrb[59].mxu0  ;;  %v11281_v25 = vpop.f32.mrb[206].mxu1  ;;  %12764 = vrcp.f32 %v11187_v30 }
 0x7e0   : > { %v7818_v4 = vadd.f32 %v11281_v25, %v16665_v21  ;;  %v7812_v53 = vpop.f32.mrb[207].mxu1  ;;  %12766 = vrcp.f32 %v7331_v19 }
 0x7e1   : > { %v7813_v9 = vadd.f32 %v16665_v21, %v7812_v53 }
 0x7e2   : > { %v11190_v5 = vpop.f32.mrb[60].mxu0  ;;  %7948 = vst.msk [vmem:[%s16672_s30 + $0x38] sm:$0xff] %vm460_vm0, %v7818_v4 }
 0x7e3   : > { %v7341_v35 = vpop.f32.mrb[61].mxu0  ;;  %7947 = vst.msk [vmem:[%s16672_s30 + $0x30] sm:$0xff] %vm460_vm0, %v7813_v9  ;;  %v11284_v61 = vpop.f32.mrb[208].mxu1  ;;  %12768 = vrcp.f32 %v11190_v5 }
 0x7e4   : > { %v7828_v8 = vadd.f32 %v11284_v61, %v16665_v21  ;;  %v7822_v37 = vpop.f32.mrb[209].mxu1  ;;  %12770 = vrcp.f32 %v7341_v35 }
 0x7e5   : > { %v7823_v59 = vadd.f32 %v16665_v21, %v7822_v37  ;;  %v12761_v43 = vpop.eup %12760 }
 0x7e6   : > { %v11193_v12 = vpop.f32.mrb[62].mxu0  ;;  %7950 = vst.msk [vmem:[%s16672_s30 + $0x48] sm:$0xff] %vm460_vm0, %v7828_v8  ;;  %v12763_v18 = vpop.eup %12762 }
 0x7e7   : > { %v7351_v7 = vpop.f32.mrb[63].mxu0  ;;  %7949 = vst.msk [vmem:[%s16672_s30 + $0x40] sm:$0xff] %vm460_vm0, %v7823_v59  ;;  %v11287_v62 = vpop.f32.mrb[210].mxu1  ;;  %12772 = vrcp.f32 %v11193_v12 }
 0x7e8   : > { %v7838_v50 = vadd.f32 %v11287_v62, %v16665_v21  ;;  %v7832_v63 = vpop.f32.mrb[211].mxu1  ;;  %12774 = vrcp.f32 %v7351_v7 }
 0x7e9   : > { %v7833_v31 = vadd.f32 %v16665_v21, %v7832_v63  ;;  %v12765_v15 = vpop.eup %12764 }
 0x7ea   : > { %v11196_v56 = vpop.f32.mrb[64].mxu0  ;;  %7952 = vst.msk [vmem:[%s16672_s30 + $0x58] sm:$0xff] %vm460_vm0, %v7838_v50  ;;  %v12767_v22 = vpop.eup %12766 }
 0x7eb   : > { %v7361_v2 = vpop.f32.mrb[65].mxu0  ;;  %7951 = vst.msk [vmem:[%s16672_s30 + $0x50] sm:$0xff] %vm460_vm0, %v7833_v31  ;;  %v11290_v41 = vpop.f32.mrb[212].mxu1  ;;  %12776 = vrcp.f32 %v11196_v56 }
 0x7ec   : > { %v7848_v28 = vadd.f32 %v11290_v41, %v16665_v21  ;;  %v7842_v17 = vpop.f32.mrb[213].mxu1  ;;  %12778 = vrcp.f32 %v7361_v2 }
 0x7ed   : > { %v7843_v27 = vadd.f32 %v16665_v21, %v7842_v17  ;;  %v12769_v25 = vpop.eup %12768 }
 0x7ee   : > { %v11199_v39 = vpop.f32.mrb[66].mxu0  ;;  %7954 = vst.msk [vmem:[%s16672_s30 + $0x68] sm:$0xff] %vm460_vm0, %v7848_v28  ;;  %v12771_v53 = vpop.eup %12770 }
 0x7ef   : > { %v7371_v29 = vpop.f32.mrb[67].mxu0  ;;  %7953 = vst.msk [vmem:[%s16672_s30 + $0x60] sm:$0xff] %vm460_vm0, %v7843_v27  ;;  %v11293_v44 = vpop.f32.mrb[214].mxu1  ;;  %12780 = vrcp.f32 %v11199_v39 }
 0x7f0   : > { %v7858_v58 = vadd.f32 %v11293_v44, %v16665_v21  ;;  %v7852_v1 = vpop.f32.mrb[215].mxu1  ;;  %12782 = vrcp.f32 %v7371_v29 }
 0x7f1   : > { %v7853_v33 = vadd.f32 %v16665_v21, %v7852_v1  ;;  %v12773_v61 = vpop.eup %12772 }
 0x7f2   : > { %v11202_v0 = vpop.f32.mrb[68].mxu0  ;;  %7956 = vst.msk [vmem:[%s16672_s30 + $0x78] sm:$0xff] %vm460_vm0, %v7858_v58  ;;  %v12775_v37 = vpop.eup %12774 }
 0x7f3   : > { %v7381_v55 = vpop.f32.mrb[69].mxu0  ;;  %7955 = vst.msk [vmem:[%s16672_s30 + $0x70] sm:$0xff] %vm460_vm0, %v7853_v33  ;;  %12784 = vrcp.f32 %v11202_v0 }
 0x7f4   : > { %12786 = vrcp.f32 %v7381_v55 }
 0x7f5   : > { %v12777_v62 = vpop.eup %12776 }
 0x7f6   : > { %v11205_v49 = vpop.f32.mrb[70].mxu0  ;;  %v12779_v63 = vpop.eup %12778 }
 0x7f7   : > { %v7391_v26 = vpop.f32.mrb[71].mxu0  ;;  %12788 = vrcp.f32 %v11205_v49 }
 0x7f8   : > { %12790 = vrcp.f32 %v7391_v26 }
 0x7f9   : > { %v12781_v41 = vpop.eup %12780 }
 0x7fa   : > { %v11240_v38 = vpop.f32.mrb[72].mxu0  ;;  %v12783_v17 = vpop.eup %12782 }
 0x7fb   : > { %v7578_v47 = vmul.f32 %v12761_v43, %v11240_v38  ;;  %v7482_v42 = vpop.f32.mrb[73].mxu0 }
 0x7fc   : > { %v7577_v57 = vmul.f32 %v12763_v18, %v7482_v42 }
 0x7fd   : > { %v7594_v36 = vadd.f32 %v7578_v47, %v16627_v45  ;;  %v12785_v44 = vpop.eup %12784 }
 0x7fe   : > { %v7593_v52 = vadd.f32 %v7577_v57, %v16630_v6  ;;  %v11243_v13 = vpop.f32.mrb[74].mxu0  ;;  %v12787_v1 = vpop.eup %12786 }
 0x7ff   : > { %v7580_v10 = vmul.f32 %v12765_v15, %v11243_v13  ;;  %v7492_v24 = vpop.f32.mrb[75].mxu0 }
 0x800   : > { %v7579_v30 = vmul.f32 %v12767_v22, %v7492_v24  ;;  %11294 = vmatprep.mubr.msk.f32.mxu1 %vm460_vm0, %v7593_v52 }
 0x801   : > { %v7596_v19 = vadd.f32 %v7580_v10, %v16633_v3  ;;  %11295 = vmatmul.mubr.msk.f32.gmra.mrb[216].mxu1 %vm460_vm0, %v7594_v36  ;;  %v12789_v49 = vpop.eup %12788 }
 0x802   : > { %v7595_v4 = vadd.f32 %v7579_v30, %v16636_v48  ;;  %v11246_v45 = vpop.f32.mrb[76].mxu0  ;;  %v12791_v43 = vpop.eup %12790 }
 0x803   : > { %v7582_v9 = vmul.f32 %v12769_v25, %v11246_v45  ;;  %v7502_v6 = vpop.f32.mrb[77].mxu0 }
 0x804   : > { %v7581_v5 = vmul.f32 %v12771_v53, %v7502_v6  ;;  %11297 = vmatprep.mubr.msk.f32.mxu1 %vm460_vm0, %v7595_v4 }
 0x805   : > { %v7598_v35 = vadd.f32 %v7582_v9, %v16639_v40  ;;  %11298 = vmatmul.mubr.msk.f32.gmra.mrb[218].mxu1 %vm460_vm0, %v7596_v19 }
 0x806   : > { %v7597_v3 = vadd.f32 %v7581_v5, %v16642_v14  ;;  %v11249_v8 = vpop.f32.mrb[78].mxu0 }
 0x807   : > { %v7584_v59 = vmul.f32 %v12773_v61, %v11249_v8  ;;  %v7512_v48 = vpop.f32.mrb[79].mxu0 }
 0x808   : > { %v7583_v12 = vmul.f32 %v12775_v37, %v7512_v48  ;;  %11300 = vmatprep.mubr.msk.f32.mxu1 %vm460_vm0, %v7597_v3 }
 0x809   : > { %v7600_v7 = vadd.f32 %v7584_v59, %v16645_v16  ;;  %11301 = vmatmul.mubr.msk.f32.gmra.mrb[220].mxu1 %vm460_vm0, %v7598_v35 }
 0x80a   : > { %v7599_v40 = vadd.f32 %v7583_v12, %v16648_v54  ;;  %v11252_v50 = vpop.f32.mrb[80].mxu0 }
 0x80b   : > { %v7586_v31 = vmul.f32 %v12777_v62, %v11252_v50  ;;  %v7522_v14 = vpop.f32.mrb[81].mxu0 }
 0x80c   : > { %v7585_v56 = vmul.f32 %v12779_v63, %v7522_v14  ;;  %11303 = vmatprep.mubr.msk.f32.mxu1 %vm460_vm0, %v7599_v40 }
 0x80d   : > { %v7602_v2 = vadd.f32 %v7586_v31, %v16651_v11  ;;  %11304 = vmatmul.mubr.msk.f32.gmra.mrb[222].mxu1 %vm460_vm0, %v7600_v7 }
 0x80e   : > { %v7601_v16 = vadd.f32 %v7585_v56, %v16654_v32  ;;  %v11255_v28 = vpop.f32.mrb[82].mxu0 }
 0x80f   : > { %v7588_v27 = vmul.f32 %v12781_v41, %v11255_v28  ;;  %v7532_v54 = vpop.f32.mrb[83].mxu0 }
 0x810   : > { %v7587_v39 = vmul.f32 %v12783_v17, %v7532_v54  ;;  %11306 = vmatprep.mubr.msk.f32.mxu1 %vm460_vm0, %v7601_v16 }
 0x811   : > { %v7604_v29 = vadd.f32 %v7588_v27, %v16657_v23  ;;  %11307 = vmatmul.mubr.msk.f32.gmra.mrb[224].mxu1 %vm460_vm0, %v7602_v2 }
 0x812   : > { %v7603_v58 = vadd.f32 %v7587_v39, %v16660_v51  ;;  %v11258_v11 = vpop.f32.mrb[84].mxu0 }
 0x813   : > { %v7590_v33 = vmul.f32 %v12785_v44, %v11258_v11  ;;  %v7542_v0 = vpop.f32.mrb[85].mxu0 }
 0x814   : > { %v7589_v55 = vmul.f32 %v12787_v1, %v7542_v0  ;;  %11309 = vmatprep.mubr.msk.f32.mxu1 %vm460_vm0, %v7603_v58 }
 0x815   : > { %v7606_v32 = vadd.f32 %v7590_v33, %v16675_v34  ;;  %11310 = vmatmul.mubr.msk.f32.gmra.mrb[226].mxu1 %vm460_vm0, %v7604_v29 }
 0x816   : > { %v7605_v26 = vadd.f32 %v7589_v55, %v16679_v46  ;;  %v11261_v23 = vpop.f32.mrb[86].mxu0 }
 0x817   : > { %v7592_v38 = vmul.f32 %v12789_v49, %v11261_v23  ;;  %v7552_v51 = vpop.f32.mrb[87].mxu0 }
 0x818   : > { %v7591_v18 = vmul.f32 %v12791_v43, %v7552_v51  ;;  %11312 = vmatprep.mubr.msk.f32.mxu1 %vm460_vm0, %v7605_v26 }
 0x819   : > { %v7608_v47 = vadd.f32 %v7592_v38, %v16687_v20  ;;  %11313 = vmatmul.mubr.msk.f32.gmra.mrb[228].mxu1 %vm460_vm0, %v7606_v32 }
 0x81a   : > { %v7607_v34 = vadd.f32 %v7591_v18, %v16691_v60 }
 0x81c   : > { %11315 = vmatprep.mubr.msk.f32.mxu1 %vm460_vm0, %v7607_v34 }
 0x81d   : > { %11316 = vmatmul.mubr.msk.f32.gmra.mrb[230].mxu1 %vm460_vm0, %v7608_v47 }
 0x8d4   : > { %v11296_v46 = vpop.f32.mrb[216].mxu1 }
 0x8d5   : > { %v7868_v42 = vadd.f32 %v11296_v46, %v16665_v21  ;;  %v7862_v57 = vpop.f32.mrb[217].mxu1 }
 0x8d6   : > { %v7863_v36 = vadd.f32 %v16665_v21, %v7862_v57 }
 0x8d7   : > { %7958 = vst.msk [vmem:[%s16672_s30 + $0x88] sm:$0xff] %vm460_vm0, %v7868_v42 }
 0x8d8   : > { %7957 = vst.msk [vmem:[%s16672_s30 + $0x80] sm:$0xff] %vm460_vm0, %v7863_v36  ;;  %v11299_v20 = vpop.f32.mrb[218].mxu1 }
 0x8d9   : > { %v7878_v60 = vadd.f32 %v11299_v20, %v16665_v21  ;;  %v7872_v15 = vpop.f32.mrb[219].mxu1 }
 0x8da   : > { %v7873_v52 = vadd.f32 %v16665_v21, %v7872_v15 }
 0x8db   : > { %7960 = vst.msk [vmem:[%s16672_s30 + $0x98] sm:$0xff] %vm460_vm0, %v7878_v60 }
 0x8dc   : > { %7959 = vst.msk [vmem:[%s16672_s30 + $0x90] sm:$0xff] %vm460_vm0, %v7873_v52  ;;  %v11302_v13 = vpop.f32.mrb[220].mxu1 }
 0x8dd   : > { %v7888_v22 = vadd.f32 %v11302_v13, %v16665_v21  ;;  %v7882_v10 = vpop.f32.mrb[221].mxu1 }
 0x8de   : > { %v7883_v24 = vadd.f32 %v16665_v21, %v7882_v10 }
 0x8df   : > { %7962 = vst.msk [vmem:[%s16672_s30 + $0xa8] sm:$0xff] %vm460_vm0, %v7888_v22 }
 0x8e0   : > { %7961 = vst.msk [vmem:[%s16672_s30 + $0xa0] sm:$0xff] %vm460_vm0, %v7883_v24  ;;  %v11305_v30 = vpop.f32.mrb[222].mxu1 }
 0x8e1   : > { %v7898_v19 = vadd.f32 %v11305_v30, %v16665_v21  ;;  %v7892_v25 = vpop.f32.mrb[223].mxu1 }
 0x8e2   : > { %v7893_v4 = vadd.f32 %v16665_v21, %v7892_v25 }
 0x8e3   : > { %7964 = vst.msk [vmem:[%s16672_s30 + $0xb8] sm:$0xff] %vm460_vm0, %v7898_v19 }
 0x8e4   : > { %7963 = vst.msk [vmem:[%s16672_s30 + $0xb0] sm:$0xff] %vm460_vm0, %v7893_v4  ;;  %v11308_v45 = vpop.f32.mrb[224].mxu1 }
 0x8e5   : > { %v7908_v53 = vadd.f32 %v11308_v45, %v16665_v21  ;;  %v7902_v9 = vpop.f32.mrb[225].mxu1 }
 0x8e6   : > { %v7903_v6 = vadd.f32 %v16665_v21, %v7902_v9 }
 0x8e7   : > { %7966 = vst.msk [vmem:[%s16672_s30 + $0xc8] sm:$0xff] %vm460_vm0, %v7908_v53 }
 0x8e8   : > { %7965 = vst.msk [vmem:[%s16672_s30 + $0xc0] sm:$0xff] %vm460_vm0, %v7903_v6  ;;  %v11311_v5 = vpop.f32.mrb[226].mxu1 }
 0x8e9   : > { %v7918_v35 = vadd.f32 %v11311_v5, %v16665_v21  ;;  %v7912_v61 = vpop.f32.mrb[227].mxu1 }
 0x8ea   : > { %v7913_v3 = vadd.f32 %v16665_v21, %v7912_v61 }
 0x8eb   : > { %7968 = vst.msk [vmem:[%s16672_s30 + $0xd8] sm:$0xff] %vm460_vm0, %v7918_v35 }
 0x8ec   : > { %7967 = vst.msk [vmem:[%s16672_s30 + $0xd0] sm:$0xff] %vm460_vm0, %v7913_v3  ;;  %v11314_v8 = vpop.f32.mrb[228].mxu1 }
 0x8ed   : > { %v7928_v37 = vadd.f32 %v11314_v8, %v16665_v21  ;;  %v7922_v59 = vpop.f32.mrb[229].mxu1 }
 0x8ee   : > { %v7923_v48 = vadd.f32 %v16665_v21, %v7922_v59 }
 0x8ef   : > { %7970 = vst.msk [vmem:[%s16672_s30 + $0xe8] sm:$0xff] %vm460_vm0, %v7928_v37 }
 0x8f0   : > { %7969 = vst.msk [vmem:[%s16672_s30 + $0xe0] sm:$0xff] %vm460_vm0, %v7923_v48  ;;  %v11317_v12 = vpop.f32.mrb[230].mxu1 }
 0x8f1   : > { %v7938_v7 = vadd.f32 %v11317_v12, %v16665_v21  ;;  %v7932_v62 = vpop.f32.mrb[231].mxu1 }
 0x8f2   : > { %v7933_v40 = vadd.f32 %v16665_v21, %v7932_v62 }
 0x8f3   : > { %7972 = vst.msk [vmem:[%s16672_s30 + $0xf8] sm:$0xff] %vm460_vm0, %v7938_v7 }
 0x8f4   : > { %7971 = vst.msk [vmem:[%s16672_s30 + $0xf0] sm:$0xff] %vm460_vm0, %v7933_v40 }
 0x8f5 PF: > { %s22_s21 = sadd.s32 1, %s12801_s21  }
 0x8f6   : > { %p19_p8 = scmp.ge.s32.totalorder %s22_s21, 4  }
 0x8f8   :  { %21 = sbr.rel (!%p19_p8) target bundleno = 1 (0x1), region = 106 }

</bundles_post_ra>
